<compile_context>
chip_gen: v5e
topology: v5e:2x2
jax: 0.10.0
libtpu: 0.0.40
codegen_flags: <defaults>
</compile_context>

<pallas_src>
import jax
import jax.numpy as jnp
from jax import lax
from jax.experimental import pallas as pl
from jax.experimental.pallas import tpu as pltpu

_OCP = 128  # output-channel lane padding (lane-dense stores, full MXU columns)


# ---------------------------------------------------------------------------
# Pallas kernel: fused 3x3 conv (implicit im2col) + bias + activation
# ---------------------------------------------------------------------------
def _build_conv_kernel(n_src, stride, OH, OW, act):
    n_ph = stride * stride

    def kernel(*refs):
        phase_refs = [refs[s * n_ph:(s + 1) * n_ph] for s in range(n_src)]
        w_refs = refs[n_src * n_ph: n_src * n_ph + n_src]
        b_ref = refs[n_src * n_ph + n_src]
        o_ref = refs[n_src * n_ph + n_src + 1]

        def row_body(i, carry):
            acc = jnp.zeros((OW, _OCP), jnp.float32)
            for s in range(n_src):
                for kh in range(3):
                    for kw in range(3):
                        ph = phase_refs[s][(kh % stride) * stride + (kw % stride)]
                        dh, dw = kh // stride, kw // stride
                        row = ph[i + dh]              # (PW_phase, C_s)  bf16
                        win = row[dw:dw + OW, :]      # (OW, C_s)
                        acc = acc + jnp.dot(
                            win, w_refs[s][kh, kw],
                            preferred_element_type=jnp.float32)
            acc = acc + b_ref[...]                    # (1, 128) broadcast
            if act == "relu":
                acc = jnp.maximum(acc, 0.0)
            else:  # leaky ReLU, negative slope 0.2 (as in the PyTorch model)
                acc = jnp.where(acc >= 0.0, acc, 0.2 * acc)
            o_ref[i] = acc.astype(o_ref.dtype)
            return carry

        lax.fori_loop(0, OH, row_body, 0)

    return kernel


# ---------------------------------------------------------------------------
# Conv wrapper: phase split (stride handling), weight/bias lane padding,
# multi-source (implicit concat) support.
# ---------------------------------------------------------------------------
def conv3x3_pallas(sources, real_cs, weight, bias, stride, act,
                   out_dtype=jnp.bfloat16):
    """3x3 conv, padding=1, fused bias + activation.

    sources : list of NHWC arrays sharing (B, H, W); channels >= real_cs[i]
              of each source must be zero (true for lane-padded activations).
    real_cs : per-source real input-channel counts (sum == weight.shape[1]).
    weight  : (OC, IC, 3, 3) float32 (PyTorch layout);  bias: (OC,) float32.
    Returns (B, OH, OW, 128); channels >= OC are exactly zero.
    """
    B, H, W = sources[0].shape[:3]
    OC = weight.shape[0]
    OH = (H + 2 - 3) // stride + 1
    OW = (W + 2 - 3) // stride + 1

    w_k = jnp.transpose(weight, (2, 3, 1, 0))        # (3, 3, IC, OC)

    phases, phase_specs, w_srcs, w_specs = [], [], [], []
    off = 0
    for src, rc in zip(sources, real_cs):
        cs = src.shape[3]
        cs_t = -(-cs // 8) * 8                        # round stored channels to >=8
        x = src.astype(jnp.bfloat16)
        if cs_t != cs:
            x = jnp.pad(x, ((0, 0), (0, 0), (0, 0), (0, cs_t - cs)))
        xp = jnp.pad(x, ((0, 0), (1, 1), (1, 1), (0, 0)))
        for p in range(stride):
            for q in range(stride):
                ph = xp[:, p::stride, q::stride, :]
                phases.append(ph)
                phase_specs.append(
                    pl.BlockSpec((None,) + ph.shape[1:],
                                 lambda bb: (bb, 0, 0, 0)))
        wk = w_k[:, :, off:off + rc, :]
        wk = jnp.pad(wk, ((0, 0), (0, 0), (0, cs_t - rc), (0, _OCP - OC)))
        w_srcs.append(wk.astype(jnp.bfloat16))
        w_specs.append(pl.BlockSpec((3, 3, cs_t, _OCP),
                                    lambda bb: (0, 0, 0, 0)))
        off += rc

    b_p = jnp.pad(bias, (0, _OCP - OC)).astype(jnp.float32).reshape(1, _OCP)
    b_spec = pl.BlockSpec((1, _OCP), lambda bb: (0, 0))
    out_spec = pl.BlockSpec((None, OH, OW, _OCP), lambda bb: (bb, 0, 0, 0))

    kernel = _build_conv_kernel(len(sources), stride, OH, OW, act)

    return pl.pallas_call(
        kernel,
        out_shape=jax.ShapeDtypeStruct((B, OH, OW, _OCP), out_dtype),
        grid=(B,),
        in_specs=phase_specs + w_specs + [b_spec],
        out_specs=out_spec,
        compiler_params=pltpu.CompilerParams(
            dimension_semantics=("parallel",)),
    )(*phases, *w_srcs, b_p)


# ---------------------------------------------------------------------------
# Nearest up-sampling (NHWC): broadcast+reshape pixel repeat (no gather)
# ---------------------------------------------------------------------------
def upsample_nearest(x, size):
    B, H, W, C = x.shape
    Ht, Wt = size
    if (Ht, Wt) == (H, W):
        return x
    if Ht % H == 0 and Wt % W == 0:
        fh, fw = Ht // H, Wt // W
        x = jnp.broadcast_to(x[:, :, None, :, None, :], (B, H, fh, W, fw, C))
        return x.reshape(B, Ht, Wt, C)
    # general (non-integer factor) fallback — matches PyTorch 'nearest'
    hi = (jnp.arange(Ht) * H) // Ht
    wi = (jnp.arange(Wt) * W) // Wt
    return jnp.take(jnp.take(x, hi, axis=1), wi, axis=2)


# ---------------------------------------------------------------------------
# Parameter init (deterministic, mirrors the PyTorch __init__)
# ---------------------------------------------------------------------------
_CONV_DEFS = [
    ("conv1", 5, 80), ("conv2", 80, 80), ("conv3", 80, 80), ("conv4", 80, 80),
    ("conv5", 80, 80), ("conv6", 80 + 80, 64), ("conv7", 64 + 80, 64),
    ("conv8", 64 + 80, 32), ("conv9", 32 + 80, 32), ("conv10", 32 + 1, 1),
]


def init_params(key):
    params = {}
    for name, ic, oc in _CONV_DEFS:
        key, sub = jax.random.split(key)
        std = (2.0 / (ic * 9)) ** 0.5                  # kaiming_normal_
        w = jax.random.normal(sub, (oc, ic, 3, 3), dtype=jnp.float32) * std
        b = jnp.full((oc,), 0.01, dtype=jnp.float32)   # constant_(bias, 0.01)
        params[name] = (w, b)
    return params


# ---------------------------------------------------------------------------
# Forward pass (mirrors CNN.forward)
# ---------------------------------------------------------------------------
def cnn_forward(params, x0):
    """x0: (B, 4, H, W) float32 NCHW (RGB-D).  Returns (B, 1, H, W) float32."""
    assert x0.shape[1] == 4, "The input is not RGB-D"
    x = jnp.transpose(x0, (0, 2, 3, 1))                # NHWC
    x0_rgb = x[..., 0:3]
    x0_d = x[..., 3:4]
    c0 = (x0_d > 0).astype(jnp.float32)

    # TODO(synk): `unguided_net` (normalized-convolution depth sub-network) is
    # not defined in guided_enc_dec.py; identity propagation is used instead.
    xout_d, cout_d = x0_d, c0

    def conv(name, srcs, rcs, stride, act, out_dtype=jnp.bfloat16):
        w, b = params[name]
        return conv3x3_pallas(srcs, rcs, w, b, stride, act, out_dtype)

    x_in = jnp.concatenate((xout_d, x0_rgb, cout_d), axis=-1)   # 5 channels
    x1 = conv("conv1", [x_in], [5], 2, "relu")
    x2 = conv("conv2", [x1], [80], 2, "relu")
    x3 = conv("conv3", [x2], [80], 2, "relu")
    x4 = conv("conv4", [x3], [80], 2, "relu")
    x5 = conv("conv5", [x4], [80], 2, "relu")

    x5u = upsample_nearest(x5, x4.shape[1:3])
    x6 = conv("conv6", [x5u, x4], [80, 80], 1, "leaky")
    x6u = upsample_nearest(x6, x3.shape[1:3])
    x7 = conv("conv7", [x6u, x3], [64, 80], 1, "leaky")
    x7u = upsample_nearest(x7, x2.shape[1:3])
    x8 = conv("conv8", [x7u, x2], [64, 80], 1, "leaky")
    x8u = upsample_nearest(x8, x1.shape[1:3])
    x9 = conv("conv9", [x8u, x1], [32, 80], 1, "leaky")
    x9u = upsample_nearest(x9, x0_d.shape[1:3])
    x10 = conv("conv10", [x9u, x0_d], [32, 1], 1, "leaky",
               out_dtype=jnp.float32)

    out = x10[..., 0:1]                                # (B, H, W, 1) f32
    return jnp.transpose(out, (0, 3, 1, 2))            # NCHW (B, 1, H, W)


if __name__ == "__main__":
    key = jax.random.PRNGKey(0)
    pkey, xkey = jax.random.split(key)
    params = init_params(pkey)

    # RGB-D input: batch=2, 4 channels (RGB + depth), 16x16 spatial
    x0 = jax.random.normal(xkey, (2, 4, 16, 16), dtype=jnp.float32)

    out = jax.jit(cnn_forward)(params, x0)
    out = jax.block_until_ready(out)
    assert out.shape == (2, 1, 16, 16), out.shape
    assert out.dtype == jnp.float32
    print("KERNEL_OK")
</pallas_src>

<mosaic_0001>
module attributes {stable_mosaic.version = 11 : i64} {
  func.func @kernel(%arg0: i32, %arg1: memref<1x9x9x8xbf16, #tpu.memory_space<vmem>>, %arg2: memref<1x9x9x8xbf16, #tpu.memory_space<vmem>>, %arg3: memref<1x9x9x8xbf16, #tpu.memory_space<vmem>>, %arg4: memref<1x9x9x8xbf16, #tpu.memory_space<vmem>>, %arg5: memref<3x3x8x128xbf16, #tpu.memory_space<vmem>>, %arg6: memref<1x128xf32, #tpu.memory_space<vmem>>, %arg7: memref<1x8x8x128xbf16, #tpu.memory_space<vmem>>) attributes {dimension_semantics = [#tpu.dimension_semantics<parallel>], iteration_bounds = array<i64: 2>, scalar_prefetch = 0 : i64, scratch_operands = 0 : i64, tpu.core_type = #tpu.core_type<tc>, window_params = [{transform_indices = @transform_0, window_bounds = array<i64: 1, 9, 9, 8>}, {transform_indices = @transform_1, window_bounds = array<i64: 1, 9, 9, 8>}, {transform_indices = @transform_2, window_bounds = array<i64: 1, 9, 9, 8>}, {transform_indices = @transform_3, window_bounds = array<i64: 1, 9, 9, 8>}, {pipeline_mode = #tpu.pipeline_mode<synchronous>, transform_indices = @transform_4, window_bounds = array<i64: 3, 3, 8, 128>}, {pipeline_mode = #tpu.pipeline_mode<synchronous>, transform_indices = @transform_5, window_bounds = array<i64: 1, 128>}, {transform_indices = @transform_6, window_bounds = array<i64: 1, 8, 8, 128>}]} {
    %c0_i32 = arith.constant 0 : i32
    %c8_i32 = arith.constant 8 : i32
    %0 = arith.addi %c0_i32, %c8_i32 : i32
    %c1_i32 = arith.constant 1 : i32
    scf.for %arg8 = %c0_i32 to %0 step %c1_i32  : i32 {
      %cst = arith.constant 0.000000e+00 : f32
      %1 = vector.broadcast %cst : f32 to vector<8x128xf32>
      %c0_i32_1 = arith.constant 0 : i32
      %2 = arith.addi %arg8, %c0_i32_1 : i32
      %c0 = arith.constant 0 : index
      %3 = arith.index_cast %2 : i32 to index
      %c0_2 = arith.constant 0 : index
      %c0_3 = arith.constant 0 : index
      %4 = vector.load %arg1[%c0, %3, %c0_2, %c0_3] : memref<1x9x9x8xbf16, #tpu.memory_space<vmem>>, vector<1x1x9x8xbf16>
      %5 = vector.shape_cast %4 : vector<1x1x9x8xbf16> to vector<9x8xbf16>
      %6 = vector.extract_strided_slice %5 {offsets = [0, 0], sizes = [8, 8], strides = [1, 1]} : vector<9x8xbf16> to vector<8x8xbf16>
      %c0_4 = arith.constant 0 : index
      %c0_5 = arith.constant 0 : index
      %c0_6 = arith.constant 0 : index
      %c0_7 = arith.constant 0 : index
      %7 = vector.load %arg5[%c0_4, %c0_5, %c0_6, %c0_7] : memref<3x3x8x128xbf16, #tpu.memory_space<vmem>>, vector<1x1x8x128xbf16>
      %8 = vector.shape_cast %7 : vector<1x1x8x128xbf16> to vector<8x128xbf16>
      %cst_8 = arith.constant dense<0.000000e+00> : vector<8x128xf32>
      %9 = tpu.matmul %6, %8, %cst_8 {dimension_numbers = #tpu.dot_dimension_numbers<[1], [0], [0], [1], [0, 0, 1, 1], [], []>} : vector<8x8xbf16>, vector<8x128xbf16>, vector<8x128xf32> -> vector<8x128xf32>
      %10 = arith.addf %1, %9 : vector<8x128xf32>
      %c0_i32_9 = arith.constant 0 : i32
      %11 = arith.addi %arg8, %c0_i32_9 : i32
      %c0_10 = arith.constant 0 : index
      %12 = arith.index_cast %11 : i32 to index
      %c0_11 = arith.constant 0 : index
      %c0_12 = arith.constant 0 : index
      %13 = vector.load %arg2[%c0_10, %12, %c0_11, %c0_12] : memref<1x9x9x8xbf16, #tpu.memory_space<vmem>>, vector<1x1x9x8xbf16>
      %14 = vector.shape_cast %13 : vector<1x1x9x8xbf16> to vector<9x8xbf16>
      %15 = vector.extract_strided_slice %14 {offsets = [0, 0], sizes = [8, 8], strides = [1, 1]} : vector<9x8xbf16> to vector<8x8xbf16>
      %c0_13 = arith.constant 0 : index
      %c1 = arith.constant 1 : index
      %c0_14 = arith.constant 0 : index
      %c0_15 = arith.constant 0 : index
      %16 = vector.load %arg5[%c0_13, %c1, %c0_14, %c0_15] : memref<3x3x8x128xbf16, #tpu.memory_space<vmem>>, vector<1x1x8x128xbf16>
      %17 = vector.shape_cast %16 : vector<1x1x8x128xbf16> to vector<8x128xbf16>
      %cst_16 = arith.constant dense<0.000000e+00> : vector<8x128xf32>
      %18 = tpu.matmul %15, %17, %cst_16 {dimension_numbers = #tpu.dot_dimension_numbers<[1], [0], [0], [1], [0, 0, 1, 1], [], []>} : vector<8x8xbf16>, vector<8x128xbf16>, vector<8x128xf32> -> vector<8x128xf32>
      %19 = arith.addf %10, %18 : vector<8x128xf32>
      %c0_i32_17 = arith.constant 0 : i32
      %20 = arith.addi %arg8, %c0_i32_17 : i32
      %c0_18 = arith.constant 0 : index
      %21 = arith.index_cast %20 : i32 to index
      %c0_19 = arith.constant 0 : index
      %c0_20 = arith.constant 0 : index
      %22 = vector.load %arg1[%c0_18, %21, %c0_19, %c0_20] : memref<1x9x9x8xbf16, #tpu.memory_space<vmem>>, vector<1x1x9x8xbf16>
      %23 = vector.shape_cast %22 : vector<1x1x9x8xbf16> to vector<9x8xbf16>
      %24 = vector.extract_strided_slice %23 {offsets = [1, 0], sizes = [8, 8], strides = [1, 1]} : vector<9x8xbf16> to vector<8x8xbf16>
      %c0_21 = arith.constant 0 : index
      %c2 = arith.constant 2 : index
      %c0_22 = arith.constant 0 : index
      %c0_23 = arith.constant 0 : index
      %25 = vector.load %arg5[%c0_21, %c2, %c0_22, %c0_23] : memref<3x3x8x128xbf16, #tpu.memory_space<vmem>>, vector<1x1x8x128xbf16>
      %26 = vector.shape_cast %25 : vector<1x1x8x128xbf16> to vector<8x128xbf16>
      %cst_24 = arith.constant dense<0.000000e+00> : vector<8x128xf32>
      %27 = tpu.matmul %24, %26, %cst_24 {dimension_numbers = #tpu.dot_dimension_numbers<[1], [0], [0], [1], [0, 0, 1, 1], [], []>} : vector<8x8xbf16>, vector<8x128xbf16>, vector<8x128xf32> -> vector<8x128xf32>
      %28 = arith.addf %19, %27 : vector<8x128xf32>
      %c0_i32_25 = arith.constant 0 : i32
      %29 = arith.addi %arg8, %c0_i32_25 : i32
      %c0_26 = arith.constant 0 : index
      %30 = arith.index_cast %29 : i32 to index
      %c0_27 = arith.constant 0 : index
      %c0_28 = arith.constant 0 : index
      %31 = vector.load %arg3[%c0_26, %30, %c0_27, %c0_28] : memref<1x9x9x8xbf16, #tpu.memory_space<vmem>>, vector<1x1x9x8xbf16>
      %32 = vector.shape_cast %31 : vector<1x1x9x8xbf16> to vector<9x8xbf16>
      %33 = vector.extract_strided_slice %32 {offsets = [0, 0], sizes = [8, 8], strides = [1, 1]} : vector<9x8xbf16> to vector<8x8xbf16>
      %c1_29 = arith.constant 1 : index
      %c0_30 = arith.constant 0 : index
      %c0_31 = arith.constant 0 : index
      %c0_32 = arith.constant 0 : index
      %34 = vector.load %arg5[%c1_29, %c0_30, %c0_31, %c0_32] : memref<3x3x8x128xbf16, #tpu.memory_space<vmem>>, vector<1x1x8x128xbf16>
      %35 = vector.shape_cast %34 : vector<1x1x8x128xbf16> to vector<8x128xbf16>
      %cst_33 = arith.constant dense<0.000000e+00> : vector<8x128xf32>
      %36 = tpu.matmul %33, %35, %cst_33 {dimension_numbers = #tpu.dot_dimension_numbers<[1], [0], [0], [1], [0, 0, 1, 1], [], []>} : vector<8x8xbf16>, vector<8x128xbf16>, vector<8x128xf32> -> vector<8x128xf32>
      %37 = arith.addf %28, %36 : vector<8x128xf32>
      %c0_i32_34 = arith.constant 0 : i32
      %38 = arith.addi %arg8, %c0_i32_34 : i32
      %c0_35 = arith.constant 0 : index
      %39 = arith.index_cast %38 : i32 to index
      %c0_36 = arith.constant 0 : index
      %c0_37 = arith.constant 0 : index
      %40 = vector.load %arg4[%c0_35, %39, %c0_36, %c0_37] : memref<1x9x9x8xbf16, #tpu.memory_space<vmem>>, vector<1x1x9x8xbf16>
      %41 = vector.shape_cast %40 : vector<1x1x9x8xbf16> to vector<9x8xbf16>
      %42 = vector.extract_strided_slice %41 {offsets = [0, 0], sizes = [8, 8], strides = [1, 1]} : vector<9x8xbf16> to vector<8x8xbf16>
      %c1_38 = arith.constant 1 : index
      %c1_39 = arith.constant 1 : index
      %c0_40 = arith.constant 0 : index
      %c0_41 = arith.constant 0 : index
      %43 = vector.load %arg5[%c1_38, %c1_39, %c0_40, %c0_41] : memref<3x3x8x128xbf16, #tpu.memory_space<vmem>>, vector<1x1x8x128xbf16>
      %44 = vector.shape_cast %43 : vector<1x1x8x128xbf16> to vector<8x128xbf16>
      %cst_42 = arith.constant dense<0.000000e+00> : vector<8x128xf32>
      %45 = tpu.matmul %42, %44, %cst_42 {dimension_numbers = #tpu.dot_dimension_numbers<[1], [0], [0], [1], [0, 0, 1, 1], [], []>} : vector<8x8xbf16>, vector<8x128xbf16>, vector<8x128xf32> -> vector<8x128xf32>
      %46 = arith.addf %37, %45 : vector<8x128xf32>
      %c0_i32_43 = arith.constant 0 : i32
      %47 = arith.addi %arg8, %c0_i32_43 : i32
      %c0_44 = arith.constant 0 : index
      %48 = arith.index_cast %47 : i32 to index
      %c0_45 = arith.constant 0 : index
      %c0_46 = arith.constant 0 : index
      %49 = vector.load %arg3[%c0_44, %48, %c0_45, %c0_46] : memref<1x9x9x8xbf16, #tpu.memory_space<vmem>>, vector<1x1x9x8xbf16>
      %50 = vector.shape_cast %49 : vector<1x1x9x8xbf16> to vector<9x8xbf16>
      %51 = vector.extract_strided_slice %50 {offsets = [1, 0], sizes = [8, 8], strides = [1, 1]} : vector<9x8xbf16> to vector<8x8xbf16>
      %c1_47 = arith.constant 1 : index
      %c2_48 = arith.constant 2 : index
      %c0_49 = arith.constant 0 : index
      %c0_50 = arith.constant 0 : index
      %52 = vector.load %arg5[%c1_47, %c2_48, %c0_49, %c0_50] : memref<3x3x8x128xbf16, #tpu.memory_space<vmem>>, vector<1x1x8x128xbf16>
      %53 = vector.shape_cast %52 : vector<1x1x8x128xbf16> to vector<8x128xbf16>
      %cst_51 = arith.constant dense<0.000000e+00> : vector<8x128xf32>
      %54 = tpu.matmul %51, %53, %cst_51 {dimension_numbers = #tpu.dot_dimension_numbers<[1], [0], [0], [1], [0, 0, 1, 1], [], []>} : vector<8x8xbf16>, vector<8x128xbf16>, vector<8x128xf32> -> vector<8x128xf32>
      %55 = arith.addf %46, %54 : vector<8x128xf32>
      %c1_i32_52 = arith.constant 1 : i32
      %56 = arith.addi %arg8, %c1_i32_52 : i32
      %c0_53 = arith.constant 0 : index
      %57 = arith.index_cast %56 : i32 to index
      %c0_54 = arith.constant 0 : index
      %c0_55 = arith.constant 0 : index
      %58 = vector.load %arg1[%c0_53, %57, %c0_54, %c0_55] : memref<1x9x9x8xbf16, #tpu.memory_space<vmem>>, vector<1x1x9x8xbf16>
      %59 = vector.shape_cast %58 : vector<1x1x9x8xbf16> to vector<9x8xbf16>
      %60 = vector.extract_strided_slice %59 {offsets = [0, 0], sizes = [8, 8], strides = [1, 1]} : vector<9x8xbf16> to vector<8x8xbf16>
      %c2_56 = arith.constant 2 : index
      %c0_57 = arith.constant 0 : index
      %c0_58 = arith.constant 0 : index
      %c0_59 = arith.constant 0 : index
      %61 = vector.load %arg5[%c2_56, %c0_57, %c0_58, %c0_59] : memref<3x3x8x128xbf16, #tpu.memory_space<vmem>>, vector<1x1x8x128xbf16>
      %62 = vector.shape_cast %61 : vector<1x1x8x128xbf16> to vector<8x128xbf16>
      %cst_60 = arith.constant dense<0.000000e+00> : vector<8x128xf32>
      %63 = tpu.matmul %60, %62, %cst_60 {dimension_numbers = #tpu.dot_dimension_numbers<[1], [0], [0], [1], [0, 0, 1, 1], [], []>} : vector<8x8xbf16>, vector<8x128xbf16>, vector<8x128xf32> -> vector<8x128xf32>
      %64 = arith.addf %55, %63 : vector<8x128xf32>
      %c1_i32_61 = arith.constant 1 : i32
      %65 = arith.addi %arg8, %c1_i32_61 : i32
      %c0_62 = arith.constant 0 : index
      %66 = arith.index_cast %65 : i32 to index
      %c0_63 = arith.constant 0 : index
      %c0_64 = arith.constant 0 : index
      %67 = vector.load %arg2[%c0_62, %66, %c0_63, %c0_64] : memref<1x9x9x8xbf16, #tpu.memory_space<vmem>>, vector<1x1x9x8xbf16>
      %68 = vector.shape_cast %67 : vector<1x1x9x8xbf16> to vector<9x8xbf16>
      %69 = vector.extract_strided_slice %68 {offsets = [0, 0], sizes = [8, 8], strides = [1, 1]} : vector<9x8xbf16> to vector<8x8xbf16>
      %c2_65 = arith.constant 2 : index
      %c1_66 = arith.constant 1 : index
      %c0_67 = arith.constant 0 : index
      %c0_68 = arith.constant 0 : index
      %70 = vector.load %arg5[%c2_65, %c1_66, %c0_67, %c0_68] : memref<3x3x8x128xbf16, #tpu.memory_space<vmem>>, vector<1x1x8x128xbf16>
      %71 = vector.shape_cast %70 : vector<1x1x8x128xbf16> to vector<8x128xbf16>
      %cst_69 = arith.constant dense<0.000000e+00> : vector<8x128xf32>
      %72 = tpu.matmul %69, %71, %cst_69 {dimension_numbers = #tpu.dot_dimension_numbers<[1], [0], [0], [1], [0, 0, 1, 1], [], []>} : vector<8x8xbf16>, vector<8x128xbf16>, vector<8x128xf32> -> vector<8x128xf32>
      %73 = arith.addf %64, %72 : vector<8x128xf32>
      %c1_i32_70 = arith.constant 1 : i32
      %74 = arith.addi %arg8, %c1_i32_70 : i32
      %c0_71 = arith.constant 0 : index
      %75 = arith.index_cast %74 : i32 to index
      %c0_72 = arith.constant 0 : index
      %c0_73 = arith.constant 0 : index
      %76 = vector.load %arg1[%c0_71, %75, %c0_72, %c0_73] : memref<1x9x9x8xbf16, #tpu.memory_space<vmem>>, vector<1x1x9x8xbf16>
      %77 = vector.shape_cast %76 : vector<1x1x9x8xbf16> to vector<9x8xbf16>
      %78 = vector.extract_strided_slice %77 {offsets = [1, 0], sizes = [8, 8], strides = [1, 1]} : vector<9x8xbf16> to vector<8x8xbf16>
      %c2_74 = arith.constant 2 : index
      %c2_75 = arith.constant 2 : index
      %c0_76 = arith.constant 0 : index
      %c0_77 = arith.constant 0 : index
      %79 = vector.load %arg5[%c2_74, %c2_75, %c0_76, %c0_77] : memref<3x3x8x128xbf16, #tpu.memory_space<vmem>>, vector<1x1x8x128xbf16>
      %80 = vector.shape_cast %79 : vector<1x1x8x128xbf16> to vector<8x128xbf16>
      %cst_78 = arith.constant dense<0.000000e+00> : vector<8x128xf32>
      %81 = tpu.matmul %78, %80, %cst_78 {dimension_numbers = #tpu.dot_dimension_numbers<[1], [0], [0], [1], [0, 0, 1, 1], [], []>} : vector<8x8xbf16>, vector<8x128xbf16>, vector<8x128xf32> -> vector<8x128xf32>
      %82 = arith.addf %73, %81 : vector<8x128xf32>
      %c0_79 = arith.constant 0 : index
      %c0_80 = arith.constant 0 : index
      %83 = vector.load %arg6[%c0_79, %c0_80] : memref<1x128xf32, #tpu.memory_space<vmem>>, vector<1x128xf32>
      %84 = vector.broadcast %83 : vector<1x128xf32> to vector<8x128xf32>
      %85 = arith.addf %82, %84 : vector<8x128xf32>
      %cst_81 = arith.constant 0.000000e+00 : f32
      %86 = vector.broadcast %cst_81 : f32 to vector<8x128xf32>
      %87 = arith.maximumf %85, %86 : vector<8x128xf32>
      %88 = arith.truncf %87 : vector<8x128xf32> to vector<8x128xbf16>
      %c0_82 = arith.constant 0 : index
      %89 = arith.index_cast %arg8 : i32 to index
      %c0_83 = arith.constant 0 : index
      %c0_84 = arith.constant 0 : index
      %90 = vector.load %arg7[%c0_82, %89, %c0_83, %c0_84] : memref<1x8x8x128xbf16, #tpu.memory_space<vmem>>, vector<1x1x8x128xbf16>
      %91 = vector.shape_cast %90 : vector<1x1x8x128xbf16> to vector<8x128xbf16>
      %92 = vector.shape_cast %88 : vector<8x128xbf16> to vector<1x1x8x128xbf16>
      tpu.vector_store %arg7[%c0_82, %89, %c0_83, %c0_84], %92 {strides = array<i32>} : memref<1x8x8x128xbf16, #tpu.memory_space<vmem>>, vector<1x1x8x128xbf16>,
    }
    %c8_i32_0 = arith.constant 8 : i32
    return
  }
  func.func @transform_0(%arg0: i32) -> (i32, i32, i32, i32) {
    %c0_i32 = arith.constant 0 : i32
    %c0_i32_0 = arith.constant 0 : i32
    %c0_i32_1 = arith.constant 0 : i32
    %c0_i32_2 = arith.constant 0 : i32
    return %arg0, %c0_i32, %c0_i32_0, %c0_i32_1 : i32, i32, i32, i32
  }
  func.func @transform_1(%arg0: i32) -> (i32, i32, i32, i32) {
    %c0_i32 = arith.constant 0 : i32
    %c0_i32_0 = arith.constant 0 : i32
    %c0_i32_1 = arith.constant 0 : i32
    %c0_i32_2 = arith.constant 0 : i32
    return %arg0, %c0_i32, %c0_i32_0, %c0_i32_1 : i32, i32, i32, i32
  }
  func.func @transform_2(%arg0: i32) -> (i32, i32, i32, i32) {
    %c0_i32 = arith.constant 0 : i32
    %c0_i32_0 = arith.constant 0 : i32
    %c0_i32_1 = arith.constant 0 : i32
    %c0_i32_2 = arith.constant 0 : i32
    return %arg0, %c0_i32, %c0_i32_0, %c0_i32_1 : i32, i32, i32, i32
  }
  func.func @transform_3(%arg0: i32) -> (i32, i32, i32, i32) {
    %c0_i32 = arith.constant 0 : i32
    %c0_i32_0 = arith.constant 0 : i32
    %c0_i32_1 = arith.constant 0 : i32
    %c0_i32_2 = arith.constant 0 : i32
    return %arg0, %c0_i32, %c0_i32_0, %c0_i32_1 : i32, i32, i32, i32
  }
  func.func @transform_4(%arg0: i32) -> (i32, i32, i32, i32) {
    %c0_i32 = arith.constant 0 : i32
    %c0_i32_0 = arith.constant 0 : i32
    %c0_i32_1 = arith.constant 0 : i32
    %c0_i32_2 = arith.constant 0 : i32
    %c0_i32_3 = arith.constant 0 : i32
    return %c0_i32, %c0_i32_0, %c0_i32_1, %c0_i32_2 : i32, i32, i32, i32
  }
  func.func @transform_5(%arg0: i32) -> (i32, i32) {
    %c0_i32 = arith.constant 0 : i32
    %c0_i32_0 = arith.constant 0 : i32
    %c0_i32_1 = arith.constant 0 : i32
    return %c0_i32, %c0_i32_0 : i32, i32
  }
  func.func @transform_6(%arg0: i32) -> (i32, i32, i32, i32) {
    %c0_i32 = arith.constant 0 : i32
    %c0_i32_0 = arith.constant 0 : i32
    %c0_i32_1 = arith.constant 0 : i32
    %c0_i32_2 = arith.constant 0 : i32
    return %arg0, %c0_i32, %c0_i32_0, %c0_i32_1 : i32, i32, i32, i32
  }
}

module attributes {stable_mosaic.version = 11 : i64} {
  func.func @kernel(%arg0: i32, %arg1: memref<1x5x5x128xbf16, #tpu.memory_space<vmem>>, %arg2: memref<1x5x5x128xbf16, #tpu.memory_space<vmem>>, %arg3: memref<1x5x5x128xbf16, #tpu.memory_space<vmem>>, %arg4: memref<1x5x5x128xbf16, #tpu.memory_space<vmem>>, %arg5: memref<3x3x128x128xbf16, #tpu.memory_space<vmem>>, %arg6: memref<1x128xf32, #tpu.memory_space<vmem>>, %arg7: memref<1x4x4x128xbf16, #tpu.memory_space<vmem>>) attributes {dimension_semantics = [#tpu.dimension_semantics<parallel>], iteration_bounds = array<i64: 2>, scalar_prefetch = 0 : i64, scratch_operands = 0 : i64, tpu.core_type = #tpu.core_type<tc>, window_params = [{transform_indices = @transform_0, window_bounds = array<i64: 1, 5, 5, 128>}, {transform_indices = @transform_1, window_bounds = array<i64: 1, 5, 5, 128>}, {transform_indices = @transform_2, window_bounds = array<i64: 1, 5, 5, 128>}, {transform_indices = @transform_3, window_bounds = array<i64: 1, 5, 5, 128>}, {pipeline_mode = #tpu.pipeline_mode<synchronous>, transform_indices = @transform_4, window_bounds = array<i64: 3, 3, 128, 128>}, {pipeline_mode = #tpu.pipeline_mode<synchronous>, transform_indices = @transform_5, window_bounds = array<i64: 1, 128>}, {transform_indices = @transform_6, window_bounds = array<i64: 1, 4, 4, 128>}]} {
    %c0_i32 = arith.constant 0 : i32
    %c4_i32 = arith.constant 4 : i32
    %0 = arith.addi %c0_i32, %c4_i32 : i32
    %c1_i32 = arith.constant 1 : i32
    scf.for %arg8 = %c0_i32 to %0 step %c1_i32  : i32 {
      %cst = arith.constant 0.000000e+00 : f32
      %1 = vector.broadcast %cst : f32 to vector<4x128xf32>
      %c0_i32_1 = arith.constant 0 : i32
      %2 = arith.addi %arg8, %c0_i32_1 : i32
      %c0 = arith.constant 0 : index
      %3 = arith.index_cast %2 : i32 to index
      %c0_2 = arith.constant 0 : index
      %c0_3 = arith.constant 0 : index
      %4 = vector.load %arg1[%c0, %3, %c0_2, %c0_3] : memref<1x5x5x128xbf16, #tpu.memory_space<vmem>>, vector<1x1x5x128xbf16>
      %5 = vector.shape_cast %4 : vector<1x1x5x128xbf16> to vector<5x128xbf16>
      %6 = vector.extract_strided_slice %5 {offsets = [0, 0], sizes = [4, 128], strides = [1, 1]} : vector<5x128xbf16> to vector<4x128xbf16>
      %c0_4 = arith.constant 0 : index
      %c0_5 = arith.constant 0 : index
      %c0_6 = arith.constant 0 : index
      %c0_7 = arith.constant 0 : index
      %7 = vector.load %arg5[%c0_4, %c0_5, %c0_6, %c0_7] : memref<3x3x128x128xbf16, #tpu.memory_space<vmem>>, vector<1x1x128x128xbf16>
      %8 = vector.shape_cast %7 : vector<1x1x128x128xbf16> to vector<128x128xbf16>
      %cst_8 = arith.constant dense<0.000000e+00> : vector<4x128xf32>
      %9 = tpu.matmul %6, %8, %cst_8 {dimension_numbers = #tpu.dot_dimension_numbers<[1], [0], [0], [1], [0, 0, 1, 1], [], []>} : vector<4x128xbf16>, vector<128x128xbf16>, vector<4x128xf32> -> vector<4x128xf32>
      %10 = arith.addf %1, %9 : vector<4x128xf32>
      %c0_i32_9 = arith.constant 0 : i32
      %11 = arith.addi %arg8, %c0_i32_9 : i32
      %c0_10 = arith.constant 0 : index
      %12 = arith.index_cast %11 : i32 to index
      %c0_11 = arith.constant 0 : index
      %c0_12 = arith.constant 0 : index
      %13 = vector.load %arg2[%c0_10, %12, %c0_11, %c0_12] : memref<1x5x5x128xbf16, #tpu.memory_space<vmem>>, vector<1x1x5x128xbf16>
      %14 = vector.shape_cast %13 : vector<1x1x5x128xbf16> to vector<5x128xbf16>
      %15 = vector.extract_strided_slice %14 {offsets = [0, 0], sizes = [4, 128], strides = [1, 1]} : vector<5x128xbf16> to vector<4x128xbf16>
      %c0_13 = arith.constant 0 : index
      %c1 = arith.constant 1 : index
      %c0_14 = arith.constant 0 : index
      %c0_15 = arith.constant 0 : index
      %16 = vector.load %arg5[%c0_13, %c1, %c0_14, %c0_15] : memref<3x3x128x128xbf16, #tpu.memory_space<vmem>>, vector<1x1x128x128xbf16>
      %17 = vector.shape_cast %16 : vector<1x1x128x128xbf16> to vector<128x128xbf16>
      %cst_16 = arith.constant dense<0.000000e+00> : vector<4x128xf32>
      %18 = tpu.matmul %15, %17, %cst_16 {dimension_numbers = #tpu.dot_dimension_numbers<[1], [0], [0], [1], [0, 0, 1, 1], [], []>} : vector<4x128xbf16>, vector<128x128xbf16>, vector<4x128xf32> -> vector<4x128xf32>
      %19 = arith.addf %10, %18 : vector<4x128xf32>
      %c0_i32_17 = arith.constant 0 : i32
      %20 = arith.addi %arg8, %c0_i32_17 : i32
      %c0_18 = arith.constant 0 : index
      %21 = arith.index_cast %20 : i32 to index
      %c0_19 = arith.constant 0 : index
      %c0_20 = arith.constant 0 : index
      %22 = vector.load %arg1[%c0_18, %21, %c0_19, %c0_20] : memref<1x5x5x128xbf16, #tpu.memory_space<vmem>>, vector<1x1x5x128xbf16>
      %23 = vector.shape_cast %22 : vector<1x1x5x128xbf16> to vector<5x128xbf16>
      %24 = vector.extract_strided_slice %23 {offsets = [1, 0], sizes = [4, 128], strides = [1, 1]} : vector<5x128xbf16> to vector<4x128xbf16>
      %c0_21 = arith.constant 0 : index
      %c2 = arith.constant 2 : index
      %c0_22 = arith.constant 0 : index
      %c0_23 = arith.constant 0 : index
      %25 = vector.load %arg5[%c0_21, %c2, %c0_22, %c0_23] : memref<3x3x128x128xbf16, #tpu.memory_space<vmem>>, vector<1x1x128x128xbf16>
      %26 = vector.shape_cast %25 : vector<1x1x128x128xbf16> to vector<128x128xbf16>
      %cst_24 = arith.constant dense<0.000000e+00> : vector<4x128xf32>
      %27 = tpu.matmul %24, %26, %cst_24 {dimension_numbers = #tpu.dot_dimension_numbers<[1], [0], [0], [1], [0, 0, 1, 1], [], []>} : vector<4x128xbf16>, vector<128x128xbf16>, vector<4x128xf32> -> vector<4x128xf32>
      %28 = arith.addf %19, %27 : vector<4x128xf32>
      %c0_i32_25 = arith.constant 0 : i32
      %29 = arith.addi %arg8, %c0_i32_25 : i32
      %c0_26 = arith.constant 0 : index
      %30 = arith.index_cast %29 : i32 to index
      %c0_27 = arith.constant 0 : index
      %c0_28 = arith.constant 0 : index
      %31 = vector.load %arg3[%c0_26, %30, %c0_27, %c0_28] : memref<1x5x5x128xbf16, #tpu.memory_space<vmem>>, vector<1x1x5x128xbf16>
      %32 = vector.shape_cast %31 : vector<1x1x5x128xbf16> to vector<5x128xbf16>
      %33 = vector.extract_strided_slice %32 {offsets = [0, 0], sizes = [4, 128], strides = [1, 1]} : vector<5x128xbf16> to vector<4x128xbf16>
      %c1_29 = arith.constant 1 : index
      %c0_30 = arith.constant 0 : index
      %c0_31 = arith.constant 0 : index
      %c0_32 = arith.constant 0 : index
      %34 = vector.load %arg5[%c1_29, %c0_30, %c0_31, %c0_32] : memref<3x3x128x128xbf16, #tpu.memory_space<vmem>>, vector<1x1x128x128xbf16>
      %35 = vector.shape_cast %34 : vector<1x1x128x128xbf16> to vector<128x128xbf16>
      %cst_33 = arith.constant dense<0.000000e+00> : vector<4x128xf32>
      %36 = tpu.matmul %33, %35, %cst_33 {dimension_numbers = #tpu.dot_dimension_numbers<[1], [0], [0], [1], [0, 0, 1, 1], [], []>} : vector<4x128xbf16>, vector<128x128xbf16>, vector<4x128xf32> -> vector<4x128xf32>
      %37 = arith.addf %28, %36 : vector<4x128xf32>
      %c0_i32_34 = arith.constant 0 : i32
      %38 = arith.addi %arg8, %c0_i32_34 : i32
      %c0_35 = arith.constant 0 : index
      %39 = arith.index_cast %38 : i32 to index
      %c0_36 = arith.constant 0 : index
      %c0_37 = arith.constant 0 : index
      %40 = vector.load %arg4[%c0_35, %39, %c0_36, %c0_37] : memref<1x5x5x128xbf16, #tpu.memory_space<vmem>>, vector<1x1x5x128xbf16>
      %41 = vector.shape_cast %40 : vector<1x1x5x128xbf16> to vector<5x128xbf16>
      %42 = vector.extract_strided_slice %41 {offsets = [0, 0], sizes = [4, 128], strides = [1, 1]} : vector<5x128xbf16> to vector<4x128xbf16>
      %c1_38 = arith.constant 1 : index
      %c1_39 = arith.constant 1 : index
      %c0_40 = arith.constant 0 : index
      %c0_41 = arith.constant 0 : index
      %43 = vector.load %arg5[%c1_38, %c1_39, %c0_40, %c0_41] : memref<3x3x128x128xbf16, #tpu.memory_space<vmem>>, vector<1x1x128x128xbf16>
      %44 = vector.shape_cast %43 : vector<1x1x128x128xbf16> to vector<128x128xbf16>
      %cst_42 = arith.constant dense<0.000000e+00> : vector<4x128xf32>
      %45 = tpu.matmul %42, %44, %cst_42 {dimension_numbers = #tpu.dot_dimension_numbers<[1], [0], [0], [1], [0, 0, 1, 1], [], []>} : vector<4x128xbf16>, vector<128x128xbf16>, vector<4x128xf32> -> vector<4x128xf32>
      %46 = arith.addf %37, %45 : vector<4x128xf32>
      %c0_i32_43 = arith.constant 0 : i32
      %47 = arith.addi %arg8, %c0_i32_43 : i32
      %c0_44 = arith.constant 0 : index
      %48 = arith.index_cast %47 : i32 to index
      %c0_45 = arith.constant 0 : index
      %c0_46 = arith.constant 0 : index
      %49 = vector.load %arg3[%c0_44, %48, %c0_45, %c0_46] : memref<1x5x5x128xbf16, #tpu.memory_space<vmem>>, vector<1x1x5x128xbf16>
      %50 = vector.shape_cast %49 : vector<1x1x5x128xbf16> to vector<5x128xbf16>
      %51 = vector.extract_strided_slice %50 {offsets = [1, 0], sizes = [4, 128], strides = [1, 1]} : vector<5x128xbf16> to vector<4x128xbf16>
      %c1_47 = arith.constant 1 : index
      %c2_48 = arith.constant 2 : index
      %c0_49 = arith.constant 0 : index
      %c0_50 = arith.constant 0 : index
      %52 = vector.load %arg5[%c1_47, %c2_48, %c0_49, %c0_50] : memref<3x3x128x128xbf16, #tpu.memory_space<vmem>>, vector<1x1x128x128xbf16>
      %53 = vector.shape_cast %52 : vector<1x1x128x128xbf16> to vector<128x128xbf16>
      %cst_51 = arith.constant dense<0.000000e+00> : vector<4x128xf32>
      %54 = tpu.matmul %51, %53, %cst_51 {dimension_numbers = #tpu.dot_dimension_numbers<[1], [0], [0], [1], [0, 0, 1, 1], [], []>} : vector<4x128xbf16>, vector<128x128xbf16>, vector<4x128xf32> -> vector<4x128xf32>
      %55 = arith.addf %46, %54 : vector<4x128xf32>
      %c1_i32_52 = arith.constant 1 : i32
      %56 = arith.addi %arg8, %c1_i32_52 : i32
      %c0_53 = arith.constant 0 : index
      %57 = arith.index_cast %56 : i32 to index
      %c0_54 = arith.constant 0 : index
      %c0_55 = arith.constant 0 : index
      %58 = vector.load %arg1[%c0_53, %57, %c0_54, %c0_55] : memref<1x5x5x128xbf16, #tpu.memory_space<vmem>>, vector<1x1x5x128xbf16>
      %59 = vector.shape_cast %58 : vector<1x1x5x128xbf16> to vector<5x128xbf16>
      %60 = vector.extract_strided_slice %59 {offsets = [0, 0], sizes = [4, 128], strides = [1, 1]} : vector<5x128xbf16> to vector<4x128xbf16>
      %c2_56 = arith.constant 2 : index
      %c0_57 = arith.constant 0 : index
      %c0_58 = arith.constant 0 : index
      %c0_59 = arith.constant 0 : index
      %61 = vector.load %arg5[%c2_56, %c0_57, %c0_58, %c0_59] : memref<3x3x128x128xbf16, #tpu.memory_space<vmem>>, vector<1x1x128x128xbf16>
      %62 = vector.shape_cast %61 : vector<1x1x128x128xbf16> to vector<128x128xbf16>
      %cst_60 = arith.constant dense<0.000000e+00> : vector<4x128xf32>
      %63 = tpu.matmul %60, %62, %cst_60 {dimension_numbers = #tpu.dot_dimension_numbers<[1], [0], [0], [1], [0, 0, 1, 1], [], []>} : vector<4x128xbf16>, vector<128x128xbf16>, vector<4x128xf32> -> vector<4x128xf32>
      %64 = arith.addf %55, %63 : vector<4x128xf32>
      %c1_i32_61 = arith.constant 1 : i32
      %65 = arith.addi %arg8, %c1_i32_61 : i32
      %c0_62 = arith.constant 0 : index
      %66 = arith.index_cast %65 : i32 to index
      %c0_63 = arith.constant 0 : index
      %c0_64 = arith.constant 0 : index
      %67 = vector.load %arg2[%c0_62, %66, %c0_63, %c0_64] : memref<1x5x5x128xbf16, #tpu.memory_space<vmem>>, vector<1x1x5x128xbf16>
      %68 = vector.shape_cast %67 : vector<1x1x5x128xbf16> to vector<5x128xbf16>
      %69 = vector.extract_strided_slice %68 {offsets = [0, 0], sizes = [4, 128], strides = [1, 1]} : vector<5x128xbf16> to vector<4x128xbf16>
      %c2_65 = arith.constant 2 : index
      %c1_66 = arith.constant 1 : index
      %c0_67 = arith.constant 0 : index
      %c0_68 = arith.constant 0 : index
      %70 = vector.load %arg5[%c2_65, %c1_66, %c0_67, %c0_68] : memref<3x3x128x128xbf16, #tpu.memory_space<vmem>>, vector<1x1x128x128xbf16>
      %71 = vector.shape_cast %70 : vector<1x1x128x128xbf16> to vector<128x128xbf16>
      %cst_69 = arith.constant dense<0.000000e+00> : vector<4x128xf32>
      %72 = tpu.matmul %69, %71, %cst_69 {dimension_numbers = #tpu.dot_dimension_numbers<[1], [0], [0], [1], [0, 0, 1, 1], [], []>} : vector<4x128xbf16>, vector<128x128xbf16>, vector<4x128xf32> -> vector<4x128xf32>
      %73 = arith.addf %64, %72 : vector<4x128xf32>
      %c1_i32_70 = arith.constant 1 : i32
      %74 = arith.addi %arg8, %c1_i32_70 : i32
      %c0_71 = arith.constant 0 : index
      %75 = arith.index_cast %74 : i32 to index
      %c0_72 = arith.constant 0 : index
      %c0_73 = arith.constant 0 : index
      %76 = vector.load %arg1[%c0_71, %75, %c0_72, %c0_73] : memref<1x5x5x128xbf16, #tpu.memory_space<vmem>>, vector<1x1x5x128xbf16>
      %77 = vector.shape_cast %76 : vector<1x1x5x128xbf16> to vector<5x128xbf16>
      %78 = vector.extract_strided_slice %77 {offsets = [1, 0], sizes = [4, 128], strides = [1, 1]} : vector<5x128xbf16> to vector<4x128xbf16>
      %c2_74 = arith.constant 2 : index
      %c2_75 = arith.constant 2 : index
      %c0_76 = arith.constant 0 : index
      %c0_77 = arith.constant 0 : index
      %79 = vector.load %arg5[%c2_74, %c2_75, %c0_76, %c0_77] : memref<3x3x128x128xbf16, #tpu.memory_space<vmem>>, vector<1x1x128x128xbf16>
      %80 = vector.shape_cast %79 : vector<1x1x128x128xbf16> to vector<128x128xbf16>
      %cst_78 = arith.constant dense<0.000000e+00> : vector<4x128xf32>
      %81 = tpu.matmul %78, %80, %cst_78 {dimension_numbers = #tpu.dot_dimension_numbers<[1], [0], [0], [1], [0, 0, 1, 1], [], []>} : vector<4x128xbf16>, vector<128x128xbf16>, vector<4x128xf32> -> vector<4x128xf32>
      %82 = arith.addf %73, %81 : vector<4x128xf32>
      %c0_79 = arith.constant 0 : index
      %c0_80 = arith.constant 0 : index
      %83 = vector.load %arg6[%c0_79, %c0_80] : memref<1x128xf32, #tpu.memory_space<vmem>>, vector<1x128xf32>
      %84 = vector.broadcast %83 : vector<1x128xf32> to vector<4x128xf32>
      %85 = arith.addf %82, %84 : vector<4x128xf32>
      %cst_81 = arith.constant 0.000000e+00 : f32
      %86 = vector.broadcast %cst_81 : f32 to vector<4x128xf32>
      %87 = arith.maximumf %85, %86 : vector<4x128xf32>
      %88 = arith.truncf %87 : vector<4x128xf32> to vector<4x128xbf16>
      %c0_82 = arith.constant 0 : index
      %89 = arith.index_cast %arg8 : i32 to index
      %c0_83 = arith.constant 0 : index
      %c0_84 = arith.constant 0 : index
      %90 = vector.load %arg7[%c0_82, %89, %c0_83, %c0_84] : memref<1x4x4x128xbf16, #tpu.memory_space<vmem>>, vector<1x1x4x128xbf16>
      %91 = vector.shape_cast %90 : vector<1x1x4x128xbf16> to vector<4x128xbf16>
      %92 = vector.shape_cast %88 : vector<4x128xbf16> to vector<1x1x4x128xbf16>
      tpu.vector_store %arg7[%c0_82, %89, %c0_83, %c0_84], %92 {strides = array<i32>} : memref<1x4x4x128xbf16, #tpu.memory_space<vmem>>, vector<1x1x4x128xbf16>,
    }
    %c4_i32_0 = arith.constant 4 : i32
    return
  }
  func.func @transform_0(%arg0: i32) -> (i32, i32, i32, i32) {
    %c0_i32 = arith.constant 0 : i32
    %c0_i32_0 = arith.constant 0 : i32
    %c0_i32_1 = arith.constant 0 : i32
    %c0_i32_2 = arith.constant 0 : i32
    return %arg0, %c0_i32, %c0_i32_0, %c0_i32_1 : i32, i32, i32, i32
  }
  func.func @transform_1(%arg0: i32) -> (i32, i32, i32, i32) {
    %c0_i32 = arith.constant 0 : i32
    %c0_i32_0 = arith.constant 0 : i32
    %c0_i32_1 = arith.constant 0 : i32
    %c0_i32_2 = arith.constant 0 : i32
    return %arg0, %c0_i32, %c0_i32_0, %c0_i32_1 : i32, i32, i32, i32
  }
  func.func @transform_2(%arg0: i32) -> (i32, i32, i32, i32) {
    %c0_i32 = arith.constant 0 : i32
    %c0_i32_0 = arith.constant 0 : i32
    %c0_i32_1 = arith.constant 0 : i32
    %c0_i32_2 = arith.constant 0 : i32
    return %arg0, %c0_i32, %c0_i32_0, %c0_i32_1 : i32, i32, i32, i32
  }
  func.func @transform_3(%arg0: i32) -> (i32, i32, i32, i32) {
    %c0_i32 = arith.constant 0 : i32
    %c0_i32_0 = arith.constant 0 : i32
    %c0_i32_1 = arith.constant 0 : i32
    %c0_i32_2 = arith.constant 0 : i32
    return %arg0, %c0_i32, %c0_i32_0, %c0_i32_1 : i32, i32, i32, i32
  }
  func.func @transform_4(%arg0: i32) -> (i32, i32, i32, i32) {
    %c0_i32 = arith.constant 0 : i32
    %c0_i32_0 = arith.constant 0 : i32
    %c0_i32_1 = arith.constant 0 : i32
    %c0_i32_2 = arith.constant 0 : i32
    %c0_i32_3 = arith.constant 0 : i32
    return %c0_i32, %c0_i32_0, %c0_i32_1, %c0_i32_2 : i32, i32, i32, i32
  }
  func.func @transform_5(%arg0: i32) -> (i32, i32) {
    %c0_i32 = arith.constant 0 : i32
    %c0_i32_0 = arith.constant 0 : i32
    %c0_i32_1 = arith.constant 0 : i32
    return %c0_i32, %c0_i32_0 : i32, i32
  }
  func.func @transform_6(%arg0: i32) -> (i32, i32, i32, i32) {
    %c0_i32 = arith.constant 0 : i32
    %c0_i32_0 = arith.constant 0 : i32
    %c0_i32_1 = arith.constant 0 : i32
    %c0_i32_2 = arith.constant 0 : i32
    return %arg0, %c0_i32, %c0_i32_0, %c0_i32_1 : i32, i32, i32, i32
  }
}

module attributes {stable_mosaic.version = 11 : i64} {
  func.func @kernel(%arg0: i32, %arg1: memref<1x3x3x128xbf16, #tpu.memory_space<vmem>>, %arg2: memref<1x3x3x128xbf16, #tpu.memory_space<vmem>>, %arg3: memref<1x3x3x128xbf16, #tpu.memory_space<vmem>>, %arg4: memref<1x3x3x128xbf16, #tpu.memory_space<vmem>>, %arg5: memref<3x3x128x128xbf16, #tpu.memory_space<vmem>>, %arg6: memref<1x128xf32, #tpu.memory_space<vmem>>, %arg7: memref<1x2x2x128xbf16, #tpu.memory_space<vmem>>) attributes {dimension_semantics = [#tpu.dimension_semantics<parallel>], iteration_bounds = array<i64: 2>, scalar_prefetch = 0 : i64, scratch_operands = 0 : i64, tpu.core_type = #tpu.core_type<tc>, window_params = [{transform_indices = @transform_0, window_bounds = array<i64: 1, 3, 3, 128>}, {transform_indices = @transform_1, window_bounds = array<i64: 1, 3, 3, 128>}, {transform_indices = @transform_2, window_bounds = array<i64: 1, 3, 3, 128>}, {transform_indices = @transform_3, window_bounds = array<i64: 1, 3, 3, 128>}, {pipeline_mode = #tpu.pipeline_mode<synchronous>, transform_indices = @transform_4, window_bounds = array<i64: 3, 3, 128, 128>}, {pipeline_mode = #tpu.pipeline_mode<synchronous>, transform_indices = @transform_5, window_bounds = array<i64: 1, 128>}, {transform_indices = @transform_6, window_bounds = array<i64: 1, 2, 2, 128>}]} {
    %c0_i32 = arith.constant 0 : i32
    %c2_i32 = arith.constant 2 : i32
    %0 = arith.addi %c0_i32, %c2_i32 : i32
    %c1_i32 = arith.constant 1 : i32
    scf.for %arg8 = %c0_i32 to %0 step %c1_i32  : i32 {
      %cst = arith.constant 0.000000e+00 : f32
      %1 = vector.broadcast %cst : f32 to vector<2x128xf32>
      %c0_i32_1 = arith.constant 0 : i32
      %2 = arith.addi %arg8, %c0_i32_1 : i32
      %c0 = arith.constant 0 : index
      %3 = arith.index_cast %2 : i32 to index
      %c0_2 = arith.constant 0 : index
      %c0_3 = arith.constant 0 : index
      %4 = vector.load %arg1[%c0, %3, %c0_2, %c0_3] : memref<1x3x3x128xbf16, #tpu.memory_space<vmem>>, vector<1x1x3x128xbf16>
      %5 = vector.shape_cast %4 : vector<1x1x3x128xbf16> to vector<3x128xbf16>
      %6 = vector.extract_strided_slice %5 {offsets = [0, 0], sizes = [2, 128], strides = [1, 1]} : vector<3x128xbf16> to vector<2x128xbf16>
      %c0_4 = arith.constant 0 : index
      %c0_5 = arith.constant 0 : index
      %c0_6 = arith.constant 0 : index
      %c0_7 = arith.constant 0 : index
      %7 = vector.load %arg5[%c0_4, %c0_5, %c0_6, %c0_7] : memref<3x3x128x128xbf16, #tpu.memory_space<vmem>>, vector<1x1x128x128xbf16>
      %8 = vector.shape_cast %7 : vector<1x1x128x128xbf16> to vector<128x128xbf16>
      %cst_8 = arith.constant dense<0.000000e+00> : vector<2x128xf32>
      %9 = tpu.matmul %6, %8, %cst_8 {dimension_numbers = #tpu.dot_dimension_numbers<[1], [0], [0], [1], [0, 0, 1, 1], [], []>} : vector<2x128xbf16>, vector<128x128xbf16>, vector<2x128xf32> -> vector<2x128xf32>
      %10 = arith.addf %1, %9 : vector<2x128xf32>
      %c0_i32_9 = arith.constant 0 : i32
      %11 = arith.addi %arg8, %c0_i32_9 : i32
      %c0_10 = arith.constant 0 : index
      %12 = arith.index_cast %11 : i32 to index
      %c0_11 = arith.constant 0 : index
      %c0_12 = arith.constant 0 : index
      %13 = vector.load %arg2[%c0_10, %12, %c0_11, %c0_12] : memref<1x3x3x128xbf16, #tpu.memory_space<vmem>>, vector<1x1x3x128xbf16>
      %14 = vector.shape_cast %13 : vector<1x1x3x128xbf16> to vector<3x128xbf16>
      %15 = vector.extract_strided_slice %14 {offsets = [0, 0], sizes = [2, 128], strides = [1, 1]} : vector<3x128xbf16> to vector<2x128xbf16>
      %c0_13 = arith.constant 0 : index
      %c1 = arith.constant 1 : index
      %c0_14 = arith.constant 0 : index
      %c0_15 = arith.constant 0 : index
      %16 = vector.load %arg5[%c0_13, %c1, %c0_14, %c0_15] : memref<3x3x128x128xbf16, #tpu.memory_space<vmem>>, vector<1x1x128x128xbf16>
      %17 = vector.shape_cast %16 : vector<1x1x128x128xbf16> to vector<128x128xbf16>
      %cst_16 = arith.constant dense<0.000000e+00> : vector<2x128xf32>
      %18 = tpu.matmul %15, %17, %cst_16 {dimension_numbers = #tpu.dot_dimension_numbers<[1], [0], [0], [1], [0, 0, 1, 1], [], []>} : vector<2x128xbf16>, vector<128x128xbf16>, vector<2x128xf32> -> vector<2x128xf32>
      %19 = arith.addf %10, %18 : vector<2x128xf32>
      %c0_i32_17 = arith.constant 0 : i32
      %20 = arith.addi %arg8, %c0_i32_17 : i32
      %c0_18 = arith.constant 0 : index
      %21 = arith.index_cast %20 : i32 to index
      %c0_19 = arith.constant 0 : index
      %c0_20 = arith.constant 0 : index
      %22 = vector.load %arg1[%c0_18, %21, %c0_19, %c0_20] : memref<1x3x3x128xbf16, #tpu.memory_space<vmem>>, vector<1x1x3x128xbf16>
      %23 = vector.shape_cast %22 : vector<1x1x3x128xbf16> to vector<3x128xbf16>
      %24 = vector.extract_strided_slice %23 {offsets = [1, 0], sizes = [2, 128], strides = [1, 1]} : vector<3x128xbf16> to vector<2x128xbf16>
      %c0_21 = arith.constant 0 : index
      %c2 = arith.constant 2 : index
      %c0_22 = arith.constant 0 : index
      %c0_23 = arith.constant 0 : index
      %25 = vector.load %arg5[%c0_21, %c2, %c0_22, %c0_23] : memref<3x3x128x128xbf16, #tpu.memory_space<vmem>>, vector<1x1x128x128xbf16>
      %26 = vector.shape_cast %25 : vector<1x1x128x128xbf16> to vector<128x128xbf16>
      %cst_24 = arith.constant dense<0.000000e+00> : vector<2x128xf32>
      %27 = tpu.matmul %24, %26, %cst_24 {dimension_numbers = #tpu.dot_dimension_numbers<[1], [0], [0], [1], [0, 0, 1, 1], [], []>} : vector<2x128xbf16>, vector<128x128xbf16>, vector<2x128xf32> -> vector<2x128xf32>
      %28 = arith.addf %19, %27 : vector<2x128xf32>
      %c0_i32_25 = arith.constant 0 : i32
      %29 = arith.addi %arg8, %c0_i32_25 : i32
      %c0_26 = arith.constant 0 : index
      %30 = arith.index_cast %29 : i32 to index
      %c0_27 = arith.constant 0 : index
      %c0_28 = arith.constant 0 : index
      %31 = vector.load %arg3[%c0_26, %30, %c0_27, %c0_28] : memref<1x3x3x128xbf16, #tpu.memory_space<vmem>>, vector<1x1x3x128xbf16>
      %32 = vector.shape_cast %31 : vector<1x1x3x128xbf16> to vector<3x128xbf16>
      %33 = vector.extract_strided_slice %32 {offsets = [0, 0], sizes = [2, 128], strides = [1, 1]} : vector<3x128xbf16> to vector<2x128xbf16>
      %c1_29 = arith.constant 1 : index
      %c0_30 = arith.constant 0 : index
      %c0_31 = arith.constant 0 : index
      %c0_32 = arith.constant 0 : index
      %34 = vector.load %arg5[%c1_29, %c0_30, %c0_31, %c0_32] : memref<3x3x128x128xbf16, #tpu.memory_space<vmem>>, vector<1x1x128x128xbf16>
      %35 = vector.shape_cast %34 : vector<1x1x128x128xbf16> to vector<128x128xbf16>
      %cst_33 = arith.constant dense<0.000000e+00> : vector<2x128xf32>
      %36 = tpu.matmul %33, %35, %cst_33 {dimension_numbers = #tpu.dot_dimension_numbers<[1], [0], [0], [1], [0, 0, 1, 1], [], []>} : vector<2x128xbf16>, vector<128x128xbf16>, vector<2x128xf32> -> vector<2x128xf32>
      %37 = arith.addf %28, %36 : vector<2x128xf32>
      %c0_i32_34 = arith.constant 0 : i32
      %38 = arith.addi %arg8, %c0_i32_34 : i32
      %c0_35 = arith.constant 0 : index
      %39 = arith.index_cast %38 : i32 to index
      %c0_36 = arith.constant 0 : index
      %c0_37 = arith.constant 0 : index
      %40 = vector.load %arg4[%c0_35, %39, %c0_36, %c0_37] : memref<1x3x3x128xbf16, #tpu.memory_space<vmem>>, vector<1x1x3x128xbf16>
      %41 = vector.shape_cast %40 : vector<1x1x3x128xbf16> to vector<3x128xbf16>
      %42 = vector.extract_strided_slice %41 {offsets = [0, 0], sizes = [2, 128], strides = [1, 1]} : vector<3x128xbf16> to vector<2x128xbf16>
      %c1_38 = arith.constant 1 : index
      %c1_39 = arith.constant 1 : index
      %c0_40 = arith.constant 0 : index
      %c0_41 = arith.constant 0 : index
      %43 = vector.load %arg5[%c1_38, %c1_39, %c0_40, %c0_41] : memref<3x3x128x128xbf16, #tpu.memory_space<vmem>>, vector<1x1x128x128xbf16>
      %44 = vector.shape_cast %43 : vector<1x1x128x128xbf16> to vector<128x128xbf16>
      %cst_42 = arith.constant dense<0.000000e+00> : vector<2x128xf32>
      %45 = tpu.matmul %42, %44, %cst_42 {dimension_numbers = #tpu.dot_dimension_numbers<[1], [0], [0], [1], [0, 0, 1, 1], [], []>} : vector<2x128xbf16>, vector<128x128xbf16>, vector<2x128xf32> -> vector<2x128xf32>
      %46 = arith.addf %37, %45 : vector<2x128xf32>
      %c0_i32_43 = arith.constant 0 : i32
      %47 = arith.addi %arg8, %c0_i32_43 : i32
      %c0_44 = arith.constant 0 : index
      %48 = arith.index_cast %47 : i32 to index
      %c0_45 = arith.constant 0 : index
      %c0_46 = arith.constant 0 : index
      %49 = vector.load %arg3[%c0_44, %48, %c0_45, %c0_46] : memref<1x3x3x128xbf16, #tpu.memory_space<vmem>>, vector<1x1x3x128xbf16>
      %50 = vector.shape_cast %49 : vector<1x1x3x128xbf16> to vector<3x128xbf16>
      %51 = vector.extract_strided_slice %50 {offsets = [1, 0], sizes = [2, 128], strides = [1, 1]} : vector<3x128xbf16> to vector<2x128xbf16>
      %c1_47 = arith.constant 1 : index
      %c2_48 = arith.constant 2 : index
      %c0_49 = arith.constant 0 : index
      %c0_50 = arith.constant 0 : index
      %52 = vector.load %arg5[%c1_47, %c2_48, %c0_49, %c0_50] : memref<3x3x128x128xbf16, #tpu.memory_space<vmem>>, vector<1x1x128x128xbf16>
      %53 = vector.shape_cast %52 : vector<1x1x128x128xbf16> to vector<128x128xbf16>
      %cst_51 = arith.constant dense<0.000000e+00> : vector<2x128xf32>
      %54 = tpu.matmul %51, %53, %cst_51 {dimension_numbers = #tpu.dot_dimension_numbers<[1], [0], [0], [1], [0, 0, 1, 1], [], []>} : vector<2x128xbf16>, vector<128x128xbf16>, vector<2x128xf32> -> vector<2x128xf32>
      %55 = arith.addf %46, %54 : vector<2x128xf32>
      %c1_i32_52 = arith.constant 1 : i32
      %56 = arith.addi %arg8, %c1_i32_52 : i32
      %c0_53 = arith.constant 0 : index
      %57 = arith.index_cast %56 : i32 to index
      %c0_54 = arith.constant 0 : index
      %c0_55 = arith.constant 0 : index
      %58 = vector.load %arg1[%c0_53, %57, %c0_54, %c0_55] : memref<1x3x3x128xbf16, #tpu.memory_space<vmem>>, vector<1x1x3x128xbf16>
      %59 = vector.shape_cast %58 : vector<1x1x3x128xbf16> to vector<3x128xbf16>
      %60 = vector.extract_strided_slice %59 {offsets = [0, 0], sizes = [2, 128], strides = [1, 1]} : vector<3x128xbf16> to vector<2x128xbf16>
      %c2_56 = arith.constant 2 : index
      %c0_57 = arith.constant 0 : index
      %c0_58 = arith.constant 0 : index
      %c0_59 = arith.constant 0 : index
      %61 = vector.load %arg5[%c2_56, %c0_57, %c0_58, %c0_59] : memref<3x3x128x128xbf16, #tpu.memory_space<vmem>>, vector<1x1x128x128xbf16>
      %62 = vector.shape_cast %61 : vector<1x1x128x128xbf16> to vector<128x128xbf16>
      %cst_60 = arith.constant dense<0.000000e+00> : vector<2x128xf32>
      %63 = tpu.matmul %60, %62, %cst_60 {dimension_numbers = #tpu.dot_dimension_numbers<[1], [0], [0], [1], [0, 0, 1, 1], [], []>} : vector<2x128xbf16>, vector<128x128xbf16>, vector<2x128xf32> -> vector<2x128xf32>
      %64 = arith.addf %55, %63 : vector<2x128xf32>
      %c1_i32_61 = arith.constant 1 : i32
      %65 = arith.addi %arg8, %c1_i32_61 : i32
      %c0_62 = arith.constant 0 : index
      %66 = arith.index_cast %65 : i32 to index
      %c0_63 = arith.constant 0 : index
      %c0_64 = arith.constant 0 : index
      %67 = vector.load %arg2[%c0_62, %66, %c0_63, %c0_64] : memref<1x3x3x128xbf16, #tpu.memory_space<vmem>>, vector<1x1x3x128xbf16>
      %68 = vector.shape_cast %67 : vector<1x1x3x128xbf16> to vector<3x128xbf16>
      %69 = vector.extract_strided_slice %68 {offsets = [0, 0], sizes = [2, 128], strides = [1, 1]} : vector<3x128xbf16> to vector<2x128xbf16>
      %c2_65 = arith.constant 2 : index
      %c1_66 = arith.constant 1 : index
      %c0_67 = arith.constant 0 : index
      %c0_68 = arith.constant 0 : index
      %70 = vector.load %arg5[%c2_65, %c1_66, %c0_67, %c0_68] : memref<3x3x128x128xbf16, #tpu.memory_space<vmem>>, vector<1x1x128x128xbf16>
      %71 = vector.shape_cast %70 : vector<1x1x128x128xbf16> to vector<128x128xbf16>
      %cst_69 = arith.constant dense<0.000000e+00> : vector<2x128xf32>
      %72 = tpu.matmul %69, %71, %cst_69 {dimension_numbers = #tpu.dot_dimension_numbers<[1], [0], [0], [1], [0, 0, 1, 1], [], []>} : vector<2x128xbf16>, vector<128x128xbf16>, vector<2x128xf32> -> vector<2x128xf32>
      %73 = arith.addf %64, %72 : vector<2x128xf32>
      %c1_i32_70 = arith.constant 1 : i32
      %74 = arith.addi %arg8, %c1_i32_70 : i32
      %c0_71 = arith.constant 0 : index
      %75 = arith.index_cast %74 : i32 to index
      %c0_72 = arith.constant 0 : index
      %c0_73 = arith.constant 0 : index
      %76 = vector.load %arg1[%c0_71, %75, %c0_72, %c0_73] : memref<1x3x3x128xbf16, #tpu.memory_space<vmem>>, vector<1x1x3x128xbf16>
      %77 = vector.shape_cast %76 : vector<1x1x3x128xbf16> to vector<3x128xbf16>
      %78 = vector.extract_strided_slice %77 {offsets = [1, 0], sizes = [2, 128], strides = [1, 1]} : vector<3x128xbf16> to vector<2x128xbf16>
      %c2_74 = arith.constant 2 : index
      %c2_75 = arith.constant 2 : index
      %c0_76 = arith.constant 0 : index
      %c0_77 = arith.constant 0 : index
      %79 = vector.load %arg5[%c2_74, %c2_75, %c0_76, %c0_77] : memref<3x3x128x128xbf16, #tpu.memory_space<vmem>>, vector<1x1x128x128xbf16>
      %80 = vector.shape_cast %79 : vector<1x1x128x128xbf16> to vector<128x128xbf16>
      %cst_78 = arith.constant dense<0.000000e+00> : vector<2x128xf32>
      %81 = tpu.matmul %78, %80, %cst_78 {dimension_numbers = #tpu.dot_dimension_numbers<[1], [0], [0], [1], [0, 0, 1, 1], [], []>} : vector<2x128xbf16>, vector<128x128xbf16>, vector<2x128xf32> -> vector<2x128xf32>
      %82 = arith.addf %73, %81 : vector<2x128xf32>
      %c0_79 = arith.constant 0 : index
      %c0_80 = arith.constant 0 : index
      %83 = vector.load %arg6[%c0_79, %c0_80] : memref<1x128xf32, #tpu.memory_space<vmem>>, vector<1x128xf32>
      %84 = vector.broadcast %83 : vector<1x128xf32> to vector<2x128xf32>
      %85 = arith.addf %82, %84 : vector<2x128xf32>
      %cst_81 = arith.constant 0.000000e+00 : f32
      %86 = vector.broadcast %cst_81 : f32 to vector<2x128xf32>
      %87 = arith.maximumf %85, %86 : vector<2x128xf32>
      %88 = arith.truncf %87 : vector<2x128xf32> to vector<2x128xbf16>
      %c0_82 = arith.constant 0 : index
      %89 = arith.index_cast %arg8 : i32 to index
      %c0_83 = arith.constant 0 : index
      %c0_84 = arith.constant 0 : index
      %90 = vector.load %arg7[%c0_82, %89, %c0_83, %c0_84] : memref<1x2x2x128xbf16, #tpu.memory_space<vmem>>, vector<1x1x2x128xbf16>
      %91 = vector.shape_cast %90 : vector<1x1x2x128xbf16> to vector<2x128xbf16>
      %92 = vector.shape_cast %88 : vector<2x128xbf16> to vector<1x1x2x128xbf16>
      tpu.vector_store %arg7[%c0_82, %89, %c0_83, %c0_84], %92 {strides = array<i32>} : memref<1x2x2x128xbf16, #tpu.memory_space<vmem>>, vector<1x1x2x128xbf16>,
    }
    %c2_i32_0 = arith.constant 2 : i32
    return
  }
  func.func @transform_0(%arg0: i32) -> (i32, i32, i32, i32) {
    %c0_i32 = arith.constant 0 : i32
    %c0_i32_0 = arith.constant 0 : i32
    %c0_i32_1 = arith.constant 0 : i32
    %c0_i32_2 = arith.constant 0 : i32
    return %arg0, %c0_i32, %c0_i32_0, %c0_i32_1 : i32, i32, i32, i32
  }
  func.func @transform_1(%arg0: i32) -> (i32, i32, i32, i32) {
    %c0_i32 = arith.constant 0 : i32
    %c0_i32_0 = arith.constant 0 : i32
    %c0_i32_1 = arith.constant 0 : i32
    %c0_i32_2 = arith.constant 0 : i32
    return %arg0, %c0_i32, %c0_i32_0, %c0_i32_1 : i32, i32, i32, i32
  }
  func.func @transform_2(%arg0: i32) -> (i32, i32, i32, i32) {
    %c0_i32 = arith.constant 0 : i32
    %c0_i32_0 = arith.constant 0 : i32
    %c0_i32_1 = arith.constant 0 : i32
    %c0_i32_2 = arith.constant 0 : i32
    return %arg0, %c0_i32, %c0_i32_0, %c0_i32_1 : i32, i32, i32, i32
  }
  func.func @transform_3(%arg0: i32) -> (i32, i32, i32, i32) {
    %c0_i32 = arith.constant 0 : i32
    %c0_i32_0 = arith.constant 0 : i32
    %c0_i32_1 = arith.constant 0 : i32
    %c0_i32_2 = arith.constant 0 : i32
    return %arg0, %c0_i32, %c0_i32_0, %c0_i32_1 : i32, i32, i32, i32
  }
  func.func @transform_4(%arg0: i32) -> (i32, i32, i32, i32) {
    %c0_i32 = arith.constant 0 : i32
    %c0_i32_0 = arith.constant 0 : i32
    %c0_i32_1 = arith.constant 0 : i32
    %c0_i32_2 = arith.constant 0 : i32
    %c0_i32_3 = arith.constant 0 : i32
    return %c0_i32, %c0_i32_0, %c0_i32_1, %c0_i32_2 : i32, i32, i32, i32
  }
  func.func @transform_5(%arg0: i32) -> (i32, i32) {
    %c0_i32 = arith.constant 0 : i32
    %c0_i32_0 = arith.constant 0 : i32
    %c0_i32_1 = arith.constant 0 : i32
    return %c0_i32, %c0_i32_0 : i32, i32
  }
  func.func @transform_6(%arg0: i32) -> (i32, i32, i32, i32) {
    %c0_i32 = arith.constant 0 : i32
    %c0_i32_0 = arith.constant 0 : i32
    %c0_i32_1 = arith.constant 0 : i32
    %c0_i32_2 = arith.constant 0 : i32
    return %arg0, %c0_i32, %c0_i32_0, %c0_i32_1 : i32, i32, i32, i32
  }
}

module attributes {stable_mosaic.version = 11 : i64} {
  func.func @kernel(%arg0: i32, %arg1: memref<1x2x2x128xbf16, #tpu.memory_space<vmem>>, %arg2: memref<1x2x2x128xbf16, #tpu.memory_space<vmem>>, %arg3: memref<1x2x2x128xbf16, #tpu.memory_space<vmem>>, %arg4: memref<1x2x2x128xbf16, #tpu.memory_space<vmem>>, %arg5: memref<3x3x128x128xbf16, #tpu.memory_space<vmem>>, %arg6: memref<1x128xf32, #tpu.memory_space<vmem>>, %arg7: memref<1x1x1x128xbf16, #tpu.memory_space<vmem>>) attributes {dimension_semantics = [#tpu.dimension_semantics<parallel>], iteration_bounds = array<i64: 2>, scalar_prefetch = 0 : i64, scratch_operands = 0 : i64, tpu.core_type = #tpu.core_type<tc>, window_params = [{transform_indices = @transform_0, window_bounds = array<i64: 1, 2, 2, 128>}, {transform_indices = @transform_1, window_bounds = array<i64: 1, 2, 2, 128>}, {transform_indices = @transform_2, window_bounds = array<i64: 1, 2, 2, 128>}, {transform_indices = @transform_3, window_bounds = array<i64: 1, 2, 2, 128>}, {pipeline_mode = #tpu.pipeline_mode<synchronous>, transform_indices = @transform_4, window_bounds = array<i64: 3, 3, 128, 128>}, {pipeline_mode = #tpu.pipeline_mode<synchronous>, transform_indices = @transform_5, window_bounds = array<i64: 1, 128>}, {transform_indices = @transform_6, window_bounds = array<i64: 1, 1, 1, 128>}]} {
    %c0_i32 = arith.constant 0 : i32
    %cst = arith.constant 0.000000e+00 : f32
    %0 = vector.broadcast %cst : f32 to vector<1x128xf32>
    %c0_i32_0 = arith.constant 0 : i32
    %1 = arith.addi %c0_i32, %c0_i32_0 : i32
    %c0 = arith.constant 0 : index
    %2 = arith.index_cast %1 : i32 to index
    %c0_1 = arith.constant 0 : index
    %c0_2 = arith.constant 0 : index
    %3 = vector.load %arg1[%c0, %2, %c0_1, %c0_2] : memref<1x2x2x128xbf16, #tpu.memory_space<vmem>>, vector<1x1x2x128xbf16>
    %4 = vector.shape_cast %3 : vector<1x1x2x128xbf16> to vector<2x128xbf16>
    %5 = vector.extract_strided_slice %4 {offsets = [0, 0], sizes = [1, 128], strides = [1, 1]} : vector<2x128xbf16> to vector<1x128xbf16>
    %c0_3 = arith.constant 0 : index
    %c0_4 = arith.constant 0 : index
    %c0_5 = arith.constant 0 : index
    %c0_6 = arith.constant 0 : index
    %6 = vector.load %arg5[%c0_3, %c0_4, %c0_5, %c0_6] : memref<3x3x128x128xbf16, #tpu.memory_space<vmem>>, vector<1x1x128x128xbf16>
    %7 = vector.shape_cast %6 : vector<1x1x128x128xbf16> to vector<128x128xbf16>
    %cst_7 = arith.constant dense<0.000000e+00> : vector<1x128xf32>
    %8 = tpu.matmul %5, %7, %cst_7 {dimension_numbers = #tpu.dot_dimension_numbers<[1], [0], [0], [1], [0, 0, 1, 1], [], []>} : vector<1x128xbf16>, vector<128x128xbf16>, vector<1x128xf32> -> vector<1x128xf32>
    %9 = arith.addf %0, %8 : vector<1x128xf32>
    %c0_i32_8 = arith.constant 0 : i32
    %10 = arith.addi %c0_i32, %c0_i32_8 : i32
    %c0_9 = arith.constant 0 : index
    %11 = arith.index_cast %10 : i32 to index
    %c0_10 = arith.constant 0 : index
    %c0_11 = arith.constant 0 : index
    %12 = vector.load %arg2[%c0_9, %11, %c0_10, %c0_11] : memref<1x2x2x128xbf16, #tpu.memory_space<vmem>>, vector<1x1x2x128xbf16>
    %13 = vector.shape_cast %12 : vector<1x1x2x128xbf16> to vector<2x128xbf16>
    %14 = vector.extract_strided_slice %13 {offsets = [0, 0], sizes = [1, 128], strides = [1, 1]} : vector<2x128xbf16> to vector<1x128xbf16>
    %c0_12 = arith.constant 0 : index
    %c1 = arith.constant 1 : index
    %c0_13 = arith.constant 0 : index
    %c0_14 = arith.constant 0 : index
    %15 = vector.load %arg5[%c0_12, %c1, %c0_13, %c0_14] : memref<3x3x128x128xbf16, #tpu.memory_space<vmem>>, vector<1x1x128x128xbf16>
    %16 = vector.shape_cast %15 : vector<1x1x128x128xbf16> to vector<128x128xbf16>
    %cst_15 = arith.constant dense<0.000000e+00> : vector<1x128xf32>
    %17 = tpu.matmul %14, %16, %cst_15 {dimension_numbers = #tpu.dot_dimension_numbers<[1], [0], [0], [1], [0, 0, 1, 1], [], []>} : vector<1x128xbf16>, vector<128x128xbf16>, vector<1x128xf32> -> vector<1x128xf32>
    %18 = arith.addf %9, %17 : vector<1x128xf32>
    %c0_i32_16 = arith.constant 0 : i32
    %19 = arith.addi %c0_i32, %c0_i32_16 : i32
    %c0_17 = arith.constant 0 : index
    %20 = arith.index_cast %19 : i32 to index
    %c0_18 = arith.constant 0 : index
    %c0_19 = arith.constant 0 : index
    %21 = vector.load %arg1[%c0_17, %20, %c0_18, %c0_19] : memref<1x2x2x128xbf16, #tpu.memory_space<vmem>>, vector<1x1x2x128xbf16>
    %22 = vector.shape_cast %21 : vector<1x1x2x128xbf16> to vector<2x128xbf16>
    %23 = vector.extract_strided_slice %22 {offsets = [1, 0], sizes = [1, 128], strides = [1, 1]} : vector<2x128xbf16> to vector<1x128xbf16>
    %c0_20 = arith.constant 0 : index
    %c2 = arith.constant 2 : index
    %c0_21 = arith.constant 0 : index
    %c0_22 = arith.constant 0 : index
    %24 = vector.load %arg5[%c0_20, %c2, %c0_21, %c0_22] : memref<3x3x128x128xbf16, #tpu.memory_space<vmem>>, vector<1x1x128x128xbf16>
    %25 = vector.shape_cast %24 : vector<1x1x128x128xbf16> to vector<128x128xbf16>
    %cst_23 = arith.constant dense<0.000000e+00> : vector<1x128xf32>
    %26 = tpu.matmul %23, %25, %cst_23 {dimension_numbers = #tpu.dot_dimension_numbers<[1], [0], [0], [1], [0, 0, 1, 1], [], []>} : vector<1x128xbf16>, vector<128x128xbf16>, vector<1x128xf32> -> vector<1x128xf32>
    %27 = arith.addf %18, %26 : vector<1x128xf32>
    %c0_i32_24 = arith.constant 0 : i32
    %28 = arith.addi %c0_i32, %c0_i32_24 : i32
    %c0_25 = arith.constant 0 : index
    %29 = arith.index_cast %28 : i32 to index
    %c0_26 = arith.constant 0 : index
    %c0_27 = arith.constant 0 : index
    %30 = vector.load %arg3[%c0_25, %29, %c0_26, %c0_27] : memref<1x2x2x128xbf16, #tpu.memory_space<vmem>>, vector<1x1x2x128xbf16>
    %31 = vector.shape_cast %30 : vector<1x1x2x128xbf16> to vector<2x128xbf16>
    %32 = vector.extract_strided_slice %31 {offsets = [0, 0], sizes = [1, 128], strides = [1, 1]} : vector<2x128xbf16> to vector<1x128xbf16>
    %c1_28 = arith.constant 1 : index
    %c0_29 = arith.constant 0 : index
    %c0_30 = arith.constant 0 : index
    %c0_31 = arith.constant 0 : index
    %33 = vector.load %arg5[%c1_28, %c0_29, %c0_30, %c0_31] : memref<3x3x128x128xbf16, #tpu.memory_space<vmem>>, vector<1x1x128x128xbf16>
    %34 = vector.shape_cast %33 : vector<1x1x128x128xbf16> to vector<128x128xbf16>
    %cst_32 = arith.constant dense<0.000000e+00> : vector<1x128xf32>
    %35 = tpu.matmul %32, %34, %cst_32 {dimension_numbers = #tpu.dot_dimension_numbers<[1], [0], [0], [1], [0, 0, 1, 1], [], []>} : vector<1x128xbf16>, vector<128x128xbf16>, vector<1x128xf32> -> vector<1x128xf32>
    %36 = arith.addf %27, %35 : vector<1x128xf32>
    %c0_i32_33 = arith.constant 0 : i32
    %37 = arith.addi %c0_i32, %c0_i32_33 : i32
    %c0_34 = arith.constant 0 : index
    %38 = arith.index_cast %37 : i32 to index
    %c0_35 = arith.constant 0 : index
    %c0_36 = arith.constant 0 : index
    %39 = vector.load %arg4[%c0_34, %38, %c0_35, %c0_36] : memref<1x2x2x128xbf16, #tpu.memory_space<vmem>>, vector<1x1x2x128xbf16>
    %40 = vector.shape_cast %39 : vector<1x1x2x128xbf16> to vector<2x128xbf16>
    %41 = vector.extract_strided_slice %40 {offsets = [0, 0], sizes = [1, 128], strides = [1, 1]} : vector<2x128xbf16> to vector<1x128xbf16>
    %c1_37 = arith.constant 1 : index
    %c1_38 = arith.constant 1 : index
    %c0_39 = arith.constant 0 : index
    %c0_40 = arith.constant 0 : index
    %42 = vector.load %arg5[%c1_37, %c1_38, %c0_39, %c0_40] : memref<3x3x128x128xbf16, #tpu.memory_space<vmem>>, vector<1x1x128x128xbf16>
    %43 = vector.shape_cast %42 : vector<1x1x128x128xbf16> to vector<128x128xbf16>
    %cst_41 = arith.constant dense<0.000000e+00> : vector<1x128xf32>
    %44 = tpu.matmul %41, %43, %cst_41 {dimension_numbers = #tpu.dot_dimension_numbers<[1], [0], [0], [1], [0, 0, 1, 1], [], []>} : vector<1x128xbf16>, vector<128x128xbf16>, vector<1x128xf32> -> vector<1x128xf32>
    %45 = arith.addf %36, %44 : vector<1x128xf32>
    %c0_i32_42 = arith.constant 0 : i32
    %46 = arith.addi %c0_i32, %c0_i32_42 : i32
    %c0_43 = arith.constant 0 : index
    %47 = arith.index_cast %46 : i32 to index
    %c0_44 = arith.constant 0 : index
    %c0_45 = arith.constant 0 : index
    %48 = vector.load %arg3[%c0_43, %47, %c0_44, %c0_45] : memref<1x2x2x128xbf16, #tpu.memory_space<vmem>>, vector<1x1x2x128xbf16>
    %49 = vector.shape_cast %48 : vector<1x1x2x128xbf16> to vector<2x128xbf16>
    %50 = vector.extract_strided_slice %49 {offsets = [1, 0], sizes = [1, 128], strides = [1, 1]} : vector<2x128xbf16> to vector<1x128xbf16>
    %c1_46 = arith.constant 1 : index
    %c2_47 = arith.constant 2 : index
    %c0_48 = arith.constant 0 : index
    %c0_49 = arith.constant 0 : index
    %51 = vector.load %arg5[%c1_46, %c2_47, %c0_48, %c0_49] : memref<3x3x128x128xbf16, #tpu.memory_space<vmem>>, vector<1x1x128x128xbf16>
    %52 = vector.shape_cast %51 : vector<1x1x128x128xbf16> to vector<128x128xbf16>
    %cst_50 = arith.constant dense<0.000000e+00> : vector<1x128xf32>
    %53 = tpu.matmul %50, %52, %cst_50 {dimension_numbers = #tpu.dot_dimension_numbers<[1], [0], [0], [1], [0, 0, 1, 1], [], []>} : vector<1x128xbf16>, vector<128x128xbf16>, vector<1x128xf32> -> vector<1x128xf32>
    %54 = arith.addf %45, %53 : vector<1x128xf32>
    %c1_i32 = arith.constant 1 : i32
    %55 = arith.addi %c0_i32, %c1_i32 : i32
    %c0_51 = arith.constant 0 : index
    %56 = arith.index_cast %55 : i32 to index
    %c0_52 = arith.constant 0 : index
    %c0_53 = arith.constant 0 : index
    %57 = vector.load %arg1[%c0_51, %56, %c0_52, %c0_53] : memref<1x2x2x128xbf16, #tpu.memory_space<vmem>>, vector<1x1x2x128xbf16>
    %58 = vector.shape_cast %57 : vector<1x1x2x128xbf16> to vector<2x128xbf16>
    %59 = vector.extract_strided_slice %58 {offsets = [0, 0], sizes = [1, 128], strides = [1, 1]} : vector<2x128xbf16> to vector<1x128xbf16>
    %c2_54 = arith.constant 2 : index
    %c0_55 = arith.constant 0 : index
    %c0_56 = arith.constant 0 : index
    %c0_57 = arith.constant 0 : index
    %60 = vector.load %arg5[%c2_54, %c0_55, %c0_56, %c0_57] : memref<3x3x128x128xbf16, #tpu.memory_space<vmem>>, vector<1x1x128x128xbf16>
    %61 = vector.shape_cast %60 : vector<1x1x128x128xbf16> to vector<128x128xbf16>
    %cst_58 = arith.constant dense<0.000000e+00> : vector<1x128xf32>
    %62 = tpu.matmul %59, %61, %cst_58 {dimension_numbers = #tpu.dot_dimension_numbers<[1], [0], [0], [1], [0, 0, 1, 1], [], []>} : vector<1x128xbf16>, vector<128x128xbf16>, vector<1x128xf32> -> vector<1x128xf32>
    %63 = arith.addf %54, %62 : vector<1x128xf32>
    %c1_i32_59 = arith.constant 1 : i32
    %64 = arith.addi %c0_i32, %c1_i32_59 : i32
    %c0_60 = arith.constant 0 : index
    %65 = arith.index_cast %64 : i32 to index
    %c0_61 = arith.constant 0 : index
    %c0_62 = arith.constant 0 : index
    %66 = vector.load %arg2[%c0_60, %65, %c0_61, %c0_62] : memref<1x2x2x128xbf16, #tpu.memory_space<vmem>>, vector<1x1x2x128xbf16>
    %67 = vector.shape_cast %66 : vector<1x1x2x128xbf16> to vector<2x128xbf16>
    %68 = vector.extract_strided_slice %67 {offsets = [0, 0], sizes = [1, 128], strides = [1, 1]} : vector<2x128xbf16> to vector<1x128xbf16>
    %c2_63 = arith.constant 2 : index
    %c1_64 = arith.constant 1 : index
    %c0_65 = arith.constant 0 : index
    %c0_66 = arith.constant 0 : index
    %69 = vector.load %arg5[%c2_63, %c1_64, %c0_65, %c0_66] : memref<3x3x128x128xbf16, #tpu.memory_space<vmem>>, vector<1x1x128x128xbf16>
    %70 = vector.shape_cast %69 : vector<1x1x128x128xbf16> to vector<128x128xbf16>
    %cst_67 = arith.constant dense<0.000000e+00> : vector<1x128xf32>
    %71 = tpu.matmul %68, %70, %cst_67 {dimension_numbers = #tpu.dot_dimension_numbers<[1], [0], [0], [1], [0, 0, 1, 1], [], []>} : vector<1x128xbf16>, vector<128x128xbf16>, vector<1x128xf32> -> vector<1x128xf32>
    %72 = arith.addf %63, %71 : vector<1x128xf32>
    %c1_i32_68 = arith.constant 1 : i32
    %73 = arith.addi %c0_i32, %c1_i32_68 : i32
    %c0_69 = arith.constant 0 : index
    %74 = arith.index_cast %73 : i32 to index
    %c0_70 = arith.constant 0 : index
    %c0_71 = arith.constant 0 : index
    %75 = vector.load %arg1[%c0_69, %74, %c0_70, %c0_71] : memref<1x2x2x128xbf16, #tpu.memory_space<vmem>>, vector<1x1x2x128xbf16>
    %76 = vector.shape_cast %75 : vector<1x1x2x128xbf16> to vector<2x128xbf16>
    %77 = vector.extract_strided_slice %76 {offsets = [1, 0], sizes = [1, 128], strides = [1, 1]} : vector<2x128xbf16> to vector<1x128xbf16>
    %c2_72 = arith.constant 2 : index
    %c2_73 = arith.constant 2 : index
    %c0_74 = arith.constant 0 : index
    %c0_75 = arith.constant 0 : index
    %78 = vector.load %arg5[%c2_72, %c2_73, %c0_74, %c0_75] : memref<3x3x128x128xbf16, #tpu.memory_space<vmem>>, vector<1x1x128x128xbf16>
    %79 = vector.shape_cast %78 : vector<1x1x128x128xbf16> to vector<128x128xbf16>
    %cst_76 = arith.constant dense<0.000000e+00> : vector<1x128xf32>
    %80 = tpu.matmul %77, %79, %cst_76 {dimension_numbers = #tpu.dot_dimension_numbers<[1], [0], [0], [1], [0, 0, 1, 1], [], []>} : vector<1x128xbf16>, vector<128x128xbf16>, vector<1x128xf32> -> vector<1x128xf32>
    %81 = arith.addf %72, %80 : vector<1x128xf32>
    %c0_77 = arith.constant 0 : index
    %c0_78 = arith.constant 0 : index
    %82 = vector.load %arg6[%c0_77, %c0_78] : memref<1x128xf32, #tpu.memory_space<vmem>>, vector<1x128xf32>
    %83 = arith.addf %81, %82 : vector<1x128xf32>
    %cst_79 = arith.constant 0.000000e+00 : f32
    %84 = vector.broadcast %cst_79 : f32 to vector<1x128xf32>
    %85 = arith.maximumf %83, %84 : vector<1x128xf32>
    %86 = arith.truncf %85 : vector<1x128xf32> to vector<1x128xbf16>
    %c0_80 = arith.constant 0 : index
    %87 = arith.index_cast %c0_i32 : i32 to index
    %c0_81 = arith.constant 0 : index
    %c0_82 = arith.constant 0 : index
    %88 = vector.load %arg7[%c0_80, %87, %c0_81, %c0_82] : memref<1x1x1x128xbf16, #tpu.memory_space<vmem>>, vector<1x1x1x128xbf16>
    %89 = vector.shape_cast %88 : vector<1x1x1x128xbf16> to vector<1x128xbf16>
    %90 = vector.shape_cast %86 : vector<1x128xbf16> to vector<1x1x1x128xbf16>
    tpu.vector_store %arg7[%c0_80, %87, %c0_81, %c0_82], %90 {strides = array<i32>} : memref<1x1x1x128xbf16, #tpu.memory_space<vmem>>, vector<1x1x1x128xbf16>,
    %c1_i32_83 = arith.constant 1 : i32
    return
  }
  func.func @transform_0(%arg0: i32) -> (i32, i32, i32, i32) {
    %c0_i32 = arith.constant 0 : i32
    %c0_i32_0 = arith.constant 0 : i32
    %c0_i32_1 = arith.constant 0 : i32
    %c0_i32_2 = arith.constant 0 : i32
    return %arg0, %c0_i32, %c0_i32_0, %c0_i32_1 : i32, i32, i32, i32
  }
  func.func @transform_1(%arg0: i32) -> (i32, i32, i32, i32) {
    %c0_i32 = arith.constant 0 : i32
    %c0_i32_0 = arith.constant 0 : i32
    %c0_i32_1 = arith.constant 0 : i32
    %c0_i32_2 = arith.constant 0 : i32
    return %arg0, %c0_i32, %c0_i32_0, %c0_i32_1 : i32, i32, i32, i32
  }
  func.func @transform_2(%arg0: i32) -> (i32, i32, i32, i32) {
    %c0_i32 = arith.constant 0 : i32
    %c0_i32_0 = arith.constant 0 : i32
    %c0_i32_1 = arith.constant 0 : i32
    %c0_i32_2 = arith.constant 0 : i32
    return %arg0, %c0_i32, %c0_i32_0, %c0_i32_1 : i32, i32, i32, i32
  }
  func.func @transform_3(%arg0: i32) -> (i32, i32, i32, i32) {
    %c0_i32 = arith.constant 0 : i32
    %c0_i32_0 = arith.constant 0 : i32
    %c0_i32_1 = arith.constant 0 : i32
    %c0_i32_2 = arith.constant 0 : i32
    return %arg0, %c0_i32, %c0_i32_0, %c0_i32_1 : i32, i32, i32, i32
  }
  func.func @transform_4(%arg0: i32) -> (i32, i32, i32, i32) {
    %c0_i32 = arith.constant 0 : i32
    %c0_i32_0 = arith.constant 0 : i32
    %c0_i32_1 = arith.constant 0 : i32
    %c0_i32_2 = arith.constant 0 : i32
    %c0_i32_3 = arith.constant 0 : i32
    return %c0_i32, %c0_i32_0, %c0_i32_1, %c0_i32_2 : i32, i32, i32, i32
  }
  func.func @transform_5(%arg0: i32) -> (i32, i32) {
    %c0_i32 = arith.constant 0 : i32
    %c0_i32_0 = arith.constant 0 : i32
    %c0_i32_1 = arith.constant 0 : i32
    return %c0_i32, %c0_i32_0 : i32, i32
  }
  func.func @transform_6(%arg0: i32) -> (i32, i32, i32, i32) {
    %c0_i32 = arith.constant 0 : i32
    %c0_i32_0 = arith.constant 0 : i32
    %c0_i32_1 = arith.constant 0 : i32
    %c0_i32_2 = arith.constant 0 : i32
    return %arg0, %c0_i32, %c0_i32_0, %c0_i32_1 : i32, i32, i32, i32
  }
}

module attributes {stable_mosaic.version = 11 : i64} {
  func.func @kernel(%arg0: i32, %arg1: memref<1x2x2x128xbf16, #tpu.memory_space<vmem>>, %arg2: memref<1x2x1x128xbf16, #tpu.memory_space<vmem>>, %arg3: memref<1x1x2x128xbf16, #tpu.memory_space<vmem>>, %arg4: memref<1x1x1x128xbf16, #tpu.memory_space<vmem>>, %arg5: memref<3x3x128x128xbf16, #tpu.memory_space<vmem>>, %arg6: memref<1x128xf32, #tpu.memory_space<vmem>>, %arg7: memref<1x1x1x128xbf16, #tpu.memory_space<vmem>>) attributes {dimension_semantics = [#tpu.dimension_semantics<parallel>], iteration_bounds = array<i64: 2>, scalar_prefetch = 0 : i64, scratch_operands = 0 : i64, tpu.core_type = #tpu.core_type<tc>, window_params = [{transform_indices = @transform_0, window_bounds = array<i64: 1, 2, 2, 128>}, {transform_indices = @transform_1, window_bounds = array<i64: 1, 2, 1, 128>}, {transform_indices = @transform_2, window_bounds = array<i64: 1, 1, 2, 128>}, {transform_indices = @transform_3, window_bounds = array<i64: 1, 1, 1, 128>}, {pipeline_mode = #tpu.pipeline_mode<synchronous>, transform_indices = @transform_4, window_bounds = array<i64: 3, 3, 128, 128>}, {pipeline_mode = #tpu.pipeline_mode<synchronous>, transform_indices = @transform_5, window_bounds = array<i64: 1, 128>}, {transform_indices = @transform_6, window_bounds = array<i64: 1, 1, 1, 128>}]} {
    %c0_i32 = arith.constant 0 : i32
    %cst = arith.constant 0.000000e+00 : f32
    %0 = vector.broadcast %cst : f32 to vector<1x128xf32>
    %c0_i32_0 = arith.constant 0 : i32
    %1 = arith.addi %c0_i32, %c0_i32_0 : i32
    %c0 = arith.constant 0 : index
    %2 = arith.index_cast %1 : i32 to index
    %c0_1 = arith.constant 0 : index
    %c0_2 = arith.constant 0 : index
    %3 = vector.load %arg1[%c0, %2, %c0_1, %c0_2] : memref<1x2x2x128xbf16, #tpu.memory_space<vmem>>, vector<1x1x2x128xbf16>
    %4 = vector.shape_cast %3 : vector<1x1x2x128xbf16> to vector<2x128xbf16>
    %5 = vector.extract_strided_slice %4 {offsets = [0, 0], sizes = [1, 128], strides = [1, 1]} : vector<2x128xbf16> to vector<1x128xbf16>
    %c0_3 = arith.constant 0 : index
    %c0_4 = arith.constant 0 : index
    %c0_5 = arith.constant 0 : index
    %c0_6 = arith.constant 0 : index
    %6 = vector.load %arg5[%c0_3, %c0_4, %c0_5, %c0_6] : memref<3x3x128x128xbf16, #tpu.memory_space<vmem>>, vector<1x1x128x128xbf16>
    %7 = vector.shape_cast %6 : vector<1x1x128x128xbf16> to vector<128x128xbf16>
    %cst_7 = arith.constant dense<0.000000e+00> : vector<1x128xf32>
    %8 = tpu.matmul %5, %7, %cst_7 {dimension_numbers = #tpu.dot_dimension_numbers<[1], [0], [0], [1], [0, 0, 1, 1], [], []>} : vector<1x128xbf16>, vector<128x128xbf16>, vector<1x128xf32> -> vector<1x128xf32>
    %9 = arith.addf %0, %8 : vector<1x128xf32>
    %c0_i32_8 = arith.constant 0 : i32
    %10 = arith.addi %c0_i32, %c0_i32_8 : i32
    %c0_9 = arith.constant 0 : index
    %11 = arith.index_cast %10 : i32 to index
    %c0_10 = arith.constant 0 : index
    %c0_11 = arith.constant 0 : index
    %12 = vector.load %arg2[%c0_9, %11, %c0_10, %c0_11] : memref<1x2x1x128xbf16, #tpu.memory_space<vmem>>, vector<1x1x1x128xbf16>
    %13 = vector.shape_cast %12 : vector<1x1x1x128xbf16> to vector<1x128xbf16>
    %c0_12 = arith.constant 0 : index
    %c1 = arith.constant 1 : index
    %c0_13 = arith.constant 0 : index
    %c0_14 = arith.constant 0 : index
    %14 = vector.load %arg5[%c0_12, %c1, %c0_13, %c0_14] : memref<3x3x128x128xbf16, #tpu.memory_space<vmem>>, vector<1x1x128x128xbf16>
    %15 = vector.shape_cast %14 : vector<1x1x128x128xbf16> to vector<128x128xbf16>
    %cst_15 = arith.constant dense<0.000000e+00> : vector<1x128xf32>
    %16 = tpu.matmul %13, %15, %cst_15 {dimension_numbers = #tpu.dot_dimension_numbers<[1], [0], [0], [1], [0, 0, 1, 1], [], []>} : vector<1x128xbf16>, vector<128x128xbf16>, vector<1x128xf32> -> vector<1x128xf32>
    %17 = arith.addf %9, %16 : vector<1x128xf32>
    %c0_i32_16 = arith.constant 0 : i32
    %18 = arith.addi %c0_i32, %c0_i32_16 : i32
    %c0_17 = arith.constant 0 : index
    %19 = arith.index_cast %18 : i32 to index
    %c0_18 = arith.constant 0 : index
    %c0_19 = arith.constant 0 : index
    %20 = vector.load %arg1[%c0_17, %19, %c0_18, %c0_19] : memref<1x2x2x128xbf16, #tpu.memory_space<vmem>>, vector<1x1x2x128xbf16>
    %21 = vector.shape_cast %20 : vector<1x1x2x128xbf16> to vector<2x128xbf16>
    %22 = vector.extract_strided_slice %21 {offsets = [1, 0], sizes = [1, 128], strides = [1, 1]} : vector<2x128xbf16> to vector<1x128xbf16>
    %c0_20 = arith.constant 0 : index
    %c2 = arith.constant 2 : index
    %c0_21 = arith.constant 0 : index
    %c0_22 = arith.constant 0 : index
    %23 = vector.load %arg5[%c0_20, %c2, %c0_21, %c0_22] : memref<3x3x128x128xbf16, #tpu.memory_space<vmem>>, vector<1x1x128x128xbf16>
    %24 = vector.shape_cast %23 : vector<1x1x128x128xbf16> to vector<128x128xbf16>
    %cst_23 = arith.constant dense<0.000000e+00> : vector<1x128xf32>
    %25 = tpu.matmul %22, %24, %cst_23 {dimension_numbers = #tpu.dot_dimension_numbers<[1], [0], [0], [1], [0, 0, 1, 1], [], []>} : vector<1x128xbf16>, vector<128x128xbf16>, vector<1x128xf32> -> vector<1x128xf32>
    %26 = arith.addf %17, %25 : vector<1x128xf32>
    %c0_i32_24 = arith.constant 0 : i32
    %27 = arith.addi %c0_i32, %c0_i32_24 : i32
    %c0_25 = arith.constant 0 : index
    %28 = arith.index_cast %27 : i32 to index
    %c0_26 = arith.constant 0 : index
    %c0_27 = arith.constant 0 : index
    %29 = vector.load %arg3[%c0_25, %28, %c0_26, %c0_27] : memref<1x1x2x128xbf16, #tpu.memory_space<vmem>>, vector<1x1x2x128xbf16>
    %30 = vector.shape_cast %29 : vector<1x1x2x128xbf16> to vector<2x128xbf16>
    %31 = vector.extract_strided_slice %30 {offsets = [0, 0], sizes = [1, 128], strides = [1, 1]} : vector<2x128xbf16> to vector<1x128xbf16>
    %c1_28 = arith.constant 1 : index
    %c0_29 = arith.constant 0 : index
    %c0_30 = arith.constant 0 : index
    %c0_31 = arith.constant 0 : index
    %32 = vector.load %arg5[%c1_28, %c0_29, %c0_30, %c0_31] : memref<3x3x128x128xbf16, #tpu.memory_space<vmem>>, vector<1x1x128x128xbf16>
    %33 = vector.shape_cast %32 : vector<1x1x128x128xbf16> to vector<128x128xbf16>
    %cst_32 = arith.constant dense<0.000000e+00> : vector<1x128xf32>
    %34 = tpu.matmul %31, %33, %cst_32 {dimension_numbers = #tpu.dot_dimension_numbers<[1], [0], [0], [1], [0, 0, 1, 1], [], []>} : vector<1x128xbf16>, vector<128x128xbf16>, vector<1x128xf32> -> vector<1x128xf32>
    %35 = arith.addf %26, %34 : vector<1x128xf32>
    %c0_i32_33 = arith.constant 0 : i32
    %36 = arith.addi %c0_i32, %c0_i32_33 : i32
    %c0_34 = arith.constant 0 : index
    %37 = arith.index_cast %36 : i32 to index
    %c0_35 = arith.constant 0 : index
    %c0_36 = arith.constant 0 : index
    %38 = vector.load %arg4[%c0_34, %37, %c0_35, %c0_36] : memref<1x1x1x128xbf16, #tpu.memory_space<vmem>>, vector<1x1x1x128xbf16>
    %39 = vector.shape_cast %38 : vector<1x1x1x128xbf16> to vector<1x128xbf16>
    %c1_37 = arith.constant 1 : index
    %c1_38 = arith.constant 1 : index
    %c0_39 = arith.constant 0 : index
    %c0_40 = arith.constant 0 : index
    %40 = vector.load %arg5[%c1_37, %c1_38, %c0_39, %c0_40] : memref<3x3x128x128xbf16, #tpu.memory_space<vmem>>, vector<1x1x128x128xbf16>
    %41 = vector.shape_cast %40 : vector<1x1x128x128xbf16> to vector<128x128xbf16>
    %cst_41 = arith.constant dense<0.000000e+00> : vector<1x128xf32>
    %42 = tpu.matmul %39, %41, %cst_41 {dimension_numbers = #tpu.dot_dimension_numbers<[1], [0], [0], [1], [0, 0, 1, 1], [], []>} : vector<1x128xbf16>, vector<128x128xbf16>, vector<1x128xf32> -> vector<1x128xf32>
    %43 = arith.addf %35, %42 : vector<1x128xf32>
    %c0_i32_42 = arith.constant 0 : i32
    %44 = arith.addi %c0_i32, %c0_i32_42 : i32
    %c0_43 = arith.constant 0 : index
    %45 = arith.index_cast %44 : i32 to index
    %c0_44 = arith.constant 0 : index
    %c0_45 = arith.constant 0 : index
    %46 = vector.load %arg3[%c0_43, %45, %c0_44, %c0_45] : memref<1x1x2x128xbf16, #tpu.memory_space<vmem>>, vector<1x1x2x128xbf16>
    %47 = vector.shape_cast %46 : vector<1x1x2x128xbf16> to vector<2x128xbf16>
    %48 = vector.extract_strided_slice %47 {offsets = [1, 0], sizes = [1, 128], strides = [1, 1]} : vector<2x128xbf16> to vector<1x128xbf16>
    %c1_46 = arith.constant 1 : index
    %c2_47 = arith.constant 2 : index
    %c0_48 = arith.constant 0 : index
    %c0_49 = arith.constant 0 : index
    %49 = vector.load %arg5[%c1_46, %c2_47, %c0_48, %c0_49] : memref<3x3x128x128xbf16, #tpu.memory_space<vmem>>, vector<1x1x128x128xbf16>
    %50 = vector.shape_cast %49 : vector<1x1x128x128xbf16> to vector<128x128xbf16>
    %cst_50 = arith.constant dense<0.000000e+00> : vector<1x128xf32>
    %51 = tpu.matmul %48, %50, %cst_50 {dimension_numbers = #tpu.dot_dimension_numbers<[1], [0], [0], [1], [0, 0, 1, 1], [], []>} : vector<1x128xbf16>, vector<128x128xbf16>, vector<1x128xf32> -> vector<1x128xf32>
    %52 = arith.addf %43, %51 : vector<1x128xf32>
    %c1_i32 = arith.constant 1 : i32
    %53 = arith.addi %c0_i32, %c1_i32 : i32
    %c0_51 = arith.constant 0 : index
    %54 = arith.index_cast %53 : i32 to index
    %c0_52 = arith.constant 0 : index
    %c0_53 = arith.constant 0 : index
    %55 = vector.load %arg1[%c0_51, %54, %c0_52, %c0_53] : memref<1x2x2x128xbf16, #tpu.memory_space<vmem>>, vector<1x1x2x128xbf16>
    %56 = vector.shape_cast %55 : vector<1x1x2x128xbf16> to vector<2x128xbf16>
    %57 = vector.extract_strided_slice %56 {offsets = [0, 0], sizes = [1, 128], strides = [1, 1]} : vector<2x128xbf16> to vector<1x128xbf16>
    %c2_54 = arith.constant 2 : index
    %c0_55 = arith.constant 0 : index
    %c0_56 = arith.constant 0 : index
    %c0_57 = arith.constant 0 : index
    %58 = vector.load %arg5[%c2_54, %c0_55, %c0_56, %c0_57] : memref<3x3x128x128xbf16, #tpu.memory_space<vmem>>, vector<1x1x128x128xbf16>
    %59 = vector.shape_cast %58 : vector<1x1x128x128xbf16> to vector<128x128xbf16>
    %cst_58 = arith.constant dense<0.000000e+00> : vector<1x128xf32>
    %60 = tpu.matmul %57, %59, %cst_58 {dimension_numbers = #tpu.dot_dimension_numbers<[1], [0], [0], [1], [0, 0, 1, 1], [], []>} : vector<1x128xbf16>, vector<128x128xbf16>, vector<1x128xf32> -> vector<1x128xf32>
    %61 = arith.addf %52, %60 : vector<1x128xf32>
    %c1_i32_59 = arith.constant 1 : i32
    %62 = arith.addi %c0_i32, %c1_i32_59 : i32
    %c0_60 = arith.constant 0 : index
    %63 = arith.index_cast %62 : i32 to index
    %c0_61 = arith.constant 0 : index
    %c0_62 = arith.constant 0 : index
    %64 = vector.load %arg2[%c0_60, %63, %c0_61, %c0_62] : memref<1x2x1x128xbf16, #tpu.memory_space<vmem>>, vector<1x1x1x128xbf16>
    %65 = vector.shape_cast %64 : vector<1x1x1x128xbf16> to vector<1x128xbf16>
    %c2_63 = arith.constant 2 : index
    %c1_64 = arith.constant 1 : index
    %c0_65 = arith.constant 0 : index
    %c0_66 = arith.constant 0 : index
    %66 = vector.load %arg5[%c2_63, %c1_64, %c0_65, %c0_66] : memref<3x3x128x128xbf16, #tpu.memory_space<vmem>>, vector<1x1x128x128xbf16>
    %67 = vector.shape_cast %66 : vector<1x1x128x128xbf16> to vector<128x128xbf16>
    %cst_67 = arith.constant dense<0.000000e+00> : vector<1x128xf32>
    %68 = tpu.matmul %65, %67, %cst_67 {dimension_numbers = #tpu.dot_dimension_numbers<[1], [0], [0], [1], [0, 0, 1, 1], [], []>} : vector<1x128xbf16>, vector<128x128xbf16>, vector<1x128xf32> -> vector<1x128xf32>
    %69 = arith.addf %61, %68 : vector<1x128xf32>
    %c1_i32_68 = arith.constant 1 : i32
    %70 = arith.addi %c0_i32, %c1_i32_68 : i32
    %c0_69 = arith.constant 0 : index
    %71 = arith.index_cast %70 : i32 to index
    %c0_70 = arith.constant 0 : index
    %c0_71 = arith.constant 0 : index
    %72 = vector.load %arg1[%c0_69, %71, %c0_70, %c0_71] : memref<1x2x2x128xbf16, #tpu.memory_space<vmem>>, vector<1x1x2x128xbf16>
    %73 = vector.shape_cast %72 : vector<1x1x2x128xbf16> to vector<2x128xbf16>
    %74 = vector.extract_strided_slice %73 {offsets = [1, 0], sizes = [1, 128], strides = [1, 1]} : vector<2x128xbf16> to vector<1x128xbf16>
    %c2_72 = arith.constant 2 : index
    %c2_73 = arith.constant 2 : index
    %c0_74 = arith.constant 0 : index
    %c0_75 = arith.constant 0 : index
    %75 = vector.load %arg5[%c2_72, %c2_73, %c0_74, %c0_75] : memref<3x3x128x128xbf16, #tpu.memory_space<vmem>>, vector<1x1x128x128xbf16>
    %76 = vector.shape_cast %75 : vector<1x1x128x128xbf16> to vector<128x128xbf16>
    %cst_76 = arith.constant dense<0.000000e+00> : vector<1x128xf32>
    %77 = tpu.matmul %74, %76, %cst_76 {dimension_numbers = #tpu.dot_dimension_numbers<[1], [0], [0], [1], [0, 0, 1, 1], [], []>} : vector<1x128xbf16>, vector<128x128xbf16>, vector<1x128xf32> -> vector<1x128xf32>
    %78 = arith.addf %69, %77 : vector<1x128xf32>
    %c0_77 = arith.constant 0 : index
    %c0_78 = arith.constant 0 : index
    %79 = vector.load %arg6[%c0_77, %c0_78] : memref<1x128xf32, #tpu.memory_space<vmem>>, vector<1x128xf32>
    %80 = arith.addf %78, %79 : vector<1x128xf32>
    %cst_79 = arith.constant 0.000000e+00 : f32
    %81 = vector.broadcast %cst_79 : f32 to vector<1x128xf32>
    %82 = arith.maximumf %80, %81 : vector<1x128xf32>
    %83 = arith.truncf %82 : vector<1x128xf32> to vector<1x128xbf16>
    %c0_80 = arith.constant 0 : index
    %84 = arith.index_cast %c0_i32 : i32 to index
    %c0_81 = arith.constant 0 : index
    %c0_82 = arith.constant 0 : index
    %85 = vector.load %arg7[%c0_80, %84, %c0_81, %c0_82] : memref<1x1x1x128xbf16, #tpu.memory_space<vmem>>, vector<1x1x1x128xbf16>
    %86 = vector.shape_cast %85 : vector<1x1x1x128xbf16> to vector<1x128xbf16>
    %87 = vector.shape_cast %83 : vector<1x128xbf16> to vector<1x1x1x128xbf16>
    tpu.vector_store %arg7[%c0_80, %84, %c0_81, %c0_82], %87 {strides = array<i32>} : memref<1x1x1x128xbf16, #tpu.memory_space<vmem>>, vector<1x1x1x128xbf16>,
    %c1_i32_83 = arith.constant 1 : i32
    return
  }
  func.func @transform_0(%arg0: i32) -> (i32, i32, i32, i32) {
    %c0_i32 = arith.constant 0 : i32
    %c0_i32_0 = arith.constant 0 : i32
    %c0_i32_1 = arith.constant 0 : i32
    %c0_i32_2 = arith.constant 0 : i32
    return %arg0, %c0_i32, %c0_i32_0, %c0_i32_1 : i32, i32, i32, i32
  }
  func.func @transform_1(%arg0: i32) -> (i32, i32, i32, i32) {
    %c0_i32 = arith.constant 0 : i32
    %c0_i32_0 = arith.constant 0 : i32
    %c0_i32_1 = arith.constant 0 : i32
    %c0_i32_2 = arith.constant 0 : i32
    return %arg0, %c0_i32, %c0_i32_0, %c0_i32_1 : i32, i32, i32, i32
  }
  func.func @transform_2(%arg0: i32) -> (i32, i32, i32, i32) {
    %c0_i32 = arith.constant 0 : i32
    %c0_i32_0 = arith.constant 0 : i32
    %c0_i32_1 = arith.constant 0 : i32
    %c0_i32_2 = arith.constant 0 : i32
    return %arg0, %c0_i32, %c0_i32_0, %c0_i32_1 : i32, i32, i32, i32
  }
  func.func @transform_3(%arg0: i32) -> (i32, i32, i32, i32) {
    %c0_i32 = arith.constant 0 : i32
    %c0_i32_0 = arith.constant 0 : i32
    %c0_i32_1 = arith.constant 0 : i32
    %c0_i32_2 = arith.constant 0 : i32
    return %arg0, %c0_i32, %c0_i32_0, %c0_i32_1 : i32, i32, i32, i32
  }
  func.func @transform_4(%arg0: i32) -> (i32, i32, i32, i32) {
    %c0_i32 = arith.constant 0 : i32
    %c0_i32_0 = arith.constant 0 : i32
    %c0_i32_1 = arith.constant 0 : i32
    %c0_i32_2 = arith.constant 0 : i32
    %c0_i32_3 = arith.constant 0 : i32
    return %c0_i32, %c0_i32_0, %c0_i32_1, %c0_i32_2 : i32, i32, i32, i32
  }
  func.func @transform_5(%arg0: i32) -> (i32, i32) {
    %c0_i32 = arith.constant 0 : i32
    %c0_i32_0 = arith.constant 0 : i32
    %c0_i32_1 = arith.constant 0 : i32
    return %c0_i32, %c0_i32_0 : i32, i32
  }
  func.func @transform_6(%arg0: i32) -> (i32, i32, i32, i32) {
    %c0_i32 = arith.constant 0 : i32
    %c0_i32_0 = arith.constant 0 : i32
    %c0_i32_1 = arith.constant 0 : i32
    %c0_i32_2 = arith.constant 0 : i32
    return %arg0, %c0_i32, %c0_i32_0, %c0_i32_1 : i32, i32, i32, i32
  }
}

module attributes {stable_mosaic.version = 11 : i64} {
  func.func @kernel(%arg0: i32, %arg1: memref<1x3x3x128xbf16, #tpu.memory_space<vmem>>, %arg2: memref<1x3x3x128xbf16, #tpu.memory_space<vmem>>, %arg3: memref<3x3x128x128xbf16, #tpu.memory_space<vmem>>, %arg4: memref<3x3x128x128xbf16, #tpu.memory_space<vmem>>, %arg5: memref<1x128xf32, #tpu.memory_space<vmem>>, %arg6: memref<1x1x1x128xbf16, #tpu.memory_space<vmem>>) attributes {dimension_semantics = [#tpu.dimension_semantics<parallel>], iteration_bounds = array<i64: 2>, scalar_prefetch = 0 : i64, scratch_operands = 0 : i64, tpu.core_type = #tpu.core_type<tc>, window_params = [{transform_indices = @transform_0, window_bounds = array<i64: 1, 3, 3, 128>}, {transform_indices = @transform_1, window_bounds = array<i64: 1, 3, 3, 128>}, {pipeline_mode = #tpu.pipeline_mode<synchronous>, transform_indices = @transform_2, window_bounds = array<i64: 3, 3, 128, 128>}, {pipeline_mode = #tpu.pipeline_mode<synchronous>, transform_indices = @transform_3, window_bounds = array<i64: 3, 3, 128, 128>}, {pipeline_mode = #tpu.pipeline_mode<synchronous>, transform_indices = @transform_4, window_bounds = array<i64: 1, 128>}, {transform_indices = @transform_5, window_bounds = array<i64: 1, 1, 1, 128>}]} {
    %c0_i32 = arith.constant 0 : i32
    %cst = arith.constant 0.000000e+00 : f32
    %0 = vector.broadcast %cst : f32 to vector<1x128xf32>
    %c0_i32_0 = arith.constant 0 : i32
    %1 = arith.addi %c0_i32, %c0_i32_0 : i32
    %c0 = arith.constant 0 : index
    %2 = arith.index_cast %1 : i32 to index
    %c0_1 = arith.constant 0 : index
    %c0_2 = arith.constant 0 : index
    %3 = vector.load %arg1[%c0, %2, %c0_1, %c0_2] : memref<1x3x3x128xbf16, #tpu.memory_space<vmem>>, vector<1x1x3x128xbf16>
    %4 = vector.shape_cast %3 : vector<1x1x3x128xbf16> to vector<3x128xbf16>
    %5 = vector.extract_strided_slice %4 {offsets = [0, 0], sizes = [1, 128], strides = [1, 1]} : vector<3x128xbf16> to vector<1x128xbf16>
    %c0_3 = arith.constant 0 : index
    %c0_4 = arith.constant 0 : index
    %c0_5 = arith.constant 0 : index
    %c0_6 = arith.constant 0 : index
    %6 = vector.load %arg3[%c0_3, %c0_4, %c0_5, %c0_6] : memref<3x3x128x128xbf16, #tpu.memory_space<vmem>>, vector<1x1x128x128xbf16>
    %7 = vector.shape_cast %6 : vector<1x1x128x128xbf16> to vector<128x128xbf16>
    %cst_7 = arith.constant dense<0.000000e+00> : vector<1x128xf32>
    %8 = tpu.matmul %5, %7, %cst_7 {dimension_numbers = #tpu.dot_dimension_numbers<[1], [0], [0], [1], [0, 0, 1, 1], [], []>} : vector<1x128xbf16>, vector<128x128xbf16>, vector<1x128xf32> -> vector<1x128xf32>
    %9 = arith.addf %0, %8 : vector<1x128xf32>
    %c0_i32_8 = arith.constant 0 : i32
    %10 = arith.addi %c0_i32, %c0_i32_8 : i32
    %c0_9 = arith.constant 0 : index
    %11 = arith.index_cast %10 : i32 to index
    %c0_10 = arith.constant 0 : index
    %c0_11 = arith.constant 0 : index
    %12 = vector.load %arg1[%c0_9, %11, %c0_10, %c0_11] : memref<1x3x3x128xbf16, #tpu.memory_space<vmem>>, vector<1x1x3x128xbf16>
    %13 = vector.shape_cast %12 : vector<1x1x3x128xbf16> to vector<3x128xbf16>
    %14 = vector.extract_strided_slice %13 {offsets = [1, 0], sizes = [1, 128], strides = [1, 1]} : vector<3x128xbf16> to vector<1x128xbf16>
    %c0_12 = arith.constant 0 : index
    %c1 = arith.constant 1 : index
    %c0_13 = arith.constant 0 : index
    %c0_14 = arith.constant 0 : index
    %15 = vector.load %arg3[%c0_12, %c1, %c0_13, %c0_14] : memref<3x3x128x128xbf16, #tpu.memory_space<vmem>>, vector<1x1x128x128xbf16>
    %16 = vector.shape_cast %15 : vector<1x1x128x128xbf16> to vector<128x128xbf16>
    %cst_15 = arith.constant dense<0.000000e+00> : vector<1x128xf32>
    %17 = tpu.matmul %14, %16, %cst_15 {dimension_numbers = #tpu.dot_dimension_numbers<[1], [0], [0], [1], [0, 0, 1, 1], [], []>} : vector<1x128xbf16>, vector<128x128xbf16>, vector<1x128xf32> -> vector<1x128xf32>
    %18 = arith.addf %9, %17 : vector<1x128xf32>
    %c0_i32_16 = arith.constant 0 : i32
    %19 = arith.addi %c0_i32, %c0_i32_16 : i32
    %c0_17 = arith.constant 0 : index
    %20 = arith.index_cast %19 : i32 to index
    %c0_18 = arith.constant 0 : index
    %c0_19 = arith.constant 0 : index
    %21 = vector.load %arg1[%c0_17, %20, %c0_18, %c0_19] : memref<1x3x3x128xbf16, #tpu.memory_space<vmem>>, vector<1x1x3x128xbf16>
    %22 = vector.shape_cast %21 : vector<1x1x3x128xbf16> to vector<3x128xbf16>
    %23 = vector.extract_strided_slice %22 {offsets = [2, 0], sizes = [1, 128], strides = [1, 1]} : vector<3x128xbf16> to vector<1x128xbf16>
    %c0_20 = arith.constant 0 : index
    %c2 = arith.constant 2 : index
    %c0_21 = arith.constant 0 : index
    %c0_22 = arith.constant 0 : index
    %24 = vector.load %arg3[%c0_20, %c2, %c0_21, %c0_22] : memref<3x3x128x128xbf16, #tpu.memory_space<vmem>>, vector<1x1x128x128xbf16>
    %25 = vector.shape_cast %24 : vector<1x1x128x128xbf16> to vector<128x128xbf16>
    %cst_23 = arith.constant dense<0.000000e+00> : vector<1x128xf32>
    %26 = tpu.matmul %23, %25, %cst_23 {dimension_numbers = #tpu.dot_dimension_numbers<[1], [0], [0], [1], [0, 0, 1, 1], [], []>} : vector<1x128xbf16>, vector<128x128xbf16>, vector<1x128xf32> -> vector<1x128xf32>
    %27 = arith.addf %18, %26 : vector<1x128xf32>
    %c1_i32 = arith.constant 1 : i32
    %28 = arith.addi %c0_i32, %c1_i32 : i32
    %c0_24 = arith.constant 0 : index
    %29 = arith.index_cast %28 : i32 to index
    %c0_25 = arith.constant 0 : index
    %c0_26 = arith.constant 0 : index
    %30 = vector.load %arg1[%c0_24, %29, %c0_25, %c0_26] : memref<1x3x3x128xbf16, #tpu.memory_space<vmem>>, vector<1x1x3x128xbf16>
    %31 = vector.shape_cast %30 : vector<1x1x3x128xbf16> to vector<3x128xbf16>
    %32 = vector.extract_strided_slice %31 {offsets = [0, 0], sizes = [1, 128], strides = [1, 1]} : vector<3x128xbf16> to vector<1x128xbf16>
    %c1_27 = arith.constant 1 : index
    %c0_28 = arith.constant 0 : index
    %c0_29 = arith.constant 0 : index
    %c0_30 = arith.constant 0 : index
    %33 = vector.load %arg3[%c1_27, %c0_28, %c0_29, %c0_30] : memref<3x3x128x128xbf16, #tpu.memory_space<vmem>>, vector<1x1x128x128xbf16>
    %34 = vector.shape_cast %33 : vector<1x1x128x128xbf16> to vector<128x128xbf16>
    %cst_31 = arith.constant dense<0.000000e+00> : vector<1x128xf32>
    %35 = tpu.matmul %32, %34, %cst_31 {dimension_numbers = #tpu.dot_dimension_numbers<[1], [0], [0], [1], [0, 0, 1, 1], [], []>} : vector<1x128xbf16>, vector<128x128xbf16>, vector<1x128xf32> -> vector<1x128xf32>
    %36 = arith.addf %27, %35 : vector<1x128xf32>
    %c1_i32_32 = arith.constant 1 : i32
    %37 = arith.addi %c0_i32, %c1_i32_32 : i32
    %c0_33 = arith.constant 0 : index
    %38 = arith.index_cast %37 : i32 to index
    %c0_34 = arith.constant 0 : index
    %c0_35 = arith.constant 0 : index
    %39 = vector.load %arg1[%c0_33, %38, %c0_34, %c0_35] : memref<1x3x3x128xbf16, #tpu.memory_space<vmem>>, vector<1x1x3x128xbf16>
    %40 = vector.shape_cast %39 : vector<1x1x3x128xbf16> to vector<3x128xbf16>
    %41 = vector.extract_strided_slice %40 {offsets = [1, 0], sizes = [1, 128], strides = [1, 1]} : vector<3x128xbf16> to vector<1x128xbf16>
    %c1_36 = arith.constant 1 : index
    %c1_37 = arith.constant 1 : index
    %c0_38 = arith.constant 0 : index
    %c0_39 = arith.constant 0 : index
    %42 = vector.load %arg3[%c1_36, %c1_37, %c0_38, %c0_39] : memref<3x3x128x128xbf16, #tpu.memory_space<vmem>>, vector<1x1x128x128xbf16>
    %43 = vector.shape_cast %42 : vector<1x1x128x128xbf16> to vector<128x128xbf16>
    %cst_40 = arith.constant dense<0.000000e+00> : vector<1x128xf32>
    %44 = tpu.matmul %41, %43, %cst_40 {dimension_numbers = #tpu.dot_dimension_numbers<[1], [0], [0], [1], [0, 0, 1, 1], [], []>} : vector<1x128xbf16>, vector<128x128xbf16>, vector<1x128xf32> -> vector<1x128xf32>
    %45 = arith.addf %36, %44 : vector<1x128xf32>
    %c1_i32_41 = arith.constant 1 : i32
    %46 = arith.addi %c0_i32, %c1_i32_41 : i32
    %c0_42 = arith.constant 0 : index
    %47 = arith.index_cast %46 : i32 to index
    %c0_43 = arith.constant 0 : index
    %c0_44 = arith.constant 0 : index
    %48 = vector.load %arg1[%c0_42, %47, %c0_43, %c0_44] : memref<1x3x3x128xbf16, #tpu.memory_space<vmem>>, vector<1x1x3x128xbf16>
    %49 = vector.shape_cast %48 : vector<1x1x3x128xbf16> to vector<3x128xbf16>
    %50 = vector.extract_strided_slice %49 {offsets = [2, 0], sizes = [1, 128], strides = [1, 1]} : vector<3x128xbf16> to vector<1x128xbf16>
    %c1_45 = arith.constant 1 : index
    %c2_46 = arith.constant 2 : index
    %c0_47 = arith.constant 0 : index
    %c0_48 = arith.constant 0 : index
    %51 = vector.load %arg3[%c1_45, %c2_46, %c0_47, %c0_48] : memref<3x3x128x128xbf16, #tpu.memory_space<vmem>>, vector<1x1x128x128xbf16>
    %52 = vector.shape_cast %51 : vector<1x1x128x128xbf16> to vector<128x128xbf16>
    %cst_49 = arith.constant dense<0.000000e+00> : vector<1x128xf32>
    %53 = tpu.matmul %50, %52, %cst_49 {dimension_numbers = #tpu.dot_dimension_numbers<[1], [0], [0], [1], [0, 0, 1, 1], [], []>} : vector<1x128xbf16>, vector<128x128xbf16>, vector<1x128xf32> -> vector<1x128xf32>
    %54 = arith.addf %45, %53 : vector<1x128xf32>
    %c2_i32 = arith.constant 2 : i32
    %55 = arith.addi %c0_i32, %c2_i32 : i32
    %c0_50 = arith.constant 0 : index
    %56 = arith.index_cast %55 : i32 to index
    %c0_51 = arith.constant 0 : index
    %c0_52 = arith.constant 0 : index
    %57 = vector.load %arg1[%c0_50, %56, %c0_51, %c0_52] : memref<1x3x3x128xbf16, #tpu.memory_space<vmem>>, vector<1x1x3x128xbf16>
    %58 = vector.shape_cast %57 : vector<1x1x3x128xbf16> to vector<3x128xbf16>
    %59 = vector.extract_strided_slice %58 {offsets = [0, 0], sizes = [1, 128], strides = [1, 1]} : vector<3x128xbf16> to vector<1x128xbf16>
    %c2_53 = arith.constant 2 : index
    %c0_54 = arith.constant 0 : index
    %c0_55 = arith.constant 0 : index
    %c0_56 = arith.constant 0 : index
    %60 = vector.load %arg3[%c2_53, %c0_54, %c0_55, %c0_56] : memref<3x3x128x128xbf16, #tpu.memory_space<vmem>>, vector<1x1x128x128xbf16>
    %61 = vector.shape_cast %60 : vector<1x1x128x128xbf16> to vector<128x128xbf16>
    %cst_57 = arith.constant dense<0.000000e+00> : vector<1x128xf32>
    %62 = tpu.matmul %59, %61, %cst_57 {dimension_numbers = #tpu.dot_dimension_numbers<[1], [0], [0], [1], [0, 0, 1, 1], [], []>} : vector<1x128xbf16>, vector<128x128xbf16>, vector<1x128xf32> -> vector<1x128xf32>
    %63 = arith.addf %54, %62 : vector<1x128xf32>
    %c2_i32_58 = arith.constant 2 : i32
    %64 = arith.addi %c0_i32, %c2_i32_58 : i32
    %c0_59 = arith.constant 0 : index
    %65 = arith.index_cast %64 : i32 to index
    %c0_60 = arith.constant 0 : index
    %c0_61 = arith.constant 0 : index
    %66 = vector.load %arg1[%c0_59, %65, %c0_60, %c0_61] : memref<1x3x3x128xbf16, #tpu.memory_space<vmem>>, vector<1x1x3x128xbf16>
    %67 = vector.shape_cast %66 : vector<1x1x3x128xbf16> to vector<3x128xbf16>
    %68 = vector.extract_strided_slice %67 {offsets = [1, 0], sizes = [1, 128], strides = [1, 1]} : vector<3x128xbf16> to vector<1x128xbf16>
    %c2_62 = arith.constant 2 : index
    %c1_63 = arith.constant 1 : index
    %c0_64 = arith.constant 0 : index
    %c0_65 = arith.constant 0 : index
    %69 = vector.load %arg3[%c2_62, %c1_63, %c0_64, %c0_65] : memref<3x3x128x128xbf16, #tpu.memory_space<vmem>>, vector<1x1x128x128xbf16>
    %70 = vector.shape_cast %69 : vector<1x1x128x128xbf16> to vector<128x128xbf16>
    %cst_66 = arith.constant dense<0.000000e+00> : vector<1x128xf32>
    %71 = tpu.matmul %68, %70, %cst_66 {dimension_numbers = #tpu.dot_dimension_numbers<[1], [0], [0], [1], [0, 0, 1, 1], [], []>} : vector<1x128xbf16>, vector<128x128xbf16>, vector<1x128xf32> -> vector<1x128xf32>
    %72 = arith.addf %63, %71 : vector<1x128xf32>
    %c2_i32_67 = arith.constant 2 : i32
    %73 = arith.addi %c0_i32, %c2_i32_67 : i32
    %c0_68 = arith.constant 0 : index
    %74 = arith.index_cast %73 : i32 to index
    %c0_69 = arith.constant 0 : index
    %c0_70 = arith.constant 0 : index
    %75 = vector.load %arg1[%c0_68, %74, %c0_69, %c0_70] : memref<1x3x3x128xbf16, #tpu.memory_space<vmem>>, vector<1x1x3x128xbf16>
    %76 = vector.shape_cast %75 : vector<1x1x3x128xbf16> to vector<3x128xbf16>
    %77 = vector.extract_strided_slice %76 {offsets = [2, 0], sizes = [1, 128], strides = [1, 1]} : vector<3x128xbf16> to vector<1x128xbf16>
    %c2_71 = arith.constant 2 : index
    %c2_72 = arith.constant 2 : index
    %c0_73 = arith.constant 0 : index
    %c0_74 = arith.constant 0 : index
    %78 = vector.load %arg3[%c2_71, %c2_72, %c0_73, %c0_74] : memref<3x3x128x128xbf16, #tpu.memory_space<vmem>>, vector<1x1x128x128xbf16>
    %79 = vector.shape_cast %78 : vector<1x1x128x128xbf16> to vector<128x128xbf16>
    %cst_75 = arith.constant dense<0.000000e+00> : vector<1x128xf32>
    %80 = tpu.matmul %77, %79, %cst_75 {dimension_numbers = #tpu.dot_dimension_numbers<[1], [0], [0], [1], [0, 0, 1, 1], [], []>} : vector<1x128xbf16>, vector<128x128xbf16>, vector<1x128xf32> -> vector<1x128xf32>
    %81 = arith.addf %72, %80 : vector<1x128xf32>
    %c0_i32_76 = arith.constant 0 : i32
    %82 = arith.addi %c0_i32, %c0_i32_76 : i32
    %c0_77 = arith.constant 0 : index
    %83 = arith.index_cast %82 : i32 to index
    %c0_78 = arith.constant 0 : index
    %c0_79 = arith.constant 0 : index
    %84 = vector.load %arg2[%c0_77, %83, %c0_78, %c0_79] : memref<1x3x3x128xbf16, #tpu.memory_space<vmem>>, vector<1x1x3x128xbf16>
    %85 = vector.shape_cast %84 : vector<1x1x3x128xbf16> to vector<3x128xbf16>
    %86 = vector.extract_strided_slice %85 {offsets = [0, 0], sizes = [1, 128], strides = [1, 1]} : vector<3x128xbf16> to vector<1x128xbf16>
    %c0_80 = arith.constant 0 : index
    %c0_81 = arith.constant 0 : index
    %c0_82 = arith.constant 0 : index
    %c0_83 = arith.constant 0 : index
    %87 = vector.load %arg4[%c0_80, %c0_81, %c0_82, %c0_83] : memref<3x3x128x128xbf16, #tpu.memory_space<vmem>>, vector<1x1x128x128xbf16>
    %88 = vector.shape_cast %87 : vector<1x1x128x128xbf16> to vector<128x128xbf16>
    %cst_84 = arith.constant dense<0.000000e+00> : vector<1x128xf32>
    %89 = tpu.matmul %86, %88, %cst_84 {dimension_numbers = #tpu.dot_dimension_numbers<[1], [0], [0], [1], [0, 0, 1, 1], [], []>} : vector<1x128xbf16>, vector<128x128xbf16>, vector<1x128xf32> -> vector<1x128xf32>
    %90 = arith.addf %81, %89 : vector<1x128xf32>
    %c0_i32_85 = arith.constant 0 : i32
    %91 = arith.addi %c0_i32, %c0_i32_85 : i32
    %c0_86 = arith.constant 0 : index
    %92 = arith.index_cast %91 : i32 to index
    %c0_87 = arith.constant 0 : index
    %c0_88 = arith.constant 0 : index
    %93 = vector.load %arg2[%c0_86, %92, %c0_87, %c0_88] : memref<1x3x3x128xbf16, #tpu.memory_space<vmem>>, vector<1x1x3x128xbf16>
    %94 = vector.shape_cast %93 : vector<1x1x3x128xbf16> to vector<3x128xbf16>
    %95 = vector.extract_strided_slice %94 {offsets = [1, 0], sizes = [1, 128], strides = [1, 1]} : vector<3x128xbf16> to vector<1x128xbf16>
    %c0_89 = arith.constant 0 : index
    %c1_90 = arith.constant 1 : index
    %c0_91 = arith.constant 0 : index
    %c0_92 = arith.constant 0 : index
    %96 = vector.load %arg4[%c0_89, %c1_90, %c0_91, %c0_92] : memref<3x3x128x128xbf16, #tpu.memory_space<vmem>>, vector<1x1x128x128xbf16>
    %97 = vector.shape_cast %96 : vector<1x1x128x128xbf16> to vector<128x128xbf16>
    %cst_93 = arith.constant dense<0.000000e+00> : vector<1x128xf32>
    %98 = tpu.matmul %95, %97, %cst_93 {dimension_numbers = #tpu.dot_dimension_numbers<[1], [0], [0], [1], [0, 0, 1, 1], [], []>} : vector<1x128xbf16>, vector<128x128xbf16>, vector<1x128xf32> -> vector<1x128xf32>
    %99 = arith.addf %90, %98 : vector<1x128xf32>
    %c0_i32_94 = arith.constant 0 : i32
    %100 = arith.addi %c0_i32, %c0_i32_94 : i32
    %c0_95 = arith.constant 0 : index
    %101 = arith.index_cast %100 : i32 to index
    %c0_96 = arith.constant 0 : index
    %c0_97 = arith.constant 0 : index
    %102 = vector.load %arg2[%c0_95, %101, %c0_96, %c0_97] : memref<1x3x3x128xbf16, #tpu.memory_space<vmem>>, vector<1x1x3x128xbf16>
    %103 = vector.shape_cast %102 : vector<1x1x3x128xbf16> to vector<3x128xbf16>
    %104 = vector.extract_strided_slice %103 {offsets = [2, 0], sizes = [1, 128], strides = [1, 1]} : vector<3x128xbf16> to vector<1x128xbf16>
    %c0_98 = arith.constant 0 : index
    %c2_99 = arith.constant 2 : index
    %c0_100 = arith.constant 0 : index
    %c0_101 = arith.constant 0 : index
    %105 = vector.load %arg4[%c0_98, %c2_99, %c0_100, %c0_101] : memref<3x3x128x128xbf16, #tpu.memory_space<vmem>>, vector<1x1x128x128xbf16>
    %106 = vector.shape_cast %105 : vector<1x1x128x128xbf16> to vector<128x128xbf16>
    %cst_102 = arith.constant dense<0.000000e+00> : vector<1x128xf32>
    %107 = tpu.matmul %104, %106, %cst_102 {dimension_numbers = #tpu.dot_dimension_numbers<[1], [0], [0], [1], [0, 0, 1, 1], [], []>} : vector<1x128xbf16>, vector<128x128xbf16>, vector<1x128xf32> -> vector<1x128xf32>
    %108 = arith.addf %99, %107 : vector<1x128xf32>
    %c1_i32_103 = arith.constant 1 : i32
    %109 = arith.addi %c0_i32, %c1_i32_103 : i32
    %c0_104 = arith.constant 0 : index
    %110 = arith.index_cast %109 : i32 to index
    %c0_105 = arith.constant 0 : index
    %c0_106 = arith.constant 0 : index
    %111 = vector.load %arg2[%c0_104, %110, %c0_105, %c0_106] : memref<1x3x3x128xbf16, #tpu.memory_space<vmem>>, vector<1x1x3x128xbf16>
    %112 = vector.shape_cast %111 : vector<1x1x3x128xbf16> to vector<3x128xbf16>
    %113 = vector.extract_strided_slice %112 {offsets = [0, 0], sizes = [1, 128], strides = [1, 1]} : vector<3x128xbf16> to vector<1x128xbf16>
    %c1_107 = arith.constant 1 : index
    %c0_108 = arith.constant 0 : index
    %c0_109 = arith.constant 0 : index
    %c0_110 = arith.constant 0 : index
    %114 = vector.load %arg4[%c1_107, %c0_108, %c0_109, %c0_110] : memref<3x3x128x128xbf16, #tpu.memory_space<vmem>>, vector<1x1x128x128xbf16>
    %115 = vector.shape_cast %114 : vector<1x1x128x128xbf16> to vector<128x128xbf16>
    %cst_111 = arith.constant dense<0.000000e+00> : vector<1x128xf32>
    %116 = tpu.matmul %113, %115, %cst_111 {dimension_numbers = #tpu.dot_dimension_numbers<[1], [0], [0], [1], [0, 0, 1, 1], [], []>} : vector<1x128xbf16>, vector<128x128xbf16>, vector<1x128xf32> -> vector<1x128xf32>
    %117 = arith.addf %108, %116 : vector<1x128xf32>
    %c1_i32_112 = arith.constant 1 : i32
    %118 = arith.addi %c0_i32, %c1_i32_112 : i32
    %c0_113 = arith.constant 0 : index
    %119 = arith.index_cast %118 : i32 to index
    %c0_114 = arith.constant 0 : index
    %c0_115 = arith.constant 0 : index
    %120 = vector.load %arg2[%c0_113, %119, %c0_114, %c0_115] : memref<1x3x3x128xbf16, #tpu.memory_space<vmem>>, vector<1x1x3x128xbf16>
    %121 = vector.shape_cast %120 : vector<1x1x3x128xbf16> to vector<3x128xbf16>
    %122 = vector.extract_strided_slice %121 {offsets = [1, 0], sizes = [1, 128], strides = [1, 1]} : vector<3x128xbf16> to vector<1x128xbf16>
    %c1_116 = arith.constant 1 : index
    %c1_117 = arith.constant 1 : index
    %c0_118 = arith.constant 0 : index
    %c0_119 = arith.constant 0 : index
    %123 = vector.load %arg4[%c1_116, %c1_117, %c0_118, %c0_119] : memref<3x3x128x128xbf16, #tpu.memory_space<vmem>>, vector<1x1x128x128xbf16>
    %124 = vector.shape_cast %123 : vector<1x1x128x128xbf16> to vector<128x128xbf16>
    %cst_120 = arith.constant dense<0.000000e+00> : vector<1x128xf32>
    %125 = tpu.matmul %122, %124, %cst_120 {dimension_numbers = #tpu.dot_dimension_numbers<[1], [0], [0], [1], [0, 0, 1, 1], [], []>} : vector<1x128xbf16>, vector<128x128xbf16>, vector<1x128xf32> -> vector<1x128xf32>
    %126 = arith.addf %117, %125 : vector<1x128xf32>
    %c1_i32_121 = arith.constant 1 : i32
    %127 = arith.addi %c0_i32, %c1_i32_121 : i32
    %c0_122 = arith.constant 0 : index
    %128 = arith.index_cast %127 : i32 to index
    %c0_123 = arith.constant 0 : index
    %c0_124 = arith.constant 0 : index
    %129 = vector.load %arg2[%c0_122, %128, %c0_123, %c0_124] : memref<1x3x3x128xbf16, #tpu.memory_space<vmem>>, vector<1x1x3x128xbf16>
    %130 = vector.shape_cast %129 : vector<1x1x3x128xbf16> to vector<3x128xbf16>
    %131 = vector.extract_strided_slice %130 {offsets = [2, 0], sizes = [1, 128], strides = [1, 1]} : vector<3x128xbf16> to vector<1x128xbf16>
    %c1_125 = arith.constant 1 : index
    %c2_126 = arith.constant 2 : index
    %c0_127 = arith.constant 0 : index
    %c0_128 = arith.constant 0 : index
    %132 = vector.load %arg4[%c1_125, %c2_126, %c0_127, %c0_128] : memref<3x3x128x128xbf16, #tpu.memory_space<vmem>>, vector<1x1x128x128xbf16>
    %133 = vector.shape_cast %132 : vector<1x1x128x128xbf16> to vector<128x128xbf16>
    %cst_129 = arith.constant dense<0.000000e+00> : vector<1x128xf32>
    %134 = tpu.matmul %131, %133, %cst_129 {dimension_numbers = #tpu.dot_dimension_numbers<[1], [0], [0], [1], [0, 0, 1, 1], [], []>} : vector<1x128xbf16>, vector<128x128xbf16>, vector<1x128xf32> -> vector<1x128xf32>
    %135 = arith.addf %126, %134 : vector<1x128xf32>
    %c2_i32_130 = arith.constant 2 : i32
    %136 = arith.addi %c0_i32, %c2_i32_130 : i32
    %c0_131 = arith.constant 0 : index
    %137 = arith.index_cast %136 : i32 to index
    %c0_132 = arith.constant 0 : index
    %c0_133 = arith.constant 0 : index
    %138 = vector.load %arg2[%c0_131, %137, %c0_132, %c0_133] : memref<1x3x3x128xbf16, #tpu.memory_space<vmem>>, vector<1x1x3x128xbf16>
    %139 = vector.shape_cast %138 : vector<1x1x3x128xbf16> to vector<3x128xbf16>
    %140 = vector.extract_strided_slice %139 {offsets = [0, 0], sizes = [1, 128], strides = [1, 1]} : vector<3x128xbf16> to vector<1x128xbf16>
    %c2_134 = arith.constant 2 : index
    %c0_135 = arith.constant 0 : index
    %c0_136 = arith.constant 0 : index
    %c0_137 = arith.constant 0 : index
    %141 = vector.load %arg4[%c2_134, %c0_135, %c0_136, %c0_137] : memref<3x3x128x128xbf16, #tpu.memory_space<vmem>>, vector<1x1x128x128xbf16>
    %142 = vector.shape_cast %141 : vector<1x1x128x128xbf16> to vector<128x128xbf16>
    %cst_138 = arith.constant dense<0.000000e+00> : vector<1x128xf32>
    %143 = tpu.matmul %140, %142, %cst_138 {dimension_numbers = #tpu.dot_dimension_numbers<[1], [0], [0], [1], [0, 0, 1, 1], [], []>} : vector<1x128xbf16>, vector<128x128xbf16>, vector<1x128xf32> -> vector<1x128xf32>
    %144 = arith.addf %135, %143 : vector<1x128xf32>
    %c2_i32_139 = arith.constant 2 : i32
    %145 = arith.addi %c0_i32, %c2_i32_139 : i32
    %c0_140 = arith.constant 0 : index
    %146 = arith.index_cast %145 : i32 to index
    %c0_141 = arith.constant 0 : index
    %c0_142 = arith.constant 0 : index
    %147 = vector.load %arg2[%c0_140, %146, %c0_141, %c0_142] : memref<1x3x3x128xbf16, #tpu.memory_space<vmem>>, vector<1x1x3x128xbf16>
    %148 = vector.shape_cast %147 : vector<1x1x3x128xbf16> to vector<3x128xbf16>
    %149 = vector.extract_strided_slice %148 {offsets = [1, 0], sizes = [1, 128], strides = [1, 1]} : vector<3x128xbf16> to vector<1x128xbf16>
    %c2_143 = arith.constant 2 : index
    %c1_144 = arith.constant 1 : index
    %c0_145 = arith.constant 0 : index
    %c0_146 = arith.constant 0 : index
    %150 = vector.load %arg4[%c2_143, %c1_144, %c0_145, %c0_146] : memref<3x3x128x128xbf16, #tpu.memory_space<vmem>>, vector<1x1x128x128xbf16>
    %151 = vector.shape_cast %150 : vector<1x1x128x128xbf16> to vector<128x128xbf16>
    %cst_147 = arith.constant dense<0.000000e+00> : vector<1x128xf32>
    %152 = tpu.matmul %149, %151, %cst_147 {dimension_numbers = #tpu.dot_dimension_numbers<[1], [0], [0], [1], [0, 0, 1, 1], [], []>} : vector<1x128xbf16>, vector<128x128xbf16>, vector<1x128xf32> -> vector<1x128xf32>
    %153 = arith.addf %144, %152 : vector<1x128xf32>
    %c2_i32_148 = arith.constant 2 : i32
    %154 = arith.addi %c0_i32, %c2_i32_148 : i32
    %c0_149 = arith.constant 0 : index
    %155 = arith.index_cast %154 : i32 to index
    %c0_150 = arith.constant 0 : index
    %c0_151 = arith.constant 0 : index
    %156 = vector.load %arg2[%c0_149, %155, %c0_150, %c0_151] : memref<1x3x3x128xbf16, #tpu.memory_space<vmem>>, vector<1x1x3x128xbf16>
    %157 = vector.shape_cast %156 : vector<1x1x3x128xbf16> to vector<3x128xbf16>
    %158 = vector.extract_strided_slice %157 {offsets = [2, 0], sizes = [1, 128], strides = [1, 1]} : vector<3x128xbf16> to vector<1x128xbf16>
    %c2_152 = arith.constant 2 : index
    %c2_153 = arith.constant 2 : index
    %c0_154 = arith.constant 0 : index
    %c0_155 = arith.constant 0 : index
    %159 = vector.load %arg4[%c2_152, %c2_153, %c0_154, %c0_155] : memref<3x3x128x128xbf16, #tpu.memory_space<vmem>>, vector<1x1x128x128xbf16>
    %160 = vector.shape_cast %159 : vector<1x1x128x128xbf16> to vector<128x128xbf16>
    %cst_156 = arith.constant dense<0.000000e+00> : vector<1x128xf32>
    %161 = tpu.matmul %158, %160, %cst_156 {dimension_numbers = #tpu.dot_dimension_numbers<[1], [0], [0], [1], [0, 0, 1, 1], [], []>} : vector<1x128xbf16>, vector<128x128xbf16>, vector<1x128xf32> -> vector<1x128xf32>
    %162 = arith.addf %153, %161 : vector<1x128xf32>
    %c0_157 = arith.constant 0 : index
    %c0_158 = arith.constant 0 : index
    %163 = vector.load %arg5[%c0_157, %c0_158] : memref<1x128xf32, #tpu.memory_space<vmem>>, vector<1x128xf32>
    %164 = arith.addf %162, %163 : vector<1x128xf32>
    %cst_159 = arith.constant 0.000000e+00 : f32
    %165 = vector.broadcast %cst_159 : f32 to vector<1x128xf32>
    %166 = arith.cmpf oge, %164, %165 : vector<1x128xf32>
    %cst_160 = arith.constant 2.000000e-01 : f32
    %167 = vector.broadcast %cst_160 : f32 to vector<1x128xf32>
    %168 = arith.mulf %167, %164 : vector<1x128xf32>
    %169 = arith.select %166, %164, %168 : vector<1x128xi1>, vector<1x128xf32>
    %170 = arith.truncf %169 : vector<1x128xf32> to vector<1x128xbf16>
    %c0_161 = arith.constant 0 : index
    %171 = arith.index_cast %c0_i32 : i32 to index
    %c0_162 = arith.constant 0 : index
    %c0_163 = arith.constant 0 : index
    %172 = vector.load %arg6[%c0_161, %171, %c0_162, %c0_163] : memref<1x1x1x128xbf16, #tpu.memory_space<vmem>>, vector<1x1x1x128xbf16>
    %173 = vector.shape_cast %172 : vector<1x1x1x128xbf16> to vector<1x128xbf16>
    %174 = vector.shape_cast %170 : vector<1x128xbf16> to vector<1x1x1x128xbf16>
    tpu.vector_store %arg6[%c0_161, %171, %c0_162, %c0_163], %174 {strides = array<i32>} : memref<1x1x1x128xbf16, #tpu.memory_space<vmem>>, vector<1x1x1x128xbf16>,
    %c1_i32_164 = arith.constant 1 : i32
    return
  }
  func.func @transform_0(%arg0: i32) -> (i32, i32, i32, i32) {
    %c0_i32 = arith.constant 0 : i32
    %c0_i32_0 = arith.constant 0 : i32
    %c0_i32_1 = arith.constant 0 : i32
    %c0_i32_2 = arith.constant 0 : i32
    return %arg0, %c0_i32, %c0_i32_0, %c0_i32_1 : i32, i32, i32, i32
  }
  func.func @transform_1(%arg0: i32) -> (i32, i32, i32, i32) {
    %c0_i32 = arith.constant 0 : i32
    %c0_i32_0 = arith.constant 0 : i32
    %c0_i32_1 = arith.constant 0 : i32
    %c0_i32_2 = arith.constant 0 : i32
    return %arg0, %c0_i32, %c0_i32_0, %c0_i32_1 : i32, i32, i32, i32
  }
  func.func @transform_2(%arg0: i32) -> (i32, i32, i32, i32) {
    %c0_i32 = arith.constant 0 : i32
    %c0_i32_0 = arith.constant 0 : i32
    %c0_i32_1 = arith.constant 0 : i32
    %c0_i32_2 = arith.constant 0 : i32
    %c0_i32_3 = arith.constant 0 : i32
    return %c0_i32, %c0_i32_0, %c0_i32_1, %c0_i32_2 : i32, i32, i32, i32
  }
  func.func @transform_3(%arg0: i32) -> (i32, i32, i32, i32) {
    %c0_i32 = arith.constant 0 : i32
    %c0_i32_0 = arith.constant 0 : i32
    %c0_i32_1 = arith.constant 0 : i32
    %c0_i32_2 = arith.constant 0 : i32
    %c0_i32_3 = arith.constant 0 : i32
    return %c0_i32, %c0_i32_0, %c0_i32_1, %c0_i32_2 : i32, i32, i32, i32
  }
  func.func @transform_4(%arg0: i32) -> (i32, i32) {
    %c0_i32 = arith.constant 0 : i32
    %c0_i32_0 = arith.constant 0 : i32
    %c0_i32_1 = arith.constant 0 : i32
    return %c0_i32, %c0_i32_0 : i32, i32
  }
  func.func @transform_5(%arg0: i32) -> (i32, i32, i32, i32) {
    %c0_i32 = arith.constant 0 : i32
    %c0_i32_0 = arith.constant 0 : i32
    %c0_i32_1 = arith.constant 0 : i32
    %c0_i32_2 = arith.constant 0 : i32
    return %arg0, %c0_i32, %c0_i32_0, %c0_i32_1 : i32, i32, i32, i32
  }
}

module attributes {stable_mosaic.version = 11 : i64} {
  func.func @kernel(%arg0: i32, %arg1: memref<1x4x4x128xbf16, #tpu.memory_space<vmem>>, %arg2: memref<1x4x4x128xbf16, #tpu.memory_space<vmem>>, %arg3: memref<3x3x128x128xbf16, #tpu.memory_space<vmem>>, %arg4: memref<3x3x128x128xbf16, #tpu.memory_space<vmem>>, %arg5: memref<1x128xf32, #tpu.memory_space<vmem>>, %arg6: memref<1x2x2x128xbf16, #tpu.memory_space<vmem>>) attributes {dimension_semantics = [#tpu.dimension_semantics<parallel>], iteration_bounds = array<i64: 2>, scalar_prefetch = 0 : i64, scratch_operands = 0 : i64, tpu.core_type = #tpu.core_type<tc>, window_params = [{transform_indices = @transform_0, window_bounds = array<i64: 1, 4, 4, 128>}, {transform_indices = @transform_1, window_bounds = array<i64: 1, 4, 4, 128>}, {pipeline_mode = #tpu.pipeline_mode<synchronous>, transform_indices = @transform_2, window_bounds = array<i64: 3, 3, 128, 128>}, {pipeline_mode = #tpu.pipeline_mode<synchronous>, transform_indices = @transform_3, window_bounds = array<i64: 3, 3, 128, 128>}, {pipeline_mode = #tpu.pipeline_mode<synchronous>, transform_indices = @transform_4, window_bounds = array<i64: 1, 128>}, {transform_indices = @transform_5, window_bounds = array<i64: 1, 2, 2, 128>}]} {
    %c0_i32 = arith.constant 0 : i32
    %c2_i32 = arith.constant 2 : i32
    %0 = arith.addi %c0_i32, %c2_i32 : i32
    %c1_i32 = arith.constant 1 : i32
    scf.for %arg7 = %c0_i32 to %0 step %c1_i32  : i32 {
      %cst = arith.constant 0.000000e+00 : f32
      %1 = vector.broadcast %cst : f32 to vector<2x128xf32>
      %c0_i32_1 = arith.constant 0 : i32
      %2 = arith.addi %arg7, %c0_i32_1 : i32
      %c0 = arith.constant 0 : index
      %3 = arith.index_cast %2 : i32 to index
      %c0_2 = arith.constant 0 : index
      %c0_3 = arith.constant 0 : index
      %4 = vector.load %arg1[%c0, %3, %c0_2, %c0_3] : memref<1x4x4x128xbf16, #tpu.memory_space<vmem>>, vector<1x1x4x128xbf16>
      %5 = vector.shape_cast %4 : vector<1x1x4x128xbf16> to vector<4x128xbf16>
      %6 = vector.extract_strided_slice %5 {offsets = [0, 0], sizes = [2, 128], strides = [1, 1]} : vector<4x128xbf16> to vector<2x128xbf16>
      %c0_4 = arith.constant 0 : index
      %c0_5 = arith.constant 0 : index
      %c0_6 = arith.constant 0 : index
      %c0_7 = arith.constant 0 : index
      %7 = vector.load %arg3[%c0_4, %c0_5, %c0_6, %c0_7] : memref<3x3x128x128xbf16, #tpu.memory_space<vmem>>, vector<1x1x128x128xbf16>
      %8 = vector.shape_cast %7 : vector<1x1x128x128xbf16> to vector<128x128xbf16>
      %cst_8 = arith.constant dense<0.000000e+00> : vector<2x128xf32>
      %9 = tpu.matmul %6, %8, %cst_8 {dimension_numbers = #tpu.dot_dimension_numbers<[1], [0], [0], [1], [0, 0, 1, 1], [], []>} : vector<2x128xbf16>, vector<128x128xbf16>, vector<2x128xf32> -> vector<2x128xf32>
      %10 = arith.addf %1, %9 : vector<2x128xf32>
      %c0_i32_9 = arith.constant 0 : i32
      %11 = arith.addi %arg7, %c0_i32_9 : i32
      %c0_10 = arith.constant 0 : index
      %12 = arith.index_cast %11 : i32 to index
      %c0_11 = arith.constant 0 : index
      %c0_12 = arith.constant 0 : index
      %13 = vector.load %arg1[%c0_10, %12, %c0_11, %c0_12] : memref<1x4x4x128xbf16, #tpu.memory_space<vmem>>, vector<1x1x4x128xbf16>
      %14 = vector.shape_cast %13 : vector<1x1x4x128xbf16> to vector<4x128xbf16>
      %15 = vector.extract_strided_slice %14 {offsets = [1, 0], sizes = [2, 128], strides = [1, 1]} : vector<4x128xbf16> to vector<2x128xbf16>
      %c0_13 = arith.constant 0 : index
      %c1 = arith.constant 1 : index
      %c0_14 = arith.constant 0 : index
      %c0_15 = arith.constant 0 : index
      %16 = vector.load %arg3[%c0_13, %c1, %c0_14, %c0_15] : memref<3x3x128x128xbf16, #tpu.memory_space<vmem>>, vector<1x1x128x128xbf16>
      %17 = vector.shape_cast %16 : vector<1x1x128x128xbf16> to vector<128x128xbf16>
      %cst_16 = arith.constant dense<0.000000e+00> : vector<2x128xf32>
      %18 = tpu.matmul %15, %17, %cst_16 {dimension_numbers = #tpu.dot_dimension_numbers<[1], [0], [0], [1], [0, 0, 1, 1], [], []>} : vector<2x128xbf16>, vector<128x128xbf16>, vector<2x128xf32> -> vector<2x128xf32>
      %19 = arith.addf %10, %18 : vector<2x128xf32>
      %c0_i32_17 = arith.constant 0 : i32
      %20 = arith.addi %arg7, %c0_i32_17 : i32
      %c0_18 = arith.constant 0 : index
      %21 = arith.index_cast %20 : i32 to index
      %c0_19 = arith.constant 0 : index
      %c0_20 = arith.constant 0 : index
      %22 = vector.load %arg1[%c0_18, %21, %c0_19, %c0_20] : memref<1x4x4x128xbf16, #tpu.memory_space<vmem>>, vector<1x1x4x128xbf16>
      %23 = vector.shape_cast %22 : vector<1x1x4x128xbf16> to vector<4x128xbf16>
      %24 = vector.extract_strided_slice %23 {offsets = [2, 0], sizes = [2, 128], strides = [1, 1]} : vector<4x128xbf16> to vector<2x128xbf16>
      %c0_21 = arith.constant 0 : index
      %c2 = arith.constant 2 : index
      %c0_22 = arith.constant 0 : index
      %c0_23 = arith.constant 0 : index
      %25 = vector.load %arg3[%c0_21, %c2, %c0_22, %c0_23] : memref<3x3x128x128xbf16, #tpu.memory_space<vmem>>, vector<1x1x128x128xbf16>
      %26 = vector.shape_cast %25 : vector<1x1x128x128xbf16> to vector<128x128xbf16>
      %cst_24 = arith.constant dense<0.000000e+00> : vector<2x128xf32>
      %27 = tpu.matmul %24, %26, %cst_24 {dimension_numbers = #tpu.dot_dimension_numbers<[1], [0], [0], [1], [0, 0, 1, 1], [], []>} : vector<2x128xbf16>, vector<128x128xbf16>, vector<2x128xf32> -> vector<2x128xf32>
      %28 = arith.addf %19, %27 : vector<2x128xf32>
      %c1_i32_25 = arith.constant 1 : i32
      %29 = arith.addi %arg7, %c1_i32_25 : i32
      %c0_26 = arith.constant 0 : index
      %30 = arith.index_cast %29 : i32 to index
      %c0_27 = arith.constant 0 : index
      %c0_28 = arith.constant 0 : index
      %31 = vector.load %arg1[%c0_26, %30, %c0_27, %c0_28] : memref<1x4x4x128xbf16, #tpu.memory_space<vmem>>, vector<1x1x4x128xbf16>
      %32 = vector.shape_cast %31 : vector<1x1x4x128xbf16> to vector<4x128xbf16>
      %33 = vector.extract_strided_slice %32 {offsets = [0, 0], sizes = [2, 128], strides = [1, 1]} : vector<4x128xbf16> to vector<2x128xbf16>
      %c1_29 = arith.constant 1 : index
      %c0_30 = arith.constant 0 : index
      %c0_31 = arith.constant 0 : index
      %c0_32 = arith.constant 0 : index
      %34 = vector.load %arg3[%c1_29, %c0_30, %c0_31, %c0_32] : memref<3x3x128x128xbf16, #tpu.memory_space<vmem>>, vector<1x1x128x128xbf16>
      %35 = vector.shape_cast %34 : vector<1x1x128x128xbf16> to vector<128x128xbf16>
      %cst_33 = arith.constant dense<0.000000e+00> : vector<2x128xf32>
      %36 = tpu.matmul %33, %35, %cst_33 {dimension_numbers = #tpu.dot_dimension_numbers<[1], [0], [0], [1], [0, 0, 1, 1], [], []>} : vector<2x128xbf16>, vector<128x128xbf16>, vector<2x128xf32> -> vector<2x128xf32>
      %37 = arith.addf %28, %36 : vector<2x128xf32>
      %c1_i32_34 = arith.constant 1 : i32
      %38 = arith.addi %arg7, %c1_i32_34 : i32
      %c0_35 = arith.constant 0 : index
      %39 = arith.index_cast %38 : i32 to index
      %c0_36 = arith.constant 0 : index
      %c0_37 = arith.constant 0 : index
      %40 = vector.load %arg1[%c0_35, %39, %c0_36, %c0_37] : memref<1x4x4x128xbf16, #tpu.memory_space<vmem>>, vector<1x1x4x128xbf16>
      %41 = vector.shape_cast %40 : vector<1x1x4x128xbf16> to vector<4x128xbf16>
      %42 = vector.extract_strided_slice %41 {offsets = [1, 0], sizes = [2, 128], strides = [1, 1]} : vector<4x128xbf16> to vector<2x128xbf16>
      %c1_38 = arith.constant 1 : index
      %c1_39 = arith.constant 1 : index
      %c0_40 = arith.constant 0 : index
      %c0_41 = arith.constant 0 : index
      %43 = vector.load %arg3[%c1_38, %c1_39, %c0_40, %c0_41] : memref<3x3x128x128xbf16, #tpu.memory_space<vmem>>, vector<1x1x128x128xbf16>
      %44 = vector.shape_cast %43 : vector<1x1x128x128xbf16> to vector<128x128xbf16>
      %cst_42 = arith.constant dense<0.000000e+00> : vector<2x128xf32>
      %45 = tpu.matmul %42, %44, %cst_42 {dimension_numbers = #tpu.dot_dimension_numbers<[1], [0], [0], [1], [0, 0, 1, 1], [], []>} : vector<2x128xbf16>, vector<128x128xbf16>, vector<2x128xf32> -> vector<2x128xf32>
      %46 = arith.addf %37, %45 : vector<2x128xf32>
      %c1_i32_43 = arith.constant 1 : i32
      %47 = arith.addi %arg7, %c1_i32_43 : i32
      %c0_44 = arith.constant 0 : index
      %48 = arith.index_cast %47 : i32 to index
      %c0_45 = arith.constant 0 : index
      %c0_46 = arith.constant 0 : index
      %49 = vector.load %arg1[%c0_44, %48, %c0_45, %c0_46] : memref<1x4x4x128xbf16, #tpu.memory_space<vmem>>, vector<1x1x4x128xbf16>
      %50 = vector.shape_cast %49 : vector<1x1x4x128xbf16> to vector<4x128xbf16>
      %51 = vector.extract_strided_slice %50 {offsets = [2, 0], sizes = [2, 128], strides = [1, 1]} : vector<4x128xbf16> to vector<2x128xbf16>
      %c1_47 = arith.constant 1 : index
      %c2_48 = arith.constant 2 : index
      %c0_49 = arith.constant 0 : index
      %c0_50 = arith.constant 0 : index
      %52 = vector.load %arg3[%c1_47, %c2_48, %c0_49, %c0_50] : memref<3x3x128x128xbf16, #tpu.memory_space<vmem>>, vector<1x1x128x128xbf16>
      %53 = vector.shape_cast %52 : vector<1x1x128x128xbf16> to vector<128x128xbf16>
      %cst_51 = arith.constant dense<0.000000e+00> : vector<2x128xf32>
      %54 = tpu.matmul %51, %53, %cst_51 {dimension_numbers = #tpu.dot_dimension_numbers<[1], [0], [0], [1], [0, 0, 1, 1], [], []>} : vector<2x128xbf16>, vector<128x128xbf16>, vector<2x128xf32> -> vector<2x128xf32>
      %55 = arith.addf %46, %54 : vector<2x128xf32>
      %c2_i32_52 = arith.constant 2 : i32
      %56 = arith.addi %arg7, %c2_i32_52 : i32
      %c0_53 = arith.constant 0 : index
      %57 = arith.index_cast %56 : i32 to index
      %c0_54 = arith.constant 0 : index
      %c0_55 = arith.constant 0 : index
      %58 = vector.load %arg1[%c0_53, %57, %c0_54, %c0_55] : memref<1x4x4x128xbf16, #tpu.memory_space<vmem>>, vector<1x1x4x128xbf16>
      %59 = vector.shape_cast %58 : vector<1x1x4x128xbf16> to vector<4x128xbf16>
      %60 = vector.extract_strided_slice %59 {offsets = [0, 0], sizes = [2, 128], strides = [1, 1]} : vector<4x128xbf16> to vector<2x128xbf16>
      %c2_56 = arith.constant 2 : index
      %c0_57 = arith.constant 0 : index
      %c0_58 = arith.constant 0 : index
      %c0_59 = arith.constant 0 : index
      %61 = vector.load %arg3[%c2_56, %c0_57, %c0_58, %c0_59] : memref<3x3x128x128xbf16, #tpu.memory_space<vmem>>, vector<1x1x128x128xbf16>
      %62 = vector.shape_cast %61 : vector<1x1x128x128xbf16> to vector<128x128xbf16>
      %cst_60 = arith.constant dense<0.000000e+00> : vector<2x128xf32>
      %63 = tpu.matmul %60, %62, %cst_60 {dimension_numbers = #tpu.dot_dimension_numbers<[1], [0], [0], [1], [0, 0, 1, 1], [], []>} : vector<2x128xbf16>, vector<128x128xbf16>, vector<2x128xf32> -> vector<2x128xf32>
      %64 = arith.addf %55, %63 : vector<2x128xf32>
      %c2_i32_61 = arith.constant 2 : i32
      %65 = arith.addi %arg7, %c2_i32_61 : i32
      %c0_62 = arith.constant 0 : index
      %66 = arith.index_cast %65 : i32 to index
      %c0_63 = arith.constant 0 : index
      %c0_64 = arith.constant 0 : index
      %67 = vector.load %arg1[%c0_62, %66, %c0_63, %c0_64] : memref<1x4x4x128xbf16, #tpu.memory_space<vmem>>, vector<1x1x4x128xbf16>
      %68 = vector.shape_cast %67 : vector<1x1x4x128xbf16> to vector<4x128xbf16>
      %69 = vector.extract_strided_slice %68 {offsets = [1, 0], sizes = [2, 128], strides = [1, 1]} : vector<4x128xbf16> to vector<2x128xbf16>
      %c2_65 = arith.constant 2 : index
      %c1_66 = arith.constant 1 : index
      %c0_67 = arith.constant 0 : index
      %c0_68 = arith.constant 0 : index
      %70 = vector.load %arg3[%c2_65, %c1_66, %c0_67, %c0_68] : memref<3x3x128x128xbf16, #tpu.memory_space<vmem>>, vector<1x1x128x128xbf16>
      %71 = vector.shape_cast %70 : vector<1x1x128x128xbf16> to vector<128x128xbf16>
      %cst_69 = arith.constant dense<0.000000e+00> : vector<2x128xf32>
      %72 = tpu.matmul %69, %71, %cst_69 {dimension_numbers = #tpu.dot_dimension_numbers<[1], [0], [0], [1], [0, 0, 1, 1], [], []>} : vector<2x128xbf16>, vector<128x128xbf16>, vector<2x128xf32> -> vector<2x128xf32>
      %73 = arith.addf %64, %72 : vector<2x128xf32>
      %c2_i32_70 = arith.constant 2 : i32
      %74 = arith.addi %arg7, %c2_i32_70 : i32
      %c0_71 = arith.constant 0 : index
      %75 = arith.index_cast %74 : i32 to index
      %c0_72 = arith.constant 0 : index
      %c0_73 = arith.constant 0 : index
      %76 = vector.load %arg1[%c0_71, %75, %c0_72, %c0_73] : memref<1x4x4x128xbf16, #tpu.memory_space<vmem>>, vector<1x1x4x128xbf16>
      %77 = vector.shape_cast %76 : vector<1x1x4x128xbf16> to vector<4x128xbf16>
      %78 = vector.extract_strided_slice %77 {offsets = [2, 0], sizes = [2, 128], strides = [1, 1]} : vector<4x128xbf16> to vector<2x128xbf16>
      %c2_74 = arith.constant 2 : index
      %c2_75 = arith.constant 2 : index
      %c0_76 = arith.constant 0 : index
      %c0_77 = arith.constant 0 : index
      %79 = vector.load %arg3[%c2_74, %c2_75, %c0_76, %c0_77] : memref<3x3x128x128xbf16, #tpu.memory_space<vmem>>, vector<1x1x128x128xbf16>
      %80 = vector.shape_cast %79 : vector<1x1x128x128xbf16> to vector<128x128xbf16>
      %cst_78 = arith.constant dense<0.000000e+00> : vector<2x128xf32>
      %81 = tpu.matmul %78, %80, %cst_78 {dimension_numbers = #tpu.dot_dimension_numbers<[1], [0], [0], [1], [0, 0, 1, 1], [], []>} : vector<2x128xbf16>, vector<128x128xbf16>, vector<2x128xf32> -> vector<2x128xf32>
      %82 = arith.addf %73, %81 : vector<2x128xf32>
      %c0_i32_79 = arith.constant 0 : i32
      %83 = arith.addi %arg7, %c0_i32_79 : i32
      %c0_80 = arith.constant 0 : index
      %84 = arith.index_cast %83 : i32 to index
      %c0_81 = arith.constant 0 : index
      %c0_82 = arith.constant 0 : index
      %85 = vector.load %arg2[%c0_80, %84, %c0_81, %c0_82] : memref<1x4x4x128xbf16, #tpu.memory_space<vmem>>, vector<1x1x4x128xbf16>
      %86 = vector.shape_cast %85 : vector<1x1x4x128xbf16> to vector<4x128xbf16>
      %87 = vector.extract_strided_slice %86 {offsets = [0, 0], sizes = [2, 128], strides = [1, 1]} : vector<4x128xbf16> to vector<2x128xbf16>
      %c0_83 = arith.constant 0 : index
      %c0_84 = arith.constant 0 : index
      %c0_85 = arith.constant 0 : index
      %c0_86 = arith.constant 0 : index
      %88 = vector.load %arg4[%c0_83, %c0_84, %c0_85, %c0_86] : memref<3x3x128x128xbf16, #tpu.memory_space<vmem>>, vector<1x1x128x128xbf16>
      %89 = vector.shape_cast %88 : vector<1x1x128x128xbf16> to vector<128x128xbf16>
      %cst_87 = arith.constant dense<0.000000e+00> : vector<2x128xf32>
      %90 = tpu.matmul %87, %89, %cst_87 {dimension_numbers = #tpu.dot_dimension_numbers<[1], [0], [0], [1], [0, 0, 1, 1], [], []>} : vector<2x128xbf16>, vector<128x128xbf16>, vector<2x128xf32> -> vector<2x128xf32>
      %91 = arith.addf %82, %90 : vector<2x128xf32>
      %c0_i32_88 = arith.constant 0 : i32
      %92 = arith.addi %arg7, %c0_i32_88 : i32
      %c0_89 = arith.constant 0 : index
      %93 = arith.index_cast %92 : i32 to index
      %c0_90 = arith.constant 0 : index
      %c0_91 = arith.constant 0 : index
      %94 = vector.load %arg2[%c0_89, %93, %c0_90, %c0_91] : memref<1x4x4x128xbf16, #tpu.memory_space<vmem>>, vector<1x1x4x128xbf16>
      %95 = vector.shape_cast %94 : vector<1x1x4x128xbf16> to vector<4x128xbf16>
      %96 = vector.extract_strided_slice %95 {offsets = [1, 0], sizes = [2, 128], strides = [1, 1]} : vector<4x128xbf16> to vector<2x128xbf16>
      %c0_92 = arith.constant 0 : index
      %c1_93 = arith.constant 1 : index
      %c0_94 = arith.constant 0 : index
      %c0_95 = arith.constant 0 : index
      %97 = vector.load %arg4[%c0_92, %c1_93, %c0_94, %c0_95] : memref<3x3x128x128xbf16, #tpu.memory_space<vmem>>, vector<1x1x128x128xbf16>
      %98 = vector.shape_cast %97 : vector<1x1x128x128xbf16> to vector<128x128xbf16>
      %cst_96 = arith.constant dense<0.000000e+00> : vector<2x128xf32>
      %99 = tpu.matmul %96, %98, %cst_96 {dimension_numbers = #tpu.dot_dimension_numbers<[1], [0], [0], [1], [0, 0, 1, 1], [], []>} : vector<2x128xbf16>, vector<128x128xbf16>, vector<2x128xf32> -> vector<2x128xf32>
      %100 = arith.addf %91, %99 : vector<2x128xf32>
      %c0_i32_97 = arith.constant 0 : i32
      %101 = arith.addi %arg7, %c0_i32_97 : i32
      %c0_98 = arith.constant 0 : index
      %102 = arith.index_cast %101 : i32 to index
      %c0_99 = arith.constant 0 : index
      %c0_100 = arith.constant 0 : index
      %103 = vector.load %arg2[%c0_98, %102, %c0_99, %c0_100] : memref<1x4x4x128xbf16, #tpu.memory_space<vmem>>, vector<1x1x4x128xbf16>
      %104 = vector.shape_cast %103 : vector<1x1x4x128xbf16> to vector<4x128xbf16>
      %105 = vector.extract_strided_slice %104 {offsets = [2, 0], sizes = [2, 128], strides = [1, 1]} : vector<4x128xbf16> to vector<2x128xbf16>
      %c0_101 = arith.constant 0 : index
      %c2_102 = arith.constant 2 : index
      %c0_103 = arith.constant 0 : index
      %c0_104 = arith.constant 0 : index
      %106 = vector.load %arg4[%c0_101, %c2_102, %c0_103, %c0_104] : memref<3x3x128x128xbf16, #tpu.memory_space<vmem>>, vector<1x1x128x128xbf16>
      %107 = vector.shape_cast %106 : vector<1x1x128x128xbf16> to vector<128x128xbf16>
      %cst_105 = arith.constant dense<0.000000e+00> : vector<2x128xf32>
      %108 = tpu.matmul %105, %107, %cst_105 {dimension_numbers = #tpu.dot_dimension_numbers<[1], [0], [0], [1], [0, 0, 1, 1], [], []>} : vector<2x128xbf16>, vector<128x128xbf16>, vector<2x128xf32> -> vector<2x128xf32>
      %109 = arith.addf %100, %108 : vector<2x128xf32>
      %c1_i32_106 = arith.constant 1 : i32
      %110 = arith.addi %arg7, %c1_i32_106 : i32
      %c0_107 = arith.constant 0 : index
      %111 = arith.index_cast %110 : i32 to index
      %c0_108 = arith.constant 0 : index
      %c0_109 = arith.constant 0 : index
      %112 = vector.load %arg2[%c0_107, %111, %c0_108, %c0_109] : memref<1x4x4x128xbf16, #tpu.memory_space<vmem>>, vector<1x1x4x128xbf16>
      %113 = vector.shape_cast %112 : vector<1x1x4x128xbf16> to vector<4x128xbf16>
      %114 = vector.extract_strided_slice %113 {offsets = [0, 0], sizes = [2, 128], strides = [1, 1]} : vector<4x128xbf16> to vector<2x128xbf16>
      %c1_110 = arith.constant 1 : index
      %c0_111 = arith.constant 0 : index
      %c0_112 = arith.constant 0 : index
      %c0_113 = arith.constant 0 : index
      %115 = vector.load %arg4[%c1_110, %c0_111, %c0_112, %c0_113] : memref<3x3x128x128xbf16, #tpu.memory_space<vmem>>, vector<1x1x128x128xbf16>
      %116 = vector.shape_cast %115 : vector<1x1x128x128xbf16> to vector<128x128xbf16>
      %cst_114 = arith.constant dense<0.000000e+00> : vector<2x128xf32>
      %117 = tpu.matmul %114, %116, %cst_114 {dimension_numbers = #tpu.dot_dimension_numbers<[1], [0], [0], [1], [0, 0, 1, 1], [], []>} : vector<2x128xbf16>, vector<128x128xbf16>, vector<2x128xf32> -> vector<2x128xf32>
      %118 = arith.addf %109, %117 : vector<2x128xf32>
      %c1_i32_115 = arith.constant 1 : i32
      %119 = arith.addi %arg7, %c1_i32_115 : i32
      %c0_116 = arith.constant 0 : index
      %120 = arith.index_cast %119 : i32 to index
      %c0_117 = arith.constant 0 : index
      %c0_118 = arith.constant 0 : index
      %121 = vector.load %arg2[%c0_116, %120, %c0_117, %c0_118] : memref<1x4x4x128xbf16, #tpu.memory_space<vmem>>, vector<1x1x4x128xbf16>
      %122 = vector.shape_cast %121 : vector<1x1x4x128xbf16> to vector<4x128xbf16>
      %123 = vector.extract_strided_slice %122 {offsets = [1, 0], sizes = [2, 128], strides = [1, 1]} : vector<4x128xbf16> to vector<2x128xbf16>
      %c1_119 = arith.constant 1 : index
      %c1_120 = arith.constant 1 : index
      %c0_121 = arith.constant 0 : index
      %c0_122 = arith.constant 0 : index
      %124 = vector.load %arg4[%c1_119, %c1_120, %c0_121, %c0_122] : memref<3x3x128x128xbf16, #tpu.memory_space<vmem>>, vector<1x1x128x128xbf16>
      %125 = vector.shape_cast %124 : vector<1x1x128x128xbf16> to vector<128x128xbf16>
      %cst_123 = arith.constant dense<0.000000e+00> : vector<2x128xf32>
      %126 = tpu.matmul %123, %125, %cst_123 {dimension_numbers = #tpu.dot_dimension_numbers<[1], [0], [0], [1], [0, 0, 1, 1], [], []>} : vector<2x128xbf16>, vector<128x128xbf16>, vector<2x128xf32> -> vector<2x128xf32>
      %127 = arith.addf %118, %126 : vector<2x128xf32>
      %c1_i32_124 = arith.constant 1 : i32
      %128 = arith.addi %arg7, %c1_i32_124 : i32
      %c0_125 = arith.constant 0 : index
      %129 = arith.index_cast %128 : i32 to index
      %c0_126 = arith.constant 0 : index
      %c0_127 = arith.constant 0 : index
      %130 = vector.load %arg2[%c0_125, %129, %c0_126, %c0_127] : memref<1x4x4x128xbf16, #tpu.memory_space<vmem>>, vector<1x1x4x128xbf16>
      %131 = vector.shape_cast %130 : vector<1x1x4x128xbf16> to vector<4x128xbf16>
      %132 = vector.extract_strided_slice %131 {offsets = [2, 0], sizes = [2, 128], strides = [1, 1]} : vector<4x128xbf16> to vector<2x128xbf16>
      %c1_128 = arith.constant 1 : index
      %c2_129 = arith.constant 2 : index
      %c0_130 = arith.constant 0 : index
      %c0_131 = arith.constant 0 : index
      %133 = vector.load %arg4[%c1_128, %c2_129, %c0_130, %c0_131] : memref<3x3x128x128xbf16, #tpu.memory_space<vmem>>, vector<1x1x128x128xbf16>
      %134 = vector.shape_cast %133 : vector<1x1x128x128xbf16> to vector<128x128xbf16>
      %cst_132 = arith.constant dense<0.000000e+00> : vector<2x128xf32>
      %135 = tpu.matmul %132, %134, %cst_132 {dimension_numbers = #tpu.dot_dimension_numbers<[1], [0], [0], [1], [0, 0, 1, 1], [], []>} : vector<2x128xbf16>, vector<128x128xbf16>, vector<2x128xf32> -> vector<2x128xf32>
      %136 = arith.addf %127, %135 : vector<2x128xf32>
      %c2_i32_133 = arith.constant 2 : i32
      %137 = arith.addi %arg7, %c2_i32_133 : i32
      %c0_134 = arith.constant 0 : index
      %138 = arith.index_cast %137 : i32 to index
      %c0_135 = arith.constant 0 : index
      %c0_136 = arith.constant 0 : index
      %139 = vector.load %arg2[%c0_134, %138, %c0_135, %c0_136] : memref<1x4x4x128xbf16, #tpu.memory_space<vmem>>, vector<1x1x4x128xbf16>
      %140 = vector.shape_cast %139 : vector<1x1x4x128xbf16> to vector<4x128xbf16>
      %141 = vector.extract_strided_slice %140 {offsets = [0, 0], sizes = [2, 128], strides = [1, 1]} : vector<4x128xbf16> to vector<2x128xbf16>
      %c2_137 = arith.constant 2 : index
      %c0_138 = arith.constant 0 : index
      %c0_139 = arith.constant 0 : index
      %c0_140 = arith.constant 0 : index
      %142 = vector.load %arg4[%c2_137, %c0_138, %c0_139, %c0_140] : memref<3x3x128x128xbf16, #tpu.memory_space<vmem>>, vector<1x1x128x128xbf16>
      %143 = vector.shape_cast %142 : vector<1x1x128x128xbf16> to vector<128x128xbf16>
      %cst_141 = arith.constant dense<0.000000e+00> : vector<2x128xf32>
      %144 = tpu.matmul %141, %143, %cst_141 {dimension_numbers = #tpu.dot_dimension_numbers<[1], [0], [0], [1], [0, 0, 1, 1], [], []>} : vector<2x128xbf16>, vector<128x128xbf16>, vector<2x128xf32> -> vector<2x128xf32>
      %145 = arith.addf %136, %144 : vector<2x128xf32>
      %c2_i32_142 = arith.constant 2 : i32
      %146 = arith.addi %arg7, %c2_i32_142 : i32
      %c0_143 = arith.constant 0 : index
      %147 = arith.index_cast %146 : i32 to index
      %c0_144 = arith.constant 0 : index
      %c0_145 = arith.constant 0 : index
      %148 = vector.load %arg2[%c0_143, %147, %c0_144, %c0_145] : memref<1x4x4x128xbf16, #tpu.memory_space<vmem>>, vector<1x1x4x128xbf16>
      %149 = vector.shape_cast %148 : vector<1x1x4x128xbf16> to vector<4x128xbf16>
      %150 = vector.extract_strided_slice %149 {offsets = [1, 0], sizes = [2, 128], strides = [1, 1]} : vector<4x128xbf16> to vector<2x128xbf16>
      %c2_146 = arith.constant 2 : index
      %c1_147 = arith.constant 1 : index
      %c0_148 = arith.constant 0 : index
      %c0_149 = arith.constant 0 : index
      %151 = vector.load %arg4[%c2_146, %c1_147, %c0_148, %c0_149] : memref<3x3x128x128xbf16, #tpu.memory_space<vmem>>, vector<1x1x128x128xbf16>
      %152 = vector.shape_cast %151 : vector<1x1x128x128xbf16> to vector<128x128xbf16>
      %cst_150 = arith.constant dense<0.000000e+00> : vector<2x128xf32>
      %153 = tpu.matmul %150, %152, %cst_150 {dimension_numbers = #tpu.dot_dimension_numbers<[1], [0], [0], [1], [0, 0, 1, 1], [], []>} : vector<2x128xbf16>, vector<128x128xbf16>, vector<2x128xf32> -> vector<2x128xf32>
      %154 = arith.addf %145, %153 : vector<2x128xf32>
      %c2_i32_151 = arith.constant 2 : i32
      %155 = arith.addi %arg7, %c2_i32_151 : i32
      %c0_152 = arith.constant 0 : index
      %156 = arith.index_cast %155 : i32 to index
      %c0_153 = arith.constant 0 : index
      %c0_154 = arith.constant 0 : index
      %157 = vector.load %arg2[%c0_152, %156, %c0_153, %c0_154] : memref<1x4x4x128xbf16, #tpu.memory_space<vmem>>, vector<1x1x4x128xbf16>
      %158 = vector.shape_cast %157 : vector<1x1x4x128xbf16> to vector<4x128xbf16>
      %159 = vector.extract_strided_slice %158 {offsets = [2, 0], sizes = [2, 128], strides = [1, 1]} : vector<4x128xbf16> to vector<2x128xbf16>
      %c2_155 = arith.constant 2 : index
      %c2_156 = arith.constant 2 : index
      %c0_157 = arith.constant 0 : index
      %c0_158 = arith.constant 0 : index
      %160 = vector.load %arg4[%c2_155, %c2_156, %c0_157, %c0_158] : memref<3x3x128x128xbf16, #tpu.memory_space<vmem>>, vector<1x1x128x128xbf16>
      %161 = vector.shape_cast %160 : vector<1x1x128x128xbf16> to vector<128x128xbf16>
      %cst_159 = arith.constant dense<0.000000e+00> : vector<2x128xf32>
      %162 = tpu.matmul %159, %161, %cst_159 {dimension_numbers = #tpu.dot_dimension_numbers<[1], [0], [0], [1], [0, 0, 1, 1], [], []>} : vector<2x128xbf16>, vector<128x128xbf16>, vector<2x128xf32> -> vector<2x128xf32>
      %163 = arith.addf %154, %162 : vector<2x128xf32>
      %c0_160 = arith.constant 0 : index
      %c0_161 = arith.constant 0 : index
      %164 = vector.load %arg5[%c0_160, %c0_161] : memref<1x128xf32, #tpu.memory_space<vmem>>, vector<1x128xf32>
      %165 = vector.broadcast %164 : vector<1x128xf32> to vector<2x128xf32>
      %166 = arith.addf %163, %165 : vector<2x128xf32>
      %cst_162 = arith.constant 0.000000e+00 : f32
      %167 = vector.broadcast %cst_162 : f32 to vector<2x128xf32>
      %168 = arith.cmpf oge, %166, %167 : vector<2x128xf32>
      %cst_163 = arith.constant 2.000000e-01 : f32
      %169 = vector.broadcast %cst_163 : f32 to vector<2x128xf32>
      %170 = arith.mulf %169, %166 : vector<2x128xf32>
      %171 = arith.select %168, %166, %170 : vector<2x128xi1>, vector<2x128xf32>
      %172 = arith.truncf %171 : vector<2x128xf32> to vector<2x128xbf16>
      %c0_164 = arith.constant 0 : index
      %173 = arith.index_cast %arg7 : i32 to index
      %c0_165 = arith.constant 0 : index
      %c0_166 = arith.constant 0 : index
      %174 = vector.load %arg6[%c0_164, %173, %c0_165, %c0_166] : memref<1x2x2x128xbf16, #tpu.memory_space<vmem>>, vector<1x1x2x128xbf16>
      %175 = vector.shape_cast %174 : vector<1x1x2x128xbf16> to vector<2x128xbf16>
      %176 = vector.shape_cast %172 : vector<2x128xbf16> to vector<1x1x2x128xbf16>
      tpu.vector_store %arg6[%c0_164, %173, %c0_165, %c0_166], %176 {strides = array<i32>} : memref<1x2x2x128xbf16, #tpu.memory_space<vmem>>, vector<1x1x2x128xbf16>,
    }
    %c2_i32_0 = arith.constant 2 : i32
    return
  }
  func.func @transform_0(%arg0: i32) -> (i32, i32, i32, i32) {
    %c0_i32 = arith.constant 0 : i32
    %c0_i32_0 = arith.constant 0 : i32
    %c0_i32_1 = arith.constant 0 : i32
    %c0_i32_2 = arith.constant 0 : i32
    return %arg0, %c0_i32, %c0_i32_0, %c0_i32_1 : i32, i32, i32, i32
  }
  func.func @transform_1(%arg0: i32) -> (i32, i32, i32, i32) {
    %c0_i32 = arith.constant 0 : i32
    %c0_i32_0 = arith.constant 0 : i32
    %c0_i32_1 = arith.constant 0 : i32
    %c0_i32_2 = arith.constant 0 : i32
    return %arg0, %c0_i32, %c0_i32_0, %c0_i32_1 : i32, i32, i32, i32
  }
  func.func @transform_2(%arg0: i32) -> (i32, i32, i32, i32) {
    %c0_i32 = arith.constant 0 : i32
    %c0_i32_0 = arith.constant 0 : i32
    %c0_i32_1 = arith.constant 0 : i32
    %c0_i32_2 = arith.constant 0 : i32
    %c0_i32_3 = arith.constant 0 : i32
    return %c0_i32, %c0_i32_0, %c0_i32_1, %c0_i32_2 : i32, i32, i32, i32
  }
  func.func @transform_3(%arg0: i32) -> (i32, i32, i32, i32) {
    %c0_i32 = arith.constant 0 : i32
    %c0_i32_0 = arith.constant 0 : i32
    %c0_i32_1 = arith.constant 0 : i32
    %c0_i32_2 = arith.constant 0 : i32
    %c0_i32_3 = arith.constant 0 : i32
    return %c0_i32, %c0_i32_0, %c0_i32_1, %c0_i32_2 : i32, i32, i32, i32
  }
  func.func @transform_4(%arg0: i32) -> (i32, i32) {
    %c0_i32 = arith.constant 0 : i32
    %c0_i32_0 = arith.constant 0 : i32
    %c0_i32_1 = arith.constant 0 : i32
    return %c0_i32, %c0_i32_0 : i32, i32
  }
  func.func @transform_5(%arg0: i32) -> (i32, i32, i32, i32) {
    %c0_i32 = arith.constant 0 : i32
    %c0_i32_0 = arith.constant 0 : i32
    %c0_i32_1 = arith.constant 0 : i32
    %c0_i32_2 = arith.constant 0 : i32
    return %arg0, %c0_i32, %c0_i32_0, %c0_i32_1 : i32, i32, i32, i32
  }
}

module attributes {stable_mosaic.version = 11 : i64} {
  func.func @kernel(%arg0: i32, %arg1: memref<1x6x6x128xbf16, #tpu.memory_space<vmem>>, %arg2: memref<1x6x6x128xbf16, #tpu.memory_space<vmem>>, %arg3: memref<3x3x128x128xbf16, #tpu.memory_space<vmem>>, %arg4: memref<3x3x128x128xbf16, #tpu.memory_space<vmem>>, %arg5: memref<1x128xf32, #tpu.memory_space<vmem>>, %arg6: memref<1x4x4x128xbf16, #tpu.memory_space<vmem>>) attributes {dimension_semantics = [#tpu.dimension_semantics<parallel>], iteration_bounds = array<i64: 2>, scalar_prefetch = 0 : i64, scratch_operands = 0 : i64, tpu.core_type = #tpu.core_type<tc>, window_params = [{transform_indices = @transform_0, window_bounds = array<i64: 1, 6, 6, 128>}, {transform_indices = @transform_1, window_bounds = array<i64: 1, 6, 6, 128>}, {pipeline_mode = #tpu.pipeline_mode<synchronous>, transform_indices = @transform_2, window_bounds = array<i64: 3, 3, 128, 128>}, {pipeline_mode = #tpu.pipeline_mode<synchronous>, transform_indices = @transform_3, window_bounds = array<i64: 3, 3, 128, 128>}, {pipeline_mode = #tpu.pipeline_mode<synchronous>, transform_indices = @transform_4, window_bounds = array<i64: 1, 128>}, {transform_indices = @transform_5, window_bounds = array<i64: 1, 4, 4, 128>}]} {
    %c0_i32 = arith.constant 0 : i32
    %c4_i32 = arith.constant 4 : i32
    %0 = arith.addi %c0_i32, %c4_i32 : i32
    %c1_i32 = arith.constant 1 : i32
    scf.for %arg7 = %c0_i32 to %0 step %c1_i32  : i32 {
      %cst = arith.constant 0.000000e+00 : f32
      %1 = vector.broadcast %cst : f32 to vector<4x128xf32>
      %c0_i32_1 = arith.constant 0 : i32
      %2 = arith.addi %arg7, %c0_i32_1 : i32
      %c0 = arith.constant 0 : index
      %3 = arith.index_cast %2 : i32 to index
      %c0_2 = arith.constant 0 : index
      %c0_3 = arith.constant 0 : index
      %4 = vector.load %arg1[%c0, %3, %c0_2, %c0_3] : memref<1x6x6x128xbf16, #tpu.memory_space<vmem>>, vector<1x1x6x128xbf16>
      %5 = vector.shape_cast %4 : vector<1x1x6x128xbf16> to vector<6x128xbf16>
      %6 = vector.extract_strided_slice %5 {offsets = [0, 0], sizes = [4, 128], strides = [1, 1]} : vector<6x128xbf16> to vector<4x128xbf16>
      %c0_4 = arith.constant 0 : index
      %c0_5 = arith.constant 0 : index
      %c0_6 = arith.constant 0 : index
      %c0_7 = arith.constant 0 : index
      %7 = vector.load %arg3[%c0_4, %c0_5, %c0_6, %c0_7] : memref<3x3x128x128xbf16, #tpu.memory_space<vmem>>, vector<1x1x128x128xbf16>
      %8 = vector.shape_cast %7 : vector<1x1x128x128xbf16> to vector<128x128xbf16>
      %cst_8 = arith.constant dense<0.000000e+00> : vector<4x128xf32>
      %9 = tpu.matmul %6, %8, %cst_8 {dimension_numbers = #tpu.dot_dimension_numbers<[1], [0], [0], [1], [0, 0, 1, 1], [], []>} : vector<4x128xbf16>, vector<128x128xbf16>, vector<4x128xf32> -> vector<4x128xf32>
      %10 = arith.addf %1, %9 : vector<4x128xf32>
      %c0_i32_9 = arith.constant 0 : i32
      %11 = arith.addi %arg7, %c0_i32_9 : i32
      %c0_10 = arith.constant 0 : index
      %12 = arith.index_cast %11 : i32 to index
      %c0_11 = arith.constant 0 : index
      %c0_12 = arith.constant 0 : index
      %13 = vector.load %arg1[%c0_10, %12, %c0_11, %c0_12] : memref<1x6x6x128xbf16, #tpu.memory_space<vmem>>, vector<1x1x6x128xbf16>
      %14 = vector.shape_cast %13 : vector<1x1x6x128xbf16> to vector<6x128xbf16>
      %15 = vector.extract_strided_slice %14 {offsets = [1, 0], sizes = [4, 128], strides = [1, 1]} : vector<6x128xbf16> to vector<4x128xbf16>
      %c0_13 = arith.constant 0 : index
      %c1 = arith.constant 1 : index
      %c0_14 = arith.constant 0 : index
      %c0_15 = arith.constant 0 : index
      %16 = vector.load %arg3[%c0_13, %c1, %c0_14, %c0_15] : memref<3x3x128x128xbf16, #tpu.memory_space<vmem>>, vector<1x1x128x128xbf16>
      %17 = vector.shape_cast %16 : vector<1x1x128x128xbf16> to vector<128x128xbf16>
      %cst_16 = arith.constant dense<0.000000e+00> : vector<4x128xf32>
      %18 = tpu.matmul %15, %17, %cst_16 {dimension_numbers = #tpu.dot_dimension_numbers<[1], [0], [0], [1], [0, 0, 1, 1], [], []>} : vector<4x128xbf16>, vector<128x128xbf16>, vector<4x128xf32> -> vector<4x128xf32>
      %19 = arith.addf %10, %18 : vector<4x128xf32>
      %c0_i32_17 = arith.constant 0 : i32
      %20 = arith.addi %arg7, %c0_i32_17 : i32
      %c0_18 = arith.constant 0 : index
      %21 = arith.index_cast %20 : i32 to index
      %c0_19 = arith.constant 0 : index
      %c0_20 = arith.constant 0 : index
      %22 = vector.load %arg1[%c0_18, %21, %c0_19, %c0_20] : memref<1x6x6x128xbf16, #tpu.memory_space<vmem>>, vector<1x1x6x128xbf16>
      %23 = vector.shape_cast %22 : vector<1x1x6x128xbf16> to vector<6x128xbf16>
      %24 = vector.extract_strided_slice %23 {offsets = [2, 0], sizes = [4, 128], strides = [1, 1]} : vector<6x128xbf16> to vector<4x128xbf16>
      %c0_21 = arith.constant 0 : index
      %c2 = arith.constant 2 : index
      %c0_22 = arith.constant 0 : index
      %c0_23 = arith.constant 0 : index
      %25 = vector.load %arg3[%c0_21, %c2, %c0_22, %c0_23] : memref<3x3x128x128xbf16, #tpu.memory_space<vmem>>, vector<1x1x128x128xbf16>
      %26 = vector.shape_cast %25 : vector<1x1x128x128xbf16> to vector<128x128xbf16>
      %cst_24 = arith.constant dense<0.000000e+00> : vector<4x128xf32>
      %27 = tpu.matmul %24, %26, %cst_24 {dimension_numbers = #tpu.dot_dimension_numbers<[1], [0], [0], [1], [0, 0, 1, 1], [], []>} : vector<4x128xbf16>, vector<128x128xbf16>, vector<4x128xf32> -> vector<4x128xf32>
      %28 = arith.addf %19, %27 : vector<4x128xf32>
      %c1_i32_25 = arith.constant 1 : i32
      %29 = arith.addi %arg7, %c1_i32_25 : i32
      %c0_26 = arith.constant 0 : index
      %30 = arith.index_cast %29 : i32 to index
      %c0_27 = arith.constant 0 : index
      %c0_28 = arith.constant 0 : index
      %31 = vector.load %arg1[%c0_26, %30, %c0_27, %c0_28] : memref<1x6x6x128xbf16, #tpu.memory_space<vmem>>, vector<1x1x6x128xbf16>
      %32 = vector.shape_cast %31 : vector<1x1x6x128xbf16> to vector<6x128xbf16>
      %33 = vector.extract_strided_slice %32 {offsets = [0, 0], sizes = [4, 128], strides = [1, 1]} : vector<6x128xbf16> to vector<4x128xbf16>
      %c1_29 = arith.constant 1 : index
      %c0_30 = arith.constant 0 : index
      %c0_31 = arith.constant 0 : index
      %c0_32 = arith.constant 0 : index
      %34 = vector.load %arg3[%c1_29, %c0_30, %c0_31, %c0_32] : memref<3x3x128x128xbf16, #tpu.memory_space<vmem>>, vector<1x1x128x128xbf16>
      %35 = vector.shape_cast %34 : vector<1x1x128x128xbf16> to vector<128x128xbf16>
      %cst_33 = arith.constant dense<0.000000e+00> : vector<4x128xf32>
      %36 = tpu.matmul %33, %35, %cst_33 {dimension_numbers = #tpu.dot_dimension_numbers<[1], [0], [0], [1], [0, 0, 1, 1], [], []>} : vector<4x128xbf16>, vector<128x128xbf16>, vector<4x128xf32> -> vector<4x128xf32>
      %37 = arith.addf %28, %36 : vector<4x128xf32>
      %c1_i32_34 = arith.constant 1 : i32
      %38 = arith.addi %arg7, %c1_i32_34 : i32
      %c0_35 = arith.constant 0 : index
      %39 = arith.index_cast %38 : i32 to index
      %c0_36 = arith.constant 0 : index
      %c0_37 = arith.constant 0 : index
      %40 = vector.load %arg1[%c0_35, %39, %c0_36, %c0_37] : memref<1x6x6x128xbf16, #tpu.memory_space<vmem>>, vector<1x1x6x128xbf16>
      %41 = vector.shape_cast %40 : vector<1x1x6x128xbf16> to vector<6x128xbf16>
      %42 = vector.extract_strided_slice %41 {offsets = [1, 0], sizes = [4, 128], strides = [1, 1]} : vector<6x128xbf16> to vector<4x128xbf16>
      %c1_38 = arith.constant 1 : index
      %c1_39 = arith.constant 1 : index
      %c0_40 = arith.constant 0 : index
      %c0_41 = arith.constant 0 : index
      %43 = vector.load %arg3[%c1_38, %c1_39, %c0_40, %c0_41] : memref<3x3x128x128xbf16, #tpu.memory_space<vmem>>, vector<1x1x128x128xbf16>
      %44 = vector.shape_cast %43 : vector<1x1x128x128xbf16> to vector<128x128xbf16>
      %cst_42 = arith.constant dense<0.000000e+00> : vector<4x128xf32>
      %45 = tpu.matmul %42, %44, %cst_42 {dimension_numbers = #tpu.dot_dimension_numbers<[1], [0], [0], [1], [0, 0, 1, 1], [], []>} : vector<4x128xbf16>, vector<128x128xbf16>, vector<4x128xf32> -> vector<4x128xf32>
      %46 = arith.addf %37, %45 : vector<4x128xf32>
      %c1_i32_43 = arith.constant 1 : i32
      %47 = arith.addi %arg7, %c1_i32_43 : i32
      %c0_44 = arith.constant 0 : index
      %48 = arith.index_cast %47 : i32 to index
      %c0_45 = arith.constant 0 : index
      %c0_46 = arith.constant 0 : index
      %49 = vector.load %arg1[%c0_44, %48, %c0_45, %c0_46] : memref<1x6x6x128xbf16, #tpu.memory_space<vmem>>, vector<1x1x6x128xbf16>
      %50 = vector.shape_cast %49 : vector<1x1x6x128xbf16> to vector<6x128xbf16>
      %51 = vector.extract_strided_slice %50 {offsets = [2, 0], sizes = [4, 128], strides = [1, 1]} : vector<6x128xbf16> to vector<4x128xbf16>
      %c1_47 = arith.constant 1 : index
      %c2_48 = arith.constant 2 : index
      %c0_49 = arith.constant 0 : index
      %c0_50 = arith.constant 0 : index
      %52 = vector.load %arg3[%c1_47, %c2_48, %c0_49, %c0_50] : memref<3x3x128x128xbf16, #tpu.memory_space<vmem>>, vector<1x1x128x128xbf16>
      %53 = vector.shape_cast %52 : vector<1x1x128x128xbf16> to vector<128x128xbf16>
      %cst_51 = arith.constant dense<0.000000e+00> : vector<4x128xf32>
      %54 = tpu.matmul %51, %53, %cst_51 {dimension_numbers = #tpu.dot_dimension_numbers<[1], [0], [0], [1], [0, 0, 1, 1], [], []>} : vector<4x128xbf16>, vector<128x128xbf16>, vector<4x128xf32> -> vector<4x128xf32>
      %55 = arith.addf %46, %54 : vector<4x128xf32>
      %c2_i32 = arith.constant 2 : i32
      %56 = arith.addi %arg7, %c2_i32 : i32
      %c0_52 = arith.constant 0 : index
      %57 = arith.index_cast %56 : i32 to index
      %c0_53 = arith.constant 0 : index
      %c0_54 = arith.constant 0 : index
      %58 = vector.load %arg1[%c0_52, %57, %c0_53, %c0_54] : memref<1x6x6x128xbf16, #tpu.memory_space<vmem>>, vector<1x1x6x128xbf16>
      %59 = vector.shape_cast %58 : vector<1x1x6x128xbf16> to vector<6x128xbf16>
      %60 = vector.extract_strided_slice %59 {offsets = [0, 0], sizes = [4, 128], strides = [1, 1]} : vector<6x128xbf16> to vector<4x128xbf16>
      %c2_55 = arith.constant 2 : index
      %c0_56 = arith.constant 0 : index
      %c0_57 = arith.constant 0 : index
      %c0_58 = arith.constant 0 : index
      %61 = vector.load %arg3[%c2_55, %c0_56, %c0_57, %c0_58] : memref<3x3x128x128xbf16, #tpu.memory_space<vmem>>, vector<1x1x128x128xbf16>
      %62 = vector.shape_cast %61 : vector<1x1x128x128xbf16> to vector<128x128xbf16>
      %cst_59 = arith.constant dense<0.000000e+00> : vector<4x128xf32>
      %63 = tpu.matmul %60, %62, %cst_59 {dimension_numbers = #tpu.dot_dimension_numbers<[1], [0], [0], [1], [0, 0, 1, 1], [], []>} : vector<4x128xbf16>, vector<128x128xbf16>, vector<4x128xf32> -> vector<4x128xf32>
      %64 = arith.addf %55, %63 : vector<4x128xf32>
      %c2_i32_60 = arith.constant 2 : i32
      %65 = arith.addi %arg7, %c2_i32_60 : i32
      %c0_61 = arith.constant 0 : index
      %66 = arith.index_cast %65 : i32 to index
      %c0_62 = arith.constant 0 : index
      %c0_63 = arith.constant 0 : index
      %67 = vector.load %arg1[%c0_61, %66, %c0_62, %c0_63] : memref<1x6x6x128xbf16, #tpu.memory_space<vmem>>, vector<1x1x6x128xbf16>
      %68 = vector.shape_cast %67 : vector<1x1x6x128xbf16> to vector<6x128xbf16>
      %69 = vector.extract_strided_slice %68 {offsets = [1, 0], sizes = [4, 128], strides = [1, 1]} : vector<6x128xbf16> to vector<4x128xbf16>
      %c2_64 = arith.constant 2 : index
      %c1_65 = arith.constant 1 : index
      %c0_66 = arith.constant 0 : index
      %c0_67 = arith.constant 0 : index
      %70 = vector.load %arg3[%c2_64, %c1_65, %c0_66, %c0_67] : memref<3x3x128x128xbf16, #tpu.memory_space<vmem>>, vector<1x1x128x128xbf16>
      %71 = vector.shape_cast %70 : vector<1x1x128x128xbf16> to vector<128x128xbf16>
      %cst_68 = arith.constant dense<0.000000e+00> : vector<4x128xf32>
      %72 = tpu.matmul %69, %71, %cst_68 {dimension_numbers = #tpu.dot_dimension_numbers<[1], [0], [0], [1], [0, 0, 1, 1], [], []>} : vector<4x128xbf16>, vector<128x128xbf16>, vector<4x128xf32> -> vector<4x128xf32>
      %73 = arith.addf %64, %72 : vector<4x128xf32>
      %c2_i32_69 = arith.constant 2 : i32
      %74 = arith.addi %arg7, %c2_i32_69 : i32
      %c0_70 = arith.constant 0 : index
      %75 = arith.index_cast %74 : i32 to index
      %c0_71 = arith.constant 0 : index
      %c0_72 = arith.constant 0 : index
      %76 = vector.load %arg1[%c0_70, %75, %c0_71, %c0_72] : memref<1x6x6x128xbf16, #tpu.memory_space<vmem>>, vector<1x1x6x128xbf16>
      %77 = vector.shape_cast %76 : vector<1x1x6x128xbf16> to vector<6x128xbf16>
      %78 = vector.extract_strided_slice %77 {offsets = [2, 0], sizes = [4, 128], strides = [1, 1]} : vector<6x128xbf16> to vector<4x128xbf16>
      %c2_73 = arith.constant 2 : index
      %c2_74 = arith.constant 2 : index
      %c0_75 = arith.constant 0 : index
      %c0_76 = arith.constant 0 : index
      %79 = vector.load %arg3[%c2_73, %c2_74, %c0_75, %c0_76] : memref<3x3x128x128xbf16, #tpu.memory_space<vmem>>, vector<1x1x128x128xbf16>
      %80 = vector.shape_cast %79 : vector<1x1x128x128xbf16> to vector<128x128xbf16>
      %cst_77 = arith.constant dense<0.000000e+00> : vector<4x128xf32>
      %81 = tpu.matmul %78, %80, %cst_77 {dimension_numbers = #tpu.dot_dimension_numbers<[1], [0], [0], [1], [0, 0, 1, 1], [], []>} : vector<4x128xbf16>, vector<128x128xbf16>, vector<4x128xf32> -> vector<4x128xf32>
      %82 = arith.addf %73, %81 : vector<4x128xf32>
      %c0_i32_78 = arith.constant 0 : i32
      %83 = arith.addi %arg7, %c0_i32_78 : i32
      %c0_79 = arith.constant 0 : index
      %84 = arith.index_cast %83 : i32 to index
      %c0_80 = arith.constant 0 : index
      %c0_81 = arith.constant 0 : index
      %85 = vector.load %arg2[%c0_79, %84, %c0_80, %c0_81] : memref<1x6x6x128xbf16, #tpu.memory_space<vmem>>, vector<1x1x6x128xbf16>
      %86 = vector.shape_cast %85 : vector<1x1x6x128xbf16> to vector<6x128xbf16>
      %87 = vector.extract_strided_slice %86 {offsets = [0, 0], sizes = [4, 128], strides = [1, 1]} : vector<6x128xbf16> to vector<4x128xbf16>
      %c0_82 = arith.constant 0 : index
      %c0_83 = arith.constant 0 : index
      %c0_84 = arith.constant 0 : index
      %c0_85 = arith.constant 0 : index
      %88 = vector.load %arg4[%c0_82, %c0_83, %c0_84, %c0_85] : memref<3x3x128x128xbf16, #tpu.memory_space<vmem>>, vector<1x1x128x128xbf16>
      %89 = vector.shape_cast %88 : vector<1x1x128x128xbf16> to vector<128x128xbf16>
      %cst_86 = arith.constant dense<0.000000e+00> : vector<4x128xf32>
      %90 = tpu.matmul %87, %89, %cst_86 {dimension_numbers = #tpu.dot_dimension_numbers<[1], [0], [0], [1], [0, 0, 1, 1], [], []>} : vector<4x128xbf16>, vector<128x128xbf16>, vector<4x128xf32> -> vector<4x128xf32>
      %91 = arith.addf %82, %90 : vector<4x128xf32>
      %c0_i32_87 = arith.constant 0 : i32
      %92 = arith.addi %arg7, %c0_i32_87 : i32
      %c0_88 = arith.constant 0 : index
      %93 = arith.index_cast %92 : i32 to index
      %c0_89 = arith.constant 0 : index
      %c0_90 = arith.constant 0 : index
      %94 = vector.load %arg2[%c0_88, %93, %c0_89, %c0_90] : memref<1x6x6x128xbf16, #tpu.memory_space<vmem>>, vector<1x1x6x128xbf16>
      %95 = vector.shape_cast %94 : vector<1x1x6x128xbf16> to vector<6x128xbf16>
      %96 = vector.extract_strided_slice %95 {offsets = [1, 0], sizes = [4, 128], strides = [1, 1]} : vector<6x128xbf16> to vector<4x128xbf16>
      %c0_91 = arith.constant 0 : index
      %c1_92 = arith.constant 1 : index
      %c0_93 = arith.constant 0 : index
      %c0_94 = arith.constant 0 : index
      %97 = vector.load %arg4[%c0_91, %c1_92, %c0_93, %c0_94] : memref<3x3x128x128xbf16, #tpu.memory_space<vmem>>, vector<1x1x128x128xbf16>
      %98 = vector.shape_cast %97 : vector<1x1x128x128xbf16> to vector<128x128xbf16>
      %cst_95 = arith.constant dense<0.000000e+00> : vector<4x128xf32>
      %99 = tpu.matmul %96, %98, %cst_95 {dimension_numbers = #tpu.dot_dimension_numbers<[1], [0], [0], [1], [0, 0, 1, 1], [], []>} : vector<4x128xbf16>, vector<128x128xbf16>, vector<4x128xf32> -> vector<4x128xf32>
      %100 = arith.addf %91, %99 : vector<4x128xf32>
      %c0_i32_96 = arith.constant 0 : i32
      %101 = arith.addi %arg7, %c0_i32_96 : i32
      %c0_97 = arith.constant 0 : index
      %102 = arith.index_cast %101 : i32 to index
      %c0_98 = arith.constant 0 : index
      %c0_99 = arith.constant 0 : index
      %103 = vector.load %arg2[%c0_97, %102, %c0_98, %c0_99] : memref<1x6x6x128xbf16, #tpu.memory_space<vmem>>, vector<1x1x6x128xbf16>
      %104 = vector.shape_cast %103 : vector<1x1x6x128xbf16> to vector<6x128xbf16>
      %105 = vector.extract_strided_slice %104 {offsets = [2, 0], sizes = [4, 128], strides = [1, 1]} : vector<6x128xbf16> to vector<4x128xbf16>
      %c0_100 = arith.constant 0 : index
      %c2_101 = arith.constant 2 : index
      %c0_102 = arith.constant 0 : index
      %c0_103 = arith.constant 0 : index
      %106 = vector.load %arg4[%c0_100, %c2_101, %c0_102, %c0_103] : memref<3x3x128x128xbf16, #tpu.memory_space<vmem>>, vector<1x1x128x128xbf16>
      %107 = vector.shape_cast %106 : vector<1x1x128x128xbf16> to vector<128x128xbf16>
      %cst_104 = arith.constant dense<0.000000e+00> : vector<4x128xf32>
      %108 = tpu.matmul %105, %107, %cst_104 {dimension_numbers = #tpu.dot_dimension_numbers<[1], [0], [0], [1], [0, 0, 1, 1], [], []>} : vector<4x128xbf16>, vector<128x128xbf16>, vector<4x128xf32> -> vector<4x128xf32>
      %109 = arith.addf %100, %108 : vector<4x128xf32>
      %c1_i32_105 = arith.constant 1 : i32
      %110 = arith.addi %arg7, %c1_i32_105 : i32
      %c0_106 = arith.constant 0 : index
      %111 = arith.index_cast %110 : i32 to index
      %c0_107 = arith.constant 0 : index
      %c0_108 = arith.constant 0 : index
      %112 = vector.load %arg2[%c0_106, %111, %c0_107, %c0_108] : memref<1x6x6x128xbf16, #tpu.memory_space<vmem>>, vector<1x1x6x128xbf16>
      %113 = vector.shape_cast %112 : vector<1x1x6x128xbf16> to vector<6x128xbf16>
      %114 = vector.extract_strided_slice %113 {offsets = [0, 0], sizes = [4, 128], strides = [1, 1]} : vector<6x128xbf16> to vector<4x128xbf16>
      %c1_109 = arith.constant 1 : index
      %c0_110 = arith.constant 0 : index
      %c0_111 = arith.constant 0 : index
      %c0_112 = arith.constant 0 : index
      %115 = vector.load %arg4[%c1_109, %c0_110, %c0_111, %c0_112] : memref<3x3x128x128xbf16, #tpu.memory_space<vmem>>, vector<1x1x128x128xbf16>
      %116 = vector.shape_cast %115 : vector<1x1x128x128xbf16> to vector<128x128xbf16>
      %cst_113 = arith.constant dense<0.000000e+00> : vector<4x128xf32>
      %117 = tpu.matmul %114, %116, %cst_113 {dimension_numbers = #tpu.dot_dimension_numbers<[1], [0], [0], [1], [0, 0, 1, 1], [], []>} : vector<4x128xbf16>, vector<128x128xbf16>, vector<4x128xf32> -> vector<4x128xf32>
      %118 = arith.addf %109, %117 : vector<4x128xf32>
      %c1_i32_114 = arith.constant 1 : i32
      %119 = arith.addi %arg7, %c1_i32_114 : i32
      %c0_115 = arith.constant 0 : index
      %120 = arith.index_cast %119 : i32 to index
      %c0_116 = arith.constant 0 : index
      %c0_117 = arith.constant 0 : index
      %121 = vector.load %arg2[%c0_115, %120, %c0_116, %c0_117] : memref<1x6x6x128xbf16, #tpu.memory_space<vmem>>, vector<1x1x6x128xbf16>
      %122 = vector.shape_cast %121 : vector<1x1x6x128xbf16> to vector<6x128xbf16>
      %123 = vector.extract_strided_slice %122 {offsets = [1, 0], sizes = [4, 128], strides = [1, 1]} : vector<6x128xbf16> to vector<4x128xbf16>
      %c1_118 = arith.constant 1 : index
      %c1_119 = arith.constant 1 : index
      %c0_120 = arith.constant 0 : index
      %c0_121 = arith.constant 0 : index
      %124 = vector.load %arg4[%c1_118, %c1_119, %c0_120, %c0_121] : memref<3x3x128x128xbf16, #tpu.memory_space<vmem>>, vector<1x1x128x128xbf16>
      %125 = vector.shape_cast %124 : vector<1x1x128x128xbf16> to vector<128x128xbf16>
      %cst_122 = arith.constant dense<0.000000e+00> : vector<4x128xf32>
      %126 = tpu.matmul %123, %125, %cst_122 {dimension_numbers = #tpu.dot_dimension_numbers<[1], [0], [0], [1], [0, 0, 1, 1], [], []>} : vector<4x128xbf16>, vector<128x128xbf16>, vector<4x128xf32> -> vector<4x128xf32>
      %127 = arith.addf %118, %126 : vector<4x128xf32>
      %c1_i32_123 = arith.constant 1 : i32
      %128 = arith.addi %arg7, %c1_i32_123 : i32
      %c0_124 = arith.constant 0 : index
      %129 = arith.index_cast %128 : i32 to index
      %c0_125 = arith.constant 0 : index
      %c0_126 = arith.constant 0 : index
      %130 = vector.load %arg2[%c0_124, %129, %c0_125, %c0_126] : memref<1x6x6x128xbf16, #tpu.memory_space<vmem>>, vector<1x1x6x128xbf16>
      %131 = vector.shape_cast %130 : vector<1x1x6x128xbf16> to vector<6x128xbf16>
      %132 = vector.extract_strided_slice %131 {offsets = [2, 0], sizes = [4, 128], strides = [1, 1]} : vector<6x128xbf16> to vector<4x128xbf16>
      %c1_127 = arith.constant 1 : index
      %c2_128 = arith.constant 2 : index
      %c0_129 = arith.constant 0 : index
      %c0_130 = arith.constant 0 : index
      %133 = vector.load %arg4[%c1_127, %c2_128, %c0_129, %c0_130] : memref<3x3x128x128xbf16, #tpu.memory_space<vmem>>, vector<1x1x128x128xbf16>
      %134 = vector.shape_cast %133 : vector<1x1x128x128xbf16> to vector<128x128xbf16>
      %cst_131 = arith.constant dense<0.000000e+00> : vector<4x128xf32>
      %135 = tpu.matmul %132, %134, %cst_131 {dimension_numbers = #tpu.dot_dimension_numbers<[1], [0], [0], [1], [0, 0, 1, 1], [], []>} : vector<4x128xbf16>, vector<128x128xbf16>, vector<4x128xf32> -> vector<4x128xf32>
      %136 = arith.addf %127, %135 : vector<4x128xf32>
      %c2_i32_132 = arith.constant 2 : i32
      %137 = arith.addi %arg7, %c2_i32_132 : i32
      %c0_133 = arith.constant 0 : index
      %138 = arith.index_cast %137 : i32 to index
      %c0_134 = arith.constant 0 : index
      %c0_135 = arith.constant 0 : index
      %139 = vector.load %arg2[%c0_133, %138, %c0_134, %c0_135] : memref<1x6x6x128xbf16, #tpu.memory_space<vmem>>, vector<1x1x6x128xbf16>
      %140 = vector.shape_cast %139 : vector<1x1x6x128xbf16> to vector<6x128xbf16>
      %141 = vector.extract_strided_slice %140 {offsets = [0, 0], sizes = [4, 128], strides = [1, 1]} : vector<6x128xbf16> to vector<4x128xbf16>
      %c2_136 = arith.constant 2 : index
      %c0_137 = arith.constant 0 : index
      %c0_138 = arith.constant 0 : index
      %c0_139 = arith.constant 0 : index
      %142 = vector.load %arg4[%c2_136, %c0_137, %c0_138, %c0_139] : memref<3x3x128x128xbf16, #tpu.memory_space<vmem>>, vector<1x1x128x128xbf16>
      %143 = vector.shape_cast %142 : vector<1x1x128x128xbf16> to vector<128x128xbf16>
      %cst_140 = arith.constant dense<0.000000e+00> : vector<4x128xf32>
      %144 = tpu.matmul %141, %143, %cst_140 {dimension_numbers = #tpu.dot_dimension_numbers<[1], [0], [0], [1], [0, 0, 1, 1], [], []>} : vector<4x128xbf16>, vector<128x128xbf16>, vector<4x128xf32> -> vector<4x128xf32>
      %145 = arith.addf %136, %144 : vector<4x128xf32>
      %c2_i32_141 = arith.constant 2 : i32
      %146 = arith.addi %arg7, %c2_i32_141 : i32
      %c0_142 = arith.constant 0 : index
      %147 = arith.index_cast %146 : i32 to index
      %c0_143 = arith.constant 0 : index
      %c0_144 = arith.constant 0 : index
      %148 = vector.load %arg2[%c0_142, %147, %c0_143, %c0_144] : memref<1x6x6x128xbf16, #tpu.memory_space<vmem>>, vector<1x1x6x128xbf16>
      %149 = vector.shape_cast %148 : vector<1x1x6x128xbf16> to vector<6x128xbf16>
      %150 = vector.extract_strided_slice %149 {offsets = [1, 0], sizes = [4, 128], strides = [1, 1]} : vector<6x128xbf16> to vector<4x128xbf16>
      %c2_145 = arith.constant 2 : index
      %c1_146 = arith.constant 1 : index
      %c0_147 = arith.constant 0 : index
      %c0_148 = arith.constant 0 : index
      %151 = vector.load %arg4[%c2_145, %c1_146, %c0_147, %c0_148] : memref<3x3x128x128xbf16, #tpu.memory_space<vmem>>, vector<1x1x128x128xbf16>
      %152 = vector.shape_cast %151 : vector<1x1x128x128xbf16> to vector<128x128xbf16>
      %cst_149 = arith.constant dense<0.000000e+00> : vector<4x128xf32>
      %153 = tpu.matmul %150, %152, %cst_149 {dimension_numbers = #tpu.dot_dimension_numbers<[1], [0], [0], [1], [0, 0, 1, 1], [], []>} : vector<4x128xbf16>, vector<128x128xbf16>, vector<4x128xf32> -> vector<4x128xf32>
      %154 = arith.addf %145, %153 : vector<4x128xf32>
      %c2_i32_150 = arith.constant 2 : i32
      %155 = arith.addi %arg7, %c2_i32_150 : i32
      %c0_151 = arith.constant 0 : index
      %156 = arith.index_cast %155 : i32 to index
      %c0_152 = arith.constant 0 : index
      %c0_153 = arith.constant 0 : index
      %157 = vector.load %arg2[%c0_151, %156, %c0_152, %c0_153] : memref<1x6x6x128xbf16, #tpu.memory_space<vmem>>, vector<1x1x6x128xbf16>
      %158 = vector.shape_cast %157 : vector<1x1x6x128xbf16> to vector<6x128xbf16>
      %159 = vector.extract_strided_slice %158 {offsets = [2, 0], sizes = [4, 128], strides = [1, 1]} : vector<6x128xbf16> to vector<4x128xbf16>
      %c2_154 = arith.constant 2 : index
      %c2_155 = arith.constant 2 : index
      %c0_156 = arith.constant 0 : index
      %c0_157 = arith.constant 0 : index
      %160 = vector.load %arg4[%c2_154, %c2_155, %c0_156, %c0_157] : memref<3x3x128x128xbf16, #tpu.memory_space<vmem>>, vector<1x1x128x128xbf16>
      %161 = vector.shape_cast %160 : vector<1x1x128x128xbf16> to vector<128x128xbf16>
      %cst_158 = arith.constant dense<0.000000e+00> : vector<4x128xf32>
      %162 = tpu.matmul %159, %161, %cst_158 {dimension_numbers = #tpu.dot_dimension_numbers<[1], [0], [0], [1], [0, 0, 1, 1], [], []>} : vector<4x128xbf16>, vector<128x128xbf16>, vector<4x128xf32> -> vector<4x128xf32>
      %163 = arith.addf %154, %162 : vector<4x128xf32>
      %c0_159 = arith.constant 0 : index
      %c0_160 = arith.constant 0 : index
      %164 = vector.load %arg5[%c0_159, %c0_160] : memref<1x128xf32, #tpu.memory_space<vmem>>, vector<1x128xf32>
      %165 = vector.broadcast %164 : vector<1x128xf32> to vector<4x128xf32>
      %166 = arith.addf %163, %165 : vector<4x128xf32>
      %cst_161 = arith.constant 0.000000e+00 : f32
      %167 = vector.broadcast %cst_161 : f32 to vector<4x128xf32>
      %168 = arith.cmpf oge, %166, %167 : vector<4x128xf32>
      %cst_162 = arith.constant 2.000000e-01 : f32
      %169 = vector.broadcast %cst_162 : f32 to vector<4x128xf32>
      %170 = arith.mulf %169, %166 : vector<4x128xf32>
      %171 = arith.select %168, %166, %170 : vector<4x128xi1>, vector<4x128xf32>
      %172 = arith.truncf %171 : vector<4x128xf32> to vector<4x128xbf16>
      %c0_163 = arith.constant 0 : index
      %173 = arith.index_cast %arg7 : i32 to index
      %c0_164 = arith.constant 0 : index
      %c0_165 = arith.constant 0 : index
      %174 = vector.load %arg6[%c0_163, %173, %c0_164, %c0_165] : memref<1x4x4x128xbf16, #tpu.memory_space<vmem>>, vector<1x1x4x128xbf16>
      %175 = vector.shape_cast %174 : vector<1x1x4x128xbf16> to vector<4x128xbf16>
      %176 = vector.shape_cast %172 : vector<4x128xbf16> to vector<1x1x4x128xbf16>
      tpu.vector_store %arg6[%c0_163, %173, %c0_164, %c0_165], %176 {strides = array<i32>} : memref<1x4x4x128xbf16, #tpu.memory_space<vmem>>, vector<1x1x4x128xbf16>,
    }
    %c4_i32_0 = arith.constant 4 : i32
    return
  }
  func.func @transform_0(%arg0: i32) -> (i32, i32, i32, i32) {
    %c0_i32 = arith.constant 0 : i32
    %c0_i32_0 = arith.constant 0 : i32
    %c0_i32_1 = arith.constant 0 : i32
    %c0_i32_2 = arith.constant 0 : i32
    return %arg0, %c0_i32, %c0_i32_0, %c0_i32_1 : i32, i32, i32, i32
  }
  func.func @transform_1(%arg0: i32) -> (i32, i32, i32, i32) {
    %c0_i32 = arith.constant 0 : i32
    %c0_i32_0 = arith.constant 0 : i32
    %c0_i32_1 = arith.constant 0 : i32
    %c0_i32_2 = arith.constant 0 : i32
    return %arg0, %c0_i32, %c0_i32_0, %c0_i32_1 : i32, i32, i32, i32
  }
  func.func @transform_2(%arg0: i32) -> (i32, i32, i32, i32) {
    %c0_i32 = arith.constant 0 : i32
    %c0_i32_0 = arith.constant 0 : i32
    %c0_i32_1 = arith.constant 0 : i32
    %c0_i32_2 = arith.constant 0 : i32
    %c0_i32_3 = arith.constant 0 : i32
    return %c0_i32, %c0_i32_0, %c0_i32_1, %c0_i32_2 : i32, i32, i32, i32
  }
  func.func @transform_3(%arg0: i32) -> (i32, i32, i32, i32) {
    %c0_i32 = arith.constant 0 : i32
    %c0_i32_0 = arith.constant 0 : i32
    %c0_i32_1 = arith.constant 0 : i32
    %c0_i32_2 = arith.constant 0 : i32
    %c0_i32_3 = arith.constant 0 : i32
    return %c0_i32, %c0_i32_0, %c0_i32_1, %c0_i32_2 : i32, i32, i32, i32
  }
  func.func @transform_4(%arg0: i32) -> (i32, i32) {
    %c0_i32 = arith.constant 0 : i32
    %c0_i32_0 = arith.constant 0 : i32
    %c0_i32_1 = arith.constant 0 : i32
    return %c0_i32, %c0_i32_0 : i32, i32
  }
  func.func @transform_5(%arg0: i32) -> (i32, i32, i32, i32) {
    %c0_i32 = arith.constant 0 : i32
    %c0_i32_0 = arith.constant 0 : i32
    %c0_i32_1 = arith.constant 0 : i32
    %c0_i32_2 = arith.constant 0 : i32
    return %arg0, %c0_i32, %c0_i32_0, %c0_i32_1 : i32, i32, i32, i32
  }
}

module attributes {stable_mosaic.version = 11 : i64} {
  func.func @kernel(%arg0: i32, %arg1: memref<1x10x10x128xbf16, #tpu.memory_space<vmem>>, %arg2: memref<1x10x10x128xbf16, #tpu.memory_space<vmem>>, %arg3: memref<3x3x128x128xbf16, #tpu.memory_space<vmem>>, %arg4: memref<3x3x128x128xbf16, #tpu.memory_space<vmem>>, %arg5: memref<1x128xf32, #tpu.memory_space<vmem>>, %arg6: memref<1x8x8x128xbf16, #tpu.memory_space<vmem>>) attributes {dimension_semantics = [#tpu.dimension_semantics<parallel>], iteration_bounds = array<i64: 2>, scalar_prefetch = 0 : i64, scratch_operands = 0 : i64, tpu.core_type = #tpu.core_type<tc>, window_params = [{transform_indices = @transform_0, window_bounds = array<i64: 1, 10, 10, 128>}, {transform_indices = @transform_1, window_bounds = array<i64: 1, 10, 10, 128>}, {pipeline_mode = #tpu.pipeline_mode<synchronous>, transform_indices = @transform_2, window_bounds = array<i64: 3, 3, 128, 128>}, {pipeline_mode = #tpu.pipeline_mode<synchronous>, transform_indices = @transform_3, window_bounds = array<i64: 3, 3, 128, 128>}, {pipeline_mode = #tpu.pipeline_mode<synchronous>, transform_indices = @transform_4, window_bounds = array<i64: 1, 128>}, {transform_indices = @transform_5, window_bounds = array<i64: 1, 8, 8, 128>}]} {
    %c0_i32 = arith.constant 0 : i32
    %c8_i32 = arith.constant 8 : i32
    %0 = arith.addi %c0_i32, %c8_i32 : i32
    %c1_i32 = arith.constant 1 : i32
    scf.for %arg7 = %c0_i32 to %0 step %c1_i32  : i32 {
      %cst = arith.constant 0.000000e+00 : f32
      %1 = vector.broadcast %cst : f32 to vector<8x128xf32>
      %c0_i32_1 = arith.constant 0 : i32
      %2 = arith.addi %arg7, %c0_i32_1 : i32
      %c0 = arith.constant 0 : index
      %3 = arith.index_cast %2 : i32 to index
      %c0_2 = arith.constant 0 : index
      %c0_3 = arith.constant 0 : index
      %4 = vector.load %arg1[%c0, %3, %c0_2, %c0_3] : memref<1x10x10x128xbf16, #tpu.memory_space<vmem>>, vector<1x1x10x128xbf16>
      %5 = vector.shape_cast %4 : vector<1x1x10x128xbf16> to vector<10x128xbf16>
      %6 = vector.extract_strided_slice %5 {offsets = [0, 0], sizes = [8, 128], strides = [1, 1]} : vector<10x128xbf16> to vector<8x128xbf16>
      %c0_4 = arith.constant 0 : index
      %c0_5 = arith.constant 0 : index
      %c0_6 = arith.constant 0 : index
      %c0_7 = arith.constant 0 : index
      %7 = vector.load %arg3[%c0_4, %c0_5, %c0_6, %c0_7] : memref<3x3x128x128xbf16, #tpu.memory_space<vmem>>, vector<1x1x128x128xbf16>
      %8 = vector.shape_cast %7 : vector<1x1x128x128xbf16> to vector<128x128xbf16>
      %cst_8 = arith.constant dense<0.000000e+00> : vector<8x128xf32>
      %9 = tpu.matmul %6, %8, %cst_8 {dimension_numbers = #tpu.dot_dimension_numbers<[1], [0], [0], [1], [0, 0, 1, 1], [], []>} : vector<8x128xbf16>, vector<128x128xbf16>, vector<8x128xf32> -> vector<8x128xf32>
      %10 = arith.addf %1, %9 : vector<8x128xf32>
      %c0_i32_9 = arith.constant 0 : i32
      %11 = arith.addi %arg7, %c0_i32_9 : i32
      %c0_10 = arith.constant 0 : index
      %12 = arith.index_cast %11 : i32 to index
      %c0_11 = arith.constant 0 : index
      %c0_12 = arith.constant 0 : index
      %13 = vector.load %arg1[%c0_10, %12, %c0_11, %c0_12] : memref<1x10x10x128xbf16, #tpu.memory_space<vmem>>, vector<1x1x10x128xbf16>
      %14 = vector.shape_cast %13 : vector<1x1x10x128xbf16> to vector<10x128xbf16>
      %15 = vector.extract_strided_slice %14 {offsets = [1, 0], sizes = [8, 128], strides = [1, 1]} : vector<10x128xbf16> to vector<8x128xbf16>
      %c0_13 = arith.constant 0 : index
      %c1 = arith.constant 1 : index
      %c0_14 = arith.constant 0 : index
      %c0_15 = arith.constant 0 : index
      %16 = vector.load %arg3[%c0_13, %c1, %c0_14, %c0_15] : memref<3x3x128x128xbf16, #tpu.memory_space<vmem>>, vector<1x1x128x128xbf16>
      %17 = vector.shape_cast %16 : vector<1x1x128x128xbf16> to vector<128x128xbf16>
      %cst_16 = arith.constant dense<0.000000e+00> : vector<8x128xf32>
      %18 = tpu.matmul %15, %17, %cst_16 {dimension_numbers = #tpu.dot_dimension_numbers<[1], [0], [0], [1], [0, 0, 1, 1], [], []>} : vector<8x128xbf16>, vector<128x128xbf16>, vector<8x128xf32> -> vector<8x128xf32>
      %19 = arith.addf %10, %18 : vector<8x128xf32>
      %c0_i32_17 = arith.constant 0 : i32
      %20 = arith.addi %arg7, %c0_i32_17 : i32
      %c0_18 = arith.constant 0 : index
      %21 = arith.index_cast %20 : i32 to index
      %c0_19 = arith.constant 0 : index
      %c0_20 = arith.constant 0 : index
      %22 = vector.load %arg1[%c0_18, %21, %c0_19, %c0_20] : memref<1x10x10x128xbf16, #tpu.memory_space<vmem>>, vector<1x1x10x128xbf16>
      %23 = vector.shape_cast %22 : vector<1x1x10x128xbf16> to vector<10x128xbf16>
      %24 = vector.extract_strided_slice %23 {offsets = [2, 0], sizes = [8, 128], strides = [1, 1]} : vector<10x128xbf16> to vector<8x128xbf16>
      %c0_21 = arith.constant 0 : index
      %c2 = arith.constant 2 : index
      %c0_22 = arith.constant 0 : index
      %c0_23 = arith.constant 0 : index
      %25 = vector.load %arg3[%c0_21, %c2, %c0_22, %c0_23] : memref<3x3x128x128xbf16, #tpu.memory_space<vmem>>, vector<1x1x128x128xbf16>
      %26 = vector.shape_cast %25 : vector<1x1x128x128xbf16> to vector<128x128xbf16>
      %cst_24 = arith.constant dense<0.000000e+00> : vector<8x128xf32>
      %27 = tpu.matmul %24, %26, %cst_24 {dimension_numbers = #tpu.dot_dimension_numbers<[1], [0], [0], [1], [0, 0, 1, 1], [], []>} : vector<8x128xbf16>, vector<128x128xbf16>, vector<8x128xf32> -> vector<8x128xf32>
      %28 = arith.addf %19, %27 : vector<8x128xf32>
      %c1_i32_25 = arith.constant 1 : i32
      %29 = arith.addi %arg7, %c1_i32_25 : i32
      %c0_26 = arith.constant 0 : index
      %30 = arith.index_cast %29 : i32 to index
      %c0_27 = arith.constant 0 : index
      %c0_28 = arith.constant 0 : index
      %31 = vector.load %arg1[%c0_26, %30, %c0_27, %c0_28] : memref<1x10x10x128xbf16, #tpu.memory_space<vmem>>, vector<1x1x10x128xbf16>
      %32 = vector.shape_cast %31 : vector<1x1x10x128xbf16> to vector<10x128xbf16>
      %33 = vector.extract_strided_slice %32 {offsets = [0, 0], sizes = [8, 128], strides = [1, 1]} : vector<10x128xbf16> to vector<8x128xbf16>
      %c1_29 = arith.constant 1 : index
      %c0_30 = arith.constant 0 : index
      %c0_31 = arith.constant 0 : index
      %c0_32 = arith.constant 0 : index
      %34 = vector.load %arg3[%c1_29, %c0_30, %c0_31, %c0_32] : memref<3x3x128x128xbf16, #tpu.memory_space<vmem>>, vector<1x1x128x128xbf16>
      %35 = vector.shape_cast %34 : vector<1x1x128x128xbf16> to vector<128x128xbf16>
      %cst_33 = arith.constant dense<0.000000e+00> : vector<8x128xf32>
      %36 = tpu.matmul %33, %35, %cst_33 {dimension_numbers = #tpu.dot_dimension_numbers<[1], [0], [0], [1], [0, 0, 1, 1], [], []>} : vector<8x128xbf16>, vector<128x128xbf16>, vector<8x128xf32> -> vector<8x128xf32>
      %37 = arith.addf %28, %36 : vector<8x128xf32>
      %c1_i32_34 = arith.constant 1 : i32
      %38 = arith.addi %arg7, %c1_i32_34 : i32
      %c0_35 = arith.constant 0 : index
      %39 = arith.index_cast %38 : i32 to index
      %c0_36 = arith.constant 0 : index
      %c0_37 = arith.constant 0 : index
      %40 = vector.load %arg1[%c0_35, %39, %c0_36, %c0_37] : memref<1x10x10x128xbf16, #tpu.memory_space<vmem>>, vector<1x1x10x128xbf16>
      %41 = vector.shape_cast %40 : vector<1x1x10x128xbf16> to vector<10x128xbf16>
      %42 = vector.extract_strided_slice %41 {offsets = [1, 0], sizes = [8, 128], strides = [1, 1]} : vector<10x128xbf16> to vector<8x128xbf16>
      %c1_38 = arith.constant 1 : index
      %c1_39 = arith.constant 1 : index
      %c0_40 = arith.constant 0 : index
      %c0_41 = arith.constant 0 : index
      %43 = vector.load %arg3[%c1_38, %c1_39, %c0_40, %c0_41] : memref<3x3x128x128xbf16, #tpu.memory_space<vmem>>, vector<1x1x128x128xbf16>
      %44 = vector.shape_cast %43 : vector<1x1x128x128xbf16> to vector<128x128xbf16>
      %cst_42 = arith.constant dense<0.000000e+00> : vector<8x128xf32>
      %45 = tpu.matmul %42, %44, %cst_42 {dimension_numbers = #tpu.dot_dimension_numbers<[1], [0], [0], [1], [0, 0, 1, 1], [], []>} : vector<8x128xbf16>, vector<128x128xbf16>, vector<8x128xf32> -> vector<8x128xf32>
      %46 = arith.addf %37, %45 : vector<8x128xf32>
      %c1_i32_43 = arith.constant 1 : i32
      %47 = arith.addi %arg7, %c1_i32_43 : i32
      %c0_44 = arith.constant 0 : index
      %48 = arith.index_cast %47 : i32 to index
      %c0_45 = arith.constant 0 : index
      %c0_46 = arith.constant 0 : index
      %49 = vector.load %arg1[%c0_44, %48, %c0_45, %c0_46] : memref<1x10x10x128xbf16, #tpu.memory_space<vmem>>, vector<1x1x10x128xbf16>
      %50 = vector.shape_cast %49 : vector<1x1x10x128xbf16> to vector<10x128xbf16>
      %51 = vector.extract_strided_slice %50 {offsets = [2, 0], sizes = [8, 128], strides = [1, 1]} : vector<10x128xbf16> to vector<8x128xbf16>
      %c1_47 = arith.constant 1 : index
      %c2_48 = arith.constant 2 : index
      %c0_49 = arith.constant 0 : index
      %c0_50 = arith.constant 0 : index
      %52 = vector.load %arg3[%c1_47, %c2_48, %c0_49, %c0_50] : memref<3x3x128x128xbf16, #tpu.memory_space<vmem>>, vector<1x1x128x128xbf16>
      %53 = vector.shape_cast %52 : vector<1x1x128x128xbf16> to vector<128x128xbf16>
      %cst_51 = arith.constant dense<0.000000e+00> : vector<8x128xf32>
      %54 = tpu.matmul %51, %53, %cst_51 {dimension_numbers = #tpu.dot_dimension_numbers<[1], [0], [0], [1], [0, 0, 1, 1], [], []>} : vector<8x128xbf16>, vector<128x128xbf16>, vector<8x128xf32> -> vector<8x128xf32>
      %55 = arith.addf %46, %54 : vector<8x128xf32>
      %c2_i32 = arith.constant 2 : i32
      %56 = arith.addi %arg7, %c2_i32 : i32
      %c0_52 = arith.constant 0 : index
      %57 = arith.index_cast %56 : i32 to index
      %c0_53 = arith.constant 0 : index
      %c0_54 = arith.constant 0 : index
      %58 = vector.load %arg1[%c0_52, %57, %c0_53, %c0_54] : memref<1x10x10x128xbf16, #tpu.memory_space<vmem>>, vector<1x1x10x128xbf16>
      %59 = vector.shape_cast %58 : vector<1x1x10x128xbf16> to vector<10x128xbf16>
      %60 = vector.extract_strided_slice %59 {offsets = [0, 0], sizes = [8, 128], strides = [1, 1]} : vector<10x128xbf16> to vector<8x128xbf16>
      %c2_55 = arith.constant 2 : index
      %c0_56 = arith.constant 0 : index
      %c0_57 = arith.constant 0 : index
      %c0_58 = arith.constant 0 : index
      %61 = vector.load %arg3[%c2_55, %c0_56, %c0_57, %c0_58] : memref<3x3x128x128xbf16, #tpu.memory_space<vmem>>, vector<1x1x128x128xbf16>
      %62 = vector.shape_cast %61 : vector<1x1x128x128xbf16> to vector<128x128xbf16>
      %cst_59 = arith.constant dense<0.000000e+00> : vector<8x128xf32>
      %63 = tpu.matmul %60, %62, %cst_59 {dimension_numbers = #tpu.dot_dimension_numbers<[1], [0], [0], [1], [0, 0, 1, 1], [], []>} : vector<8x128xbf16>, vector<128x128xbf16>, vector<8x128xf32> -> vector<8x128xf32>
      %64 = arith.addf %55, %63 : vector<8x128xf32>
      %c2_i32_60 = arith.constant 2 : i32
      %65 = arith.addi %arg7, %c2_i32_60 : i32
      %c0_61 = arith.constant 0 : index
      %66 = arith.index_cast %65 : i32 to index
      %c0_62 = arith.constant 0 : index
      %c0_63 = arith.constant 0 : index
      %67 = vector.load %arg1[%c0_61, %66, %c0_62, %c0_63] : memref<1x10x10x128xbf16, #tpu.memory_space<vmem>>, vector<1x1x10x128xbf16>
      %68 = vector.shape_cast %67 : vector<1x1x10x128xbf16> to vector<10x128xbf16>
      %69 = vector.extract_strided_slice %68 {offsets = [1, 0], sizes = [8, 128], strides = [1, 1]} : vector<10x128xbf16> to vector<8x128xbf16>
      %c2_64 = arith.constant 2 : index
      %c1_65 = arith.constant 1 : index
      %c0_66 = arith.constant 0 : index
      %c0_67 = arith.constant 0 : index
      %70 = vector.load %arg3[%c2_64, %c1_65, %c0_66, %c0_67] : memref<3x3x128x128xbf16, #tpu.memory_space<vmem>>, vector<1x1x128x128xbf16>
      %71 = vector.shape_cast %70 : vector<1x1x128x128xbf16> to vector<128x128xbf16>
      %cst_68 = arith.constant dense<0.000000e+00> : vector<8x128xf32>
      %72 = tpu.matmul %69, %71, %cst_68 {dimension_numbers = #tpu.dot_dimension_numbers<[1], [0], [0], [1], [0, 0, 1, 1], [], []>} : vector<8x128xbf16>, vector<128x128xbf16>, vector<8x128xf32> -> vector<8x128xf32>
      %73 = arith.addf %64, %72 : vector<8x128xf32>
      %c2_i32_69 = arith.constant 2 : i32
      %74 = arith.addi %arg7, %c2_i32_69 : i32
      %c0_70 = arith.constant 0 : index
      %75 = arith.index_cast %74 : i32 to index
      %c0_71 = arith.constant 0 : index
      %c0_72 = arith.constant 0 : index
      %76 = vector.load %arg1[%c0_70, %75, %c0_71, %c0_72] : memref<1x10x10x128xbf16, #tpu.memory_space<vmem>>, vector<1x1x10x128xbf16>
      %77 = vector.shape_cast %76 : vector<1x1x10x128xbf16> to vector<10x128xbf16>
      %78 = vector.extract_strided_slice %77 {offsets = [2, 0], sizes = [8, 128], strides = [1, 1]} : vector<10x128xbf16> to vector<8x128xbf16>
      %c2_73 = arith.constant 2 : index
      %c2_74 = arith.constant 2 : index
      %c0_75 = arith.constant 0 : index
      %c0_76 = arith.constant 0 : index
      %79 = vector.load %arg3[%c2_73, %c2_74, %c0_75, %c0_76] : memref<3x3x128x128xbf16, #tpu.memory_space<vmem>>, vector<1x1x128x128xbf16>
      %80 = vector.shape_cast %79 : vector<1x1x128x128xbf16> to vector<128x128xbf16>
      %cst_77 = arith.constant dense<0.000000e+00> : vector<8x128xf32>
      %81 = tpu.matmul %78, %80, %cst_77 {dimension_numbers = #tpu.dot_dimension_numbers<[1], [0], [0], [1], [0, 0, 1, 1], [], []>} : vector<8x128xbf16>, vector<128x128xbf16>, vector<8x128xf32> -> vector<8x128xf32>
      %82 = arith.addf %73, %81 : vector<8x128xf32>
      %c0_i32_78 = arith.constant 0 : i32
      %83 = arith.addi %arg7, %c0_i32_78 : i32
      %c0_79 = arith.constant 0 : index
      %84 = arith.index_cast %83 : i32 to index
      %c0_80 = arith.constant 0 : index
      %c0_81 = arith.constant 0 : index
      %85 = vector.load %arg2[%c0_79, %84, %c0_80, %c0_81] : memref<1x10x10x128xbf16, #tpu.memory_space<vmem>>, vector<1x1x10x128xbf16>
      %86 = vector.shape_cast %85 : vector<1x1x10x128xbf16> to vector<10x128xbf16>
      %87 = vector.extract_strided_slice %86 {offsets = [0, 0], sizes = [8, 128], strides = [1, 1]} : vector<10x128xbf16> to vector<8x128xbf16>
      %c0_82 = arith.constant 0 : index
      %c0_83 = arith.constant 0 : index
      %c0_84 = arith.constant 0 : index
      %c0_85 = arith.constant 0 : index
      %88 = vector.load %arg4[%c0_82, %c0_83, %c0_84, %c0_85] : memref<3x3x128x128xbf16, #tpu.memory_space<vmem>>, vector<1x1x128x128xbf16>
      %89 = vector.shape_cast %88 : vector<1x1x128x128xbf16> to vector<128x128xbf16>
      %cst_86 = arith.constant dense<0.000000e+00> : vector<8x128xf32>
      %90 = tpu.matmul %87, %89, %cst_86 {dimension_numbers = #tpu.dot_dimension_numbers<[1], [0], [0], [1], [0, 0, 1, 1], [], []>} : vector<8x128xbf16>, vector<128x128xbf16>, vector<8x128xf32> -> vector<8x128xf32>
      %91 = arith.addf %82, %90 : vector<8x128xf32>
      %c0_i32_87 = arith.constant 0 : i32
      %92 = arith.addi %arg7, %c0_i32_87 : i32
      %c0_88 = arith.constant 0 : index
      %93 = arith.index_cast %92 : i32 to index
      %c0_89 = arith.constant 0 : index
      %c0_90 = arith.constant 0 : index
      %94 = vector.load %arg2[%c0_88, %93, %c0_89, %c0_90] : memref<1x10x10x128xbf16, #tpu.memory_space<vmem>>, vector<1x1x10x128xbf16>
      %95 = vector.shape_cast %94 : vector<1x1x10x128xbf16> to vector<10x128xbf16>
      %96 = vector.extract_strided_slice %95 {offsets = [1, 0], sizes = [8, 128], strides = [1, 1]} : vector<10x128xbf16> to vector<8x128xbf16>
      %c0_91 = arith.constant 0 : index
      %c1_92 = arith.constant 1 : index
      %c0_93 = arith.constant 0 : index
      %c0_94 = arith.constant 0 : index
      %97 = vector.load %arg4[%c0_91, %c1_92, %c0_93, %c0_94] : memref<3x3x128x128xbf16, #tpu.memory_space<vmem>>, vector<1x1x128x128xbf16>
      %98 = vector.shape_cast %97 : vector<1x1x128x128xbf16> to vector<128x128xbf16>
      %cst_95 = arith.constant dense<0.000000e+00> : vector<8x128xf32>
      %99 = tpu.matmul %96, %98, %cst_95 {dimension_numbers = #tpu.dot_dimension_numbers<[1], [0], [0], [1], [0, 0, 1, 1], [], []>} : vector<8x128xbf16>, vector<128x128xbf16>, vector<8x128xf32> -> vector<8x128xf32>
      %100 = arith.addf %91, %99 : vector<8x128xf32>
      %c0_i32_96 = arith.constant 0 : i32
      %101 = arith.addi %arg7, %c0_i32_96 : i32
      %c0_97 = arith.constant 0 : index
      %102 = arith.index_cast %101 : i32 to index
      %c0_98 = arith.constant 0 : index
      %c0_99 = arith.constant 0 : index
      %103 = vector.load %arg2[%c0_97, %102, %c0_98, %c0_99] : memref<1x10x10x128xbf16, #tpu.memory_space<vmem>>, vector<1x1x10x128xbf16>
      %104 = vector.shape_cast %103 : vector<1x1x10x128xbf16> to vector<10x128xbf16>
      %105 = vector.extract_strided_slice %104 {offsets = [2, 0], sizes = [8, 128], strides = [1, 1]} : vector<10x128xbf16> to vector<8x128xbf16>
      %c0_100 = arith.constant 0 : index
      %c2_101 = arith.constant 2 : index
      %c0_102 = arith.constant 0 : index
      %c0_103 = arith.constant 0 : index
      %106 = vector.load %arg4[%c0_100, %c2_101, %c0_102, %c0_103] : memref<3x3x128x128xbf16, #tpu.memory_space<vmem>>, vector<1x1x128x128xbf16>
      %107 = vector.shape_cast %106 : vector<1x1x128x128xbf16> to vector<128x128xbf16>
      %cst_104 = arith.constant dense<0.000000e+00> : vector<8x128xf32>
      %108 = tpu.matmul %105, %107, %cst_104 {dimension_numbers = #tpu.dot_dimension_numbers<[1], [0], [0], [1], [0, 0, 1, 1], [], []>} : vector<8x128xbf16>, vector<128x128xbf16>, vector<8x128xf32> -> vector<8x128xf32>
      %109 = arith.addf %100, %108 : vector<8x128xf32>
      %c1_i32_105 = arith.constant 1 : i32
      %110 = arith.addi %arg7, %c1_i32_105 : i32
      %c0_106 = arith.constant 0 : index
      %111 = arith.index_cast %110 : i32 to index
      %c0_107 = arith.constant 0 : index
      %c0_108 = arith.constant 0 : index
      %112 = vector.load %arg2[%c0_106, %111, %c0_107, %c0_108] : memref<1x10x10x128xbf16, #tpu.memory_space<vmem>>, vector<1x1x10x128xbf16>
      %113 = vector.shape_cast %112 : vector<1x1x10x128xbf16> to vector<10x128xbf16>
      %114 = vector.extract_strided_slice %113 {offsets = [0, 0], sizes = [8, 128], strides = [1, 1]} : vector<10x128xbf16> to vector<8x128xbf16>
      %c1_109 = arith.constant 1 : index
      %c0_110 = arith.constant 0 : index
      %c0_111 = arith.constant 0 : index
      %c0_112 = arith.constant 0 : index
      %115 = vector.load %arg4[%c1_109, %c0_110, %c0_111, %c0_112] : memref<3x3x128x128xbf16, #tpu.memory_space<vmem>>, vector<1x1x128x128xbf16>
      %116 = vector.shape_cast %115 : vector<1x1x128x128xbf16> to vector<128x128xbf16>
      %cst_113 = arith.constant dense<0.000000e+00> : vector<8x128xf32>
      %117 = tpu.matmul %114, %116, %cst_113 {dimension_numbers = #tpu.dot_dimension_numbers<[1], [0], [0], [1], [0, 0, 1, 1], [], []>} : vector<8x128xbf16>, vector<128x128xbf16>, vector<8x128xf32> -> vector<8x128xf32>
      %118 = arith.addf %109, %117 : vector<8x128xf32>
      %c1_i32_114 = arith.constant 1 : i32
      %119 = arith.addi %arg7, %c1_i32_114 : i32
      %c0_115 = arith.constant 0 : index
      %120 = arith.index_cast %119 : i32 to index
      %c0_116 = arith.constant 0 : index
      %c0_117 = arith.constant 0 : index
      %121 = vector.load %arg2[%c0_115, %120, %c0_116, %c0_117] : memref<1x10x10x128xbf16, #tpu.memory_space<vmem>>, vector<1x1x10x128xbf16>
      %122 = vector.shape_cast %121 : vector<1x1x10x128xbf16> to vector<10x128xbf16>
      %123 = vector.extract_strided_slice %122 {offsets = [1, 0], sizes = [8, 128], strides = [1, 1]} : vector<10x128xbf16> to vector<8x128xbf16>
      %c1_118 = arith.constant 1 : index
      %c1_119 = arith.constant 1 : index
      %c0_120 = arith.constant 0 : index
      %c0_121 = arith.constant 0 : index
      %124 = vector.load %arg4[%c1_118, %c1_119, %c0_120, %c0_121] : memref<3x3x128x128xbf16, #tpu.memory_space<vmem>>, vector<1x1x128x128xbf16>
      %125 = vector.shape_cast %124 : vector<1x1x128x128xbf16> to vector<128x128xbf16>
      %cst_122 = arith.constant dense<0.000000e+00> : vector<8x128xf32>
      %126 = tpu.matmul %123, %125, %cst_122 {dimension_numbers = #tpu.dot_dimension_numbers<[1], [0], [0], [1], [0, 0, 1, 1], [], []>} : vector<8x128xbf16>, vector<128x128xbf16>, vector<8x128xf32> -> vector<8x128xf32>
      %127 = arith.addf %118, %126 : vector<8x128xf32>
      %c1_i32_123 = arith.constant 1 : i32
      %128 = arith.addi %arg7, %c1_i32_123 : i32
      %c0_124 = arith.constant 0 : index
      %129 = arith.index_cast %128 : i32 to index
      %c0_125 = arith.constant 0 : index
      %c0_126 = arith.constant 0 : index
      %130 = vector.load %arg2[%c0_124, %129, %c0_125, %c0_126] : memref<1x10x10x128xbf16, #tpu.memory_space<vmem>>, vector<1x1x10x128xbf16>
      %131 = vector.shape_cast %130 : vector<1x1x10x128xbf16> to vector<10x128xbf16>
      %132 = vector.extract_strided_slice %131 {offsets = [2, 0], sizes = [8, 128], strides = [1, 1]} : vector<10x128xbf16> to vector<8x128xbf16>
      %c1_127 = arith.constant 1 : index
      %c2_128 = arith.constant 2 : index
      %c0_129 = arith.constant 0 : index
      %c0_130 = arith.constant 0 : index
      %133 = vector.load %arg4[%c1_127, %c2_128, %c0_129, %c0_130] : memref<3x3x128x128xbf16, #tpu.memory_space<vmem>>, vector<1x1x128x128xbf16>
      %134 = vector.shape_cast %133 : vector<1x1x128x128xbf16> to vector<128x128xbf16>
      %cst_131 = arith.constant dense<0.000000e+00> : vector<8x128xf32>
      %135 = tpu.matmul %132, %134, %cst_131 {dimension_numbers = #tpu.dot_dimension_numbers<[1], [0], [0], [1], [0, 0, 1, 1], [], []>} : vector<8x128xbf16>, vector<128x128xbf16>, vector<8x128xf32> -> vector<8x128xf32>
      %136 = arith.addf %127, %135 : vector<8x128xf32>
      %c2_i32_132 = arith.constant 2 : i32
      %137 = arith.addi %arg7, %c2_i32_132 : i32
      %c0_133 = arith.constant 0 : index
      %138 = arith.index_cast %137 : i32 to index
      %c0_134 = arith.constant 0 : index
      %c0_135 = arith.constant 0 : index
      %139 = vector.load %arg2[%c0_133, %138, %c0_134, %c0_135] : memref<1x10x10x128xbf16, #tpu.memory_space<vmem>>, vector<1x1x10x128xbf16>
      %140 = vector.shape_cast %139 : vector<1x1x10x128xbf16> to vector<10x128xbf16>
      %141 = vector.extract_strided_slice %140 {offsets = [0, 0], sizes = [8, 128], strides = [1, 1]} : vector<10x128xbf16> to vector<8x128xbf16>
      %c2_136 = arith.constant 2 : index
      %c0_137 = arith.constant 0 : index
      %c0_138 = arith.constant 0 : index
      %c0_139 = arith.constant 0 : index
      %142 = vector.load %arg4[%c2_136, %c0_137, %c0_138, %c0_139] : memref<3x3x128x128xbf16, #tpu.memory_space<vmem>>, vector<1x1x128x128xbf16>
      %143 = vector.shape_cast %142 : vector<1x1x128x128xbf16> to vector<128x128xbf16>
      %cst_140 = arith.constant dense<0.000000e+00> : vector<8x128xf32>
      %144 = tpu.matmul %141, %143, %cst_140 {dimension_numbers = #tpu.dot_dimension_numbers<[1], [0], [0], [1], [0, 0, 1, 1], [], []>} : vector<8x128xbf16>, vector<128x128xbf16>, vector<8x128xf32> -> vector<8x128xf32>
      %145 = arith.addf %136, %144 : vector<8x128xf32>
      %c2_i32_141 = arith.constant 2 : i32
      %146 = arith.addi %arg7, %c2_i32_141 : i32
      %c0_142 = arith.constant 0 : index
      %147 = arith.index_cast %146 : i32 to index
      %c0_143 = arith.constant 0 : index
      %c0_144 = arith.constant 0 : index
      %148 = vector.load %arg2[%c0_142, %147, %c0_143, %c0_144] : memref<1x10x10x128xbf16, #tpu.memory_space<vmem>>, vector<1x1x10x128xbf16>
      %149 = vector.shape_cast %148 : vector<1x1x10x128xbf16> to vector<10x128xbf16>
      %150 = vector.extract_strided_slice %149 {offsets = [1, 0], sizes = [8, 128], strides = [1, 1]} : vector<10x128xbf16> to vector<8x128xbf16>
      %c2_145 = arith.constant 2 : index
      %c1_146 = arith.constant 1 : index
      %c0_147 = arith.constant 0 : index
      %c0_148 = arith.constant 0 : index
      %151 = vector.load %arg4[%c2_145, %c1_146, %c0_147, %c0_148] : memref<3x3x128x128xbf16, #tpu.memory_space<vmem>>, vector<1x1x128x128xbf16>
      %152 = vector.shape_cast %151 : vector<1x1x128x128xbf16> to vector<128x128xbf16>
      %cst_149 = arith.constant dense<0.000000e+00> : vector<8x128xf32>
      %153 = tpu.matmul %150, %152, %cst_149 {dimension_numbers = #tpu.dot_dimension_numbers<[1], [0], [0], [1], [0, 0, 1, 1], [], []>} : vector<8x128xbf16>, vector<128x128xbf16>, vector<8x128xf32> -> vector<8x128xf32>
      %154 = arith.addf %145, %153 : vector<8x128xf32>
      %c2_i32_150 = arith.constant 2 : i32
      %155 = arith.addi %arg7, %c2_i32_150 : i32
      %c0_151 = arith.constant 0 : index
      %156 = arith.index_cast %155 : i32 to index
      %c0_152 = arith.constant 0 : index
      %c0_153 = arith.constant 0 : index
      %157 = vector.load %arg2[%c0_151, %156, %c0_152, %c0_153] : memref<1x10x10x128xbf16, #tpu.memory_space<vmem>>, vector<1x1x10x128xbf16>
      %158 = vector.shape_cast %157 : vector<1x1x10x128xbf16> to vector<10x128xbf16>
      %159 = vector.extract_strided_slice %158 {offsets = [2, 0], sizes = [8, 128], strides = [1, 1]} : vector<10x128xbf16> to vector<8x128xbf16>
      %c2_154 = arith.constant 2 : index
      %c2_155 = arith.constant 2 : index
      %c0_156 = arith.constant 0 : index
      %c0_157 = arith.constant 0 : index
      %160 = vector.load %arg4[%c2_154, %c2_155, %c0_156, %c0_157] : memref<3x3x128x128xbf16, #tpu.memory_space<vmem>>, vector<1x1x128x128xbf16>
      %161 = vector.shape_cast %160 : vector<1x1x128x128xbf16> to vector<128x128xbf16>
      %cst_158 = arith.constant dense<0.000000e+00> : vector<8x128xf32>
      %162 = tpu.matmul %159, %161, %cst_158 {dimension_numbers = #tpu.dot_dimension_numbers<[1], [0], [0], [1], [0, 0, 1, 1], [], []>} : vector<8x128xbf16>, vector<128x128xbf16>, vector<8x128xf32> -> vector<8x128xf32>
      %163 = arith.addf %154, %162 : vector<8x128xf32>
      %c0_159 = arith.constant 0 : index
      %c0_160 = arith.constant 0 : index
      %164 = vector.load %arg5[%c0_159, %c0_160] : memref<1x128xf32, #tpu.memory_space<vmem>>, vector<1x128xf32>
      %165 = vector.broadcast %164 : vector<1x128xf32> to vector<8x128xf32>
      %166 = arith.addf %163, %165 : vector<8x128xf32>
      %cst_161 = arith.constant 0.000000e+00 : f32
      %167 = vector.broadcast %cst_161 : f32 to vector<8x128xf32>
      %168 = arith.cmpf oge, %166, %167 : vector<8x128xf32>
      %cst_162 = arith.constant 2.000000e-01 : f32
      %169 = vector.broadcast %cst_162 : f32 to vector<8x128xf32>
      %170 = arith.mulf %169, %166 : vector<8x128xf32>
      %171 = arith.select %168, %166, %170 : vector<8x128xi1>, vector<8x128xf32>
      %172 = arith.truncf %171 : vector<8x128xf32> to vector<8x128xbf16>
      %c0_163 = arith.constant 0 : index
      %173 = arith.index_cast %arg7 : i32 to index
      %c0_164 = arith.constant 0 : index
      %c0_165 = arith.constant 0 : index
      %174 = vector.load %arg6[%c0_163, %173, %c0_164, %c0_165] : memref<1x8x8x128xbf16, #tpu.memory_space<vmem>>, vector<1x1x8x128xbf16>
      %175 = vector.shape_cast %174 : vector<1x1x8x128xbf16> to vector<8x128xbf16>
      %176 = vector.shape_cast %172 : vector<8x128xbf16> to vector<1x1x8x128xbf16>
      tpu.vector_store %arg6[%c0_163, %173, %c0_164, %c0_165], %176 {strides = array<i32>} : memref<1x8x8x128xbf16, #tpu.memory_space<vmem>>, vector<1x1x8x128xbf16>,
    }
    %c8_i32_0 = arith.constant 8 : i32
    return
  }
  func.func @transform_0(%arg0: i32) -> (i32, i32, i32, i32) {
    %c0_i32 = arith.constant 0 : i32
    %c0_i32_0 = arith.constant 0 : i32
    %c0_i32_1 = arith.constant 0 : i32
    %c0_i32_2 = arith.constant 0 : i32
    return %arg0, %c0_i32, %c0_i32_0, %c0_i32_1 : i32, i32, i32, i32
  }
  func.func @transform_1(%arg0: i32) -> (i32, i32, i32, i32) {
    %c0_i32 = arith.constant 0 : i32
    %c0_i32_0 = arith.constant 0 : i32
    %c0_i32_1 = arith.constant 0 : i32
    %c0_i32_2 = arith.constant 0 : i32
    return %arg0, %c0_i32, %c0_i32_0, %c0_i32_1 : i32, i32, i32, i32
  }
  func.func @transform_2(%arg0: i32) -> (i32, i32, i32, i32) {
    %c0_i32 = arith.constant 0 : i32
    %c0_i32_0 = arith.constant 0 : i32
    %c0_i32_1 = arith.constant 0 : i32
    %c0_i32_2 = arith.constant 0 : i32
    %c0_i32_3 = arith.constant 0 : i32
    return %c0_i32, %c0_i32_0, %c0_i32_1, %c0_i32_2 : i32, i32, i32, i32
  }
  func.func @transform_3(%arg0: i32) -> (i32, i32, i32, i32) {
    %c0_i32 = arith.constant 0 : i32
    %c0_i32_0 = arith.constant 0 : i32
    %c0_i32_1 = arith.constant 0 : i32
    %c0_i32_2 = arith.constant 0 : i32
    %c0_i32_3 = arith.constant 0 : i32
    return %c0_i32, %c0_i32_0, %c0_i32_1, %c0_i32_2 : i32, i32, i32, i32
  }
  func.func @transform_4(%arg0: i32) -> (i32, i32) {
    %c0_i32 = arith.constant 0 : i32
    %c0_i32_0 = arith.constant 0 : i32
    %c0_i32_1 = arith.constant 0 : i32
    return %c0_i32, %c0_i32_0 : i32, i32
  }
  func.func @transform_5(%arg0: i32) -> (i32, i32, i32, i32) {
    %c0_i32 = arith.constant 0 : i32
    %c0_i32_0 = arith.constant 0 : i32
    %c0_i32_1 = arith.constant 0 : i32
    %c0_i32_2 = arith.constant 0 : i32
    return %arg0, %c0_i32, %c0_i32_0, %c0_i32_1 : i32, i32, i32, i32
  }
}

module attributes {stable_mosaic.version = 11 : i64} {
  func.func @kernel(%arg0: i32, %arg1: memref<1x18x18x128xbf16, #tpu.memory_space<vmem>>, %arg2: memref<1x18x18x8xbf16, #tpu.memory_space<vmem>>, %arg3: memref<3x3x128x128xbf16, #tpu.memory_space<vmem>>, %arg4: memref<3x3x8x128xbf16, #tpu.memory_space<vmem>>, %arg5: memref<1x128xf32, #tpu.memory_space<vmem>>, %arg6: memref<1x16x16x128xf32, #tpu.memory_space<vmem>>) attributes {dimension_semantics = [#tpu.dimension_semantics<parallel>], iteration_bounds = array<i64: 2>, scalar_prefetch = 0 : i64, scratch_operands = 0 : i64, tpu.core_type = #tpu.core_type<tc>, window_params = [{transform_indices = @transform_0, window_bounds = array<i64: 1, 18, 18, 128>}, {transform_indices = @transform_1, window_bounds = array<i64: 1, 18, 18, 8>}, {pipeline_mode = #tpu.pipeline_mode<synchronous>, transform_indices = @transform_2, window_bounds = array<i64: 3, 3, 128, 128>}, {pipeline_mode = #tpu.pipeline_mode<synchronous>, transform_indices = @transform_3, window_bounds = array<i64: 3, 3, 8, 128>}, {pipeline_mode = #tpu.pipeline_mode<synchronous>, transform_indices = @transform_4, window_bounds = array<i64: 1, 128>}, {transform_indices = @transform_5, window_bounds = array<i64: 1, 16, 16, 128>}]} {
    %c0_i32 = arith.constant 0 : i32
    %c16_i32 = arith.constant 16 : i32
    %0 = arith.addi %c0_i32, %c16_i32 : i32
    %c1_i32 = arith.constant 1 : i32
    scf.for %arg7 = %c0_i32 to %0 step %c1_i32  : i32 {
      %cst = arith.constant 0.000000e+00 : f32
      %1 = vector.broadcast %cst : f32 to vector<16x128xf32>
      %c0_i32_1 = arith.constant 0 : i32
      %2 = arith.addi %arg7, %c0_i32_1 : i32
      %c0 = arith.constant 0 : index
      %3 = arith.index_cast %2 : i32 to index
      %c0_2 = arith.constant 0 : index
      %c0_3 = arith.constant 0 : index
      %4 = vector.load %arg1[%c0, %3, %c0_2, %c0_3] : memref<1x18x18x128xbf16, #tpu.memory_space<vmem>>, vector<1x1x18x128xbf16>
      %5 = vector.shape_cast %4 : vector<1x1x18x128xbf16> to vector<18x128xbf16>
      %6 = vector.extract_strided_slice %5 {offsets = [0, 0], sizes = [16, 128], strides = [1, 1]} : vector<18x128xbf16> to vector<16x128xbf16>
      %c0_4 = arith.constant 0 : index
      %c0_5 = arith.constant 0 : index
      %c0_6 = arith.constant 0 : index
      %c0_7 = arith.constant 0 : index
      %7 = vector.load %arg3[%c0_4, %c0_5, %c0_6, %c0_7] : memref<3x3x128x128xbf16, #tpu.memory_space<vmem>>, vector<1x1x128x128xbf16>
      %8 = vector.shape_cast %7 : vector<1x1x128x128xbf16> to vector<128x128xbf16>
      %cst_8 = arith.constant dense<0.000000e+00> : vector<16x128xf32>
      %9 = tpu.matmul %6, %8, %cst_8 {dimension_numbers = #tpu.dot_dimension_numbers<[1], [0], [0], [1], [0, 0, 1, 1], [], []>} : vector<16x128xbf16>, vector<128x128xbf16>, vector<16x128xf32> -> vector<16x128xf32>
      %10 = arith.addf %1, %9 : vector<16x128xf32>
      %c0_i32_9 = arith.constant 0 : i32
      %11 = arith.addi %arg7, %c0_i32_9 : i32
      %c0_10 = arith.constant 0 : index
      %12 = arith.index_cast %11 : i32 to index
      %c0_11 = arith.constant 0 : index
      %c0_12 = arith.constant 0 : index
      %13 = vector.load %arg1[%c0_10, %12, %c0_11, %c0_12] : memref<1x18x18x128xbf16, #tpu.memory_space<vmem>>, vector<1x1x18x128xbf16>
      %14 = vector.shape_cast %13 : vector<1x1x18x128xbf16> to vector<18x128xbf16>
      %15 = vector.extract_strided_slice %14 {offsets = [1, 0], sizes = [16, 128], strides = [1, 1]} : vector<18x128xbf16> to vector<16x128xbf16>
      %c0_13 = arith.constant 0 : index
      %c1 = arith.constant 1 : index
      %c0_14 = arith.constant 0 : index
      %c0_15 = arith.constant 0 : index
      %16 = vector.load %arg3[%c0_13, %c1, %c0_14, %c0_15] : memref<3x3x128x128xbf16, #tpu.memory_space<vmem>>, vector<1x1x128x128xbf16>
      %17 = vector.shape_cast %16 : vector<1x1x128x128xbf16> to vector<128x128xbf16>
      %cst_16 = arith.constant dense<0.000000e+00> : vector<16x128xf32>
      %18 = tpu.matmul %15, %17, %cst_16 {dimension_numbers = #tpu.dot_dimension_numbers<[1], [0], [0], [1], [0, 0, 1, 1], [], []>} : vector<16x128xbf16>, vector<128x128xbf16>, vector<16x128xf32> -> vector<16x128xf32>
      %19 = arith.addf %10, %18 : vector<16x128xf32>
      %c0_i32_17 = arith.constant 0 : i32
      %20 = arith.addi %arg7, %c0_i32_17 : i32
      %c0_18 = arith.constant 0 : index
      %21 = arith.index_cast %20 : i32 to index
      %c0_19 = arith.constant 0 : index
      %c0_20 = arith.constant 0 : index
      %22 = vector.load %arg1[%c0_18, %21, %c0_19, %c0_20] : memref<1x18x18x128xbf16, #tpu.memory_space<vmem>>, vector<1x1x18x128xbf16>
      %23 = vector.shape_cast %22 : vector<1x1x18x128xbf16> to vector<18x128xbf16>
      %24 = vector.extract_strided_slice %23 {offsets = [2, 0], sizes = [16, 128], strides = [1, 1]} : vector<18x128xbf16> to vector<16x128xbf16>
      %c0_21 = arith.constant 0 : index
      %c2 = arith.constant 2 : index
      %c0_22 = arith.constant 0 : index
      %c0_23 = arith.constant 0 : index
      %25 = vector.load %arg3[%c0_21, %c2, %c0_22, %c0_23] : memref<3x3x128x128xbf16, #tpu.memory_space<vmem>>, vector<1x1x128x128xbf16>
      %26 = vector.shape_cast %25 : vector<1x1x128x128xbf16> to vector<128x128xbf16>
      %cst_24 = arith.constant dense<0.000000e+00> : vector<16x128xf32>
      %27 = tpu.matmul %24, %26, %cst_24 {dimension_numbers = #tpu.dot_dimension_numbers<[1], [0], [0], [1], [0, 0, 1, 1], [], []>} : vector<16x128xbf16>, vector<128x128xbf16>, vector<16x128xf32> -> vector<16x128xf32>
      %28 = arith.addf %19, %27 : vector<16x128xf32>
      %c1_i32_25 = arith.constant 1 : i32
      %29 = arith.addi %arg7, %c1_i32_25 : i32
      %c0_26 = arith.constant 0 : index
      %30 = arith.index_cast %29 : i32 to index
      %c0_27 = arith.constant 0 : index
      %c0_28 = arith.constant 0 : index
      %31 = vector.load %arg1[%c0_26, %30, %c0_27, %c0_28] : memref<1x18x18x128xbf16, #tpu.memory_space<vmem>>, vector<1x1x18x128xbf16>
      %32 = vector.shape_cast %31 : vector<1x1x18x128xbf16> to vector<18x128xbf16>
      %33 = vector.extract_strided_slice %32 {offsets = [0, 0], sizes = [16, 128], strides = [1, 1]} : vector<18x128xbf16> to vector<16x128xbf16>
      %c1_29 = arith.constant 1 : index
      %c0_30 = arith.constant 0 : index
      %c0_31 = arith.constant 0 : index
      %c0_32 = arith.constant 0 : index
      %34 = vector.load %arg3[%c1_29, %c0_30, %c0_31, %c0_32] : memref<3x3x128x128xbf16, #tpu.memory_space<vmem>>, vector<1x1x128x128xbf16>
      %35 = vector.shape_cast %34 : vector<1x1x128x128xbf16> to vector<128x128xbf16>
      %cst_33 = arith.constant dense<0.000000e+00> : vector<16x128xf32>
      %36 = tpu.matmul %33, %35, %cst_33 {dimension_numbers = #tpu.dot_dimension_numbers<[1], [0], [0], [1], [0, 0, 1, 1], [], []>} : vector<16x128xbf16>, vector<128x128xbf16>, vector<16x128xf32> -> vector<16x128xf32>
      %37 = arith.addf %28, %36 : vector<16x128xf32>
      %c1_i32_34 = arith.constant 1 : i32
      %38 = arith.addi %arg7, %c1_i32_34 : i32
      %c0_35 = arith.constant 0 : index
      %39 = arith.index_cast %38 : i32 to index
      %c0_36 = arith.constant 0 : index
      %c0_37 = arith.constant 0 : index
      %40 = vector.load %arg1[%c0_35, %39, %c0_36, %c0_37] : memref<1x18x18x128xbf16, #tpu.memory_space<vmem>>, vector<1x1x18x128xbf16>
      %41 = vector.shape_cast %40 : vector<1x1x18x128xbf16> to vector<18x128xbf16>
      %42 = vector.extract_strided_slice %41 {offsets = [1, 0], sizes = [16, 128], strides = [1, 1]} : vector<18x128xbf16> to vector<16x128xbf16>
      %c1_38 = arith.constant 1 : index
      %c1_39 = arith.constant 1 : index
      %c0_40 = arith.constant 0 : index
      %c0_41 = arith.constant 0 : index
      %43 = vector.load %arg3[%c1_38, %c1_39, %c0_40, %c0_41] : memref<3x3x128x128xbf16, #tpu.memory_space<vmem>>, vector<1x1x128x128xbf16>
      %44 = vector.shape_cast %43 : vector<1x1x128x128xbf16> to vector<128x128xbf16>
      %cst_42 = arith.constant dense<0.000000e+00> : vector<16x128xf32>
      %45 = tpu.matmul %42, %44, %cst_42 {dimension_numbers = #tpu.dot_dimension_numbers<[1], [0], [0], [1], [0, 0, 1, 1], [], []>} : vector<16x128xbf16>, vector<128x128xbf16>, vector<16x128xf32> -> vector<16x128xf32>
      %46 = arith.addf %37, %45 : vector<16x128xf32>
      %c1_i32_43 = arith.constant 1 : i32
      %47 = arith.addi %arg7, %c1_i32_43 : i32
      %c0_44 = arith.constant 0 : index
      %48 = arith.index_cast %47 : i32 to index
      %c0_45 = arith.constant 0 : index
      %c0_46 = arith.constant 0 : index
      %49 = vector.load %arg1[%c0_44, %48, %c0_45, %c0_46] : memref<1x18x18x128xbf16, #tpu.memory_space<vmem>>, vector<1x1x18x128xbf16>
      %50 = vector.shape_cast %49 : vector<1x1x18x128xbf16> to vector<18x128xbf16>
      %51 = vector.extract_strided_slice %50 {offsets = [2, 0], sizes = [16, 128], strides = [1, 1]} : vector<18x128xbf16> to vector<16x128xbf16>
      %c1_47 = arith.constant 1 : index
      %c2_48 = arith.constant 2 : index
      %c0_49 = arith.constant 0 : index
      %c0_50 = arith.constant 0 : index
      %52 = vector.load %arg3[%c1_47, %c2_48, %c0_49, %c0_50] : memref<3x3x128x128xbf16, #tpu.memory_space<vmem>>, vector<1x1x128x128xbf16>
      %53 = vector.shape_cast %52 : vector<1x1x128x128xbf16> to vector<128x128xbf16>
      %cst_51 = arith.constant dense<0.000000e+00> : vector<16x128xf32>
      %54 = tpu.matmul %51, %53, %cst_51 {dimension_numbers = #tpu.dot_dimension_numbers<[1], [0], [0], [1], [0, 0, 1, 1], [], []>} : vector<16x128xbf16>, vector<128x128xbf16>, vector<16x128xf32> -> vector<16x128xf32>
      %55 = arith.addf %46, %54 : vector<16x128xf32>
      %c2_i32 = arith.constant 2 : i32
      %56 = arith.addi %arg7, %c2_i32 : i32
      %c0_52 = arith.constant 0 : index
      %57 = arith.index_cast %56 : i32 to index
      %c0_53 = arith.constant 0 : index
      %c0_54 = arith.constant 0 : index
      %58 = vector.load %arg1[%c0_52, %57, %c0_53, %c0_54] : memref<1x18x18x128xbf16, #tpu.memory_space<vmem>>, vector<1x1x18x128xbf16>
      %59 = vector.shape_cast %58 : vector<1x1x18x128xbf16> to vector<18x128xbf16>
      %60 = vector.extract_strided_slice %59 {offsets = [0, 0], sizes = [16, 128], strides = [1, 1]} : vector<18x128xbf16> to vector<16x128xbf16>
      %c2_55 = arith.constant 2 : index
      %c0_56 = arith.constant 0 : index
      %c0_57 = arith.constant 0 : index
      %c0_58 = arith.constant 0 : index
      %61 = vector.load %arg3[%c2_55, %c0_56, %c0_57, %c0_58] : memref<3x3x128x128xbf16, #tpu.memory_space<vmem>>, vector<1x1x128x128xbf16>
      %62 = vector.shape_cast %61 : vector<1x1x128x128xbf16> to vector<128x128xbf16>
      %cst_59 = arith.constant dense<0.000000e+00> : vector<16x128xf32>
      %63 = tpu.matmul %60, %62, %cst_59 {dimension_numbers = #tpu.dot_dimension_numbers<[1], [0], [0], [1], [0, 0, 1, 1], [], []>} : vector<16x128xbf16>, vector<128x128xbf16>, vector<16x128xf32> -> vector<16x128xf32>
      %64 = arith.addf %55, %63 : vector<16x128xf32>
      %c2_i32_60 = arith.constant 2 : i32
      %65 = arith.addi %arg7, %c2_i32_60 : i32
      %c0_61 = arith.constant 0 : index
      %66 = arith.index_cast %65 : i32 to index
      %c0_62 = arith.constant 0 : index
      %c0_63 = arith.constant 0 : index
      %67 = vector.load %arg1[%c0_61, %66, %c0_62, %c0_63] : memref<1x18x18x128xbf16, #tpu.memory_space<vmem>>, vector<1x1x18x128xbf16>
      %68 = vector.shape_cast %67 : vector<1x1x18x128xbf16> to vector<18x128xbf16>
      %69 = vector.extract_strided_slice %68 {offsets = [1, 0], sizes = [16, 128], strides = [1, 1]} : vector<18x128xbf16> to vector<16x128xbf16>
      %c2_64 = arith.constant 2 : index
      %c1_65 = arith.constant 1 : index
      %c0_66 = arith.constant 0 : index
      %c0_67 = arith.constant 0 : index
      %70 = vector.load %arg3[%c2_64, %c1_65, %c0_66, %c0_67] : memref<3x3x128x128xbf16, #tpu.memory_space<vmem>>, vector<1x1x128x128xbf16>
      %71 = vector.shape_cast %70 : vector<1x1x128x128xbf16> to vector<128x128xbf16>
      %cst_68 = arith.constant dense<0.000000e+00> : vector<16x128xf32>
      %72 = tpu.matmul %69, %71, %cst_68 {dimension_numbers = #tpu.dot_dimension_numbers<[1], [0], [0], [1], [0, 0, 1, 1], [], []>} : vector<16x128xbf16>, vector<128x128xbf16>, vector<16x128xf32> -> vector<16x128xf32>
      %73 = arith.addf %64, %72 : vector<16x128xf32>
      %c2_i32_69 = arith.constant 2 : i32
      %74 = arith.addi %arg7, %c2_i32_69 : i32
      %c0_70 = arith.constant 0 : index
      %75 = arith.index_cast %74 : i32 to index
      %c0_71 = arith.constant 0 : index
      %c0_72 = arith.constant 0 : index
      %76 = vector.load %arg1[%c0_70, %75, %c0_71, %c0_72] : memref<1x18x18x128xbf16, #tpu.memory_space<vmem>>, vector<1x1x18x128xbf16>
      %77 = vector.shape_cast %76 : vector<1x1x18x128xbf16> to vector<18x128xbf16>
      %78 = vector.extract_strided_slice %77 {offsets = [2, 0], sizes = [16, 128], strides = [1, 1]} : vector<18x128xbf16> to vector<16x128xbf16>
      %c2_73 = arith.constant 2 : index
      %c2_74 = arith.constant 2 : index
      %c0_75 = arith.constant 0 : index
      %c0_76 = arith.constant 0 : index
      %79 = vector.load %arg3[%c2_73, %c2_74, %c0_75, %c0_76] : memref<3x3x128x128xbf16, #tpu.memory_space<vmem>>, vector<1x1x128x128xbf16>
      %80 = vector.shape_cast %79 : vector<1x1x128x128xbf16> to vector<128x128xbf16>
      %cst_77 = arith.constant dense<0.000000e+00> : vector<16x128xf32>
      %81 = tpu.matmul %78, %80, %cst_77 {dimension_numbers = #tpu.dot_dimension_numbers<[1], [0], [0], [1], [0, 0, 1, 1], [], []>} : vector<16x128xbf16>, vector<128x128xbf16>, vector<16x128xf32> -> vector<16x128xf32>
      %82 = arith.addf %73, %81 : vector<16x128xf32>
      %c0_i32_78 = arith.constant 0 : i32
      %83 = arith.addi %arg7, %c0_i32_78 : i32
      %c0_79 = arith.constant 0 : index
      %84 = arith.index_cast %83 : i32 to index
      %c0_80 = arith.constant 0 : index
      %c0_81 = arith.constant 0 : index
      %85 = vector.load %arg2[%c0_79, %84, %c0_80, %c0_81] : memref<1x18x18x8xbf16, #tpu.memory_space<vmem>>, vector<1x1x18x8xbf16>
      %86 = vector.shape_cast %85 : vector<1x1x18x8xbf16> to vector<18x8xbf16>
      %87 = vector.extract_strided_slice %86 {offsets = [0, 0], sizes = [16, 8], strides = [1, 1]} : vector<18x8xbf16> to vector<16x8xbf16>
      %c0_82 = arith.constant 0 : index
      %c0_83 = arith.constant 0 : index
      %c0_84 = arith.constant 0 : index
      %c0_85 = arith.constant 0 : index
      %88 = vector.load %arg4[%c0_82, %c0_83, %c0_84, %c0_85] : memref<3x3x8x128xbf16, #tpu.memory_space<vmem>>, vector<1x1x8x128xbf16>
      %89 = vector.shape_cast %88 : vector<1x1x8x128xbf16> to vector<8x128xbf16>
      %cst_86 = arith.constant dense<0.000000e+00> : vector<16x128xf32>
      %90 = tpu.matmul %87, %89, %cst_86 {dimension_numbers = #tpu.dot_dimension_numbers<[1], [0], [0], [1], [0, 0, 1, 1], [], []>} : vector<16x8xbf16>, vector<8x128xbf16>, vector<16x128xf32> -> vector<16x128xf32>
      %91 = arith.addf %82, %90 : vector<16x128xf32>
      %c0_i32_87 = arith.constant 0 : i32
      %92 = arith.addi %arg7, %c0_i32_87 : i32
      %c0_88 = arith.constant 0 : index
      %93 = arith.index_cast %92 : i32 to index
      %c0_89 = arith.constant 0 : index
      %c0_90 = arith.constant 0 : index
      %94 = vector.load %arg2[%c0_88, %93, %c0_89, %c0_90] : memref<1x18x18x8xbf16, #tpu.memory_space<vmem>>, vector<1x1x18x8xbf16>
      %95 = vector.shape_cast %94 : vector<1x1x18x8xbf16> to vector<18x8xbf16>
      %96 = vector.extract_strided_slice %95 {offsets = [1, 0], sizes = [16, 8], strides = [1, 1]} : vector<18x8xbf16> to vector<16x8xbf16>
      %c0_91 = arith.constant 0 : index
      %c1_92 = arith.constant 1 : index
      %c0_93 = arith.constant 0 : index
      %c0_94 = arith.constant 0 : index
      %97 = vector.load %arg4[%c0_91, %c1_92, %c0_93, %c0_94] : memref<3x3x8x128xbf16, #tpu.memory_space<vmem>>, vector<1x1x8x128xbf16>
      %98 = vector.shape_cast %97 : vector<1x1x8x128xbf16> to vector<8x128xbf16>
      %cst_95 = arith.constant dense<0.000000e+00> : vector<16x128xf32>
      %99 = tpu.matmul %96, %98, %cst_95 {dimension_numbers = #tpu.dot_dimension_numbers<[1], [0], [0], [1], [0, 0, 1, 1], [], []>} : vector<16x8xbf16>, vector<8x128xbf16>, vector<16x128xf32> -> vector<16x128xf32>
      %100 = arith.addf %91, %99 : vector<16x128xf32>
      %c0_i32_96 = arith.constant 0 : i32
      %101 = arith.addi %arg7, %c0_i32_96 : i32
      %c0_97 = arith.constant 0 : index
      %102 = arith.index_cast %101 : i32 to index
      %c0_98 = arith.constant 0 : index
      %c0_99 = arith.constant 0 : index
      %103 = vector.load %arg2[%c0_97, %102, %c0_98, %c0_99] : memref<1x18x18x8xbf16, #tpu.memory_space<vmem>>, vector<1x1x18x8xbf16>
      %104 = vector.shape_cast %103 : vector<1x1x18x8xbf16> to vector<18x8xbf16>
      %105 = vector.extract_strided_slice %104 {offsets = [2, 0], sizes = [16, 8], strides = [1, 1]} : vector<18x8xbf16> to vector<16x8xbf16>
      %c0_100 = arith.constant 0 : index
      %c2_101 = arith.constant 2 : index
      %c0_102 = arith.constant 0 : index
      %c0_103 = arith.constant 0 : index
      %106 = vector.load %arg4[%c0_100, %c2_101, %c0_102, %c0_103] : memref<3x3x8x128xbf16, #tpu.memory_space<vmem>>, vector<1x1x8x128xbf16>
      %107 = vector.shape_cast %106 : vector<1x1x8x128xbf16> to vector<8x128xbf16>
      %cst_104 = arith.constant dense<0.000000e+00> : vector<16x128xf32>
      %108 = tpu.matmul %105, %107, %cst_104 {dimension_numbers = #tpu.dot_dimension_numbers<[1], [0], [0], [1], [0, 0, 1, 1], [], []>} : vector<16x8xbf16>, vector<8x128xbf16>, vector<16x128xf32> -> vector<16x128xf32>
      %109 = arith.addf %100, %108 : vector<16x128xf32>
      %c1_i32_105 = arith.constant 1 : i32
      %110 = arith.addi %arg7, %c1_i32_105 : i32
      %c0_106 = arith.constant 0 : index
      %111 = arith.index_cast %110 : i32 to index
      %c0_107 = arith.constant 0 : index
      %c0_108 = arith.constant 0 : index
      %112 = vector.load %arg2[%c0_106, %111, %c0_107, %c0_108] : memref<1x18x18x8xbf16, #tpu.memory_space<vmem>>, vector<1x1x18x8xbf16>
      %113 = vector.shape_cast %112 : vector<1x1x18x8xbf16> to vector<18x8xbf16>
      %114 = vector.extract_strided_slice %113 {offsets = [0, 0], sizes = [16, 8], strides = [1, 1]} : vector<18x8xbf16> to vector<16x8xbf16>
      %c1_109 = arith.constant 1 : index
      %c0_110 = arith.constant 0 : index
      %c0_111 = arith.constant 0 : index
      %c0_112 = arith.constant 0 : index
      %115 = vector.load %arg4[%c1_109, %c0_110, %c0_111, %c0_112] : memref<3x3x8x128xbf16, #tpu.memory_space<vmem>>, vector<1x1x8x128xbf16>
      %116 = vector.shape_cast %115 : vector<1x1x8x128xbf16> to vector<8x128xbf16>
      %cst_113 = arith.constant dense<0.000000e+00> : vector<16x128xf32>
      %117 = tpu.matmul %114, %116, %cst_113 {dimension_numbers = #tpu.dot_dimension_numbers<[1], [0], [0], [1], [0, 0, 1, 1], [], []>} : vector<16x8xbf16>, vector<8x128xbf16>, vector<16x128xf32> -> vector<16x128xf32>
      %118 = arith.addf %109, %117 : vector<16x128xf32>
      %c1_i32_114 = arith.constant 1 : i32
      %119 = arith.addi %arg7, %c1_i32_114 : i32
      %c0_115 = arith.constant 0 : index
      %120 = arith.index_cast %119 : i32 to index
      %c0_116 = arith.constant 0 : index
      %c0_117 = arith.constant 0 : index
      %121 = vector.load %arg2[%c0_115, %120, %c0_116, %c0_117] : memref<1x18x18x8xbf16, #tpu.memory_space<vmem>>, vector<1x1x18x8xbf16>
      %122 = vector.shape_cast %121 : vector<1x1x18x8xbf16> to vector<18x8xbf16>
      %123 = vector.extract_strided_slice %122 {offsets = [1, 0], sizes = [16, 8], strides = [1, 1]} : vector<18x8xbf16> to vector<16x8xbf16>
      %c1_118 = arith.constant 1 : index
      %c1_119 = arith.constant 1 : index
      %c0_120 = arith.constant 0 : index
      %c0_121 = arith.constant 0 : index
      %124 = vector.load %arg4[%c1_118, %c1_119, %c0_120, %c0_121] : memref<3x3x8x128xbf16, #tpu.memory_space<vmem>>, vector<1x1x8x128xbf16>
      %125 = vector.shape_cast %124 : vector<1x1x8x128xbf16> to vector<8x128xbf16>
      %cst_122 = arith.constant dense<0.000000e+00> : vector<16x128xf32>
      %126 = tpu.matmul %123, %125, %cst_122 {dimension_numbers = #tpu.dot_dimension_numbers<[1], [0], [0], [1], [0, 0, 1, 1], [], []>} : vector<16x8xbf16>, vector<8x128xbf16>, vector<16x128xf32> -> vector<16x128xf32>
      %127 = arith.addf %118, %126 : vector<16x128xf32>
      %c1_i32_123 = arith.constant 1 : i32
      %128 = arith.addi %arg7, %c1_i32_123 : i32
      %c0_124 = arith.constant 0 : index
      %129 = arith.index_cast %128 : i32 to index
      %c0_125 = arith.constant 0 : index
      %c0_126 = arith.constant 0 : index
      %130 = vector.load %arg2[%c0_124, %129, %c0_125, %c0_126] : memref<1x18x18x8xbf16, #tpu.memory_space<vmem>>, vector<1x1x18x8xbf16>
      %131 = vector.shape_cast %130 : vector<1x1x18x8xbf16> to vector<18x8xbf16>
      %132 = vector.extract_strided_slice %131 {offsets = [2, 0], sizes = [16, 8], strides = [1, 1]} : vector<18x8xbf16> to vector<16x8xbf16>
      %c1_127 = arith.constant 1 : index
      %c2_128 = arith.constant 2 : index
      %c0_129 = arith.constant 0 : index
      %c0_130 = arith.constant 0 : index
      %133 = vector.load %arg4[%c1_127, %c2_128, %c0_129, %c0_130] : memref<3x3x8x128xbf16, #tpu.memory_space<vmem>>, vector<1x1x8x128xbf16>
      %134 = vector.shape_cast %133 : vector<1x1x8x128xbf16> to vector<8x128xbf16>
      %cst_131 = arith.constant dense<0.000000e+00> : vector<16x128xf32>
      %135 = tpu.matmul %132, %134, %cst_131 {dimension_numbers = #tpu.dot_dimension_numbers<[1], [0], [0], [1], [0, 0, 1, 1], [], []>} : vector<16x8xbf16>, vector<8x128xbf16>, vector<16x128xf32> -> vector<16x128xf32>
      %136 = arith.addf %127, %135 : vector<16x128xf32>
      %c2_i32_132 = arith.constant 2 : i32
      %137 = arith.addi %arg7, %c2_i32_132 : i32
      %c0_133 = arith.constant 0 : index
      %138 = arith.index_cast %137 : i32 to index
      %c0_134 = arith.constant 0 : index
      %c0_135 = arith.constant 0 : index
      %139 = vector.load %arg2[%c0_133, %138, %c0_134, %c0_135] : memref<1x18x18x8xbf16, #tpu.memory_space<vmem>>, vector<1x1x18x8xbf16>
      %140 = vector.shape_cast %139 : vector<1x1x18x8xbf16> to vector<18x8xbf16>
      %141 = vector.extract_strided_slice %140 {offsets = [0, 0], sizes = [16, 8], strides = [1, 1]} : vector<18x8xbf16> to vector<16x8xbf16>
      %c2_136 = arith.constant 2 : index
      %c0_137 = arith.constant 0 : index
      %c0_138 = arith.constant 0 : index
      %c0_139 = arith.constant 0 : index
      %142 = vector.load %arg4[%c2_136, %c0_137, %c0_138, %c0_139] : memref<3x3x8x128xbf16, #tpu.memory_space<vmem>>, vector<1x1x8x128xbf16>
      %143 = vector.shape_cast %142 : vector<1x1x8x128xbf16> to vector<8x128xbf16>
      %cst_140 = arith.constant dense<0.000000e+00> : vector<16x128xf32>
      %144 = tpu.matmul %141, %143, %cst_140 {dimension_numbers = #tpu.dot_dimension_numbers<[1], [0], [0], [1], [0, 0, 1, 1], [], []>} : vector<16x8xbf16>, vector<8x128xbf16>, vector<16x128xf32> -> vector<16x128xf32>
      %145 = arith.addf %136, %144 : vector<16x128xf32>
      %c2_i32_141 = arith.constant 2 : i32
      %146 = arith.addi %arg7, %c2_i32_141 : i32
      %c0_142 = arith.constant 0 : index
      %147 = arith.index_cast %146 : i32 to index
      %c0_143 = arith.constant 0 : index
      %c0_144 = arith.constant 0 : index
      %148 = vector.load %arg2[%c0_142, %147, %c0_143, %c0_144] : memref<1x18x18x8xbf16, #tpu.memory_space<vmem>>, vector<1x1x18x8xbf16>
      %149 = vector.shape_cast %148 : vector<1x1x18x8xbf16> to vector<18x8xbf16>
      %150 = vector.extract_strided_slice %149 {offsets = [1, 0], sizes = [16, 8], strides = [1, 1]} : vector<18x8xbf16> to vector<16x8xbf16>
      %c2_145 = arith.constant 2 : index
      %c1_146 = arith.constant 1 : index
      %c0_147 = arith.constant 0 : index
      %c0_148 = arith.constant 0 : index
      %151 = vector.load %arg4[%c2_145, %c1_146, %c0_147, %c0_148] : memref<3x3x8x128xbf16, #tpu.memory_space<vmem>>, vector<1x1x8x128xbf16>
      %152 = vector.shape_cast %151 : vector<1x1x8x128xbf16> to vector<8x128xbf16>
      %cst_149 = arith.constant dense<0.000000e+00> : vector<16x128xf32>
      %153 = tpu.matmul %150, %152, %cst_149 {dimension_numbers = #tpu.dot_dimension_numbers<[1], [0], [0], [1], [0, 0, 1, 1], [], []>} : vector<16x8xbf16>, vector<8x128xbf16>, vector<16x128xf32> -> vector<16x128xf32>
      %154 = arith.addf %145, %153 : vector<16x128xf32>
      %c2_i32_150 = arith.constant 2 : i32
      %155 = arith.addi %arg7, %c2_i32_150 : i32
      %c0_151 = arith.constant 0 : index
      %156 = arith.index_cast %155 : i32 to index
      %c0_152 = arith.constant 0 : index
      %c0_153 = arith.constant 0 : index
      %157 = vector.load %arg2[%c0_151, %156, %c0_152, %c0_153] : memref<1x18x18x8xbf16, #tpu.memory_space<vmem>>, vector<1x1x18x8xbf16>
      %158 = vector.shape_cast %157 : vector<1x1x18x8xbf16> to vector<18x8xbf16>
      %159 = vector.extract_strided_slice %158 {offsets = [2, 0], sizes = [16, 8], strides = [1, 1]} : vector<18x8xbf16> to vector<16x8xbf16>
      %c2_154 = arith.constant 2 : index
      %c2_155 = arith.constant 2 : index
      %c0_156 = arith.constant 0 : index
      %c0_157 = arith.constant 0 : index
      %160 = vector.load %arg4[%c2_154, %c2_155, %c0_156, %c0_157] : memref<3x3x8x128xbf16, #tpu.memory_space<vmem>>, vector<1x1x8x128xbf16>
      %161 = vector.shape_cast %160 : vector<1x1x8x128xbf16> to vector<8x128xbf16>
      %cst_158 = arith.constant dense<0.000000e+00> : vector<16x128xf32>
      %162 = tpu.matmul %159, %161, %cst_158 {dimension_numbers = #tpu.dot_dimension_numbers<[1], [0], [0], [1], [0, 0, 1, 1], [], []>} : vector<16x8xbf16>, vector<8x128xbf16>, vector<16x128xf32> -> vector<16x128xf32>
      %163 = arith.addf %154, %162 : vector<16x128xf32>
      %c0_159 = arith.constant 0 : index
      %c0_160 = arith.constant 0 : index
      %164 = vector.load %arg5[%c0_159, %c0_160] : memref<1x128xf32, #tpu.memory_space<vmem>>, vector<1x128xf32>
      %165 = vector.broadcast %164 : vector<1x128xf32> to vector<16x128xf32>
      %166 = arith.addf %163, %165 : vector<16x128xf32>
      %cst_161 = arith.constant 0.000000e+00 : f32
      %167 = vector.broadcast %cst_161 : f32 to vector<16x128xf32>
      %168 = arith.cmpf oge, %166, %167 : vector<16x128xf32>
      %cst_162 = arith.constant 2.000000e-01 : f32
      %169 = vector.broadcast %cst_162 : f32 to vector<16x128xf32>
      %170 = arith.mulf %169, %166 : vector<16x128xf32>
      %171 = arith.select %168, %166, %170 : vector<16x128xi1>, vector<16x128xf32>
      %c0_163 = arith.constant 0 : index
      %172 = arith.index_cast %arg7 : i32 to index
      %c0_164 = arith.constant 0 : index
      %c0_165 = arith.constant 0 : index
      %173 = vector.load %arg6[%c0_163, %172, %c0_164, %c0_165] : memref<1x16x16x128xf32, #tpu.memory_space<vmem>>, vector<1x1x16x128xf32>
      %174 = vector.shape_cast %173 : vector<1x1x16x128xf32> to vector<16x128xf32>
      %175 = vector.shape_cast %171 : vector<16x128xf32> to vector<1x1x16x128xf32>
      tpu.vector_store %arg6[%c0_163, %172, %c0_164, %c0_165], %175 {strides = array<i32>} : memref<1x16x16x128xf32, #tpu.memory_space<vmem>>, vector<1x1x16x128xf32>,
    }
    %c16_i32_0 = arith.constant 16 : i32
    return
  }
  func.func @transform_0(%arg0: i32) -> (i32, i32, i32, i32) {
    %c0_i32 = arith.constant 0 : i32
    %c0_i32_0 = arith.constant 0 : i32
    %c0_i32_1 = arith.constant 0 : i32
    %c0_i32_2 = arith.constant 0 : i32
    return %arg0, %c0_i32, %c0_i32_0, %c0_i32_1 : i32, i32, i32, i32
  }
  func.func @transform_1(%arg0: i32) -> (i32, i32, i32, i32) {
    %c0_i32 = arith.constant 0 : i32
    %c0_i32_0 = arith.constant 0 : i32
    %c0_i32_1 = arith.constant 0 : i32
    %c0_i32_2 = arith.constant 0 : i32
    return %arg0, %c0_i32, %c0_i32_0, %c0_i32_1 : i32, i32, i32, i32
  }
  func.func @transform_2(%arg0: i32) -> (i32, i32, i32, i32) {
    %c0_i32 = arith.constant 0 : i32
    %c0_i32_0 = arith.constant 0 : i32
    %c0_i32_1 = arith.constant 0 : i32
    %c0_i32_2 = arith.constant 0 : i32
    %c0_i32_3 = arith.constant 0 : i32
    return %c0_i32, %c0_i32_0, %c0_i32_1, %c0_i32_2 : i32, i32, i32, i32
  }
  func.func @transform_3(%arg0: i32) -> (i32, i32, i32, i32) {
    %c0_i32 = arith.constant 0 : i32
    %c0_i32_0 = arith.constant 0 : i32
    %c0_i32_1 = arith.constant 0 : i32
    %c0_i32_2 = arith.constant 0 : i32
    %c0_i32_3 = arith.constant 0 : i32
    return %c0_i32, %c0_i32_0, %c0_i32_1, %c0_i32_2 : i32, i32, i32, i32
  }
  func.func @transform_4(%arg0: i32) -> (i32, i32) {
    %c0_i32 = arith.constant 0 : i32
    %c0_i32_0 = arith.constant 0 : i32
    %c0_i32_1 = arith.constant 0 : i32
    return %c0_i32, %c0_i32_0 : i32, i32
  }
  func.func @transform_5(%arg0: i32) -> (i32, i32, i32, i32) {
    %c0_i32 = arith.constant 0 : i32
    %c0_i32_0 = arith.constant 0 : i32
    %c0_i32_1 = arith.constant 0 : i32
    %c0_i32_2 = arith.constant 0 : i32
    return %arg0, %c0_i32, %c0_i32_0, %c0_i32_1 : i32, i32, i32, i32
  }
}

</mosaic_0001>

<bundles_post_ra>
// kernel: cnn_forward.10
= control target key start
LH: loop header
LB: loop body
LE: loop exit
PB: predicated region body
PF: predicated region fallthrough
CT: control target
= control target key end

     0   :  { %s828_s21 = smov 0   ;;  %s959_s0 = inlined_call_operand.vmem [shape: bf16[2,9,9,8], index: 0, kind: input, shape index: {}]   ;;  %s960_s1 = inlined_call_operand.vmem [shape: bf16[2,9,9,8], index: 1, kind: input, shape index: {}]   ;;  %s961_s2 = inlined_call_operand.vmem [shape: bf16[2,9,9,8], index: 2, kind: input, shape index: {}]   ;;  %s962_s3 = inlined_call_operand.vmem [shape: bf16[2,9,9,8], index: 3, kind: input, shape index: {}]   ;;  %s963_s4 = inlined_call_operand.vmem [shape: bf16[3,3,8,128], index: 4, kind: input, shape index: {}]   ;;  %s964_s5 = inlined_call_operand.vmem [shape: f32[1,128], index: 5, kind: input, shape index: {}]   ;;  %s965_s6 = inlined_call_operand.vmem [shape: bf16[2,8,8,128], index: 6, kind: output, shape index: {}]  }
   0x1 LB: > { %s698_s22 = sadd.s32 4294967295, %s787_s21   ;;  %p702_p0 = scmp.ge.s32.totalorder %s787_s21, 1  ;;  %s787_s21 = sphi %s828_s21, %s16_s21  }
   0x2   : > { %p242_p1 = scmp.lt.s32.totalorder %s787_s21, 3 }
   0x4   : > { %p243_p2 = pnand %p702_p0, %p242_p1 }
   0x5   : > { %p287_p3 = scmp.lt.s32.totalorder (!%p243_p2), %s698_s22, 1  ;;  %s859_s16 = smov (!%p243_p2), 0  }
   0x6   : > { %246 = sbr.rel (%p243_p2) target bundleno = 192 (0xc0), region = 44 }
   0xb   : > { %s967_s22 = smov (!%p287_p3, %s698_s22), 1 }
   0xc   : > { %s836_s23 = smul.u32 72, %s967_s22  ;;  %s751_s24 = sshll.u32 %s967_s22, 5 }
   0xd   : > { %s841_s27 = scalar_lea.vmem %s965_s6, %s751_s24 }
   0xe   : > { %s291_s30 = scalar_lea.vmem %s959_s0, %s836_s23  ;;  %s296_s9 = scalar_lea.vmem %s960_s1, %s836_s23 }
   0xf   : > { %s301_s12 = scalar_lea.vmem %s961_s2, %s836_s23  ;;  %s306_s15 = scalar_lea.vmem %s962_s3, %s836_s23 }
  0x10 LB: >> { %v712_v0 = vld [vmem:[%s963_s4 + $0x4] sm:$0xf]  ;;  %vm334_vm0 = vcmask 1043456   ;;  %v324_v1 = vld [vmem:[%s963_s4] sm:$0xf]  ;;  %s880_s28 = sshll.u32 %s791_s16, 3  ;;  %s791_s16 = sphi %s859_s16, %s318_s16  }
  0x11   : >> { %v336_v2 = vsel %vm334_vm0, %v712_v0, 0  ;;  %v355_v3 = vsel %vm334_vm0, %v324_v1, 0  ;;  %v722_v4 = vld [vmem:[%s963_s4 + $0xc] sm:$0xf]  ;;  %v725_v5 = vld [vmem:[%s963_s4 + $0x10] sm:$0xf]  ;;  %s892_s11 = scalar_lea.vmem %s296_s9, %s880_s28  ;;  %s900_s17 = scalar_lea.vmem %s291_s30, %s880_s28 }
  0x12   : >> { %345 = vmatpush.bf16.msra.mxu0 %v336_v2  ;;  %364 = vmatpush.bf16.msra.mxu1 %v355_v3  ;;  %v414_v6 = vsel %vm334_vm0, %v722_v4, 0  ;;  %vm330_vm1 = vcmask 64512   ;;  %v439_v7 = vsel %vm334_vm0, %v725_v5, 0  ;;  %v715_v8 = vld [vmem:[%s963_s4 + $0x8] sm:$0xf]  ;;  %s405_s26 = scalar_lea.vmem %s301_s12, %s880_s28  ;;  %s431_s18 = scalar_lea.vmem %s306_s15, %s880_s28 }
  0x13   : >> { %423 = vmatpush.bf16.msra.mxu3 %v414_v6  ;;  %v388_v9 = vsel %vm334_vm0, %v715_v8, 0  ;;  %v736_v10 = vld [vmem:[%s963_s4 + $0x18] sm:$0xf]  ;;  %v740_v11 = vld [vmem:[%s963_s4 + $0x1c] sm:$0xf] }
  0x14   : >> { %v327_v12 = vld [vmem:[%s892_s11] sm:$0xf]  ;;  %397 = vmatpush.bf16.msra.mxu2 %v388_v9  ;;  %v756_v17 = vld [vmem:[%s405_s26] sm:$0x10]  ;;  %v501_v20 = vsel %vm334_vm0, %v736_v10, 0  ;;  %v526_v21 = vsel %vm334_vm0, %v740_v11, 0 }
  0x15   : >> { %v322_v13 = vld [vmem:[%s900_s17] sm:$0xf]  ;;  %713 = vmatmul.msk.bf16.vlgmr.msra.gmra.mxu0 %vm330_vm1, %v327_v12  ;;  %v753_v19 = vld [vmem:[%s900_s17] sm:$0x10]  ;;  %v727_v22 = vld [vmem:[%s963_s4 + $0x14] sm:$0xf] }
  0x16   : >> { %448 = vmatpush.bf16.msrb.mxu0 %v439_v7  ;;  %v718_v14 = vld [vmem:[%s900_s17] sm:$0xf]  ;;  %714 = vmatmul.msk.bf16.vlgmr.msra.gmra.mxu1 %vm330_vm1, %v322_v13  ;;  %v473_v24 = vsel %vm334_vm0, %v727_v22, 0  ;;  %v745_v36 = vld [vmem:[%s900_s17 + $0x8] sm:$0xf] }
  0x17   : >> { %v406_v15 = vld [vmem:[%s405_s26] sm:$0xf]  ;;  %v719_v23 = vor.u32 %v753_v19, %v718_v14  ;;  %535 = vmatpush.bf16.msrb.mxu3 %v526_v21  ;;  %482 = vmatpush.bf16.msrb.mxu1 %v473_v24  ;;  %v758_v37 = vld [vmem:[%s900_s17 + $0x8] sm:$0x10]  ;;  %v739_v38 = vld [vmem:[%s892_s11 + $0x8] sm:$0xf] }
  0x18   : >> { %v730_v16 = vld [vmem:[%s405_s26] sm:$0xf]  ;;  %723 = vmatmul.msk.bf16.vlgmr.msra.gmra.mxu3 %vm330_vm1, %v406_v15  ;;  %510 = vmatpush.bf16.msrb.mxu2 %v501_v20  ;;  %v746_v39 = vor.u32 %v758_v37, %v745_v36  ;;  %v734_v41 = vld [vmem:[%s900_s17 + $0x8] sm:$0xf]  ;;  %s748_s17 = sshll.u32 %s791_s16, 2  ;;  %s318_s16 = sadd.s32 1, %s791_s16  }
  0x19   : >> { %v731_v18 = vor.u32 %v756_v17, %v730_v16  ;;  %v742_v25 = vld [vmem:[%s963_s4 + $0x20] sm:$0xf]  ;;  %v378_v27 = vshrl.u32 %v719_v23, 16  ;;  %v380_v28 = vshll.u32 %v719_v23, 16  ;;  %s584_s19 = scalar_lea.vmem %s841_s27, %s748_s17  ;;  %p315_p4 = scmp.ge.s32.totalorder %s318_s16, 8  }
  0x1a   : >> { %v560_v29 = vsel %vm334_vm0, %v742_v25, 0  ;;  %v432_v35 = vld [vmem:[%s431_s18] sm:$0xf]  ;;  %v552_v40 = vshll.u32 %v746_v39, 16  ;;  %v550_v42 = vshrl.u32 %v746_v39, 16 }
  0x1b   : >> { %v465_v26 = vshll.u32 %v731_v18, 16  ;;  %569 = vmatpush.bf16.msra.mxu0 %v560_v29  ;;  %v382_v30 = vrot.slane %v380_v28, 1  ;;  %v463_v31 = vshrl.u32 %v731_v18, 16  ;;  %v776_v4 = vld [vmem:[%s964_s5] ss:$0 sm:$0xff] }
  0x1c   : >> { %v554_v43 = vrot.slane %v552_v40, 1 }
  0x1d   : >> { %v383_v32 = vor.u32 %v382_v30, %v378_v27  ;;  %v467_v33 = vrot.slane %v465_v26, 1 }
  0x1e   : >> { %v555_v44 = vor.u32 %v554_v43, %v550_v42 }
  0x1f   : >> { %720 = vmatmul.msk.bf16.vlgmr.msra.gmra.mxu2 %vm330_vm1, %v383_v32  ;;  %v468_v34 = vor.u32 %v467_v33, %v463_v31 }
  0x25   : >> { %726 = vmatmul.msk.bf16.vlgmr.msrb.gmra.mxu0 %vm330_vm1, %v432_v35 }
  0x26   : >> { %732 = vmatmul.msk.bf16.vlgmr.msrb.gmra.mxu1 %vm330_vm1, %v468_v34 }
  0x28   : >> { %741 = vmatmul.msk.bf16.vlgmr.msrb.gmra.mxu3 %vm330_vm1, %v739_v38 }
  0x2f   : >> { %737 = vmatmul.msk.bf16.vlgmr.msrb.gmra.mxu2 %vm330_vm1, %v734_v41 }
  0x35   : >> { %747 = vmatmul.msk.bf16.vlgmr.msra.gmra.mxu0 %vm330_vm1, %v555_v44 }
  0x92   : >> { %v347_v45 = vpop.f32.mrf.mxu0 }
  0x93   : >> { %v366_v46 = vpop.f32.mrf.mxu1 }
  0x94   : >> { %v367_v53 = vadd.f32 %v366_v46, %v347_v45 }
  0x9a   : >> { %v349_v48 = vpop.f32.mrf.mxu0 }
  0x9b   : >> { %v425_v47 = vpop.f32.mrf.mxu3  ;;  %v368_v49 = vpop.f32.mrf.mxu1 }
  0xa2   : >> { %v399_v51 = vpop.f32.mrf.mxu2  ;;  %v450_v52 = vpop.f32.mrf.mxu0 }
  0xa3   : >> { %v427_v50 = vpop.f32.mrf.mxu3  ;;  %v484_v54 = vpop.f32.mrf.mxu1  ;;  %v403_v55 = vadd.f32 %v399_v51, %v367_v53 }
  0xa5   : >> { %v429_v56 = vadd.f32 %v425_v47, %v403_v55 }
  0xa7   : >> { %v454_v61 = vadd.f32 %v450_v52, %v429_v56 }
  0xa9   : >> { %v488_v62 = vadd.f32 %v484_v54, %v454_v61 }
  0xaa   : >> { %v401_v58 = vpop.f32.mrf.mxu2  ;;  %v452_v59 = vpop.f32.mrf.mxu0 }
  0xab   : >> { %v537_v57 = vpop.f32.mrf.mxu3  ;;  %v486_v60 = vpop.f32.mrf.mxu1 }
  0xb2   : >> { %v512_v0 = vpop.f32.mrf.mxu2  ;;  %v571_v1 = vpop.f32.mrf.mxu0 }
  0xb3   : >> { %v539_v63 = vpop.f32.mrf.mxu3  ;;  %v516_v2 = vadd.f32 %v512_v0, %v488_v62 }
  0xb5   : >> { %v541_v3 = vadd.f32 %v537_v57, %v516_v2 }
  0xb7   : >> { %v575_v5 = vadd.f32 %v571_v1, %v541_v3 }
  0xb9   : >> { %v580_v6 = vadd.f32 %v776_v4, %v575_v5 }
  0xba   : >> { %v514_v7 = vpop.f32.mrf.mxu2  ;;  %v573_v8 = vpop.f32.mrf.mxu0 }
  0xbb   : >> { %v581_v9 = vmax.f32 %v580_v6, 0.0  ;;  %317 = sbr.rel (!%p315_p4) target bundleno = 16 (0x10), region = 105 }
  0xbd   : >> { %v582_v10 = vpack.c.bf16 %v581_v9, %v581_v9 }
  0xbf   : >> { %585 = vst [vmem:[%s584_s19] sm:$0xf] %v582_v10 }
  0xc0 PF: > { %s16_s21 = sadd.s32 1, %s787_s21  }
  0xc1   : > { %p13_p5 = scmp.ge.s32.totalorder %s16_s21, 4  }
  0xc3   :  { %15 = sbr.rel (!%p13_p5) target bundleno = 1 (0x1), region = 116 }

// kernel: cnn_forward.11
= control target key start
LH: loop header
LB: loop body
LE: loop exit
PB: predicated region body
PF: predicated region fallthrough
CT: control target
= control target key end

     0   :  { %s1780_s21 = smov 0   ;;  %s2078_s0 = inlined_call_operand.vmem [shape: bf16[2,5,5,128], index: 0, kind: input, shape index: {}]   ;;  %s2079_s1 = inlined_call_operand.vmem [shape: bf16[2,5,5,128], index: 1, kind: input, shape index: {}]   ;;  %s2080_s2 = inlined_call_operand.vmem [shape: bf16[2,5,5,128], index: 2, kind: input, shape index: {}]   ;;  %s2081_s3 = inlined_call_operand.vmem [shape: bf16[2,5,5,128], index: 3, kind: input, shape index: {}]   ;;  %s2082_s4 = inlined_call_operand.vmem [shape: bf16[3,3,128,128], index: 4, kind: input, shape index: {}]   ;;  %s2083_s5 = inlined_call_operand.vmem [shape: f32[1,128], index: 5, kind: input, shape index: {}]   ;;  %s2084_s6 = inlined_call_operand.vmem [shape: bf16[2,4,4,128], index: 6, kind: output, shape index: {}]  }
   0x1 LB: > { %s1200_s22 = sadd.s32 4294967295, %s1739_s21   ;;  %p1204_p0 = scmp.ge.s32.totalorder %s1739_s21, 1  ;;  %s1739_s21 = sphi %s1780_s21, %s16_s21  }
   0x2   : > { %p242_p1 = scmp.lt.s32.totalorder %s1739_s21, 3 }
   0x4   : > { %p243_p2 = pnand %p1204_p0, %p242_p1 }
   0x5   : > { %p287_p3 = scmp.lt.s32.totalorder (!%p243_p2), %s1200_s22, 1  ;;  %s1811_s16 = smov (!%p243_p2), 0  }
   0x6   : > { %246 = sbr.rel (%p243_p2) target bundleno = 247 (0xf7), region = 44 }
   0xb   : > { %s2086_s22 = smov (!%p287_p3, %s1200_s22), 1 }
   0xc   : > { %s1788_s23 = smul.u32 20, %s2086_s22  ;;  %s1638_s24 = sshll.u32 %s2086_s22, 3 }
   0xd   : > { %s1793_s27 = scalar_lea.vmem %s2084_s6, %s1638_s24 }
   0xe   : > { %s291_s30 = scalar_lea.vmem %s2078_s0, %s1788_s23  ;;  %s296_s9 = scalar_lea.vmem %s2079_s1, %s1788_s23 }
   0xf   : > { %s301_s12 = scalar_lea.vmem %s2080_s2, %s1788_s23  ;;  %s306_s15 = scalar_lea.vmem %s2081_s3, %s1788_s23 }
  0x10 LB: >> { %v1654_v0 = vld [vmem:[%s2082_s4 + $0x78] sm:$0xff]  ;;  %v1653_v4 = vld [vmem:[%s2082_s4 + $0x70] sm:$0xff]  ;;  %v1652_v8 = vld [vmem:[%s2082_s4 + $0x68] sm:$0xff]  ;;  %s1853_s28 = sshll.u32 %s1743_s16, 2  ;;  %s1635_s22 = sshll.u32 %s1743_s16, 1  ;;  %s1743_s16 = sphi %s1811_s16, %s317_s16  }
  0x11   : >> { %v1662_v1 = vld [vmem:[%s2082_s4 + $0xb8] sm:$0xff]  ;;  %405 = vmatpush.bf16.msra.mxu0 %v1654_v0  ;;  %v1661_v5 = vld [vmem:[%s2082_s4 + $0xb0] sm:$0xff]  ;;  %v1660_v9 = vld [vmem:[%s2082_s4 + $0xa8] sm:$0xff]  ;;  %s1873_s20 = scalar_lea.vmem %s291_s30, %s1853_s28  ;;  %s1936_s14 = scalar_lea.vmem %s296_s9, %s1853_s28 }
  0x12   : >> { %v1670_v2 = vld [vmem:[%s2082_s4 + $0xf8] sm:$0xff]  ;;  %555 = vmatpush.bf16.msra.mxu2 %v1662_v1  ;;  %v1669_v6 = vld [vmem:[%s2082_s4 + $0xf0] sm:$0xff]  ;;  %v1668_v10 = vld [vmem:[%s2082_s4 + $0xe8] sm:$0xff]  ;;  %s570_s26 = scalar_lea.vmem %s301_s12, %s1853_s28  ;;  %s652_s11 = scalar_lea.vmem %s306_s15, %s1853_s28 }
  0x13   : >> { %v1646_v3 = vld [vmem:[%s2082_s4 + $0x38] sm:$0xff]  ;;  %637 = vmatpush.bf16.msra.mxu3 %v1670_v2  ;;  %v1645_v7 = vld [vmem:[%s2082_s4 + $0x30] sm:$0xff]  ;;  %v1644_v11 = vld [vmem:[%s2082_s4 + $0x28] sm:$0xff]  ;;  %s1086_s24 = scalar_lea.vmem %s1793_s27, %s1635_s22  ;;  %s317_s16 = sadd.s32 1, %s1743_s16  }
  0x14   : >> { %466 = vmatpush.bf16.msra.mxu1 %v1646_v3  ;;  %v1651_v12 = vld [vmem:[%s2082_s4 + $0x60] sm:$0xff]  ;;  %v1650_v16 = vld [vmem:[%s2082_s4 + $0x58] sm:$0xff]  ;;  %v1649_v22 = vld [vmem:[%s2082_s4 + $0x50] sm:$0xff]  ;;  %p314_p4 = scmp.ge.s32.totalorder %s317_s16, 4  }
  0x15   : >> { %406 = vmatpush.bf16.msra.mxu0 %v1653_v4  ;;  %v1659_v13 = vld [vmem:[%s2082_s4 + $0xa0] sm:$0xff]  ;;  %v1658_v17 = vld [vmem:[%s2082_s4 + $0x98] sm:$0xff]  ;;  %v1657_v23 = vld [vmem:[%s2082_s4 + $0x90] sm:$0xff] }
  0x16   : >> { %556 = vmatpush.bf16.msra.mxu2 %v1661_v5  ;;  %v1667_v14 = vld [vmem:[%s2082_s4 + $0xe0] sm:$0xff]  ;;  %v1666_v18 = vld [vmem:[%s2082_s4 + $0xd8] sm:$0xff]  ;;  %v1665_v25 = vld [vmem:[%s2082_s4 + $0xd0] sm:$0xff] }
  0x17   : >> { %638 = vmatpush.bf16.msra.mxu3 %v1669_v6  ;;  %v1643_v15 = vld [vmem:[%s2082_s4 + $0x20] sm:$0xff]  ;;  %v1642_v19 = vld [vmem:[%s2082_s4 + $0x18] sm:$0xff]  ;;  %v1641_v26 = vld [vmem:[%s2082_s4 + $0x10] sm:$0xff] }
  0x18   : >> { %467 = vmatpush.bf16.msra.mxu1 %v1645_v7  ;;  %v320_v20 = vld [vmem:[%s1873_s20] sm:$0x7]  ;;  %v1648_v27 = vld [vmem:[%s2082_s4 + $0x48] sm:$0xff]  ;;  %v1678_v36 = vld [vmem:[%s2082_s4 + $0x138] sm:$0xff] }
  0x19   : >> { %407 = vmatpush.bf16.msra.mxu0 %v1652_v8  ;;  %v497_v21 = vunpack.c.l.b16 %v320_v20  ;;  %v1656_v28 = vld [vmem:[%s2082_s4 + $0x88] sm:$0xff]  ;;  %v1647_v32 = vld [vmem:[%s2082_s4 + $0x40] sm:$0xff]  ;;  %v1694_v37 = vld [vmem:[%s2082_s4 + $0x1b8] sm:$0xff] }
  0x1a   : >> { %557 = vmatpush.bf16.msra.mxu2 %v1660_v9  ;;  %v1664_v30 = vld [vmem:[%s2082_s4 + $0xc8] sm:$0xff]  ;;  %v1655_v33 = vld [vmem:[%s2082_s4 + $0x80] sm:$0xff]  ;;  %v1702_v40 = vld [vmem:[%s2082_s4 + $0x1f8] sm:$0xff] }
  0x1b   : >> { %639 = vmatpush.bf16.msra.mxu3 %v1668_v10  ;;  %v498_v24 = vpack.c.b16 %v497_v21, %v497_v21  ;;  %v1640_v31 = vld [vmem:[%s2082_s4 + $0x8] sm:$0xff]  ;;  %v1663_v38 = vld [vmem:[%s2082_s4 + $0xc0] sm:$0xff]  ;;  %v1686_v41 = vld [vmem:[%s2082_s4 + $0x178] sm:$0xff] }
  0x1c   : >> { %468 = vmatpush.bf16.msra.mxu1 %v1644_v11  ;;  %v1639_v39 = vld [vmem:[%s2082_s4] sm:$0xff]  ;;  %v1677_v43 = vld [vmem:[%s2082_s4 + $0x130] sm:$0xff]  ;;  %v1676_v49 = vld [vmem:[%s2082_s4 + $0x128] sm:$0xff] }
  0x1d   : >> { %408 = vmatpush.bf16.msra.mxu0 %v1651_v12  ;;  %v502_v29 = vshll.u32 %v498_v24, 16  ;;  %v500_v34 = vshrl.u32 %v498_v24, 16  ;;  %v1693_v44 = vld [vmem:[%s2082_s4 + $0x1b0] sm:$0xff]  ;;  %v339_v45 = vld [vmem:[%s1936_s14] sm:$0x7]  ;;  %v1692_v50 = vld [vmem:[%s2082_s4 + $0x1a8] sm:$0xff] }
  0x1e   : >> { %558 = vmatpush.bf16.msra.mxu2 %v1659_v13  ;;  %v1701_v46 = vld [vmem:[%s2082_s4 + $0x1f0] sm:$0xff]  ;;  %v571_v48 = vld [vmem:[%s570_s26] sm:$0x7]  ;;  %v1700_v51 = vld [vmem:[%s2082_s4 + $0x1e8] sm:$0xff] }
  0x1f   : >> { %640 = vmatpush.bf16.msra.mxu3 %v1667_v14  ;;  %v504_v35 = vrot.slane %v502_v29, 1  ;;  %v1685_v47 = vld [vmem:[%s2082_s4 + $0x170] sm:$0xff]  ;;  %v1684_v52 = vld [vmem:[%s2082_s4 + $0x168] sm:$0xff]  ;;  %v1675_v53 = vld [vmem:[%s2082_s4 + $0x120] sm:$0xff]  ;;  %v751_v59 = vunpack.c.l.b16 %v571_v48 }
  0x20   : >> { %469 = vmatpush.bf16.msra.mxu1 %v1643_v15  ;;  %v1691_v54 = vld [vmem:[%s2082_s4 + $0x1a0] sm:$0xff]  ;;  %v1674_v57 = vld [vmem:[%s2082_s4 + $0x118] sm:$0xff]  ;;  %v1673_v62 = vld [vmem:[%s2082_s4 + $0x110] sm:$0xff] }
  0x21   : >> { %409 = vmatpush.bf16.msra.mxu0 %v1650_v16  ;;  %v505_v42 = vor.u32 %v504_v35, %v500_v34  ;;  %v1699_v55 = vld [vmem:[%s2082_s4 + $0x1e0] sm:$0xff]  ;;  %v1690_v58 = vld [vmem:[%s2082_s4 + $0x198] sm:$0xff]  ;;  %v1689_v63 = vld [vmem:[%s2082_s4 + $0x190] sm:$0xff]  ;;  %v752_v0 = vpack.c.b16 %v751_v59, %v751_v59 }
  0x22   : >> { %559 = vmatpush.bf16.msra.mxu2 %v1658_v17  ;;  %v1683_v56 = vld [vmem:[%s2082_s4 + $0x160] sm:$0xff]  ;;  %v1698_v60 = vld [vmem:[%s2082_s4 + $0x1d8] sm:$0xff]  ;;  %v1697_v1 = vld [vmem:[%s2082_s4 + $0x1d0] sm:$0xff] }
  0x23   : >> { %641 = vmatpush.bf16.msra.mxu3 %v1666_v18  ;;  %v1682_v61 = vld [vmem:[%s2082_s4 + $0x158] sm:$0xff]  ;;  %v1681_v2 = vld [vmem:[%s2082_s4 + $0x150] sm:$0xff]  ;;  %v1672_v3 = vld [vmem:[%s2082_s4 + $0x108] sm:$0xff]  ;;  %v756_v5 = vshll.u32 %v752_v0, 16  ;;  %v754_v11 = vshrl.u32 %v752_v0, 16 }
  0x24   : >> { %470 = vmatpush.bf16.msra.mxu1 %v1642_v19  ;;  %v1688_v4 = vld [vmem:[%s2082_s4 + $0x188] sm:$0xff]  ;;  %v1671_v8 = vld [vmem:[%s2082_s4 + $0x100] sm:$0xff]  ;;  %v1710_v10 = vld [vmem:[%s2082_s4 + $0x238] sm:$0xff] }
  0x25   : >> { %410 = vmatpush.bf16.msra.mxu0 %v1649_v22  ;;  %v1696_v6 = vld [vmem:[%s2082_s4 + $0x1c8] sm:$0xff]  ;;  %v1687_v9 = vld [vmem:[%s2082_s4 + $0x180] sm:$0xff]  ;;  %v758_v12 = vrot.slane %v756_v5, 1  ;;  %v1709_v17 = vld [vmem:[%s2082_s4 + $0x230] sm:$0xff] }
  0x26   : >> { %560 = vmatpush.bf16.msra.mxu2 %v1657_v23  ;;  %v1680_v7 = vld [vmem:[%s2082_s4 + $0x148] sm:$0xff]  ;;  %v1695_v13 = vld [vmem:[%s2082_s4 + $0x1c0] sm:$0xff]  ;;  %v1706_v23 = vld [vmem:[%s2082_s4 + $0x218] sm:$0xff] }
  0x27   : >> { %642 = vmatpush.bf16.msra.mxu3 %v1665_v25  ;;  %v1679_v14 = vld [vmem:[%s2082_s4 + $0x140] sm:$0xff]  ;;  %v759_v19 = vor.u32 %v758_v12, %v754_v11  ;;  %v1705_v25 = vld [vmem:[%s2082_s4 + $0x210] sm:$0xff] }
  0x28   : >> { %471 = vmatpush.bf16.msra.mxu1 %v1641_v26  ;;  %v1488_v15 = vld [vmem:[%s1873_s20 + $0x4] sm:$0x7]  ;;  %v653_v16 = vld [vmem:[%s652_s11] sm:$0x7] }
  0x29   : >> { %411 = vmatpush.bf16.msra.mxu0 %v1648_v27  ;;  %v1538_v18 = vld [vmem:[%s1936_s14 + $0x4] sm:$0x7]  ;;  %v1006_v22 = vunpack.c.l.b16 %v1488_v15  ;;  %v1704_v27 = vld [vmem:[%s2082_s4 + $0x208] sm:$0xff] }
  0x2a   : >> { %561 = vmatpush.bf16.msra.mxu2 %v1656_v28  ;;  %v1707_v21 = vld [vmem:[%s2082_s4 + $0x220] sm:$0xff] }
  0x2b   : >> { %643 = vmatpush.bf16.msra.mxu3 %v1664_v30  ;;  %v1007_v24 = vpack.c.b16 %v1006_v22, %v1006_v22  ;;  %v1703_v30 = vld [vmem:[%s2082_s4 + $0x200] sm:$0xff] }
  0x2c   : >> { %472 = vmatpush.bf16.msra.mxu1 %v1640_v31 }
  0x2d   : >> { %412 = vmatpush.bf16.msra.mxu0 %v1647_v32  ;;  %v1011_v26 = vshll.u32 %v1007_v24, 16  ;;  %v1009_v28 = vshrl.u32 %v1007_v24, 16 }
  0x2e   : >> { %562 = vmatpush.bf16.msra.mxu2 %v1655_v33 }
  0x2f   : >> { %644 = vmatpush.bf16.msra.mxu3 %v1663_v38  ;;  %v1013_v29 = vrot.slane %v1011_v26, 1 }
  0x30   : >> { %473 = vmatpush.bf16.msra.mxu1 %v1639_v39  ;;  %413 = vmatmul.bf16.vlgmr.msra.gmra.mxu0 %v339_v45 }
  0x31   : >> { %719 = vmatpush.bf16.msrb.mxu0 %v1678_v36  ;;  %563 = vmatmul.bf16.vlgmr.msra.gmra.mxu2 %v505_v42  ;;  %v1014_v31 = vor.u32 %v1013_v29, %v1009_v28 }
  0x32   : >> { %892 = vmatpush.bf16.msrb.mxu2 %v1694_v37  ;;  %645 = vmatmul.bf16.vlgmr.msra.gmra.mxu3 %v571_v48 }
  0x33   : >> { %974 = vmatpush.bf16.msrb.mxu3 %v1702_v40  ;;  %474 = vmatmul.bf16.vlgmr.msra.gmra.mxu1 %v320_v20  ;;  %v1708_v20 = vld [vmem:[%s2082_s4 + $0x228] sm:$0xff] }
  0x34   : >> { %809 = vmatpush.bf16.msrb.mxu1 %v1686_v41 }
  0x35   : >> { %720 = vmatpush.bf16.msrb.mxu0 %v1677_v43 }
  0x36   : >> { %893 = vmatpush.bf16.msrb.mxu2 %v1693_v44 }
  0x37   : >> { %975 = vmatpush.bf16.msrb.mxu3 %v1701_v46 }
  0x38   : >> { %810 = vmatpush.bf16.msrb.mxu1 %v1685_v47 }
  0x39   : >> { %721 = vmatpush.bf16.msrb.mxu0 %v1676_v49 }
  0x3a   : >> { %894 = vmatpush.bf16.msrb.mxu2 %v1692_v50 }
  0x3b   : >> { %976 = vmatpush.bf16.msrb.mxu3 %v1700_v51 }
  0x3c   : >> { %811 = vmatpush.bf16.msrb.mxu1 %v1684_v52 }
  0x3d   : >> { %722 = vmatpush.bf16.msrb.mxu0 %v1675_v53 }
  0x3e   : >> { %895 = vmatpush.bf16.msrb.mxu2 %v1691_v54 }
  0x3f   : >> { %977 = vmatpush.bf16.msrb.mxu3 %v1699_v55  ;;  %v1728_v55 = vld [vmem:[%s2083_s5] ss:$0 sm:$0xff] }
  0x40   : >> { %812 = vmatpush.bf16.msrb.mxu1 %v1683_v56 }
  0x41   : >> { %723 = vmatpush.bf16.msrb.mxu0 %v1674_v57 }
  0x42   : >> { %896 = vmatpush.bf16.msrb.mxu2 %v1690_v58 }
  0x43   : >> { %978 = vmatpush.bf16.msrb.mxu3 %v1698_v60 }
  0x44   : >> { %813 = vmatpush.bf16.msrb.mxu1 %v1682_v61 }
  0x45   : >> { %724 = vmatpush.bf16.msrb.mxu0 %v1673_v62 }
  0x46   : >> { %897 = vmatpush.bf16.msrb.mxu2 %v1689_v63 }
  0x47   : >> { %979 = vmatpush.bf16.msrb.mxu3 %v1697_v1 }
  0x48   : >> { %814 = vmatpush.bf16.msrb.mxu1 %v1681_v2 }
  0x49   : >> { %725 = vmatpush.bf16.msrb.mxu0 %v1672_v3 }
  0x4a   : >> { %898 = vmatpush.bf16.msrb.mxu2 %v1688_v4 }
  0x4b   : >> { %980 = vmatpush.bf16.msrb.mxu3 %v1696_v6 }
  0x4c   : >> { %815 = vmatpush.bf16.msrb.mxu1 %v1680_v7 }
  0x4d   : >> { %726 = vmatpush.bf16.msrb.mxu0 %v1671_v8 }
  0x4e   : >> { %899 = vmatpush.bf16.msrb.mxu2 %v1687_v9 }
  0x4f   : >> { %981 = vmatpush.bf16.msrb.mxu3 %v1695_v13 }
  0x50   : >> { %816 = vmatpush.bf16.msrb.mxu1 %v1679_v14  ;;  %727 = vmatmul.bf16.vlgmr.msrb.gmra.mxu0 %v653_v16 }
  0x51   : >> { %1064 = vmatpush.bf16.msra.mxu0 %v1710_v10  ;;  %900 = vmatmul.bf16.vlgmr.msrb.gmra.mxu2 %v1488_v15 }
  0x52   : >> { %982 = vmatmul.bf16.vlgmr.msrb.gmra.mxu3 %v1538_v18 }
  0x53   : >> { %817 = vmatmul.bf16.vlgmr.msrb.gmra.mxu1 %v759_v19 }
  0x55   : >> { %1065 = vmatpush.bf16.msra.mxu0 %v1709_v17 }
  0x59   : >> { %1066 = vmatpush.bf16.msra.mxu0 %v1708_v20 }
  0x5d   : >> { %1067 = vmatpush.bf16.msra.mxu0 %v1707_v21 }
  0x61   : >> { %1068 = vmatpush.bf16.msra.mxu0 %v1706_v23 }
  0x65   : >> { %1069 = vmatpush.bf16.msra.mxu0 %v1705_v25 }
  0x69   : >> { %1070 = vmatpush.bf16.msra.mxu0 %v1704_v27 }
  0x6d   : >> { %1071 = vmatpush.bf16.msra.mxu0 %v1703_v30 }
  0x70   : >> { %1072 = vmatmul.bf16.vlgmr.msra.gmra.mxu0 %v1014_v31 }
  0xad   : >> { %v414_v32 = vpop.f32.mrf.mxu0 }
  0xb0   : >> { %v475_v33 = vpop.f32.mrf.mxu1 }
  0xb1   : >> { %v476_v42 = vadd.f32 %v475_v33, %v414_v32 }
  0xb4   : >> { %v564_v34 = vpop.f32.mrf.mxu2 }
  0xb5   : >> { %v646_v35 = vpop.f32.mrf.mxu3  ;;  %v416_v36 = vpop.f32.mrf.mxu0  ;;  %v568_v44 = vadd.f32 %v564_v34, %v476_v42 }
  0xb7   : >> { %v650_v48 = vadd.f32 %v646_v35, %v568_v44 }
  0xb8   : >> { %v477_v37 = vpop.f32.mrf.mxu1 }
  0xbc   : >> { %v566_v38 = vpop.f32.mrf.mxu2 }
  0xbd   : >> { %v648_v39 = vpop.f32.mrf.mxu3 }
  0xcd   : >> { %v728_v40 = vpop.f32.mrf.mxu0 }
  0xce   : >> { %v732_v50 = vadd.f32 %v728_v40, %v650_v48 }
  0xd0   : >> { %v818_v41 = vpop.f32.mrf.mxu1 }
  0xd1   : >> { %v822_v52 = vadd.f32 %v818_v41, %v732_v50 }
  0xd4   : >> { %v901_v43 = vpop.f32.mrf.mxu2 }
  0xd5   : >> { %v983_v45 = vpop.f32.mrf.mxu3  ;;  %v730_v46 = vpop.f32.mrf.mxu0  ;;  %v905_v53 = vadd.f32 %v901_v43, %v822_v52 }
  0xd7   : >> { %v987_v54 = vadd.f32 %v983_v45, %v905_v53 }
  0xd8   : >> { %v820_v47 = vpop.f32.mrf.mxu1 }
  0xdc   : >> { %v903_v49 = vpop.f32.mrf.mxu2 }
  0xdd   : >> { %v985_v51 = vpop.f32.mrf.mxu3 }
  0xed   : >> { %v1073_v56 = vpop.f32.mrf.mxu0 }
  0xee   : >> { %v1077_v57 = vadd.f32 %v1073_v56, %v987_v54 }
  0xf0   : >> { %v1082_v58 = vadd.f32 %v1728_v55, %v1077_v57 }
  0xf2   : >> { %v1083_v59 = vmax.f32 %v1082_v58, 0.0  ;;  %316 = sbr.rel (!%p314_p4) target bundleno = 16 (0x10), region = 105 }
  0xf4   : >> { %v1084_v60 = vpack.c.bf16 %v1083_v59, %v1083_v59 }
  0xf5   : >> { %v1075_v61 = vpop.f32.mrf.mxu0 }
  0xf6   : >> { %1087 = vst [vmem:[%s1086_s24] sm:$0x3] %v1084_v60 }
  0xf7 PF: > { %s16_s21 = sadd.s32 1, %s1739_s21  }
  0xf8   : > { %p13_p5 = scmp.ge.s32.totalorder %s16_s21, 4  }
  0xfa   :  { %15 = sbr.rel (!%p13_p5) target bundleno = 1 (0x1), region = 116 }

// kernel: cnn_forward.12
= control target key start
LH: loop header
LB: loop body
LE: loop exit
PB: predicated region body
PF: predicated region fallthrough
CT: control target
= control target key end

     0   :  { %s1768_s21 = smov 0   ;;  %s2074_s0 = inlined_call_operand.vmem [shape: bf16[2,3,3,128], index: 0, kind: input, shape index: {}]   ;;  %s2075_s1 = inlined_call_operand.vmem [shape: bf16[2,3,3,128], index: 1, kind: input, shape index: {}]   ;;  %s2076_s2 = inlined_call_operand.vmem [shape: bf16[2,3,3,128], index: 2, kind: input, shape index: {}]   ;;  %s2077_s3 = inlined_call_operand.vmem [shape: bf16[2,3,3,128], index: 3, kind: input, shape index: {}]   ;;  %s2078_s4 = inlined_call_operand.vmem [shape: bf16[3,3,128,128], index: 4, kind: input, shape index: {}]   ;;  %s2079_s5 = inlined_call_operand.vmem [shape: f32[1,128], index: 5, kind: input, shape index: {}]   ;;  %s2080_s6 = inlined_call_operand.vmem [shape: bf16[2,2,2,128], index: 6, kind: output, shape index: {}]  }
   0x1 LB: > { %s1191_s22 = sadd.s32 4294967295, %s1727_s21   ;;  %p1195_p0 = scmp.ge.s32.totalorder %s1727_s21, 1  ;;  %s1727_s21 = sphi %s1768_s21, %s16_s21  }
   0x2   : > { %p242_p1 = scmp.lt.s32.totalorder %s1727_s21, 3 }
   0x4   : > { %p243_p2 = pnand %p1195_p0, %p242_p1 }
   0x5   : > { %p286_p3 = scmp.lt.s32.totalorder (!%p243_p2), %s1191_s22, 1  ;;  %s1799_s16 = smov (!%p243_p2), 0  }
   0x6   : > { %246 = sbr.rel (%p243_p2) target bundleno = 247 (0xf7), region = 44 }
   0xb   : > { %s2082_s22 = smov (!%p286_p3, %s1191_s22), 1 }
   0xc   : > { %s1776_s23 = smul.u32 6, %s2082_s22  ;;  %s1200_s24 = sshll.u32 %s2082_s22, 1 }
   0xd   : > { %s1781_s27 = scalar_lea.vmem %s2080_s6, %s1200_s24 }
   0xe   : > { %s290_s30 = scalar_lea.vmem %s2074_s0, %s1776_s23  ;;  %s295_s9 = scalar_lea.vmem %s2075_s1, %s1776_s23 }
   0xf   : > { %s300_s12 = scalar_lea.vmem %s2076_s2, %s1776_s23  ;;  %s305_s15 = scalar_lea.vmem %s2077_s3, %s1776_s23 }
  0x10 LB: >> { %v1642_v0 = vld [vmem:[%s2078_s4 + $0x78] sm:$0xff]  ;;  %v1641_v4 = vld [vmem:[%s2078_s4 + $0x70] sm:$0xff]  ;;  %v1640_v8 = vld [vmem:[%s2078_s4 + $0x68] sm:$0xff]  ;;  %s1841_s28 = sshll.u32 %s1731_s16, 1  ;;  %s1080_s14 = scalar_lea.vmem %s1781_s27, %s1731_s16  ;;  %s1731_s16 = sphi %s1799_s16, %s315_s16  }
  0x11   : >> { %v1650_v1 = vld [vmem:[%s2078_s4 + $0xb8] sm:$0xff]  ;;  %403 = vmatpush.bf16.msra.mxu0 %v1642_v0  ;;  %v1649_v5 = vld [vmem:[%s2078_s4 + $0xb0] sm:$0xff]  ;;  %v1648_v9 = vld [vmem:[%s2078_s4 + $0xa8] sm:$0xff]  ;;  %s1861_s20 = scalar_lea.vmem %s290_s30, %s1841_s28  ;;  %s567_s29 = scalar_lea.vmem %s300_s12, %s1841_s28 }
  0x12   : >> { %v1658_v2 = vld [vmem:[%s2078_s4 + $0xf8] sm:$0xff]  ;;  %552 = vmatpush.bf16.msra.mxu2 %v1650_v1  ;;  %v1657_v6 = vld [vmem:[%s2078_s4 + $0xf0] sm:$0xff]  ;;  %v1656_v10 = vld [vmem:[%s2078_s4 + $0xe8] sm:$0xff]  ;;  %s1924_s13 = scalar_lea.vmem %s295_s9, %s1841_s28  ;;  %s649_s7 = scalar_lea.vmem %s305_s15, %s1841_s28 }
  0x13   : >> { %v1634_v3 = vld [vmem:[%s2078_s4 + $0x38] sm:$0xff]  ;;  %634 = vmatpush.bf16.msra.mxu3 %v1658_v2  ;;  %v1633_v7 = vld [vmem:[%s2078_s4 + $0x30] sm:$0xff]  ;;  %v1632_v11 = vld [vmem:[%s2078_s4 + $0x28] sm:$0xff]  ;;  %s315_s16 = sadd.s32 1, %s1731_s16  }
  0x14   : >> { %464 = vmatpush.bf16.msra.mxu1 %v1634_v3  ;;  %v1639_v12 = vld [vmem:[%s2078_s4 + $0x60] sm:$0xff]  ;;  %v1638_v16 = vld [vmem:[%s2078_s4 + $0x58] sm:$0xff]  ;;  %v1637_v21 = vld [vmem:[%s2078_s4 + $0x50] sm:$0xff]  ;;  %p312_p4 = scmp.ge.s32.totalorder %s315_s16, 2  }
  0x15   : >> { %404 = vmatpush.bf16.msra.mxu0 %v1641_v4  ;;  %v1647_v13 = vld [vmem:[%s2078_s4 + $0xa0] sm:$0xff]  ;;  %v1646_v17 = vld [vmem:[%s2078_s4 + $0x98] sm:$0xff]  ;;  %v1645_v22 = vld [vmem:[%s2078_s4 + $0x90] sm:$0xff] }
  0x16   : >> { %553 = vmatpush.bf16.msra.mxu2 %v1649_v5  ;;  %v1655_v14 = vld [vmem:[%s2078_s4 + $0xe0] sm:$0xff]  ;;  %v1654_v18 = vld [vmem:[%s2078_s4 + $0xd8] sm:$0xff]  ;;  %v1653_v23 = vld [vmem:[%s2078_s4 + $0xd0] sm:$0xff] }
  0x17   : >> { %635 = vmatpush.bf16.msra.mxu3 %v1657_v6  ;;  %v1631_v15 = vld [vmem:[%s2078_s4 + $0x20] sm:$0xff]  ;;  %v1630_v19 = vld [vmem:[%s2078_s4 + $0x18] sm:$0xff]  ;;  %v1629_v24 = vld [vmem:[%s2078_s4 + $0x10] sm:$0xff] }
  0x18   : >> { %465 = vmatpush.bf16.msra.mxu1 %v1633_v7  ;;  %v318_v20 = vld [vmem:[%s1861_s20] sm:$0x3]  ;;  %v1636_v25 = vld [vmem:[%s2078_s4 + $0x48] sm:$0xff]  ;;  %v1666_v36 = vld [vmem:[%s2078_s4 + $0x138] sm:$0xff] }
  0x19   : >> { %405 = vmatpush.bf16.msra.mxu0 %v1640_v8  ;;  %495 = vst [vmem:[#allocation1] ss:$4 sm:$0xff] %v318_v20  ;;  %v1644_v26 = vld [vmem:[%s2078_s4 + $0x88] sm:$0xff]  ;;  %v568_v30 = vld [vmem:[%s567_s29] sm:$0x3]  ;;  %v1682_v37 = vld [vmem:[%s2078_s4 + $0x1b8] sm:$0xff] }
  0x1a   : >> { %554 = vmatpush.bf16.msra.mxu2 %v1648_v9  ;;  %v1652_v27 = vld [vmem:[%s2078_s4 + $0xc8] sm:$0xff]  ;;  %v1635_v32 = vld [vmem:[%s2078_s4 + $0x40] sm:$0xff]  ;;  %v1690_v40 = vld [vmem:[%s2078_s4 + $0x1f8] sm:$0xff] }
  0x1b   : >> { %636 = vmatpush.bf16.msra.mxu3 %v1656_v10  ;;  %v1628_v28 = vld [vmem:[%s2078_s4 + $0x8] sm:$0xff]  ;;  %v1643_v33 = vld [vmem:[%s2078_s4 + $0x80] sm:$0xff]  ;;  %v1674_v41 = vld [vmem:[%s2078_s4 + $0x178] sm:$0xff] }
  0x1c   : >> { %466 = vmatpush.bf16.msra.mxu1 %v1632_v11  ;;  %v1651_v38 = vld [vmem:[%s2078_s4 + $0xc0] sm:$0xff]  ;;  %v1665_v42 = vld [vmem:[%s2078_s4 + $0x130] sm:$0xff]  ;;  %v1664_v50 = vld [vmem:[%s2078_s4 + $0x128] sm:$0xff] }
  0x1d   : >> { %406 = vmatpush.bf16.msra.mxu0 %v1639_v12  ;;  %v1627_v39 = vld [vmem:[%s2078_s4] sm:$0xff]  ;;  %v1681_v45 = vld [vmem:[%s2078_s4 + $0x1b0] sm:$0xff]  ;;  %v1680_v51 = vld [vmem:[%s2078_s4 + $0x1a8] sm:$0xff] }
  0x1e   : >> { %555 = vmatpush.bf16.msra.mxu2 %v1647_v13  ;;  %v337_v44 = vld [vmem:[%s1924_s13] sm:$0x3]  ;;  %v1948_v47 = vld [vmem:[%s1861_s20 + $0x2] sm:$0x3]  ;;  %v1689_v48 = vld [vmem:[%s2078_s4 + $0x1f0] sm:$0xff] }
  0x1f   : >> { %637 = vmatpush.bf16.msra.mxu3 %v1655_v14  ;;  %v1673_v49 = vld [vmem:[%s2078_s4 + $0x170] sm:$0xff]  ;;  %v1688_v52 = vld [vmem:[%s2078_s4 + $0x1e8] sm:$0xff]  ;;  %v1663_v54 = vld [vmem:[%s2078_s4 + $0x120] sm:$0xff] }
  0x20   : >> { %467 = vmatpush.bf16.msra.mxu1 %v1631_v15  ;;  %v496_v29 = vld.sshfl [vmem:[#allocation1] sm:$0xff pattern:$0x73625140]  ;;  %v1672_v53 = vld [vmem:[%s2078_s4 + $0x168] sm:$0xff]  ;;  %v1662_v58 = vld [vmem:[%s2078_s4 + $0x118] sm:$0xff] }
  0x21   : >> { %407 = vmatpush.bf16.msra.mxu0 %v1638_v16  ;;  %v499_v31 = vshll.u32 %v496_v29, 16  ;;  %748 = vst [vmem:[#allocation1] ss:$4 sm:$0xff] %v568_v30  ;;  %v497_v34 = vshrl.u32 %v496_v29, 16  ;;  %v1679_v55 = vld [vmem:[%s2078_s4 + $0x1a0] sm:$0xff]  ;;  %v1678_v59 = vld [vmem:[%s2078_s4 + $0x198] sm:$0xff] }
  0x22   : >> { %556 = vmatpush.bf16.msra.mxu2 %v1646_v17  ;;  %v1687_v56 = vld [vmem:[%s2078_s4 + $0x1e0] sm:$0xff]  ;;  %v1686_v60 = vld [vmem:[%s2078_s4 + $0x1d8] sm:$0xff]  ;;  %v1661_v62 = vld [vmem:[%s2078_s4 + $0x110] sm:$0xff] }
  0x23   : >> { %638 = vmatpush.bf16.msra.mxu3 %v1654_v18  ;;  %v501_v35 = vrot.slane %v499_v31, 1  ;;  %v1671_v57 = vld [vmem:[%s2078_s4 + $0x160] sm:$0xff]  ;;  %v1670_v61 = vld [vmem:[%s2078_s4 + $0x158] sm:$0xff]  ;;  %v1677_v63 = vld [vmem:[%s2078_s4 + $0x190] sm:$0xff] }
  0x24   : >> { %468 = vmatpush.bf16.msra.mxu1 %v1630_v19  ;;  %v1685_v0 = vld [vmem:[%s2078_s4 + $0x1d0] sm:$0xff]  ;;  %v1660_v2 = vld [vmem:[%s2078_s4 + $0x108] sm:$0xff]  ;;  %v1659_v7 = vld [vmem:[%s2078_s4 + $0x100] sm:$0xff] }
  0x25   : >> { %408 = vmatpush.bf16.msra.mxu0 %v1637_v21  ;;  %v502_v43 = vor.u32 %v501_v35, %v497_v34  ;;  %v1669_v1 = vld [vmem:[%s2078_s4 + $0x150] sm:$0xff]  ;;  %v1676_v3 = vld [vmem:[%s2078_s4 + $0x188] sm:$0xff]  ;;  %v1675_v8 = vld [vmem:[%s2078_s4 + $0x180] sm:$0xff] }
  0x26   : >> { %557 = vmatpush.bf16.msra.mxu2 %v1645_v22  ;;  %v1684_v4 = vld [vmem:[%s2078_s4 + $0x1c8] sm:$0xff]  ;;  %v1698_v9 = vld [vmem:[%s2078_s4 + $0x238] sm:$0xff]  ;;  %v1683_v10 = vld [vmem:[%s2078_s4 + $0x1c0] sm:$0xff] }
  0x27   : >> { %639 = vmatpush.bf16.msra.mxu3 %v1653_v23  ;;  %v1668_v5 = vld [vmem:[%s2078_s4 + $0x148] sm:$0xff]  ;;  %v1667_v11 = vld [vmem:[%s2078_s4 + $0x140] sm:$0xff]  ;;  %v1697_v15 = vld [vmem:[%s2078_s4 + $0x230] sm:$0xff] }
  0x28   : >> { %469 = vmatpush.bf16.msra.mxu1 %v1629_v24  ;;  %v1945_v46 = vld.sshfl [vmem:[#allocation1] sm:$0xff pattern:$0x73625140]  ;;  %v1696_v18 = vld [vmem:[%s2078_s4 + $0x228] sm:$0xff]  ;;  %v1693_v21 = vld [vmem:[%s2078_s4 + $0x210] sm:$0xff] }
  0x29   : >> { %409 = vmatpush.bf16.msra.mxu0 %v1636_v25  ;;  %1002 = vst [vmem:[#allocation1] ss:$4 sm:$0xff] %v1948_v47  ;;  %v752_v6 = vshll.u32 %v1945_v46, 16  ;;  %v750_v12 = vshrl.u32 %v1945_v46, 16  ;;  %v650_v14 = vld [vmem:[%s649_s7] sm:$0x3] }
  0x2a   : >> { %558 = vmatpush.bf16.msra.mxu2 %v1644_v26  ;;  %v1528_v16 = vld [vmem:[%s1924_s13 + $0x2] sm:$0x3]  ;;  %v1692_v24 = vld [vmem:[%s2078_s4 + $0x208] sm:$0xff] }
  0x2b   : >> { %640 = vmatpush.bf16.msra.mxu3 %v1652_v27  ;;  %v754_v13 = vrot.slane %v752_v6, 1  ;;  %v1695_v19 = vld [vmem:[%s2078_s4 + $0x220] sm:$0xff] }
  0x2c   : >> { %470 = vmatpush.bf16.msra.mxu1 %v1628_v28  ;;  %v1691_v27 = vld [vmem:[%s2078_s4 + $0x200] sm:$0xff] }
  0x2d   : >> { %410 = vmatpush.bf16.msra.mxu0 %v1635_v32  ;;  %v755_v17 = vor.u32 %v754_v13, %v750_v12 }
  0x2e   : >> { %559 = vmatpush.bf16.msra.mxu2 %v1643_v33 }
  0x2f   : >> { %641 = vmatpush.bf16.msra.mxu3 %v1651_v38 }
  0x30   : >> { %471 = vmatpush.bf16.msra.mxu1 %v1627_v39  ;;  %411 = vmatmul.bf16.vlgmr.msra.gmra.mxu0 %v337_v44  ;;  %v1003_v22 = vld.sshfl [vmem:[#allocation1] sm:$0xff pattern:$0x73625140] }
  0x31   : >> { %716 = vmatpush.bf16.msrb.mxu0 %v1666_v36  ;;  %560 = vmatmul.bf16.vlgmr.msra.gmra.mxu2 %v502_v43  ;;  %v1006_v23 = vshll.u32 %v1003_v22, 16  ;;  %v1004_v25 = vshrl.u32 %v1003_v22, 16 }
  0x32   : >> { %888 = vmatpush.bf16.msrb.mxu2 %v1682_v37  ;;  %642 = vmatmul.bf16.vlgmr.msra.gmra.mxu3 %v568_v30 }
  0x33   : >> { %970 = vmatpush.bf16.msrb.mxu3 %v1690_v40  ;;  %472 = vmatmul.bf16.vlgmr.msra.gmra.mxu1 %v318_v20  ;;  %v1694_v20 = vld [vmem:[%s2078_s4 + $0x218] sm:$0xff]  ;;  %v1008_v26 = vrot.slane %v1006_v23, 1 }
  0x34   : >> { %805 = vmatpush.bf16.msrb.mxu1 %v1674_v41 }
  0x35   : >> { %717 = vmatpush.bf16.msrb.mxu0 %v1665_v42  ;;  %v1009_v28 = vor.u32 %v1008_v26, %v1004_v25 }
  0x36   : >> { %889 = vmatpush.bf16.msrb.mxu2 %v1681_v45 }
  0x37   : >> { %971 = vmatpush.bf16.msrb.mxu3 %v1689_v48 }
  0x38   : >> { %806 = vmatpush.bf16.msrb.mxu1 %v1673_v49 }
  0x39   : >> { %718 = vmatpush.bf16.msrb.mxu0 %v1664_v50 }
  0x3a   : >> { %890 = vmatpush.bf16.msrb.mxu2 %v1680_v51 }
  0x3b   : >> { %972 = vmatpush.bf16.msrb.mxu3 %v1688_v52  ;;  %v1716_v52 = vld [vmem:[%s2079_s5] ss:$0 sm:$0xff] }
  0x3c   : >> { %807 = vmatpush.bf16.msrb.mxu1 %v1672_v53 }
  0x3d   : >> { %719 = vmatpush.bf16.msrb.mxu0 %v1663_v54 }
  0x3e   : >> { %891 = vmatpush.bf16.msrb.mxu2 %v1679_v55 }
  0x3f   : >> { %973 = vmatpush.bf16.msrb.mxu3 %v1687_v56 }
  0x40   : >> { %808 = vmatpush.bf16.msrb.mxu1 %v1671_v57 }
  0x41   : >> { %720 = vmatpush.bf16.msrb.mxu0 %v1662_v58 }
  0x42   : >> { %892 = vmatpush.bf16.msrb.mxu2 %v1678_v59 }
  0x43   : >> { %974 = vmatpush.bf16.msrb.mxu3 %v1686_v60 }
  0x44   : >> { %809 = vmatpush.bf16.msrb.mxu1 %v1670_v61 }
  0x45   : >> { %721 = vmatpush.bf16.msrb.mxu0 %v1661_v62 }
  0x46   : >> { %893 = vmatpush.bf16.msrb.mxu2 %v1677_v63 }
  0x47   : >> { %975 = vmatpush.bf16.msrb.mxu3 %v1685_v0 }
  0x48   : >> { %810 = vmatpush.bf16.msrb.mxu1 %v1669_v1 }
  0x49   : >> { %722 = vmatpush.bf16.msrb.mxu0 %v1660_v2 }
  0x4a   : >> { %894 = vmatpush.bf16.msrb.mxu2 %v1676_v3 }
  0x4b   : >> { %976 = vmatpush.bf16.msrb.mxu3 %v1684_v4 }
  0x4c   : >> { %811 = vmatpush.bf16.msrb.mxu1 %v1668_v5 }
  0x4d   : >> { %723 = vmatpush.bf16.msrb.mxu0 %v1659_v7 }
  0x4e   : >> { %895 = vmatpush.bf16.msrb.mxu2 %v1675_v8 }
  0x4f   : >> { %977 = vmatpush.bf16.msrb.mxu3 %v1683_v10 }
  0x50   : >> { %812 = vmatpush.bf16.msrb.mxu1 %v1667_v11  ;;  %724 = vmatmul.bf16.vlgmr.msrb.gmra.mxu0 %v650_v14 }
  0x51   : >> { %1059 = vmatpush.bf16.msra.mxu0 %v1698_v9  ;;  %896 = vmatmul.bf16.vlgmr.msrb.gmra.mxu2 %v1948_v47 }
  0x52   : >> { %978 = vmatmul.bf16.vlgmr.msrb.gmra.mxu3 %v1528_v16 }
  0x53   : >> { %813 = vmatmul.bf16.vlgmr.msrb.gmra.mxu1 %v755_v17 }
  0x55   : >> { %1060 = vmatpush.bf16.msra.mxu0 %v1697_v15 }
  0x59   : >> { %1061 = vmatpush.bf16.msra.mxu0 %v1696_v18 }
  0x5d   : >> { %1062 = vmatpush.bf16.msra.mxu0 %v1695_v19 }
  0x61   : >> { %1063 = vmatpush.bf16.msra.mxu0 %v1694_v20 }
  0x65   : >> { %1064 = vmatpush.bf16.msra.mxu0 %v1693_v21 }
  0x69   : >> { %1065 = vmatpush.bf16.msra.mxu0 %v1692_v24 }
  0x6d   : >> { %1066 = vmatpush.bf16.msra.mxu0 %v1691_v27 }
  0x70   : >> { %1067 = vmatmul.bf16.vlgmr.msra.gmra.mxu0 %v1009_v28 }
  0xad   : >> { %v412_v29 = vpop.f32.mrf.mxu0 }
  0xb0   : >> { %v473_v30 = vpop.f32.mrf.mxu1 }
  0xb1   : >> { %v474_v39 = vadd.f32 %v473_v30, %v412_v29 }
  0xb4   : >> { %v561_v31 = vpop.f32.mrf.mxu2 }
  0xb5   : >> { %v643_v32 = vpop.f32.mrf.mxu3  ;;  %v414_v33 = vpop.f32.mrf.mxu0  ;;  %v565_v41 = vadd.f32 %v561_v31, %v474_v39 }
  0xb7   : >> { %v647_v45 = vadd.f32 %v643_v32, %v565_v41 }
  0xb8   : >> { %v475_v34 = vpop.f32.mrf.mxu1 }
  0xbc   : >> { %v563_v35 = vpop.f32.mrf.mxu2 }
  0xbd   : >> { %v645_v36 = vpop.f32.mrf.mxu3 }
  0xcd   : >> { %v725_v37 = vpop.f32.mrf.mxu0 }
  0xce   : >> { %v729_v47 = vadd.f32 %v725_v37, %v647_v45 }
  0xd0   : >> { %v814_v38 = vpop.f32.mrf.mxu1 }
  0xd1   : >> { %v818_v49 = vadd.f32 %v814_v38, %v729_v47 }
  0xd4   : >> { %v897_v40 = vpop.f32.mrf.mxu2 }
  0xd5   : >> { %v979_v42 = vpop.f32.mrf.mxu3  ;;  %v727_v43 = vpop.f32.mrf.mxu0  ;;  %v901_v50 = vadd.f32 %v897_v40, %v818_v49 }
  0xd7   : >> { %v983_v51 = vadd.f32 %v979_v42, %v901_v50 }
  0xd8   : >> { %v816_v44 = vpop.f32.mrf.mxu1 }
  0xdc   : >> { %v899_v46 = vpop.f32.mrf.mxu2 }
  0xdd   : >> { %v981_v48 = vpop.f32.mrf.mxu3 }
  0xed   : >> { %v1068_v53 = vpop.f32.mrf.mxu0 }
  0xee   : >> { %v1072_v54 = vadd.f32 %v1068_v53, %v983_v51 }
  0xf0   : >> { %v1077_v55 = vadd.f32 %v1716_v52, %v1072_v54 }
  0xf2   : >> { %v1078_v56 = vmax.f32 %v1077_v55, 0.0  ;;  %314 = sbr.rel (!%p312_p4) target bundleno = 16 (0x10), region = 105 }
  0xf4   : >> { %v1079_v57 = vpack.c.bf16 %v1078_v56, %v1078_v56 }
  0xf5   : >> { %v1070_v58 = vpop.f32.mrf.mxu0 }
  0xf6   : >> { %1081 = vst [vmem:[%s1080_s14] sm:$0x1] %v1079_v57 }
  0xf7 PF: > { %s16_s21 = sadd.s32 1, %s1727_s21  }
  0xf8   : > { %p13_p5 = scmp.ge.s32.totalorder %s16_s21, 4  }
  0xfa   :  { %15 = sbr.rel (!%p13_p5) target bundleno = 1 (0x1), region = 116 }

// kernel: cnn_forward.13
= control target key start
LH: loop header
LB: loop body
LE: loop exit
PB: predicated region body
PF: predicated region fallthrough
CT: control target
= control target key end

     0   :  { %s1675_s21 = smov 0   ;;  %s1945_s0 = inlined_call_operand.vmem [shape: bf16[2,2,2,128], index: 0, kind: input, shape index: {}]   ;;  %s1946_s1 = inlined_call_operand.vmem [shape: bf16[2,2,2,128], index: 1, kind: input, shape index: {}]   ;;  %s1947_s2 = inlined_call_operand.vmem [shape: bf16[2,2,2,128], index: 2, kind: input, shape index: {}]   ;;  %s1948_s3 = inlined_call_operand.vmem [shape: bf16[2,2,2,128], index: 3, kind: input, shape index: {}]   ;;  %s1949_s4 = inlined_call_operand.vmem [shape: bf16[3,3,128,128], index: 4, kind: input, shape index: {}]   ;;  %s1950_s5 = inlined_call_operand.vmem [shape: f32[1,128], index: 5, kind: input, shape index: {}]   ;;  %s1951_s6 = inlined_call_operand.vmem [shape: bf16[2,1,1,128], index: 6, kind: output, shape index: {}]  }
   0x1 LB: > { %s1123_s22 = sadd.s32 4294967295, %s1638_s21   ;;  %p1127_p0 = scmp.ge.s32.totalorder %s1638_s21, 1  ;;  %s1638_s21 = sphi %s1675_s21, %s16_s21  }
   0x2   : > { %p238_p1 = scmp.lt.s32.totalorder %s1638_s21, 3 }
   0x4   : > { %p239_p2 = pnand %p1127_p0, %p238_p1 }
   0x5   : > { %p277_p3 = scmp.lt.s32.totalorder (!%p239_p2), %s1123_s22, 1 }
   0x6   : > { %242 = sbr.rel (%p239_p2) target bundleno = 243 (0xf3), region = 44 }
   0xb   : > { %v1567_v0 = vld [vmem:[%s1949_s4 + $0x78] sm:$0xff]  ;;  %v1566_v4 = vld [vmem:[%s1949_s4 + $0x70] sm:$0xff]  ;;  %s1953_s22 = smov (!%p277_p3, %s1123_s22), 1  ;;  %v1565_v8 = vld [vmem:[%s1949_s4 + $0x68] sm:$0xff]  ;;  %vm1034_vm0 = vcmask 1040384  }
   0xc   : > { %v1575_v1 = vld [vmem:[%s1949_s4 + $0xb8] sm:$0xff]  ;;  %379 = vmatpush.bf16.msra.mxu0 %v1567_v0  ;;  %v1574_v5 = vld [vmem:[%s1949_s4 + $0xb0] sm:$0xff]  ;;  %v1573_v9 = vld [vmem:[%s1949_s4 + $0xa8] sm:$0xff]  ;;  %s1722_s25 = sshll.u32 %s1953_s22, 1  ;;  %s295_s16 = scalar_lea.vmem %s1951_s6, %s1953_s22  ;;  %vm1035_vm1 = vsmask.f32 256 }
   0xd   : > { %v1583_v2 = vld [vmem:[%s1949_s4 + $0xf8] sm:$0xff]  ;;  %524 = vmatpush.bf16.msra.mxu2 %v1575_v1  ;;  %v1582_v6 = vld [vmem:[%s1949_s4 + $0xf0] sm:$0xff]  ;;  %v1581_v10 = vld [vmem:[%s1949_s4 + $0xe8] sm:$0xff]  ;;  %s1740_s12 = scalar_lea.vmem %s1945_s0, %s1722_s25  ;;  %s288_s10 = scalar_lea.vmem %s1947_s2, %s1722_s25 }
   0xe   : > { %v1559_v3 = vld [vmem:[%s1949_s4 + $0x38] sm:$0xff]  ;;  %604 = vmatpush.bf16.msra.mxu3 %v1583_v2  ;;  %v1558_v7 = vld [vmem:[%s1949_s4 + $0x30] sm:$0xff]  ;;  %v1557_v11 = vld [vmem:[%s1949_s4 + $0x28] sm:$0xff]  ;;  %s1805_s14 = scalar_lea.vmem %s1946_s1, %s1722_s25  ;;  %s292_s15 = scalar_lea.vmem %s1948_s3, %s1722_s25 }
   0xf   : > { %440 = vmatpush.bf16.msra.mxu1 %v1559_v3  ;;  %v1564_v12 = vld [vmem:[%s1949_s4 + $0x60] sm:$0xff]  ;;  %v1563_v16 = vld [vmem:[%s1949_s4 + $0x58] sm:$0xff]  ;;  %v1562_v21 = vld [vmem:[%s1949_s4 + $0x50] sm:$0xff] }
  0x10   : > { %380 = vmatpush.bf16.msra.mxu0 %v1566_v4  ;;  %v1572_v13 = vld [vmem:[%s1949_s4 + $0xa0] sm:$0xff]  ;;  %v1571_v17 = vld [vmem:[%s1949_s4 + $0x98] sm:$0xff]  ;;  %v1570_v22 = vld [vmem:[%s1949_s4 + $0x90] sm:$0xff] }
  0x11   : > { %525 = vmatpush.bf16.msra.mxu2 %v1574_v5  ;;  %v1580_v14 = vld [vmem:[%s1949_s4 + $0xe0] sm:$0xff]  ;;  %v1579_v18 = vld [vmem:[%s1949_s4 + $0xd8] sm:$0xff]  ;;  %v1578_v23 = vld [vmem:[%s1949_s4 + $0xd0] sm:$0xff] }
  0x12   : > { %605 = vmatpush.bf16.msra.mxu3 %v1582_v6  ;;  %v1556_v15 = vld [vmem:[%s1949_s4 + $0x20] sm:$0xff]  ;;  %v1555_v19 = vld [vmem:[%s1949_s4 + $0x18] sm:$0xff]  ;;  %v1554_v24 = vld [vmem:[%s1949_s4 + $0x10] sm:$0xff] }
  0x13   : > { %441 = vmatpush.bf16.msra.mxu1 %v1558_v7  ;;  %v296_v20 = vld [vmem:[%s1740_s12] sm:$0x1]  ;;  %v1561_v25 = vld [vmem:[%s1949_s4 + $0x48] sm:$0xff]  ;;  %v1591_v33 = vld [vmem:[%s1949_s4 + $0x138] sm:$0xff] }
  0x14   : > { %381 = vmatpush.bf16.msra.mxu0 %v1565_v8  ;;  %471 = vst [vmem:[#allocation1] ss:$9 sm:$0xff] %v296_v20  ;;  %v1569_v26 = vld [vmem:[%s1949_s4 + $0x88] sm:$0xff]  ;;  %v538_v30 = vld [vmem:[%s288_s10] sm:$0x1]  ;;  %v1607_v34 = vld [vmem:[%s1949_s4 + $0x1b8] sm:$0xff] }
  0x15   : > { %526 = vmatpush.bf16.msra.mxu2 %v1573_v9  ;;  %v1577_v27 = vld [vmem:[%s1949_s4 + $0xc8] sm:$0xff]  ;;  %v1560_v31 = vld [vmem:[%s1949_s4 + $0x40] sm:$0xff]  ;;  %v1615_v37 = vld [vmem:[%s1949_s4 + $0x1f8] sm:$0xff] }
  0x16   : > { %606 = vmatpush.bf16.msra.mxu3 %v1581_v10  ;;  %v1553_v28 = vld [vmem:[%s1949_s4 + $0x8] sm:$0xff]  ;;  %v1568_v32 = vld [vmem:[%s1949_s4 + $0x80] sm:$0xff]  ;;  %v1599_v38 = vld [vmem:[%s1949_s4 + $0x178] sm:$0xff] }
  0x17   : > { %442 = vmatpush.bf16.msra.mxu1 %v1557_v11  ;;  %v1576_v35 = vld [vmem:[%s1949_s4 + $0xc0] sm:$0xff]  ;;  %v1590_v40 = vld [vmem:[%s1949_s4 + $0x130] sm:$0xff]  ;;  %v1589_v47 = vld [vmem:[%s1949_s4 + $0x128] sm:$0xff] }
  0x18   : > { %382 = vmatpush.bf16.msra.mxu0 %v1564_v12  ;;  %v1552_v36 = vld [vmem:[%s1949_s4] sm:$0xff]  ;;  %v1606_v41 = vld [vmem:[%s1949_s4 + $0x1b0] sm:$0xff]  ;;  %v1605_v48 = vld [vmem:[%s1949_s4 + $0x1a8] sm:$0xff] }
  0x19   : > { %527 = vmatpush.bf16.msra.mxu2 %v1572_v13  ;;  %v313_v42 = vld [vmem:[%s1805_s14] sm:$0x1]  ;;  %v1821_v43 = vld [vmem:[%s1740_s12 + $0x1] sm:$0x1]  ;;  %v1614_v45 = vld [vmem:[%s1949_s4 + $0x1f0] sm:$0xff] }
  0x1a   : > { %607 = vmatpush.bf16.msra.mxu3 %v1580_v14  ;;  %v1598_v46 = vld [vmem:[%s1949_s4 + $0x170] sm:$0xff]  ;;  %v1613_v49 = vld [vmem:[%s1949_s4 + $0x1e8] sm:$0xff]  ;;  %v1588_v51 = vld [vmem:[%s1949_s4 + $0x120] sm:$0xff] }
  0x1b   : > { %443 = vmatpush.bf16.msra.mxu1 %v1556_v15  ;;  %v472_v29 = vld [vmem:[#allocation1] sm:$0xff]  ;;  %v1597_v50 = vld [vmem:[%s1949_s4 + $0x168] sm:$0xff]  ;;  %v1587_v55 = vld [vmem:[%s1949_s4 + $0x118] sm:$0xff] }
  0x1c   : > { %383 = vmatpush.bf16.msra.mxu0 %v1563_v16  ;;  %716 = vst [vmem:[#allocation1] ss:$9 sm:$0xff] %v538_v30  ;;  %v473_v39 = vshrl.u32 %v472_v29, 16  ;;  %v1604_v52 = vld [vmem:[%s1949_s4 + $0x1a0] sm:$0xff]  ;;  %v1603_v56 = vld [vmem:[%s1949_s4 + $0x198] sm:$0xff]  ;;  %v1586_v59 = vld [vmem:[%s1949_s4 + $0x110] sm:$0xff] }
  0x1d   : > { %528 = vmatpush.bf16.msra.mxu2 %v1571_v17  ;;  %v1612_v53 = vld [vmem:[%s1949_s4 + $0x1e0] sm:$0xff]  ;;  %v1611_v57 = vld [vmem:[%s1949_s4 + $0x1d8] sm:$0xff]  ;;  %v1602_v60 = vld [vmem:[%s1949_s4 + $0x190] sm:$0xff] }
  0x1e   : > { %608 = vmatpush.bf16.msra.mxu3 %v1579_v18  ;;  %v1596_v54 = vld [vmem:[%s1949_s4 + $0x160] sm:$0xff]  ;;  %v1595_v58 = vld [vmem:[%s1949_s4 + $0x158] sm:$0xff]  ;;  %v1610_v61 = vld [vmem:[%s1949_s4 + $0x1d0] sm:$0xff] }
  0x1f   : > { %444 = vmatpush.bf16.msra.mxu1 %v1555_v19  ;;  %v1594_v62 = vld [vmem:[%s1949_s4 + $0x150] sm:$0xff]  ;;  %v1585_v63 = vld [vmem:[%s1949_s4 + $0x108] sm:$0xff]  ;;  %v1584_v3 = vld [vmem:[%s1949_s4 + $0x100] sm:$0xff] }
  0x20   : > { %384 = vmatpush.bf16.msra.mxu0 %v1562_v21  ;;  %v1601_v0 = vld [vmem:[%s1949_s4 + $0x188] sm:$0xff]  ;;  %v1600_v4 = vld [vmem:[%s1949_s4 + $0x180] sm:$0xff]  ;;  %v1623_v5 = vld [vmem:[%s1949_s4 + $0x238] sm:$0xff] }
  0x21   : > { %529 = vmatpush.bf16.msra.mxu2 %v1570_v22  ;;  %v1609_v1 = vld [vmem:[%s1949_s4 + $0x1c8] sm:$0xff]  ;;  %v1608_v6 = vld [vmem:[%s1949_s4 + $0x1c0] sm:$0xff]  ;;  %v1622_v9 = vld [vmem:[%s1949_s4 + $0x230] sm:$0xff] }
  0x22   : > { %609 = vmatpush.bf16.msra.mxu3 %v1578_v23  ;;  %v1593_v2 = vld [vmem:[%s1949_s4 + $0x148] sm:$0xff]  ;;  %v1592_v7 = vld [vmem:[%s1949_s4 + $0x140] sm:$0xff]  ;;  %v1619_v14 = vld [vmem:[%s1949_s4 + $0x218] sm:$0xff] }
  0x23   : > { %445 = vmatpush.bf16.msra.mxu1 %v1554_v24  ;;  %v1823_v44 = vld [vmem:[#allocation1] sm:$0xff]  ;;  %v1621_v12 = vld [vmem:[%s1949_s4 + $0x228] sm:$0xff]  ;;  %v1618_v15 = vld [vmem:[%s1949_s4 + $0x210] sm:$0xff] }
  0x24   : > { %385 = vmatpush.bf16.msra.mxu0 %v1561_v25  ;;  %963 = vst [vmem:[#allocation1] ss:$9 sm:$0xff] %v1821_v43  ;;  %v618_v8 = vld [vmem:[%s292_s15] sm:$0x1]  ;;  %v1453_v10 = vld [vmem:[%s1805_s14 + $0x1] sm:$0x1]  ;;  %vm1036_vm2 = vmand %vm1034_vm0, %vm1035_vm1 }
  0x25   : > { %530 = vmatpush.bf16.msra.mxu2 %v1569_v26  ;;  %v718_v11 = vshrl.u32 %v1823_v44, 16  ;;  %v1620_v13 = vld [vmem:[%s1949_s4 + $0x220] sm:$0xff]  ;;  %v1617_v16 = vld [vmem:[%s1949_s4 + $0x208] sm:$0xff] }
  0x26   : > { %610 = vmatpush.bf16.msra.mxu3 %v1577_v27  ;;  %v1616_v17 = vld [vmem:[%s1949_s4 + $0x200] sm:$0xff] }
  0x27   : > { %446 = vmatpush.bf16.msra.mxu1 %v1553_v28  ;;  %v1030_v44 = vld [vmem:[%s1950_s5] sm:$0x1] }
  0x28   : > { %386 = vmatpush.bf16.msra.mxu0 %v1560_v31 }
  0x29   : > { %531 = vmatpush.bf16.msra.mxu2 %v1568_v32 }
  0x2a   : > { %611 = vmatpush.bf16.msra.mxu3 %v1576_v35 }
  0x2b   : > { %447 = vmatpush.bf16.msra.mxu1 %v1552_v36  ;;  %387 = vmatmul.bf16.vlgmr.msra.gmra.mxu0 %v313_v42  ;;  %v964_v18 = vld [vmem:[#allocation1] sm:$0xff] }
  0x2c   : > { %684 = vmatpush.bf16.msrb.mxu0 %v1591_v33  ;;  %532 = vmatmul.bf16.vlgmr.msra.gmra.mxu2 %v473_v39  ;;  %v965_v19 = vshrl.u32 %v964_v18, 16 }
  0x2d   : > { %850 = vmatpush.bf16.msrb.mxu2 %v1607_v34  ;;  %612 = vmatmul.bf16.vlgmr.msra.gmra.mxu3 %v538_v30 }
  0x2e   : > { %931 = vmatpush.bf16.msrb.mxu3 %v1615_v37  ;;  %448 = vmatmul.bf16.vlgmr.msra.gmra.mxu1 %v296_v20 }
  0x2f   : > { %769 = vmatpush.bf16.msrb.mxu1 %v1599_v38 }
  0x30   : > { %685 = vmatpush.bf16.msrb.mxu0 %v1590_v40 }
  0x31   : > { %851 = vmatpush.bf16.msrb.mxu2 %v1606_v41 }
  0x32   : > { %932 = vmatpush.bf16.msrb.mxu3 %v1614_v45 }
  0x33   : > { %770 = vmatpush.bf16.msrb.mxu1 %v1598_v46 }
  0x34   : > { %686 = vmatpush.bf16.msrb.mxu0 %v1589_v47 }
  0x35   : > { %852 = vmatpush.bf16.msrb.mxu2 %v1605_v48  ;;  %v1037_v48 = vld [vmem:[%s295_s16] sm:$0x1] }
  0x36   : > { %933 = vmatpush.bf16.msrb.mxu3 %v1613_v49 }
  0x37   : > { %771 = vmatpush.bf16.msrb.mxu1 %v1597_v50 }
  0x38   : > { %687 = vmatpush.bf16.msrb.mxu0 %v1588_v51 }
  0x39   : > { %853 = vmatpush.bf16.msrb.mxu2 %v1604_v52 }
  0x3a   : > { %934 = vmatpush.bf16.msrb.mxu3 %v1612_v53 }
  0x3b   : > { %772 = vmatpush.bf16.msrb.mxu1 %v1596_v54 }
  0x3c   : > { %688 = vmatpush.bf16.msrb.mxu0 %v1587_v55 }
  0x3d   : > { %854 = vmatpush.bf16.msrb.mxu2 %v1603_v56 }
  0x3e   : > { %935 = vmatpush.bf16.msrb.mxu3 %v1611_v57 }
  0x3f   : > { %773 = vmatpush.bf16.msrb.mxu1 %v1595_v58 }
  0x40   : > { %689 = vmatpush.bf16.msrb.mxu0 %v1586_v59 }
  0x41   : > { %855 = vmatpush.bf16.msrb.mxu2 %v1602_v60 }
  0x42   : > { %936 = vmatpush.bf16.msrb.mxu3 %v1610_v61 }
  0x43   : > { %774 = vmatpush.bf16.msrb.mxu1 %v1594_v62 }
  0x44   : > { %690 = vmatpush.bf16.msrb.mxu0 %v1585_v63 }
  0x45   : > { %856 = vmatpush.bf16.msrb.mxu2 %v1601_v0 }
  0x46   : > { %937 = vmatpush.bf16.msrb.mxu3 %v1609_v1 }
  0x47   : > { %775 = vmatpush.bf16.msrb.mxu1 %v1593_v2 }
  0x48   : > { %691 = vmatpush.bf16.msrb.mxu0 %v1584_v3 }
  0x49   : > { %857 = vmatpush.bf16.msrb.mxu2 %v1600_v4 }
  0x4a   : > { %938 = vmatpush.bf16.msrb.mxu3 %v1608_v6 }
  0x4b   : > { %776 = vmatpush.bf16.msrb.mxu1 %v1592_v7  ;;  %692 = vmatmul.bf16.vlgmr.msrb.gmra.mxu0 %v618_v8 }
  0x4c   : > { %1016 = vmatpush.bf16.msra.mxu0 %v1623_v5  ;;  %858 = vmatmul.bf16.vlgmr.msrb.gmra.mxu2 %v1821_v43 }
  0x4d   : > { %939 = vmatmul.bf16.vlgmr.msrb.gmra.mxu3 %v1453_v10 }
  0x4e   : > { %777 = vmatmul.bf16.vlgmr.msrb.gmra.mxu1 %v718_v11 }
  0x50   : > { %1017 = vmatpush.bf16.msra.mxu0 %v1622_v9 }
  0x54   : > { %1018 = vmatpush.bf16.msra.mxu0 %v1621_v12 }
  0x58   : > { %1019 = vmatpush.bf16.msra.mxu0 %v1620_v13 }
  0x5c   : > { %1020 = vmatpush.bf16.msra.mxu0 %v1619_v14 }
  0x60   : > { %1021 = vmatpush.bf16.msra.mxu0 %v1618_v15 }
  0x64   : > { %1022 = vmatpush.bf16.msra.mxu0 %v1617_v16 }
  0x68   : > { %1023 = vmatpush.bf16.msra.mxu0 %v1616_v17 }
  0x6b   : > { %1024 = vmatmul.bf16.vlgmr.msra.gmra.mxu0 %v965_v19 }
  0xa8   : > { %v388_v20 = vpop.f32.mrf.mxu0 }
  0xab   : > { %v449_v21 = vpop.f32.mrf.mxu1 }
  0xac   : > { %v450_v30 = vadd.f32 %v449_v21, %v388_v20 }
  0xaf   : > { %v533_v22 = vpop.f32.mrf.mxu2 }
  0xb0   : > { %v613_v23 = vpop.f32.mrf.mxu3  ;;  %v390_v24 = vpop.f32.mrf.mxu0  ;;  %v537_v32 = vadd.f32 %v533_v22, %v450_v30 }
  0xb2   : > { %v617_v36 = vadd.f32 %v613_v23, %v537_v32 }
  0xb3   : > { %v451_v25 = vpop.f32.mrf.mxu1 }
  0xb7   : > { %v535_v26 = vpop.f32.mrf.mxu2 }
  0xb8   : > { %v615_v27 = vpop.f32.mrf.mxu3 }
  0xc8   : > { %v693_v28 = vpop.f32.mrf.mxu0 }
  0xc9   : > { %v697_v38 = vadd.f32 %v693_v28, %v617_v36 }
  0xcb   : > { %v778_v29 = vpop.f32.mrf.mxu1 }
  0xcc   : > { %v782_v40 = vadd.f32 %v778_v29, %v697_v38 }
  0xcf   : > { %v859_v31 = vpop.f32.mrf.mxu2 }
  0xd0   : > { %v940_v33 = vpop.f32.mrf.mxu3  ;;  %v695_v34 = vpop.f32.mrf.mxu0  ;;  %v863_v41 = vadd.f32 %v859_v31, %v782_v40 }
  0xd2   : > { %v944_v42 = vadd.f32 %v940_v33, %v863_v41 }
  0xd3   : > { %v780_v35 = vpop.f32.mrf.mxu1 }
  0xd7   : > { %v861_v37 = vpop.f32.mrf.mxu2 }
  0xd8   : > { %v942_v39 = vpop.f32.mrf.mxu3 }
  0xe8   : > { %v1025_v43 = vpop.f32.mrf.mxu0 }
  0xe9   : > { %v1029_v45 = vadd.f32 %v1025_v43, %v944_v42 }
  0xeb   : > { %v1031_v46 = vadd.f32 %v1030_v44, %v1029_v45 }
  0xed   : > { %v1032_v47 = vmax.f32 %v1031_v46, 0.0 }
  0xef   : > { %v1033_v49 = vpack.c.bf16 %v1032_v47, %v1032_v47 }
  0xf0   : > { %v1027_v50 = vpop.f32.mrf.mxu0 }
  0xf1   : > { %v1038_v51 = vsel %vm1036_vm2, %v1033_v49, %v1037_v48 }
  0xf2   : > { %1039 = vst [vmem:[%s295_s16] sm:$0x1] %v1038_v51 }
  0xf3 PF: > { %s16_s21 = sadd.s32 1, %s1638_s21  }
  0xf4   : > { %p13_p4 = scmp.ge.s32.totalorder %s16_s21, 4  }
  0xf6   :  { %15 = sbr.rel (!%p13_p4) target bundleno = 1 (0x1), region = 93 }

// kernel: cnn_forward.14
= control target key start
LH: loop header
LB: loop body
LE: loop exit
PB: predicated region body
PF: predicated region fallthrough
CT: control target
= control target key end

     0   :  { %s1661_s21 = smov 0   ;;  %s1931_s0 = inlined_call_operand.vmem [shape: bf16[2,2,2,128], index: 0, kind: input, shape index: {}]   ;;  %s1932_s1 = inlined_call_operand.vmem [shape: bf16[2,2,1,128], index: 1, kind: input, shape index: {}]   ;;  %s1933_s2 = inlined_call_operand.vmem [shape: bf16[2,1,2,128], index: 2, kind: input, shape index: {}]   ;;  %s1934_s3 = inlined_call_operand.vmem [shape: bf16[2,1,1,128], index: 3, kind: input, shape index: {}]   ;;  %s1935_s4 = inlined_call_operand.vmem [shape: bf16[3,3,128,128], index: 4, kind: input, shape index: {}]   ;;  %s1936_s5 = inlined_call_operand.vmem [shape: f32[1,128], index: 5, kind: input, shape index: {}]   ;;  %s1937_s6 = inlined_call_operand.vmem [shape: bf16[2,1,1,128], index: 6, kind: output, shape index: {}]  }
   0x1 LB: > { %s1111_s22 = sadd.s32 4294967295, %s1624_s21   ;;  %p1115_p0 = scmp.ge.s32.totalorder %s1624_s21, 1  ;;  %s1624_s21 = sphi %s1661_s21, %s16_s21  }
   0x2   : > { %p236_p1 = scmp.lt.s32.totalorder %s1624_s21, 3 }
   0x4   : > { %p237_p2 = pnand %p1115_p0, %p236_p1 }
   0x5   : > { %p273_p3 = scmp.lt.s32.totalorder (!%p237_p2), %s1111_s22, 1 }
   0x6   : > { %240 = sbr.rel (%p237_p2) target bundleno = 243 (0xf3), region = 44 }
   0xb   : > { %v1553_v0 = vld [vmem:[%s1935_s4 + $0x78] sm:$0xff]  ;;  %v1552_v4 = vld [vmem:[%s1935_s4 + $0x70] sm:$0xff]  ;;  %s1939_s22 = smov (!%p273_p3, %s1111_s22), 1  ;;  %v1551_v8 = vld [vmem:[%s1935_s4 + $0x68] sm:$0xff]  ;;  %vm1028_vm0 = vcmask 1040384  }
   0xc   : > { %v1561_v1 = vld [vmem:[%s1935_s4 + $0xb8] sm:$0xff]  ;;  %373 = vmatpush.bf16.msra.mxu0 %v1553_v0  ;;  %v1560_v5 = vld [vmem:[%s1935_s4 + $0xb0] sm:$0xff]  ;;  %v1559_v9 = vld [vmem:[%s1935_s4 + $0xa8] sm:$0xff]  ;;  %s1116_s25 = sshll.u32 %s1939_s22, 1  ;;  %s283_s10 = scalar_lea.vmem %s1933_s2, %s1939_s22  ;;  %vm1029_vm1 = vsmask.f32 256 }
   0xd   : > { %v1569_v2 = vld [vmem:[%s1935_s4 + $0xf8] sm:$0xff]  ;;  %518 = vmatpush.bf16.msra.mxu2 %v1561_v1  ;;  %v1568_v6 = vld [vmem:[%s1935_s4 + $0xf0] sm:$0xff]  ;;  %v1567_v10 = vld [vmem:[%s1935_s4 + $0xe8] sm:$0xff]  ;;  %s1725_s12 = scalar_lea.vmem %s1931_s0, %s1116_s25  ;;  %s1791_s14 = scalar_lea.vmem %s1932_s1, %s1116_s25 }
   0xe   : > { %v1545_v3 = vld [vmem:[%s1935_s4 + $0x38] sm:$0xff]  ;;  %598 = vmatpush.bf16.msra.mxu3 %v1569_v2  ;;  %v1544_v7 = vld [vmem:[%s1935_s4 + $0x30] sm:$0xff]  ;;  %v1543_v11 = vld [vmem:[%s1935_s4 + $0x28] sm:$0xff]  ;;  %s289_s11 = scalar_lea.vmem %s1937_s6, %s1939_s22 }
   0xf   : > { %434 = vmatpush.bf16.msra.mxu1 %v1545_v3  ;;  %v1550_v12 = vld [vmem:[%s1935_s4 + $0x60] sm:$0xff]  ;;  %v1549_v16 = vld [vmem:[%s1935_s4 + $0x58] sm:$0xff]  ;;  %v1548_v21 = vld [vmem:[%s1935_s4 + $0x50] sm:$0xff] }
  0x10   : > { %374 = vmatpush.bf16.msra.mxu0 %v1552_v4  ;;  %v1558_v13 = vld [vmem:[%s1935_s4 + $0xa0] sm:$0xff]  ;;  %v1557_v17 = vld [vmem:[%s1935_s4 + $0x98] sm:$0xff]  ;;  %v1556_v22 = vld [vmem:[%s1935_s4 + $0x90] sm:$0xff] }
  0x11   : > { %519 = vmatpush.bf16.msra.mxu2 %v1560_v5  ;;  %v1566_v14 = vld [vmem:[%s1935_s4 + $0xe0] sm:$0xff]  ;;  %v1565_v18 = vld [vmem:[%s1935_s4 + $0xd8] sm:$0xff]  ;;  %v1564_v23 = vld [vmem:[%s1935_s4 + $0xd0] sm:$0xff] }
  0x12   : > { %599 = vmatpush.bf16.msra.mxu3 %v1568_v6  ;;  %v1542_v15 = vld [vmem:[%s1935_s4 + $0x20] sm:$0xff]  ;;  %v1541_v19 = vld [vmem:[%s1935_s4 + $0x18] sm:$0xff]  ;;  %v1540_v24 = vld [vmem:[%s1935_s4 + $0x10] sm:$0xff] }
  0x13   : > { %435 = vmatpush.bf16.msra.mxu1 %v1544_v7  ;;  %v290_v20 = vld [vmem:[%s1725_s12] sm:$0x1]  ;;  %v1547_v25 = vld [vmem:[%s1935_s4 + $0x48] sm:$0xff]  ;;  %v1577_v33 = vld [vmem:[%s1935_s4 + $0x138] sm:$0xff] }
  0x14   : > { %375 = vmatpush.bf16.msra.mxu0 %v1551_v8  ;;  %465 = vst [vmem:[#allocation1] ss:$9 sm:$0xff] %v290_v20  ;;  %v1555_v26 = vld [vmem:[%s1935_s4 + $0x88] sm:$0xff]  ;;  %v532_v30 = vld [vmem:[%s283_s10] sm:$0x1]  ;;  %v1593_v34 = vld [vmem:[%s1935_s4 + $0x1b8] sm:$0xff]  ;;  %s286_s10 = scalar_lea.vmem %s1934_s3, %s1939_s22 }
  0x15   : > { %520 = vmatpush.bf16.msra.mxu2 %v1559_v9  ;;  %v1563_v27 = vld [vmem:[%s1935_s4 + $0xc8] sm:$0xff]  ;;  %v1546_v31 = vld [vmem:[%s1935_s4 + $0x40] sm:$0xff]  ;;  %v1601_v37 = vld [vmem:[%s1935_s4 + $0x1f8] sm:$0xff] }
  0x16   : > { %600 = vmatpush.bf16.msra.mxu3 %v1567_v10  ;;  %v1539_v28 = vld [vmem:[%s1935_s4 + $0x8] sm:$0xff]  ;;  %v1554_v32 = vld [vmem:[%s1935_s4 + $0x80] sm:$0xff]  ;;  %v1585_v38 = vld [vmem:[%s1935_s4 + $0x178] sm:$0xff] }
  0x17   : > { %436 = vmatpush.bf16.msra.mxu1 %v1543_v11  ;;  %v1562_v35 = vld [vmem:[%s1935_s4 + $0xc0] sm:$0xff]  ;;  %v1576_v40 = vld [vmem:[%s1935_s4 + $0x130] sm:$0xff]  ;;  %v1575_v47 = vld [vmem:[%s1935_s4 + $0x128] sm:$0xff] }
  0x18   : > { %376 = vmatpush.bf16.msra.mxu0 %v1550_v12  ;;  %v1538_v36 = vld [vmem:[%s1935_s4] sm:$0xff]  ;;  %v1592_v41 = vld [vmem:[%s1935_s4 + $0x1b0] sm:$0xff]  ;;  %v1591_v48 = vld [vmem:[%s1935_s4 + $0x1a8] sm:$0xff] }
  0x19   : > { %521 = vmatpush.bf16.msra.mxu2 %v1558_v13  ;;  %v307_v42 = vld [vmem:[%s1791_s14] sm:$0x1]  ;;  %v1807_v43 = vld [vmem:[%s1725_s12 + $0x1] sm:$0x1]  ;;  %v1600_v45 = vld [vmem:[%s1935_s4 + $0x1f0] sm:$0xff] }
  0x1a   : > { %601 = vmatpush.bf16.msra.mxu3 %v1566_v14  ;;  %v1584_v46 = vld [vmem:[%s1935_s4 + $0x170] sm:$0xff]  ;;  %v1599_v49 = vld [vmem:[%s1935_s4 + $0x1e8] sm:$0xff]  ;;  %v1574_v51 = vld [vmem:[%s1935_s4 + $0x120] sm:$0xff] }
  0x1b   : > { %437 = vmatpush.bf16.msra.mxu1 %v1542_v15  ;;  %v466_v29 = vld [vmem:[#allocation1] sm:$0xff]  ;;  %v1583_v50 = vld [vmem:[%s1935_s4 + $0x168] sm:$0xff]  ;;  %v1573_v55 = vld [vmem:[%s1935_s4 + $0x118] sm:$0xff] }
  0x1c   : > { %377 = vmatpush.bf16.msra.mxu0 %v1549_v16  ;;  %710 = vst [vmem:[#allocation1] ss:$9 sm:$0xff] %v532_v30  ;;  %v467_v39 = vshrl.u32 %v466_v29, 16  ;;  %v1590_v52 = vld [vmem:[%s1935_s4 + $0x1a0] sm:$0xff]  ;;  %v1589_v56 = vld [vmem:[%s1935_s4 + $0x198] sm:$0xff]  ;;  %v1572_v59 = vld [vmem:[%s1935_s4 + $0x110] sm:$0xff] }
  0x1d   : > { %522 = vmatpush.bf16.msra.mxu2 %v1557_v17  ;;  %v1598_v53 = vld [vmem:[%s1935_s4 + $0x1e0] sm:$0xff]  ;;  %v1597_v57 = vld [vmem:[%s1935_s4 + $0x1d8] sm:$0xff]  ;;  %v1588_v60 = vld [vmem:[%s1935_s4 + $0x190] sm:$0xff] }
  0x1e   : > { %602 = vmatpush.bf16.msra.mxu3 %v1565_v18  ;;  %v1582_v54 = vld [vmem:[%s1935_s4 + $0x160] sm:$0xff]  ;;  %v1581_v58 = vld [vmem:[%s1935_s4 + $0x158] sm:$0xff]  ;;  %v1596_v61 = vld [vmem:[%s1935_s4 + $0x1d0] sm:$0xff] }
  0x1f   : > { %438 = vmatpush.bf16.msra.mxu1 %v1541_v19  ;;  %v1580_v62 = vld [vmem:[%s1935_s4 + $0x150] sm:$0xff]  ;;  %v1571_v63 = vld [vmem:[%s1935_s4 + $0x108] sm:$0xff]  ;;  %v1570_v3 = vld [vmem:[%s1935_s4 + $0x100] sm:$0xff] }
  0x20   : > { %378 = vmatpush.bf16.msra.mxu0 %v1548_v21  ;;  %v1587_v0 = vld [vmem:[%s1935_s4 + $0x188] sm:$0xff]  ;;  %v1586_v4 = vld [vmem:[%s1935_s4 + $0x180] sm:$0xff]  ;;  %v1609_v5 = vld [vmem:[%s1935_s4 + $0x238] sm:$0xff] }
  0x21   : > { %523 = vmatpush.bf16.msra.mxu2 %v1556_v22  ;;  %v1595_v1 = vld [vmem:[%s1935_s4 + $0x1c8] sm:$0xff]  ;;  %v1594_v6 = vld [vmem:[%s1935_s4 + $0x1c0] sm:$0xff]  ;;  %v1608_v9 = vld [vmem:[%s1935_s4 + $0x230] sm:$0xff] }
  0x22   : > { %603 = vmatpush.bf16.msra.mxu3 %v1564_v23  ;;  %v1579_v2 = vld [vmem:[%s1935_s4 + $0x148] sm:$0xff]  ;;  %v1578_v7 = vld [vmem:[%s1935_s4 + $0x140] sm:$0xff]  ;;  %v1605_v14 = vld [vmem:[%s1935_s4 + $0x218] sm:$0xff] }
  0x23   : > { %439 = vmatpush.bf16.msra.mxu1 %v1540_v24  ;;  %v1809_v44 = vld [vmem:[#allocation1] sm:$0xff]  ;;  %v1607_v12 = vld [vmem:[%s1935_s4 + $0x228] sm:$0xff]  ;;  %v1604_v15 = vld [vmem:[%s1935_s4 + $0x210] sm:$0xff] }
  0x24   : > { %379 = vmatpush.bf16.msra.mxu0 %v1547_v25  ;;  %957 = vst [vmem:[#allocation1] ss:$9 sm:$0xff] %v1807_v43  ;;  %v612_v8 = vld [vmem:[%s286_s10] sm:$0x1]  ;;  %v1439_v10 = vld [vmem:[%s1791_s14 + $0x1] sm:$0x1]  ;;  %vm1030_vm2 = vmand %vm1028_vm0, %vm1029_vm1 }
  0x25   : > { %524 = vmatpush.bf16.msra.mxu2 %v1555_v26  ;;  %v712_v11 = vshrl.u32 %v1809_v44, 16  ;;  %v1606_v13 = vld [vmem:[%s1935_s4 + $0x220] sm:$0xff]  ;;  %v1603_v16 = vld [vmem:[%s1935_s4 + $0x208] sm:$0xff] }
  0x26   : > { %604 = vmatpush.bf16.msra.mxu3 %v1563_v27  ;;  %v1602_v17 = vld [vmem:[%s1935_s4 + $0x200] sm:$0xff] }
  0x27   : > { %440 = vmatpush.bf16.msra.mxu1 %v1539_v28  ;;  %v1024_v44 = vld [vmem:[%s1936_s5] sm:$0x1] }
  0x28   : > { %380 = vmatpush.bf16.msra.mxu0 %v1546_v31 }
  0x29   : > { %525 = vmatpush.bf16.msra.mxu2 %v1554_v32 }
  0x2a   : > { %605 = vmatpush.bf16.msra.mxu3 %v1562_v35 }
  0x2b   : > { %441 = vmatpush.bf16.msra.mxu1 %v1538_v36  ;;  %381 = vmatmul.bf16.vlgmr.msra.gmra.mxu0 %v307_v42  ;;  %v958_v18 = vld [vmem:[#allocation1] sm:$0xff] }
  0x2c   : > { %678 = vmatpush.bf16.msrb.mxu0 %v1577_v33  ;;  %526 = vmatmul.bf16.vlgmr.msra.gmra.mxu2 %v467_v39  ;;  %v959_v19 = vshrl.u32 %v958_v18, 16 }
  0x2d   : > { %844 = vmatpush.bf16.msrb.mxu2 %v1593_v34  ;;  %606 = vmatmul.bf16.vlgmr.msra.gmra.mxu3 %v532_v30 }
  0x2e   : > { %925 = vmatpush.bf16.msrb.mxu3 %v1601_v37  ;;  %442 = vmatmul.bf16.vlgmr.msra.gmra.mxu1 %v290_v20 }
  0x2f   : > { %763 = vmatpush.bf16.msrb.mxu1 %v1585_v38 }
  0x30   : > { %679 = vmatpush.bf16.msrb.mxu0 %v1576_v40 }
  0x31   : > { %845 = vmatpush.bf16.msrb.mxu2 %v1592_v41 }
  0x32   : > { %926 = vmatpush.bf16.msrb.mxu3 %v1600_v45 }
  0x33   : > { %764 = vmatpush.bf16.msrb.mxu1 %v1584_v46 }
  0x34   : > { %680 = vmatpush.bf16.msrb.mxu0 %v1575_v47 }
  0x35   : > { %846 = vmatpush.bf16.msrb.mxu2 %v1591_v48  ;;  %v1031_v48 = vld [vmem:[%s289_s11] sm:$0x1] }
  0x36   : > { %927 = vmatpush.bf16.msrb.mxu3 %v1599_v49 }
  0x37   : > { %765 = vmatpush.bf16.msrb.mxu1 %v1583_v50 }
  0x38   : > { %681 = vmatpush.bf16.msrb.mxu0 %v1574_v51 }
  0x39   : > { %847 = vmatpush.bf16.msrb.mxu2 %v1590_v52 }
  0x3a   : > { %928 = vmatpush.bf16.msrb.mxu3 %v1598_v53 }
  0x3b   : > { %766 = vmatpush.bf16.msrb.mxu1 %v1582_v54 }
  0x3c   : > { %682 = vmatpush.bf16.msrb.mxu0 %v1573_v55 }
  0x3d   : > { %848 = vmatpush.bf16.msrb.mxu2 %v1589_v56 }
  0x3e   : > { %929 = vmatpush.bf16.msrb.mxu3 %v1597_v57 }
  0x3f   : > { %767 = vmatpush.bf16.msrb.mxu1 %v1581_v58 }
  0x40   : > { %683 = vmatpush.bf16.msrb.mxu0 %v1572_v59 }
  0x41   : > { %849 = vmatpush.bf16.msrb.mxu2 %v1588_v60 }
  0x42   : > { %930 = vmatpush.bf16.msrb.mxu3 %v1596_v61 }
  0x43   : > { %768 = vmatpush.bf16.msrb.mxu1 %v1580_v62 }
  0x44   : > { %684 = vmatpush.bf16.msrb.mxu0 %v1571_v63 }
  0x45   : > { %850 = vmatpush.bf16.msrb.mxu2 %v1587_v0 }
  0x46   : > { %931 = vmatpush.bf16.msrb.mxu3 %v1595_v1 }
  0x47   : > { %769 = vmatpush.bf16.msrb.mxu1 %v1579_v2 }
  0x48   : > { %685 = vmatpush.bf16.msrb.mxu0 %v1570_v3 }
  0x49   : > { %851 = vmatpush.bf16.msrb.mxu2 %v1586_v4 }
  0x4a   : > { %932 = vmatpush.bf16.msrb.mxu3 %v1594_v6 }
  0x4b   : > { %770 = vmatpush.bf16.msrb.mxu1 %v1578_v7  ;;  %686 = vmatmul.bf16.vlgmr.msrb.gmra.mxu0 %v612_v8 }
  0x4c   : > { %1010 = vmatpush.bf16.msra.mxu0 %v1609_v5  ;;  %852 = vmatmul.bf16.vlgmr.msrb.gmra.mxu2 %v1807_v43 }
  0x4d   : > { %933 = vmatmul.bf16.vlgmr.msrb.gmra.mxu3 %v1439_v10 }
  0x4e   : > { %771 = vmatmul.bf16.vlgmr.msrb.gmra.mxu1 %v712_v11 }
  0x50   : > { %1011 = vmatpush.bf16.msra.mxu0 %v1608_v9 }
  0x54   : > { %1012 = vmatpush.bf16.msra.mxu0 %v1607_v12 }
  0x58   : > { %1013 = vmatpush.bf16.msra.mxu0 %v1606_v13 }
  0x5c   : > { %1014 = vmatpush.bf16.msra.mxu0 %v1605_v14 }
  0x60   : > { %1015 = vmatpush.bf16.msra.mxu0 %v1604_v15 }
  0x64   : > { %1016 = vmatpush.bf16.msra.mxu0 %v1603_v16 }
  0x68   : > { %1017 = vmatpush.bf16.msra.mxu0 %v1602_v17 }
  0x6b   : > { %1018 = vmatmul.bf16.vlgmr.msra.gmra.mxu0 %v959_v19 }
  0xa8   : > { %v382_v20 = vpop.f32.mrf.mxu0 }
  0xab   : > { %v443_v21 = vpop.f32.mrf.mxu1 }
  0xac   : > { %v444_v30 = vadd.f32 %v443_v21, %v382_v20 }
  0xaf   : > { %v527_v22 = vpop.f32.mrf.mxu2 }
  0xb0   : > { %v607_v23 = vpop.f32.mrf.mxu3  ;;  %v384_v24 = vpop.f32.mrf.mxu0  ;;  %v531_v32 = vadd.f32 %v527_v22, %v444_v30 }
  0xb2   : > { %v611_v36 = vadd.f32 %v607_v23, %v531_v32 }
  0xb3   : > { %v445_v25 = vpop.f32.mrf.mxu1 }
  0xb7   : > { %v529_v26 = vpop.f32.mrf.mxu2 }
  0xb8   : > { %v609_v27 = vpop.f32.mrf.mxu3 }
  0xc8   : > { %v687_v28 = vpop.f32.mrf.mxu0 }
  0xc9   : > { %v691_v38 = vadd.f32 %v687_v28, %v611_v36 }
  0xcb   : > { %v772_v29 = vpop.f32.mrf.mxu1 }
  0xcc   : > { %v776_v40 = vadd.f32 %v772_v29, %v691_v38 }
  0xcf   : > { %v853_v31 = vpop.f32.mrf.mxu2 }
  0xd0   : > { %v934_v33 = vpop.f32.mrf.mxu3  ;;  %v689_v34 = vpop.f32.mrf.mxu0  ;;  %v857_v41 = vadd.f32 %v853_v31, %v776_v40 }
  0xd2   : > { %v938_v42 = vadd.f32 %v934_v33, %v857_v41 }
  0xd3   : > { %v774_v35 = vpop.f32.mrf.mxu1 }
  0xd7   : > { %v855_v37 = vpop.f32.mrf.mxu2 }
  0xd8   : > { %v936_v39 = vpop.f32.mrf.mxu3 }
  0xe8   : > { %v1019_v43 = vpop.f32.mrf.mxu0 }
  0xe9   : > { %v1023_v45 = vadd.f32 %v1019_v43, %v938_v42 }
  0xeb   : > { %v1025_v46 = vadd.f32 %v1024_v44, %v1023_v45 }
  0xed   : > { %v1026_v47 = vmax.f32 %v1025_v46, 0.0 }
  0xef   : > { %v1027_v49 = vpack.c.bf16 %v1026_v47, %v1026_v47 }
  0xf0   : > { %v1021_v50 = vpop.f32.mrf.mxu0 }
  0xf1   : > { %v1032_v51 = vsel %vm1030_vm2, %v1027_v49, %v1031_v48 }
  0xf2   : > { %1033 = vst [vmem:[%s289_s11] sm:$0x1] %v1032_v51 }
  0xf3 PF: > { %s16_s21 = sadd.s32 1, %s1624_s21  }
  0xf4   : > { %p13_p4 = scmp.ge.s32.totalorder %s16_s21, 4  }
  0xf6   :  { %15 = sbr.rel (!%p13_p4) target bundleno = 1 (0x1), region = 93 }

// kernel: cnn_forward.15
= control target key start
LH: loop header
LB: loop body
LE: loop exit
PB: predicated region body
PF: predicated region fallthrough
CT: control target
= control target key end

     0   :  { %s2842_s18 = smov 0   ;;  %s3337_s0 = inlined_call_operand.vmem [shape: bf16[2,3,3,128], index: 0, kind: input, shape index: {}]   ;;  %s3338_s1 = inlined_call_operand.vmem [shape: bf16[2,3,3,128], index: 1, kind: input, shape index: {}]   ;;  %s3339_s2 = inlined_call_operand.vmem [shape: bf16[3,3,128,128], index: 2, kind: input, shape index: {}]   ;;  %s3340_s3 = inlined_call_operand.vmem [shape: bf16[3,3,128,128], index: 3, kind: input, shape index: {}]   ;;  %s3341_s4 = inlined_call_operand.vmem [shape: f32[1,128], index: 4, kind: input, shape index: {}]   ;;  %s3342_s5 = inlined_call_operand.vmem [shape: bf16[2,1,1,128], index: 5, kind: output, shape index: {}]  }
   0x1 LB: > { %s1806_s19 = sadd.s32 4294967295, %s2810_s18   ;;  %p1810_p0 = scmp.ge.s32.totalorder %s2810_s18, 1  ;;  %s2810_s18 = sphi %s2842_s18, %s15_s18  }
   0x2   : > { %p197_p1 = scmp.lt.s32.totalorder %s2810_s18, 3 }
   0x4   : > { %p198_p2 = pnand %p1810_p0, %p197_p1 }
   0x5   : > { %p228_p3 = scmp.lt.s32.totalorder (!%p198_p2), %s1806_s19, 1 }
   0x6   : > { %201 = sbr.rel (%p198_p2) target bundleno = 310 (0x136), region = 40 }
   0xb   : > { %v2666_v0 = vld [vmem:[%s3339_s2 + $0x78] sm:$0xff]  ;;  %v2665_v4 = vld [vmem:[%s3339_s2 + $0x70] sm:$0xff]  ;;  %v2664_v8 = vld [vmem:[%s3339_s2 + $0x68] sm:$0xff]  ;;  %s3344_s19 = smov (!%p228_p3, %s1806_s19), 1  ;;  %vm1741_vm0 = vcmask 1040384  }
   0xc   : > { %v2658_v1 = vld [vmem:[%s3339_s2 + $0x38] sm:$0xff]  ;;  %329 = vmatpush.bf16.msra.mxu0 %v2666_v0  ;;  %v2657_v5 = vld [vmem:[%s3339_s2 + $0x30] sm:$0xff]  ;;  %v2656_v9 = vld [vmem:[%s3339_s2 + $0x28] sm:$0xff]  ;;  %s2795_s25 = smul.u32 6, %s3344_s19  ;;  %s240_s30 = scalar_lea.vmem %s3342_s5, %s3344_s19  ;;  %vm1742_vm1 = vsmask.f32 256 }
   0xd   : > { %v2674_v2 = vld [vmem:[%s3339_s2 + $0xb8] sm:$0xff]  ;;  %390 = vmatpush.bf16.msra.mxu1 %v2658_v1  ;;  %v2673_v6 = vld [vmem:[%s3339_s2 + $0xb0] sm:$0xff]  ;;  %v2672_v10 = vld [vmem:[%s3339_s2 + $0xa8] sm:$0xff] }
   0xe   : > { %v2682_v3 = vld [vmem:[%s3339_s2 + $0xf8] sm:$0xff]  ;;  %473 = vmatpush.bf16.msra.mxu2 %v2674_v2  ;;  %v2681_v7 = vld [vmem:[%s3339_s2 + $0xf0] sm:$0xff]  ;;  %v2680_v11 = vld [vmem:[%s3339_s2 + $0xe8] sm:$0xff]  ;;  %s2912_s11 = scalar_lea.vmem %s3337_s0, %s2795_s25  ;;  %s3075_s6 = scalar_lea.vmem %s3338_s1, %s2795_s25 }
   0xf   : > { %554 = vmatpush.bf16.msra.mxu3 %v2682_v3  ;;  %v2663_v12 = vld [vmem:[%s3339_s2 + $0x60] sm:$0xff]  ;;  %v2662_v16 = vld [vmem:[%s3339_s2 + $0x58] sm:$0xff]  ;;  %v2661_v21 = vld [vmem:[%s3339_s2 + $0x50] sm:$0xff] }
  0x10   : > { %330 = vmatpush.bf16.msra.mxu0 %v2665_v4  ;;  %v2655_v13 = vld [vmem:[%s3339_s2 + $0x20] sm:$0xff]  ;;  %v2654_v17 = vld [vmem:[%s3339_s2 + $0x18] sm:$0xff]  ;;  %v2653_v22 = vld [vmem:[%s3339_s2 + $0x10] sm:$0xff] }
  0x11   : > { %391 = vmatpush.bf16.msra.mxu1 %v2657_v5  ;;  %v2671_v14 = vld [vmem:[%s3339_s2 + $0xa0] sm:$0xff]  ;;  %v2670_v18 = vld [vmem:[%s3339_s2 + $0x98] sm:$0xff]  ;;  %v2669_v23 = vld [vmem:[%s3339_s2 + $0x90] sm:$0xff] }
  0x12   : > { %474 = vmatpush.bf16.msra.mxu2 %v2673_v6  ;;  %v2679_v15 = vld [vmem:[%s3339_s2 + $0xe0] sm:$0xff]  ;;  %v2678_v19 = vld [vmem:[%s3339_s2 + $0xd8] sm:$0xff]  ;;  %v2677_v24 = vld [vmem:[%s3339_s2 + $0xd0] sm:$0xff] }
  0x13   : > { %555 = vmatpush.bf16.msra.mxu3 %v2681_v7  ;;  %v241_v20 = vld [vmem:[%s2912_s11] sm:$0x3]  ;;  %v2660_v25 = vld [vmem:[%s3339_s2 + $0x48] sm:$0xff]  ;;  %v2690_v33 = vld [vmem:[%s3339_s2 + $0x138] sm:$0xff] }
  0x14   : > { %331 = vmatpush.bf16.msra.mxu0 %v2664_v8  ;;  %276 = vst [vmem:[#allocation1] ss:$4 sm:$0xff] %v241_v20  ;;  %v2652_v26 = vld [vmem:[%s3339_s2 + $0x8] sm:$0xff]  ;;  %v2659_v30 = vld [vmem:[%s3339_s2 + $0x40] sm:$0xff]  ;;  %v2698_v34 = vld [vmem:[%s3339_s2 + $0x178] sm:$0xff] }
  0x15   : > { %392 = vmatpush.bf16.msra.mxu1 %v2656_v9  ;;  %v2668_v27 = vld [vmem:[%s3339_s2 + $0x88] sm:$0xff]  ;;  %v2651_v31 = vld [vmem:[%s3339_s2] sm:$0xff]  ;;  %v2706_v35 = vld [vmem:[%s3339_s2 + $0x1b8] sm:$0xff] }
  0x16   : > { %475 = vmatpush.bf16.msra.mxu2 %v2672_v10  ;;  %v2676_v28 = vld [vmem:[%s3339_s2 + $0xc8] sm:$0xff]  ;;  %v2667_v32 = vld [vmem:[%s3339_s2 + $0x80] sm:$0xff]  ;;  %v2714_v38 = vld [vmem:[%s3339_s2 + $0x1f8] sm:$0xff] }
  0x17   : > { %556 = vmatpush.bf16.msra.mxu3 %v2680_v11  ;;  %v2675_v36 = vld [vmem:[%s3339_s2 + $0xc0] sm:$0xff]  ;;  %v2689_v39 = vld [vmem:[%s3339_s2 + $0x130] sm:$0xff]  ;;  %v2688_v46 = vld [vmem:[%s3339_s2 + $0x128] sm:$0xff] }
  0x18   : > { %332 = vmatpush.bf16.msra.mxu0 %v2663_v12  ;;  %v1941_v40 = vld [vmem:[%s2912_s11 + $0x2] sm:$0x3]  ;;  %v2697_v41 = vld [vmem:[%s3339_s2 + $0x170] sm:$0xff]  ;;  %v2696_v47 = vld [vmem:[%s3339_s2 + $0x168] sm:$0xff] }
  0x19   : > { %393 = vmatpush.bf16.msra.mxu1 %v2655_v13  ;;  %v2705_v42 = vld [vmem:[%s3339_s2 + $0x1b0] sm:$0xff]  ;;  %v2704_v48 = vld [vmem:[%s3339_s2 + $0x1a8] sm:$0xff]  ;;  %v2687_v50 = vld [vmem:[%s3339_s2 + $0x120] sm:$0xff] }
  0x1a   : > { %476 = vmatpush.bf16.msra.mxu2 %v2671_v14  ;;  %v2713_v44 = vld [vmem:[%s3339_s2 + $0x1f0] sm:$0xff]  ;;  %v2712_v49 = vld [vmem:[%s3339_s2 + $0x1e8] sm:$0xff]  ;;  %v2695_v51 = vld [vmem:[%s3339_s2 + $0x160] sm:$0xff] }
  0x1b   : > { %557 = vmatpush.bf16.msra.mxu3 %v2679_v15  ;;  %v277_v29 = vld.sshfl [vmem:[#allocation1] sm:$0xff pattern:$0x73625140]  ;;  %v2686_v55 = vld [vmem:[%s3339_s2 + $0x118] sm:$0xff]  ;;  %v2685_v59 = vld [vmem:[%s3339_s2 + $0x110] sm:$0xff] }
  0x1c   : > { %333 = vmatpush.bf16.msra.mxu0 %v2662_v16  ;;  %420 = vst [vmem:[#allocation1] ss:$4 sm:$0xff] %v241_v20  ;;  %v278_v37 = vshrl.u32 %v277_v29, 16  ;;  %v2703_v52 = vld [vmem:[%s3339_s2 + $0x1a0] sm:$0xff]  ;;  %v2694_v56 = vld [vmem:[%s3339_s2 + $0x158] sm:$0xff]  ;;  %v2693_v61 = vld [vmem:[%s3339_s2 + $0x150] sm:$0xff] }
  0x1d   : > { %394 = vmatpush.bf16.msra.mxu1 %v2654_v17  ;;  %v2711_v54 = vld [vmem:[%s3339_s2 + $0x1e0] sm:$0xff]  ;;  %v2702_v57 = vld [vmem:[%s3339_s2 + $0x198] sm:$0xff]  ;;  %v2701_v62 = vld [vmem:[%s3339_s2 + $0x190] sm:$0xff] }
  0x1e   : > { %477 = vmatpush.bf16.msra.mxu2 %v2670_v18  ;;  %v2710_v58 = vld [vmem:[%s3339_s2 + $0x1d8] sm:$0xff]  ;;  %v2086_v60 = vld [vmem:[%s2912_s11 + $0x4] sm:$0x3]  ;;  %v2709_v0 = vld [vmem:[%s3339_s2 + $0x1d0] sm:$0xff] }
  0x1f   : > { %558 = vmatpush.bf16.msra.mxu3 %v2678_v19  ;;  %v2684_v1 = vld [vmem:[%s3339_s2 + $0x108] sm:$0xff]  ;;  %v2683_v5 = vld [vmem:[%s3339_s2 + $0x100] sm:$0xff]  ;;  %v2722_v8 = vld [vmem:[%s3339_s2 + $0x238] sm:$0xff] }
  0x20   : > { %334 = vmatpush.bf16.msra.mxu0 %v2661_v21  ;;  %v2692_v2 = vld [vmem:[%s3339_s2 + $0x148] sm:$0xff]  ;;  %v2691_v6 = vld [vmem:[%s3339_s2 + $0x140] sm:$0xff]  ;;  %v2730_v9 = vld [vmem:[%s3340_s3 + $0x38] sm:$0xff] }
  0x21   : > { %395 = vmatpush.bf16.msra.mxu1 %v2653_v22  ;;  %v2700_v3 = vld [vmem:[%s3339_s2 + $0x188] sm:$0xff]  ;;  %v2699_v7 = vld [vmem:[%s3339_s2 + $0x180] sm:$0xff]  ;;  %v2738_v11 = vld [vmem:[%s3340_s3 + $0x78] sm:$0xff] }
  0x22   : > { %478 = vmatpush.bf16.msra.mxu2 %v2669_v23  ;;  %v2708_v4 = vld [vmem:[%s3339_s2 + $0x1c8] sm:$0xff]  ;;  %v2707_v12 = vld [vmem:[%s3339_s2 + $0x1c0] sm:$0xff]  ;;  %v2746_v13 = vld [vmem:[%s3340_s3 + $0xb8] sm:$0xff] }
  0x23   : > { %559 = vmatpush.bf16.msra.mxu3 %v2677_v24  ;;  %v421_v43 = vld.sshfl [vmem:[#allocation1] sm:$0xff pattern:$0x73625140]  ;;  %v2721_v16 = vld [vmem:[%s3339_s2 + $0x230] sm:$0xff]  ;;  %v2720_v22 = vld [vmem:[%s3339_s2 + $0x228] sm:$0xff] }
  0x24   : > { %335 = vmatpush.bf16.msra.mxu0 %v2660_v25  ;;  %v423_v45 = vrot.slane %v421_v43, 1  ;;  %586 = vst [vmem:[#allocation1] ss:$4 sm:$0xff] %v1941_v40  ;;  %v2729_v17 = vld [vmem:[%s3340_s3 + $0x30] sm:$0xff]  ;;  %v3090_v21 = vld [vmem:[%s3075_s6] sm:$0x3]  ;;  %vm1743_vm3 = vmand %vm1741_vm0, %vm1742_vm1 }
  0x25   : > { %396 = vmatpush.bf16.msra.mxu1 %v2652_v26  ;;  %v2737_v18 = vld [vmem:[%s3340_s3 + $0x70] sm:$0xff]  ;;  %v2728_v23 = vld [vmem:[%s3340_s3 + $0x28] sm:$0xff]  ;;  %v2735_v29 = vld [vmem:[%s3340_s3 + $0x60] sm:$0xff] }
  0x26   : > { %479 = vmatpush.bf16.msra.mxu2 %v2668_v27  ;;  %v2736_v25 = vld [vmem:[%s3340_s3 + $0x68] sm:$0xff]  ;;  %v2719_v27 = vld [vmem:[%s3339_s2 + $0x220] sm:$0xff] }
  0x27   : > { %560 = vmatpush.bf16.msra.mxu3 %v2676_v28  ;;  %v2744_v26 = vld [vmem:[%s3340_s3 + $0xa8] sm:$0xff]  ;;  %v2727_v28 = vld [vmem:[%s3340_s3 + $0x20] sm:$0xff] }
  0x28   : > { %336 = vmatpush.bf16.msra.mxu0 %v2659_v30  ;;  %v2743_v30 = vld [vmem:[%s3340_s3 + $0xa0] sm:$0xff] }
  0x29   : > { %397 = vmatpush.bf16.msra.mxu1 %v2651_v31  ;;  %v2718_v31 = vld [vmem:[%s3339_s2 + $0x218] sm:$0xff] }
  0x2a   : > { %480 = vmatpush.bf16.msra.mxu2 %v2667_v32  ;;  %v2726_v32 = vld [vmem:[%s3340_s3 + $0x18] sm:$0xff] }
  0x2b   : > { %561 = vmatpush.bf16.msra.mxu3 %v2675_v36  ;;  %337 = vmatmul.bf16.vlgmr.msra.gmra.mxu0 %v278_v37  ;;  %v3003_v53 = vld.sshfl [vmem:[#allocation1] sm:$0xff pattern:$0x73625140]  ;;  %v2717_v36 = vld [vmem:[%s3339_s2 + $0x210] sm:$0xff] }
  0x2c   : > { %639 = vmatpush.bf16.msrb.mxu0 %v2690_v33  ;;  %398 = vmatmul.bf16.vlgmr.msra.gmra.mxu1 %v241_v20  ;;  %670 = vst [vmem:[#allocation1] ss:$4 sm:$0xff] %v1941_v40  ;;  %v588_v14 = vshrl.u32 %v3003_v53, 16  ;;  %v2745_v20 = vld [vmem:[%s3340_s3 + $0xb0] sm:$0xff] }
  0x2d   : > { %723 = vmatpush.bf16.msrb.mxu1 %v2698_v34  ;;  %481 = vmatmul.bf16.vlgmr.msra.gmra.mxu2 %v423_v45  ;;  %v2734_v34 = vld [vmem:[%s3340_s3 + $0x58] sm:$0xff]  ;;  %v2725_v37 = vld [vmem:[%s3340_s3 + $0x10] sm:$0xff]  ;;  %v2740_v45 = vld [vmem:[%s3340_s3 + $0x88] sm:$0xff] }
  0x2e   : > { %804 = vmatpush.bf16.msrb.mxu2 %v2706_v35  ;;  %562 = vmatmul.bf16.vlgmr.msra.gmra.mxu3 %v1941_v40  ;;  %v2742_v35 = vld [vmem:[%s3340_s3 + $0x98] sm:$0xff]  ;;  %v3145_v40 = vld [vmem:[%s3075_s6 + $0x2] sm:$0x3] }
  0x2f   : > { %889 = vmatpush.bf16.msrb.mxu3 %v2714_v38  ;;  %v2733_v38 = vld [vmem:[%s3340_s3 + $0x50] sm:$0xff] }
  0x30   : > { %640 = vmatpush.bf16.msrb.mxu0 %v2689_v39  ;;  %v2741_v39 = vld [vmem:[%s3340_s3 + $0x90] sm:$0xff] }
  0x31   : > { %724 = vmatpush.bf16.msrb.mxu1 %v2697_v41  ;;  %v2716_v41 = vld [vmem:[%s3339_s2 + $0x208] sm:$0xff] }
  0x32   : > { %805 = vmatpush.bf16.msrb.mxu2 %v2705_v42  ;;  %v2724_v42 = vld [vmem:[%s3340_s3 + $0x8] sm:$0xff] }
  0x33   : > { %890 = vmatpush.bf16.msrb.mxu3 %v2713_v44  ;;  %v671_v63 = vld.sshfl [vmem:[#allocation1] sm:$0xff pattern:$0x73625140]  ;;  %v2732_v44 = vld [vmem:[%s3340_s3 + $0x48] sm:$0xff] }
  0x34   : > { %641 = vmatpush.bf16.msrb.mxu0 %v2688_v46  ;;  %836 = vst [vmem:[#allocation1] ss:$4 sm:$0xff] %v2086_v60  ;;  %v673_v15 = vrot.slane %v671_v63, 1  ;;  %v2715_v46 = vld [vmem:[%s3339_s2 + $0x200] sm:$0xff]  ;;  %v2760_v63 = vld [vmem:[%s3340_s3 + $0x128] sm:$0xff] }
  0x35   : > { %725 = vmatpush.bf16.msrb.mxu1 %v2696_v47  ;;  %v2723_v47 = vld [vmem:[%s3340_s3] sm:$0xff] }
  0x36   : > { %806 = vmatpush.bf16.msrb.mxu2 %v2704_v48  ;;  %v2731_v48 = vld [vmem:[%s3340_s3 + $0x40] sm:$0xff] }
  0x37   : > { %891 = vmatpush.bf16.msrb.mxu3 %v2712_v49  ;;  %v2754_v49 = vld [vmem:[%s3340_s3 + $0xf8] sm:$0xff] }
  0x38   : > { %642 = vmatpush.bf16.msrb.mxu0 %v2687_v50  ;;  %v2762_v50 = vld [vmem:[%s3340_s3 + $0x138] sm:$0xff] }
  0x39   : > { %726 = vmatpush.bf16.msrb.mxu1 %v2695_v51  ;;  %v2770_v51 = vld [vmem:[%s3340_s3 + $0x178] sm:$0xff] }
  0x3a   : > { %807 = vmatpush.bf16.msrb.mxu2 %v2703_v52  ;;  %v2739_v52 = vld [vmem:[%s3340_s3 + $0x80] sm:$0xff] }
  0x3b   : > { %892 = vmatpush.bf16.msrb.mxu3 %v2711_v54  ;;  %v837_v10 = vld.sshfl [vmem:[#allocation1] sm:$0xff pattern:$0x73625140] }
  0x3c   : > { %643 = vmatpush.bf16.msrb.mxu0 %v2686_v55  ;;  %920 = vst [vmem:[#allocation1] ss:$4 sm:$0xff] %v2086_v60  ;;  %v838_v19 = vshrl.u32 %v837_v10, 16  ;;  %v2778_v55 = vld [vmem:[%s3340_s3 + $0x1b8] sm:$0xff] }
  0x3d   : > { %727 = vmatpush.bf16.msrb.mxu1 %v2694_v56  ;;  %v2766_v10 = vld [vmem:[%s3340_s3 + $0x158] sm:$0xff] }
  0x3e   : > { %808 = vmatpush.bf16.msrb.mxu2 %v2702_v57  ;;  %v2753_v57 = vld [vmem:[%s3340_s3 + $0xf0] sm:$0xff] }
  0x3f   : > { %893 = vmatpush.bf16.msrb.mxu3 %v2710_v58 }
  0x40   : > { %644 = vmatpush.bf16.msrb.mxu0 %v2685_v59  ;;  %v2761_v59 = vld [vmem:[%s3340_s3 + $0x130] sm:$0xff] }
  0x41   : > { %728 = vmatpush.bf16.msrb.mxu1 %v2693_v61  ;;  %v2777_v61 = vld [vmem:[%s3340_s3 + $0x1b0] sm:$0xff] }
  0x42   : > { %809 = vmatpush.bf16.msrb.mxu2 %v2701_v62  ;;  %v2752_v62 = vld [vmem:[%s3340_s3 + $0xe8] sm:$0xff] }
  0x43   : > { %894 = vmatpush.bf16.msrb.mxu3 %v2709_v0  ;;  %v3098_v24 = vld.sshfl [vmem:[#allocation1] sm:$0xff pattern:$0x73625140]  ;;  %v2768_v0 = vld [vmem:[%s3340_s3 + $0x168] sm:$0xff] }
  0x44   : > { %645 = vmatpush.bf16.msrb.mxu0 %v2684_v1  ;;  %1084 = vst [vmem:[#allocation1] ss:$4 sm:$0xff] %v3090_v21  ;;  %v923_v53 = vrot.slane %v3098_v24, 1  ;;  %v2776_v1 = vld [vmem:[%s3340_s3 + $0x1a8] sm:$0xff]  ;;  %v2763_v24 = vld [vmem:[%s3340_s3 + $0x140] sm:$0xff] }
  0x45   : > { %729 = vmatpush.bf16.msrb.mxu1 %v2692_v2 }
  0x46   : > { %810 = vmatpush.bf16.msrb.mxu2 %v2700_v3  ;;  %v2504_v3 = vld [vmem:[%s3075_s6 + $0x4] sm:$0x3] }
  0x47   : > { %895 = vmatpush.bf16.msrb.mxu3 %v2708_v4  ;;  %v2751_v4 = vld [vmem:[%s3340_s3 + $0xe0] sm:$0xff] }
  0x48   : > { %646 = vmatpush.bf16.msrb.mxu0 %v2683_v5  ;;  %v2759_v5 = vld [vmem:[%s3340_s3 + $0x120] sm:$0xff] }
  0x49   : > { %730 = vmatpush.bf16.msrb.mxu1 %v2691_v6  ;;  %v2767_v6 = vld [vmem:[%s3340_s3 + $0x160] sm:$0xff] }
  0x4a   : > { %811 = vmatpush.bf16.msrb.mxu2 %v2699_v7  ;;  %v2775_v7 = vld [vmem:[%s3340_s3 + $0x1a0] sm:$0xff] }
  0x4b   : > { %896 = vmatpush.bf16.msrb.mxu3 %v2707_v12  ;;  %647 = vmatmul.bf16.vlgmr.msrb.gmra.mxu0 %v588_v14  ;;  %v1085_v33 = vld.sshfl [vmem:[#allocation1] sm:$0xff pattern:$0x73625140]  ;;  %v2749_v12 = vld [vmem:[%s3340_s3 + $0xd0] sm:$0xff] }
  0x4c   : > { %973 = vmatpush.bf16.msra.mxu0 %v2722_v8  ;;  %731 = vmatmul.bf16.vlgmr.msrb.gmra.mxu1 %v673_v15  ;;  %1168 = vst [vmem:[#allocation1] ss:$4 sm:$0xff] %v3090_v21  ;;  %v1086_v54 = vshrl.u32 %v1085_v33, 16  ;;  %v2750_v8 = vld [vmem:[%s3340_s3 + $0xd8] sm:$0xff]  ;;  %v2765_v14 = vld [vmem:[%s3340_s3 + $0x150] sm:$0xff]  ;;  %v2783_v33 = vld [vmem:[%s3340_s3 + $0x1e0] sm:$0xff] }
  0x4d   : > { %1052 = vmatpush.bf16.msra.mxu1 %v2730_v9  ;;  %812 = vmatmul.bf16.vlgmr.msrb.gmra.mxu2 %v2086_v60  ;;  %v2769_v60 = vld [vmem:[%s3340_s3 + $0x170] sm:$0xff]  ;;  %v2758_v9 = vld [vmem:[%s3340_s3 + $0x118] sm:$0xff] }
  0x4e   : > { %1137 = vmatpush.bf16.msra.mxu2 %v2738_v11  ;;  %897 = vmatmul.bf16.vlgmr.msrb.gmra.mxu3 %v838_v19  ;;  %v2774_v11 = vld [vmem:[%s3340_s3 + $0x198] sm:$0xff]  ;;  %v2773_v15 = vld [vmem:[%s3340_s3 + $0x190] sm:$0xff]  ;;  %v2764_v19 = vld [vmem:[%s3340_s3 + $0x148] sm:$0xff] }
  0x4f   : > { %1221 = vmatpush.bf16.msra.mxu3 %v2746_v13  ;;  %v2757_v13 = vld [vmem:[%s3340_s3 + $0x110] sm:$0xff] }
  0x50   : > { %974 = vmatpush.bf16.msra.mxu0 %v2721_v16 }
  0x51   : > { %1053 = vmatpush.bf16.msra.mxu1 %v2729_v17  ;;  %v2748_v17 = vld [vmem:[%s3340_s3 + $0xc8] sm:$0xff] }
  0x52   : > { %1138 = vmatpush.bf16.msra.mxu2 %v2737_v18  ;;  %v2756_v18 = vld [vmem:[%s3340_s3 + $0x108] sm:$0xff] }
  0x53   : > { %1222 = vmatpush.bf16.msra.mxu3 %v2745_v20  ;;  %v1169_v43 = vld.sshfl [vmem:[#allocation1] sm:$0xff pattern:$0x73625140]  ;;  %v2772_v20 = vld [vmem:[%s3340_s3 + $0x188] sm:$0xff] }
  0x54   : > { %975 = vmatpush.bf16.msra.mxu0 %v2720_v22  ;;  %1334 = vst [vmem:[#allocation1] ss:$4 sm:$0xff] %v3145_v40  ;;  %v1171_v58 = vrot.slane %v1169_v43, 1  ;;  %v2755_v22 = vld [vmem:[%s3340_s3 + $0x100] sm:$0xff] }
  0x55   : > { %1054 = vmatpush.bf16.msra.mxu1 %v2728_v23  ;;  %v2786_v23 = vld [vmem:[%s3340_s3 + $0x1f8] sm:$0xff] }
  0x56   : > { %1139 = vmatpush.bf16.msra.mxu2 %v2736_v25  ;;  %v2794_v25 = vld [vmem:[%s3340_s3 + $0x238] sm:$0xff] }
  0x57   : > { %1223 = vmatpush.bf16.msra.mxu3 %v2744_v26  ;;  %v2771_v26 = vld [vmem:[%s3340_s3 + $0x180] sm:$0xff] }
  0x58   : > { %976 = vmatpush.bf16.msra.mxu0 %v2719_v27 }
  0x59   : > { %1055 = vmatpush.bf16.msra.mxu1 %v2727_v28 }
  0x5a   : > { %1140 = vmatpush.bf16.msra.mxu2 %v2735_v29  ;;  %v2785_v29 = vld [vmem:[%s3340_s3 + $0x1f0] sm:$0xff] }
  0x5b   : > { %1224 = vmatpush.bf16.msra.mxu3 %v2743_v30  ;;  %v3185_v56 = vld.sshfl [vmem:[#allocation1] sm:$0xff pattern:$0x73625140]  ;;  %v2793_v30 = vld [vmem:[%s3340_s3 + $0x230] sm:$0xff] }
  0x5c   : > { %977 = vmatpush.bf16.msra.mxu0 %v2718_v31  ;;  %1418 = vst [vmem:[#allocation1] ss:$4 sm:$0xff] %v3145_v40  ;;  %v1336_v27 = vshrl.u32 %v3185_v56, 16  ;;  %v2784_v31 = vld [vmem:[%s3340_s3 + $0x1e8] sm:$0xff] }
  0x5d   : > { %1056 = vmatpush.bf16.msra.mxu1 %v2726_v32  ;;  %v2792_v32 = vld [vmem:[%s3340_s3 + $0x228] sm:$0xff] }
  0x5e   : > { %1141 = vmatpush.bf16.msra.mxu2 %v2734_v34  ;;  %v2791_v34 = vld [vmem:[%s3340_s3 + $0x220] sm:$0xff] }
  0x5f   : > { %1225 = vmatpush.bf16.msra.mxu3 %v2742_v35  ;;  %v2782_v35 = vld [vmem:[%s3340_s3 + $0x1d8] sm:$0xff] }
  0x60   : > { %978 = vmatpush.bf16.msra.mxu0 %v2717_v36  ;;  %v2790_v36 = vld [vmem:[%s3340_s3 + $0x218] sm:$0xff] }
  0x61   : > { %1057 = vmatpush.bf16.msra.mxu1 %v2725_v37  ;;  %v2781_v37 = vld [vmem:[%s3340_s3 + $0x1d0] sm:$0xff] }
  0x62   : > { %1142 = vmatpush.bf16.msra.mxu2 %v2733_v38  ;;  %v2789_v38 = vld [vmem:[%s3340_s3 + $0x210] sm:$0xff] }
  0x63   : > { %1226 = vmatpush.bf16.msra.mxu3 %v2741_v39  ;;  %v1419_v2 = vld.sshfl [vmem:[#allocation1] sm:$0xff pattern:$0x73625140]  ;;  %v2780_v39 = vld [vmem:[%s3340_s3 + $0x1c8] sm:$0xff] }
  0x64   : > { %979 = vmatpush.bf16.msra.mxu0 %v2716_v41  ;;  %1584 = vst [vmem:[#allocation1] ss:$4 sm:$0xff] %v2504_v3  ;;  %v1421_v28 = vrot.slane %v1419_v2, 1  ;;  %v2779_v41 = vld [vmem:[%s3340_s3 + $0x1c0] sm:$0xff] }
  0x65   : > { %1058 = vmatpush.bf16.msra.mxu1 %v2724_v42  ;;  %v2787_v42 = vld [vmem:[%s3340_s3 + $0x200] sm:$0xff] }
  0x66   : > { %1143 = vmatpush.bf16.msra.mxu2 %v2732_v44 }
  0x67   : > { %1227 = vmatpush.bf16.msra.mxu3 %v2740_v45 }
  0x68   : > { %980 = vmatpush.bf16.msra.mxu0 %v2715_v46 }
  0x69   : > { %1059 = vmatpush.bf16.msra.mxu1 %v2723_v47 }
  0x6a   : > { %1144 = vmatpush.bf16.msra.mxu2 %v2731_v48 }
  0x6b   : > { %1228 = vmatpush.bf16.msra.mxu3 %v2739_v52  ;;  %981 = vmatmul.bf16.vlgmr.msra.gmra.mxu0 %v923_v53  ;;  %v3250_v16 = vld.sshfl [vmem:[#allocation1] sm:$0xff pattern:$0x73625140] }
  0x6c   : > { %1302 = vmatpush.bf16.msrb.mxu0 %v2754_v49  ;;  %1060 = vmatmul.bf16.vlgmr.msra.gmra.mxu1 %v3090_v21  ;;  %1668 = vst [vmem:[#allocation1] ss:$4 sm:$0xff] %v2504_v3  ;;  %v2747_v21 = vld [vmem:[%s3340_s3 + $0xc0] sm:$0xff]  ;;  %v1586_v44 = vshrl.u32 %v3250_v16, 16 }
  0x6d   : > { %1387 = vmatpush.bf16.msrb.mxu1 %v2762_v50  ;;  %1145 = vmatmul.bf16.vlgmr.msra.gmra.mxu2 %v1086_v54 }
  0x6e   : > { %1471 = vmatpush.bf16.msrb.mxu2 %v2770_v51  ;;  %1229 = vmatmul.bf16.vlgmr.msra.gmra.mxu3 %v1171_v58 }
  0x6f   : > { %1552 = vmatpush.bf16.msrb.mxu3 %v2778_v55 }
  0x70   : > { %1303 = vmatpush.bf16.msrb.mxu0 %v2753_v57 }
  0x71   : > { %1388 = vmatpush.bf16.msrb.mxu1 %v2761_v59 }
  0x72   : > { %1472 = vmatpush.bf16.msrb.mxu2 %v2769_v60 }
  0x73   : > { %1553 = vmatpush.bf16.msrb.mxu3 %v2777_v61  ;;  %v1669_v43 = vld.sshfl [vmem:[#allocation1] sm:$0xff pattern:$0x73625140] }
  0x74   : > { %1304 = vmatpush.bf16.msrb.mxu0 %v2752_v62  ;;  %v1671_v45 = vrot.slane %v1669_v43, 1 }
  0x75   : > { %1389 = vmatpush.bf16.msrb.mxu1 %v2760_v63 }
  0x76   : > { %1473 = vmatpush.bf16.msrb.mxu2 %v2768_v0 }
  0x77   : > { %1554 = vmatpush.bf16.msrb.mxu3 %v2776_v1 }
  0x78   : > { %1305 = vmatpush.bf16.msrb.mxu0 %v2751_v4 }
  0x79   : > { %1390 = vmatpush.bf16.msrb.mxu1 %v2759_v5 }
  0x7a   : > { %1474 = vmatpush.bf16.msrb.mxu2 %v2767_v6 }
  0x7b   : > { %1555 = vmatpush.bf16.msrb.mxu3 %v2775_v7 }
  0x7c   : > { %1306 = vmatpush.bf16.msrb.mxu0 %v2750_v8 }
  0x7d   : > { %1391 = vmatpush.bf16.msrb.mxu1 %v2758_v9 }
  0x7e   : > { %1475 = vmatpush.bf16.msrb.mxu2 %v2766_v10 }
  0x7f   : > { %1556 = vmatpush.bf16.msrb.mxu3 %v2774_v11 }
  0x80   : > { %1307 = vmatpush.bf16.msrb.mxu0 %v2749_v12 }
  0x81   : > { %1392 = vmatpush.bf16.msrb.mxu1 %v2757_v13 }
  0x82   : > { %1476 = vmatpush.bf16.msrb.mxu2 %v2765_v14 }
  0x83   : > { %1557 = vmatpush.bf16.msrb.mxu3 %v2773_v15 }
  0x84   : > { %1308 = vmatpush.bf16.msrb.mxu0 %v2748_v17 }
  0x85   : > { %1393 = vmatpush.bf16.msrb.mxu1 %v2756_v18 }
  0x86   : > { %1477 = vmatpush.bf16.msrb.mxu2 %v2764_v19 }
  0x87   : > { %1558 = vmatpush.bf16.msrb.mxu3 %v2772_v20 }
  0x88   : > { %1309 = vmatpush.bf16.msrb.mxu0 %v2747_v21 }
  0x89   : > { %1394 = vmatpush.bf16.msrb.mxu1 %v2755_v22 }
  0x8a   : > { %1478 = vmatpush.bf16.msrb.mxu2 %v2763_v24 }
  0x8b   : > { %1559 = vmatpush.bf16.msrb.mxu3 %v2771_v26  ;;  %1310 = vmatmul.bf16.vlgmr.msrb.gmra.mxu0 %v3145_v40  ;;  %v2788_v40 = vld [vmem:[%s3340_s3 + $0x208] sm:$0xff] }
  0x8c   : > { %1637 = vmatpush.bf16.msra.mxu0 %v2786_v23  ;;  %1395 = vmatmul.bf16.vlgmr.msrb.gmra.mxu1 %v1336_v27 }
  0x8d   : > { %1721 = vmatpush.bf16.msra.mxu1 %v2794_v25  ;;  %1479 = vmatmul.bf16.vlgmr.msrb.gmra.mxu2 %v1421_v28 }
  0x8e   : > { %1560 = vmatmul.bf16.vlgmr.msrb.gmra.mxu3 %v2504_v3 }
  0x90   : > { %1638 = vmatpush.bf16.msra.mxu0 %v2785_v29 }
  0x91   : > { %1722 = vmatpush.bf16.msra.mxu1 %v2793_v30 }
  0x94   : > { %1639 = vmatpush.bf16.msra.mxu0 %v2784_v31 }
  0x95   : > { %1723 = vmatpush.bf16.msra.mxu1 %v2792_v32  ;;  %v1735_v32 = vld [vmem:[%s3341_s4] sm:$0x1] }
  0x98   : > { %1640 = vmatpush.bf16.msra.mxu0 %v2783_v33 }
  0x99   : > { %1724 = vmatpush.bf16.msra.mxu1 %v2791_v34 }
  0x9c   : > { %1641 = vmatpush.bf16.msra.mxu0 %v2782_v35 }
  0x9d   : > { %1725 = vmatpush.bf16.msra.mxu1 %v2790_v36 }
  0xa0   : > { %1642 = vmatpush.bf16.msra.mxu0 %v2781_v37 }
  0xa1   : > { %1726 = vmatpush.bf16.msra.mxu1 %v2789_v38  ;;  %v1744_v38 = vld [vmem:[%s240_s30] sm:$0x1] }
  0xa4   : > { %1643 = vmatpush.bf16.msra.mxu0 %v2780_v39 }
  0xa5   : > { %1727 = vmatpush.bf16.msra.mxu1 %v2788_v40 }
  0xa8   : > { %1644 = vmatpush.bf16.msra.mxu0 %v2779_v41  ;;  %v338_v46 = vpop.f32.mrf.mxu0 }
  0xa9   : > { %1728 = vmatpush.bf16.msra.mxu1 %v2787_v42  ;;  %v399_v47 = vpop.f32.mrf.mxu1 }
  0xaa   : > { %v400_v48 = vadd.f32 %v399_v47, %v338_v46 }
  0xab   : > { %1645 = vmatmul.bf16.vlgmr.msra.gmra.mxu0 %v1586_v44 }
  0xac   : > { %1729 = vmatmul.bf16.vlgmr.msra.gmra.mxu1 %v1671_v45 }
  0xb0   : > { %v340_v49 = vpop.f32.mrf.mxu0  ;;  %v482_v51 = vpop.f32.mrf.mxu2 }
  0xb1   : > { %v401_v50 = vpop.f32.mrf.mxu1  ;;  %v563_v52 = vpop.f32.mrf.mxu3  ;;  %v486_v53 = vadd.f32 %v482_v51, %v400_v48 }
  0xb3   : > { %v567_v54 = vadd.f32 %v563_v52, %v486_v53 }
  0xb8   : > { %v484_v55 = vpop.f32.mrf.mxu2 }
  0xb9   : > { %v565_v56 = vpop.f32.mrf.mxu3 }
  0xc8   : > { %v648_v57 = vpop.f32.mrf.mxu0 }
  0xc9   : > { %v732_v58 = vpop.f32.mrf.mxu1  ;;  %v652_v9 = vadd.f32 %v648_v57, %v567_v54 }
  0xcb   : > { %v736_v10 = vadd.f32 %v732_v58, %v652_v9 }
  0xd0   : > { %v813_v59 = vpop.f32.mrf.mxu2  ;;  %v650_v61 = vpop.f32.mrf.mxu0 }
  0xd1   : > { %v898_v60 = vpop.f32.mrf.mxu3  ;;  %v734_v62 = vpop.f32.mrf.mxu1  ;;  %v817_v11 = vadd.f32 %v813_v59, %v736_v10 }
  0xd3   : > { %v902_v14 = vadd.f32 %v898_v60, %v817_v11 }
  0xd8   : > { %v815_v63 = vpop.f32.mrf.mxu2 }
  0xd9   : > { %v900_v0 = vpop.f32.mrf.mxu3 }
  0xe8   : > { %v982_v1 = vpop.f32.mrf.mxu0 }
  0xe9   : > { %v1061_v2 = vpop.f32.mrf.mxu1  ;;  %v986_v15 = vadd.f32 %v982_v1, %v902_v14 }
  0xeb   : > { %v1065_v20 = vadd.f32 %v1061_v2, %v986_v15 }
  0xf0   : > { %v1146_v3 = vpop.f32.mrf.mxu2  ;;  %v984_v4 = vpop.f32.mrf.mxu0 }
  0xf1   : > { %v1230_v5 = vpop.f32.mrf.mxu3  ;;  %v1063_v6 = vpop.f32.mrf.mxu1  ;;  %v1150_v21 = vadd.f32 %v1146_v3, %v1065_v20 }
  0xf3   : > { %v1234_v22 = vadd.f32 %v1230_v5, %v1150_v21 }
  0xf8   : > { %v1148_v7 = vpop.f32.mrf.mxu2 }
  0xf9   : > { %v1232_v8 = vpop.f32.mrf.mxu3 }
 0x108   : > { %v1311_v12 = vpop.f32.mrf.mxu0 }
 0x109   : > { %v1396_v13 = vpop.f32.mrf.mxu1  ;;  %v1315_v25 = vadd.f32 %v1311_v12, %v1234_v22 }
 0x10b   : > { %v1400_v26 = vadd.f32 %v1396_v13, %v1315_v25 }
 0x110   : > { %v1480_v16 = vpop.f32.mrf.mxu2  ;;  %v1313_v17 = vpop.f32.mrf.mxu0 }
 0x111   : > { %v1561_v18 = vpop.f32.mrf.mxu3  ;;  %v1398_v19 = vpop.f32.mrf.mxu1  ;;  %v1484_v27 = vadd.f32 %v1480_v16, %v1400_v26 }
 0x113   : > { %v1565_v28 = vadd.f32 %v1561_v18, %v1484_v27 }
 0x118   : > { %v1482_v23 = vpop.f32.mrf.mxu2 }
 0x119   : > { %v1563_v24 = vpop.f32.mrf.mxu3 }
 0x128   : > { %v1646_v29 = vpop.f32.mrf.mxu0 }
 0x129   : > { %v1650_v30 = vadd.f32 %v1646_v29, %v1565_v28  ;;  %v1730_v31 = vpop.f32.mrf.mxu1 }
 0x12b   : > { %v1734_v33 = vadd.f32 %v1730_v31, %v1650_v30 }
 0x12d   : > { %v1736_v34 = vadd.f32 %v1735_v32, %v1734_v33 }
 0x12f   : > { %vm1737_vm2 = vcmp.ge.f32.partialorder %v1736_v34, 0.0  ;;  %v1738_v35 = vmul.f32 0.2, %v1736_v34 }
 0x130   : > { %v1648_v36 = vpop.f32.mrf.mxu0 }
 0x131   : > { %v1739_v37 = vsel %vm1737_vm2, %v1736_v34, %v1738_v35  ;;  %v1732_v39 = vpop.f32.mrf.mxu1 }
 0x132   : > { %v1740_v40 = vpack.c.bf16 %v1739_v37, %v1739_v37 }
 0x134   : > { %v1745_v41 = vsel %vm1743_vm3, %v1740_v40, %v1744_v38 }
 0x135   : > { %1746 = vst [vmem:[%s240_s30] sm:$0x1] %v1745_v41 }
 0x136 PF: > { %s15_s18 = sadd.s32 1, %s2810_s18  }
 0x137   : > { %p12_p4 = scmp.ge.s32.totalorder %s15_s18, 4  }
 0x139   :  { %14 = sbr.rel (!%p12_p4) target bundleno = 1 (0x1), region = 93 }

// kernel: cnn_forward.16
= control target key start
LH: loop header
LB: loop body
LE: loop exit
PB: predicated region body
PF: predicated region fallthrough
CT: control target
= control target key end

     0   :  { %s2938_s18 = smov 0   ;;  %s3452_s0 = inlined_call_operand.vmem [shape: bf16[2,4,4,128], index: 0, kind: input, shape index: {}]   ;;  %s3453_s1 = inlined_call_operand.vmem [shape: bf16[2,4,4,128], index: 1, kind: input, shape index: {}]   ;;  %s3454_s2 = inlined_call_operand.vmem [shape: bf16[3,3,128,128], index: 2, kind: input, shape index: {}]   ;;  %s3455_s3 = inlined_call_operand.vmem [shape: bf16[3,3,128,128], index: 3, kind: input, shape index: {}]   ;;  %s3456_s4 = inlined_call_operand.vmem [shape: f32[1,128], index: 4, kind: input, shape index: {}]   ;;  %s3457_s5 = inlined_call_operand.vmem [shape: bf16[2,2,2,128], index: 5, kind: output, shape index: {}]  }
   0x1 LB: > { %s1875_s19 = sadd.s32 4294967295, %s2902_s18   ;;  %p1879_p0 = scmp.ge.s32.totalorder %s2902_s18, 1  ;;  %s2902_s18 = sphi %s2938_s18, %s15_s18  }
   0x2   : > { %p197_p1 = scmp.lt.s32.totalorder %s2902_s18, 3 }
   0x4   : > { %p198_p2 = pnand %p1879_p0, %p197_p1 }
   0x5   : > { %p229_p3 = scmp.lt.s32.totalorder (!%p198_p2), %s1875_s19, 1  ;;  %s2961_s6 = smov (!%p198_p2), 0  }
   0x6   : > { %201 = sbr.rel (%p198_p2) target bundleno = 313 (0x139), region = 40 }
   0xb   : > { %s3459_s19 = smov (!%p229_p3, %s1875_s19), 1 }
   0xc   : > { %s2729_s20 = sshll.u32 %s3459_s19, 3  ;;  %s1884_s21 = sshll.u32 %s3459_s19, 1 }
   0xd   : > { %s2949_s24 = scalar_lea.vmem %s3452_s0, %s2729_s20  ;;  %s2954_s27 = scalar_lea.vmem %s3453_s1, %s2729_s20 }
   0xe   : > { %s2959_s30 = scalar_lea.vmem %s3457_s5, %s1884_s21 }
   0xf LB: >> { %v2746_v0 = vld [vmem:[%s3454_s2 + $0x78] sm:$0xff]  ;;  %v2745_v4 = vld [vmem:[%s3454_s2 + $0x70] sm:$0xff]  ;;  %v2744_v8 = vld [vmem:[%s3454_s2 + $0x68] sm:$0xff]  ;;  %s1885_s20 = sshll.u32 %s2906_s6, 1  ;;  %s1786_s11 = scalar_lea.vmem %s2959_s30, %s2906_s6  ;;  %s2906_s6 = sphi %s2961_s6, %s248_s6  }
  0x10   : >> { %v2738_v1 = vld [vmem:[%s3454_s2 + $0x38] sm:$0xff]  ;;  %343 = vmatpush.bf16.msra.mxu0 %v2746_v0  ;;  %v2737_v5 = vld [vmem:[%s3454_s2 + $0x30] sm:$0xff]  ;;  %v2736_v9 = vld [vmem:[%s3454_s2 + $0x28] sm:$0xff]  ;;  %s3024_s26 = scalar_lea.vmem %s2949_s24, %s1885_s20  ;;  %s3182_s13 = scalar_lea.vmem %s2954_s27, %s1885_s20 }
  0x11   : >> { %v2754_v2 = vld [vmem:[%s3454_s2 + $0xb8] sm:$0xff]  ;;  %404 = vmatpush.bf16.msra.mxu1 %v2738_v1  ;;  %v2753_v6 = vld [vmem:[%s3454_s2 + $0xb0] sm:$0xff]  ;;  %v2752_v10 = vld [vmem:[%s3454_s2 + $0xa8] sm:$0xff]  ;;  %s248_s6 = sadd.s32 1, %s2906_s6  }
  0x12   : >> { %v2762_v3 = vld [vmem:[%s3454_s2 + $0xf8] sm:$0xff]  ;;  %487 = vmatpush.bf16.msra.mxu2 %v2754_v2  ;;  %v2761_v7 = vld [vmem:[%s3454_s2 + $0xf0] sm:$0xff]  ;;  %v2760_v11 = vld [vmem:[%s3454_s2 + $0xe8] sm:$0xff]  ;;  %p245_p4 = scmp.ge.s32.totalorder %s248_s6, 2  }
  0x13   : >> { %570 = vmatpush.bf16.msra.mxu3 %v2762_v3  ;;  %v2743_v12 = vld [vmem:[%s3454_s2 + $0x60] sm:$0xff]  ;;  %v2742_v16 = vld [vmem:[%s3454_s2 + $0x58] sm:$0xff]  ;;  %v2741_v21 = vld [vmem:[%s3454_s2 + $0x50] sm:$0xff] }
  0x14   : >> { %344 = vmatpush.bf16.msra.mxu0 %v2745_v4  ;;  %v2735_v13 = vld [vmem:[%s3454_s2 + $0x20] sm:$0xff]  ;;  %v2734_v17 = vld [vmem:[%s3454_s2 + $0x18] sm:$0xff]  ;;  %v2733_v22 = vld [vmem:[%s3454_s2 + $0x10] sm:$0xff] }
  0x15   : >> { %405 = vmatpush.bf16.msra.mxu1 %v2737_v5  ;;  %v2751_v14 = vld [vmem:[%s3454_s2 + $0xa0] sm:$0xff]  ;;  %v2750_v18 = vld [vmem:[%s3454_s2 + $0x98] sm:$0xff]  ;;  %v2749_v23 = vld [vmem:[%s3454_s2 + $0x90] sm:$0xff] }
  0x16   : >> { %488 = vmatpush.bf16.msra.mxu2 %v2753_v6  ;;  %v2759_v15 = vld [vmem:[%s3454_s2 + $0xe0] sm:$0xff]  ;;  %v2758_v19 = vld [vmem:[%s3454_s2 + $0xd8] sm:$0xff]  ;;  %v2757_v24 = vld [vmem:[%s3454_s2 + $0xd0] sm:$0xff] }
  0x17   : >> { %571 = vmatpush.bf16.msra.mxu3 %v2761_v7  ;;  %v251_v20 = vld [vmem:[%s3024_s26] sm:$0x3]  ;;  %v2740_v25 = vld [vmem:[%s3454_s2 + $0x48] sm:$0xff]  ;;  %v2770_v35 = vld [vmem:[%s3454_s2 + $0x138] sm:$0xff] }
  0x18   : >> { %345 = vmatpush.bf16.msra.mxu0 %v2744_v8  ;;  %286 = vst [vmem:[#allocation1] ss:$4 sm:$0xff] %v251_v20  ;;  %v2732_v26 = vld [vmem:[%s3454_s2 + $0x8] sm:$0xff]  ;;  %v2739_v30 = vld [vmem:[%s3454_s2 + $0x40] sm:$0xff]  ;;  %v2778_v36 = vld [vmem:[%s3454_s2 + $0x178] sm:$0xff] }
  0x19   : >> { %406 = vmatpush.bf16.msra.mxu1 %v2736_v9  ;;  %v2748_v27 = vld [vmem:[%s3454_s2 + $0x88] sm:$0xff]  ;;  %v2731_v31 = vld [vmem:[%s3454_s2] sm:$0xff]  ;;  %v2786_v37 = vld [vmem:[%s3454_s2 + $0x1b8] sm:$0xff] }
  0x1a   : >> { %489 = vmatpush.bf16.msra.mxu2 %v2752_v10  ;;  %v2756_v28 = vld [vmem:[%s3454_s2 + $0xc8] sm:$0xff]  ;;  %v2747_v34 = vld [vmem:[%s3454_s2 + $0x80] sm:$0xff]  ;;  %v2794_v40 = vld [vmem:[%s3454_s2 + $0x1f8] sm:$0xff] }
  0x1b   : >> { %572 = vmatpush.bf16.msra.mxu3 %v2760_v11  ;;  %v2755_v39 = vld [vmem:[%s3454_s2 + $0xc0] sm:$0xff]  ;;  %v2769_v42 = vld [vmem:[%s3454_s2 + $0x130] sm:$0xff]  ;;  %v2768_v49 = vld [vmem:[%s3454_s2 + $0x128] sm:$0xff] }
  0x1c   : >> { %346 = vmatpush.bf16.msra.mxu0 %v2743_v12  ;;  %v2015_v43 = vld [vmem:[%s3024_s26 + $0x2] sm:$0x3]  ;;  %v2777_v44 = vld [vmem:[%s3454_s2 + $0x170] sm:$0xff]  ;;  %v2776_v50 = vld [vmem:[%s3454_s2 + $0x168] sm:$0xff] }
  0x1d   : >> { %407 = vmatpush.bf16.msra.mxu1 %v2735_v13  ;;  %v2785_v45 = vld [vmem:[%s3454_s2 + $0x1b0] sm:$0xff]  ;;  %v2784_v51 = vld [vmem:[%s3454_s2 + $0x1a8] sm:$0xff]  ;;  %v2767_v53 = vld [vmem:[%s3454_s2 + $0x120] sm:$0xff] }
  0x1e   : >> { %490 = vmatpush.bf16.msra.mxu2 %v2751_v14  ;;  %v2793_v47 = vld [vmem:[%s3454_s2 + $0x1f0] sm:$0xff]  ;;  %v2792_v52 = vld [vmem:[%s3454_s2 + $0x1e8] sm:$0xff]  ;;  %v2775_v54 = vld [vmem:[%s3454_s2 + $0x160] sm:$0xff] }
  0x1f   : >> { %573 = vmatpush.bf16.msra.mxu3 %v2759_v15  ;;  %v287_v29 = vld.sshfl [vmem:[#allocation1] sm:$0xff pattern:$0x73625140]  ;;  %v2766_v58 = vld [vmem:[%s3454_s2 + $0x118] sm:$0xff]  ;;  %v2765_v62 = vld [vmem:[%s3454_s2 + $0x110] sm:$0xff] }
  0x20   : >> { %347 = vmatpush.bf16.msra.mxu0 %v2742_v16  ;;  %434 = vst [vmem:[#allocation1] ss:$4 sm:$0xff] %v251_v20  ;;  %v288_v32 = vshrl.u32 %v287_v29, 16  ;;  %v290_v33 = vshll.u32 %v287_v29, 16  ;;  %v2783_v55 = vld [vmem:[%s3454_s2 + $0x1a0] sm:$0xff]  ;;  %v2774_v59 = vld [vmem:[%s3454_s2 + $0x158] sm:$0xff] }
  0x21   : >> { %408 = vmatpush.bf16.msra.mxu1 %v2734_v17  ;;  %v2791_v57 = vld [vmem:[%s3454_s2 + $0x1e0] sm:$0xff]  ;;  %v2782_v60 = vld [vmem:[%s3454_s2 + $0x198] sm:$0xff]  ;;  %v2773_v0 = vld [vmem:[%s3454_s2 + $0x150] sm:$0xff] }
  0x22   : >> { %491 = vmatpush.bf16.msra.mxu2 %v2750_v18  ;;  %v292_v38 = vrot.slane %v290_v33, 1  ;;  %v2790_v61 = vld [vmem:[%s3454_s2 + $0x1d8] sm:$0xff]  ;;  %v2161_v63 = vld [vmem:[%s3024_s26 + $0x4] sm:$0x3]  ;;  %v2781_v1 = vld [vmem:[%s3454_s2 + $0x190] sm:$0xff] }
  0x23   : >> { %574 = vmatpush.bf16.msra.mxu3 %v2758_v19  ;;  %v2789_v3 = vld [vmem:[%s3454_s2 + $0x1d0] sm:$0xff]  ;;  %v2764_v4 = vld [vmem:[%s3454_s2 + $0x108] sm:$0xff]  ;;  %v2763_v9 = vld [vmem:[%s3454_s2 + $0x100] sm:$0xff] }
  0x24   : >> { %348 = vmatpush.bf16.msra.mxu0 %v2741_v21  ;;  %v293_v41 = vor.u32 %v292_v38, %v288_v32  ;;  %v2772_v5 = vld [vmem:[%s3454_s2 + $0x148] sm:$0xff]  ;;  %v2771_v10 = vld [vmem:[%s3454_s2 + $0x140] sm:$0xff]  ;;  %v2802_v14 = vld [vmem:[%s3454_s2 + $0x238] sm:$0xff] }
  0x25   : >> { %409 = vmatpush.bf16.msra.mxu1 %v2733_v22  ;;  %v2780_v6 = vld [vmem:[%s3454_s2 + $0x188] sm:$0xff]  ;;  %v2779_v11 = vld [vmem:[%s3454_s2 + $0x180] sm:$0xff]  ;;  %v2810_v15 = vld [vmem:[%s3455_s3 + $0x38] sm:$0xff] }
  0x26   : >> { %492 = vmatpush.bf16.msra.mxu2 %v2749_v23  ;;  %v2788_v8 = vld [vmem:[%s3454_s2 + $0x1c8] sm:$0xff]  ;;  %v2818_v17 = vld [vmem:[%s3455_s3 + $0x78] sm:$0xff]  ;;  %v2787_v18 = vld [vmem:[%s3454_s2 + $0x1c0] sm:$0xff] }
  0x27   : >> { %575 = vmatpush.bf16.msra.mxu3 %v2757_v24  ;;  %v435_v46 = vld.sshfl [vmem:[#allocation1] sm:$0xff pattern:$0x73625140]  ;;  %v2826_v21 = vld [vmem:[%s3455_s3 + $0xb8] sm:$0xff]  ;;  %v2825_v29 = vld [vmem:[%s3455_s3 + $0xb0] sm:$0xff] }
  0x28   : >> { %349 = vmatpush.bf16.msra.mxu0 %v2740_v25  ;;  %v437_v48 = vrot.slane %v435_v46, 1  ;;  %602 = vst [vmem:[#allocation1] ss:$4 sm:$0xff] %v2015_v43  ;;  %v2801_v25 = vld [vmem:[%s3454_s2 + $0x230] sm:$0xff]  ;;  %v2808_v32 = vld [vmem:[%s3455_s3 + $0x28] sm:$0xff]  ;;  %v2815_v38 = vld [vmem:[%s3455_s3 + $0x60] sm:$0xff] }
  0x29   : >> { %410 = vmatpush.bf16.msra.mxu1 %v2732_v26  ;;  %v2809_v26 = vld [vmem:[%s3455_s3 + $0x30] sm:$0xff] }
  0x2a   : >> { %493 = vmatpush.bf16.msra.mxu2 %v2748_v27  ;;  %v2817_v27 = vld [vmem:[%s3455_s3 + $0x70] sm:$0xff] }
  0x2b   : >> { %576 = vmatpush.bf16.msra.mxu3 %v2756_v28  ;;  %v2805_v46 = vld [vmem:[%s3455_s3 + $0x10] sm:$0xff] }
  0x2c   : >> { %350 = vmatpush.bf16.msra.mxu0 %v2739_v30  ;;  %v3197_v30 = vld [vmem:[%s3182_s13] sm:$0x3] }
  0x2d   : >> { %411 = vmatpush.bf16.msra.mxu1 %v2731_v31  ;;  %v2800_v31 = vld [vmem:[%s3454_s2 + $0x228] sm:$0xff] }
  0x2e   : >> { %494 = vmatpush.bf16.msra.mxu2 %v2747_v34  ;;  %v2816_v34 = vld [vmem:[%s3455_s3 + $0x68] sm:$0xff] }
  0x2f   : >> { %577 = vmatpush.bf16.msra.mxu3 %v2755_v39  ;;  %351 = vmatmul.bf16.vlgmr.msra.gmra.mxu0 %v293_v41  ;;  %v603_v56 = vld.sshfl [vmem:[#allocation1] sm:$0xff pattern:$0x73625140]  ;;  %v2806_v41 = vld [vmem:[%s3455_s3 + $0x18] sm:$0xff] }
  0x30   : >> { %659 = vmatpush.bf16.msrb.mxu0 %v2770_v35  ;;  %412 = vmatmul.bf16.vlgmr.msra.gmra.mxu1 %v251_v20  ;;  %690 = vst [vmem:[#allocation1] ss:$4 sm:$0xff] %v2015_v43  ;;  %v606_v7 = vshll.u32 %v603_v56, 16  ;;  %v604_v12 = vshrl.u32 %v603_v56, 16  ;;  %v2824_v35 = vld [vmem:[%s3455_s3 + $0xa8] sm:$0xff]  ;;  %v2823_v39 = vld [vmem:[%s3455_s3 + $0xa0] sm:$0xff] }
  0x31   : >> { %743 = vmatpush.bf16.msrb.mxu1 %v2778_v36  ;;  %495 = vmatmul.bf16.vlgmr.msra.gmra.mxu2 %v437_v48  ;;  %v2799_v36 = vld [vmem:[%s3454_s2 + $0x220] sm:$0xff]  ;;  %v2821_v48 = vld [vmem:[%s3455_s3 + $0x90] sm:$0xff] }
  0x32   : >> { %826 = vmatpush.bf16.msrb.mxu2 %v2786_v37  ;;  %578 = vmatmul.bf16.vlgmr.msra.gmra.mxu3 %v2015_v43  ;;  %v608_v13 = vrot.slane %v606_v7, 1  ;;  %v2807_v37 = vld [vmem:[%s3455_s3 + $0x20] sm:$0xff]  ;;  %v2814_v43 = vld [vmem:[%s3455_s3 + $0x58] sm:$0xff]  ;;  %v2841_v7 = vld [vmem:[%s3455_s3 + $0x130] sm:$0xff] }
  0x33   : >> { %915 = vmatpush.bf16.msrb.mxu3 %v2794_v40  ;;  %v2798_v40 = vld [vmem:[%s3454_s2 + $0x218] sm:$0xff]  ;;  %v2795_v56 = vld [vmem:[%s3454_s2 + $0x200] sm:$0xff] }
  0x34   : >> { %660 = vmatpush.bf16.msrb.mxu0 %v2769_v42  ;;  %v609_v22 = vor.u32 %v608_v13, %v604_v12  ;;  %v2848_v12 = vld [vmem:[%s3455_s3 + $0x168] sm:$0xff] }
  0x35   : >> { %744 = vmatpush.bf16.msrb.mxu1 %v2777_v44  ;;  %v2822_v44 = vld [vmem:[%s3455_s3 + $0x98] sm:$0xff]  ;;  %v2856_v13 = vld [vmem:[%s3455_s3 + $0x1a8] sm:$0xff] }
  0x36   : >> { %827 = vmatpush.bf16.msrb.mxu2 %v2785_v45  ;;  %v2797_v45 = vld [vmem:[%s3454_s2 + $0x210] sm:$0xff] }
  0x37   : >> { %916 = vmatpush.bf16.msrb.mxu3 %v2793_v47  ;;  %v691_v2 = vld.sshfl [vmem:[#allocation1] sm:$0xff pattern:$0x73625140]  ;;  %v2813_v47 = vld [vmem:[%s3455_s3 + $0x50] sm:$0xff] }
  0x38   : >> { %661 = vmatpush.bf16.msrb.mxu0 %v2768_v49  ;;  %858 = vst [vmem:[#allocation1] ss:$4 sm:$0xff] %v2161_v63  ;;  %v693_v24 = vrot.slane %v691_v2, 1  ;;  %v3252_v49 = vld [vmem:[%s3182_s13 + $0x2] sm:$0x3] }
  0x39   : >> { %745 = vmatpush.bf16.msrb.mxu1 %v2776_v50  ;;  %v2796_v50 = vld [vmem:[%s3454_s2 + $0x208] sm:$0xff] }
  0x3a   : >> { %828 = vmatpush.bf16.msrb.mxu2 %v2784_v51  ;;  %v2804_v51 = vld [vmem:[%s3455_s3 + $0x8] sm:$0xff] }
  0x3b   : >> { %917 = vmatpush.bf16.msrb.mxu3 %v2792_v52 }
  0x3c   : >> { %662 = vmatpush.bf16.msrb.mxu0 %v2767_v53 }
  0x3d   : >> { %746 = vmatpush.bf16.msrb.mxu1 %v2775_v54  ;;  %v2812_v54 = vld [vmem:[%s3455_s3 + $0x48] sm:$0xff] }
  0x3e   : >> { %829 = vmatpush.bf16.msrb.mxu2 %v2783_v55  ;;  %v2820_v55 = vld [vmem:[%s3455_s3 + $0x88] sm:$0xff] }
  0x3f   : >> { %918 = vmatpush.bf16.msrb.mxu3 %v2791_v57  ;;  %v859_v16 = vld.sshfl [vmem:[#allocation1] sm:$0xff pattern:$0x73625140] }
  0x40   : >> { %663 = vmatpush.bf16.msrb.mxu0 %v2766_v58  ;;  %946 = vst [vmem:[#allocation1] ss:$4 sm:$0xff] %v2161_v63  ;;  %v860_v19 = vshrl.u32 %v859_v16, 16  ;;  %v862_v20 = vshll.u32 %v859_v16, 16  ;;  %v2803_v57 = vld [vmem:[%s3455_s3] sm:$0xff] }
  0x41   : >> { %747 = vmatpush.bf16.msrb.mxu1 %v2774_v59  ;;  %v2831_v16 = vld [vmem:[%s3455_s3 + $0xe0] sm:$0xff] }
  0x42   : >> { %830 = vmatpush.bf16.msrb.mxu2 %v2782_v60  ;;  %v864_v23 = vrot.slane %v862_v20, 1  ;;  %v2811_v60 = vld [vmem:[%s3455_s3 + $0x40] sm:$0xff]  ;;  %v2830_v20 = vld [vmem:[%s3455_s3 + $0xd8] sm:$0xff] }
  0x43   : >> { %919 = vmatpush.bf16.msrb.mxu3 %v2790_v61  ;;  %v2834_v61 = vld [vmem:[%s3455_s3 + $0xf8] sm:$0xff] }
  0x44   : >> { %664 = vmatpush.bf16.msrb.mxu0 %v2765_v62  ;;  %v865_v28 = vor.u32 %v864_v23, %v860_v19  ;;  %v2842_v62 = vld [vmem:[%s3455_s3 + $0x138] sm:$0xff]  ;;  %v2855_v19 = vld [vmem:[%s3455_s3 + $0x1a0] sm:$0xff] }
  0x45   : >> { %748 = vmatpush.bf16.msrb.mxu1 %v2773_v0  ;;  %v2819_v0 = vld [vmem:[%s3455_s3 + $0x80] sm:$0xff]  ;;  %v2854_v23 = vld [vmem:[%s3455_s3 + $0x198] sm:$0xff] }
  0x46   : >> { %831 = vmatpush.bf16.msrb.mxu2 %v2781_v1 }
  0x47   : >> { %920 = vmatpush.bf16.msrb.mxu3 %v2789_v3  ;;  %v3205_v33 = vld.sshfl [vmem:[#allocation1] sm:$0xff pattern:$0x73625140]  ;;  %v2858_v3 = vld [vmem:[%s3455_s3 + $0x1b8] sm:$0xff] }
  0x48   : >> { %665 = vmatpush.bf16.msrb.mxu0 %v2764_v4  ;;  %1112 = vst [vmem:[#allocation1] ss:$4 sm:$0xff] %v3197_v30  ;;  %v949_v1 = vrot.slane %v3205_v33, 1  ;;  %v2852_v33 = vld [vmem:[%s3455_s3 + $0x188] sm:$0xff] }
  0x49   : >> { %749 = vmatpush.bf16.msrb.mxu1 %v2772_v5  ;;  %v2833_v5 = vld [vmem:[%s3455_s3 + $0xf0] sm:$0xff] }
  0x4a   : >> { %832 = vmatpush.bf16.msrb.mxu2 %v2780_v6 }
  0x4b   : >> { %921 = vmatpush.bf16.msrb.mxu3 %v2788_v8  ;;  %v2849_v8 = vld [vmem:[%s3455_s3 + $0x170] sm:$0xff] }
  0x4c   : >> { %666 = vmatpush.bf16.msrb.mxu0 %v2763_v9  ;;  %v2857_v9 = vld [vmem:[%s3455_s3 + $0x1b0] sm:$0xff] }
  0x4d   : >> { %750 = vmatpush.bf16.msrb.mxu1 %v2771_v10  ;;  %v2832_v10 = vld [vmem:[%s3455_s3 + $0xe8] sm:$0xff] }
  0x4e   : >> { %833 = vmatpush.bf16.msrb.mxu2 %v2779_v11  ;;  %v2840_v11 = vld [vmem:[%s3455_s3 + $0x128] sm:$0xff] }
  0x4f   : >> { %922 = vmatpush.bf16.msrb.mxu3 %v2787_v18  ;;  %667 = vmatmul.bf16.vlgmr.msrb.gmra.mxu0 %v609_v22  ;;  %v1113_v42 = vld.sshfl [vmem:[#allocation1] sm:$0xff pattern:$0x73625140]  ;;  %v2846_v22 = vld [vmem:[%s3455_s3 + $0x158] sm:$0xff] }
  0x50   : >> { %999 = vmatpush.bf16.msra.mxu0 %v2802_v14  ;;  %751 = vmatmul.bf16.vlgmr.msrb.gmra.mxu1 %v693_v24  ;;  %1200 = vst [vmem:[#allocation1] ss:$4 sm:$0xff] %v3197_v30  ;;  %v1116_v52 = vshll.u32 %v1113_v42, 16  ;;  %v1114_v58 = vshrl.u32 %v1113_v42, 16  ;;  %v2847_v18 = vld [vmem:[%s3455_s3 + $0x160] sm:$0xff]  ;;  %v2829_v24 = vld [vmem:[%s3455_s3 + $0xd0] sm:$0xff] }
  0x51   : >> { %1080 = vmatpush.bf16.msra.mxu1 %v2810_v15  ;;  %834 = vmatmul.bf16.vlgmr.msrb.gmra.mxu2 %v2161_v63  ;;  %v2850_v63 = vld [vmem:[%s3455_s3 + $0x178] sm:$0xff]  ;;  %v3321_v15 = vld [vmem:[%s3182_s13 + $0x4] sm:$0x3] }
  0x52   : >> { %1169 = vmatpush.bf16.msra.mxu2 %v2818_v17  ;;  %923 = vmatmul.bf16.vlgmr.msrb.gmra.mxu3 %v865_v28  ;;  %v1118_v59 = vrot.slane %v1116_v52, 1  ;;  %v2839_v17 = vld [vmem:[%s3455_s3 + $0x120] sm:$0xff]  ;;  %v2861_v52 = vld [vmem:[%s3455_s3 + $0x1d0] sm:$0xff] }
  0x53   : >> { %1253 = vmatpush.bf16.msra.mxu3 %v2826_v21  ;;  %v2838_v21 = vld [vmem:[%s3455_s3 + $0x118] sm:$0xff] }
  0x54   : >> { %1000 = vmatpush.bf16.msra.mxu0 %v2801_v25  ;;  %v1119_v2 = vor.u32 %v1118_v59, %v1114_v58  ;;  %v2837_v25 = vld [vmem:[%s3455_s3 + $0x110] sm:$0xff]  ;;  %v2859_v59 = vld [vmem:[%s3455_s3 + $0x1c0] sm:$0xff] }
  0x55   : >> { %1081 = vmatpush.bf16.msra.mxu1 %v2809_v26  ;;  %v2845_v26 = vld [vmem:[%s3455_s3 + $0x150] sm:$0xff] }
  0x56   : >> { %1170 = vmatpush.bf16.msra.mxu2 %v2817_v27  ;;  %v2853_v27 = vld [vmem:[%s3455_s3 + $0x190] sm:$0xff] }
  0x57   : >> { %1254 = vmatpush.bf16.msra.mxu3 %v2825_v29  ;;  %v1201_v53 = vld.sshfl [vmem:[#allocation1] sm:$0xff pattern:$0x73625140]  ;;  %v2828_v29 = vld [vmem:[%s3455_s3 + $0xc8] sm:$0xff] }
  0x58   : >> { %1001 = vmatpush.bf16.msra.mxu0 %v2800_v31  ;;  %1367 = vst [vmem:[#allocation1] ss:$4 sm:$0xff] %v3252_v49  ;;  %v1203_v6 = vrot.slane %v1201_v53, 1  ;;  %v2836_v31 = vld [vmem:[%s3455_s3 + $0x108] sm:$0xff]  ;;  %v2869_v53 = vld [vmem:[%s3455_s3 + $0x210] sm:$0xff] }
  0x59   : >> { %1082 = vmatpush.bf16.msra.mxu1 %v2808_v32  ;;  %v2844_v32 = vld [vmem:[%s3455_s3 + $0x148] sm:$0xff] }
  0x5a   : >> { %1171 = vmatpush.bf16.msra.mxu2 %v2816_v34  ;;  %v2827_v34 = vld [vmem:[%s3455_s3 + $0xc0] sm:$0xff] }
  0x5b   : >> { %1255 = vmatpush.bf16.msra.mxu3 %v2824_v35 }
  0x5c   : >> { %1002 = vmatpush.bf16.msra.mxu0 %v2799_v36 }
  0x5d   : >> { %1083 = vmatpush.bf16.msra.mxu1 %v2807_v37  ;;  %v2835_v37 = vld [vmem:[%s3455_s3 + $0x100] sm:$0xff] }
  0x5e   : >> { %1172 = vmatpush.bf16.msra.mxu2 %v2815_v38  ;;  %v2866_v38 = vld [vmem:[%s3455_s3 + $0x1f8] sm:$0xff] }
  0x5f   : >> { %1256 = vmatpush.bf16.msra.mxu3 %v2823_v39  ;;  %v3292_v4 = vld.sshfl [vmem:[#allocation1] sm:$0xff pattern:$0x73625140] }
  0x60   : >> { %1003 = vmatpush.bf16.msra.mxu0 %v2798_v40  ;;  %1455 = vst [vmem:[#allocation1] ss:$4 sm:$0xff] %v3252_v49  ;;  %v1369_v35 = vshrl.u32 %v3292_v4, 16  ;;  %v2843_v39 = vld [vmem:[%s3455_s3 + $0x140] sm:$0xff]  ;;  %v2874_v40 = vld [vmem:[%s3455_s3 + $0x238] sm:$0xff] }
  0x61   : >> { %1084 = vmatpush.bf16.msra.mxu1 %v2806_v41  ;;  %v2851_v41 = vld [vmem:[%s3455_s3 + $0x180] sm:$0xff] }
  0x62   : >> { %1173 = vmatpush.bf16.msra.mxu2 %v2814_v43 }
  0x63   : >> { %1257 = vmatpush.bf16.msra.mxu3 %v2822_v44  ;;  %v2865_v44 = vld [vmem:[%s3455_s3 + $0x1f0] sm:$0xff] }
  0x64   : >> { %1004 = vmatpush.bf16.msra.mxu0 %v2797_v45  ;;  %v2873_v45 = vld [vmem:[%s3455_s3 + $0x230] sm:$0xff] }
  0x65   : >> { %1085 = vmatpush.bf16.msra.mxu1 %v2805_v46  ;;  %v2864_v46 = vld [vmem:[%s3455_s3 + $0x1e8] sm:$0xff] }
  0x66   : >> { %1174 = vmatpush.bf16.msra.mxu2 %v2813_v47  ;;  %v2872_v47 = vld [vmem:[%s3455_s3 + $0x228] sm:$0xff] }
  0x67   : >> { %1258 = vmatpush.bf16.msra.mxu3 %v2821_v48  ;;  %v1456_v14 = vld.sshfl [vmem:[#allocation1] sm:$0xff pattern:$0x73625140] }
  0x68   : >> { %1005 = vmatpush.bf16.msra.mxu0 %v2796_v50  ;;  %1622 = vst [vmem:[#allocation1] ss:$4 sm:$0xff] %v3321_v15  ;;  %v1458_v43 = vrot.slane %v1456_v14, 1  ;;  %v2863_v48 = vld [vmem:[%s3455_s3 + $0x1e0] sm:$0xff]  ;;  %v2862_v50 = vld [vmem:[%s3455_s3 + $0x1d8] sm:$0xff] }
  0x69   : >> { %1086 = vmatpush.bf16.msra.mxu1 %v2804_v51  ;;  %v2870_v51 = vld [vmem:[%s3455_s3 + $0x218] sm:$0xff] }
  0x6a   : >> { %1175 = vmatpush.bf16.msra.mxu2 %v2812_v54 }
  0x6b   : >> { %1259 = vmatpush.bf16.msra.mxu3 %v2820_v55  ;;  %v2860_v55 = vld [vmem:[%s3455_s3 + $0x1c8] sm:$0xff] }
  0x6c   : >> { %1006 = vmatpush.bf16.msra.mxu0 %v2795_v56  ;;  %v2868_v56 = vld [vmem:[%s3455_s3 + $0x208] sm:$0xff] }
  0x6d   : >> { %1087 = vmatpush.bf16.msra.mxu1 %v2803_v57 }
  0x6e   : >> { %1176 = vmatpush.bf16.msra.mxu2 %v2811_v60  ;;  %v2867_v60 = vld [vmem:[%s3455_s3 + $0x200] sm:$0xff] }
  0x6f   : >> { %1260 = vmatpush.bf16.msra.mxu3 %v2819_v0  ;;  %1007 = vmatmul.bf16.vlgmr.msra.gmra.mxu0 %v949_v1  ;;  %v3360_v28 = vld.sshfl [vmem:[#allocation1] sm:$0xff pattern:$0x73625140] }
  0x70   : >> { %1335 = vmatpush.bf16.msrb.mxu0 %v2834_v61  ;;  %1088 = vmatmul.bf16.vlgmr.msra.gmra.mxu1 %v3197_v30  ;;  %v1371_v30 = vshll.u32 %v3292_v4, 16  ;;  %1710 = vst [vmem:[#allocation1] ss:$4 sm:$0xff] %v3321_v15  ;;  %v1626_v54 = vshll.u32 %v3360_v28, 16  ;;  %v1624_v57 = vshrl.u32 %v3360_v28, 16 }
  0x71   : >> { %1424 = vmatpush.bf16.msrb.mxu1 %v2842_v62  ;;  %1177 = vmatmul.bf16.vlgmr.msra.gmra.mxu2 %v1119_v2 }
  0x72   : >> { %1508 = vmatpush.bf16.msrb.mxu2 %v2850_v63  ;;  %1261 = vmatmul.bf16.vlgmr.msra.gmra.mxu3 %v1203_v6  ;;  %v1373_v36 = vrot.slane %v1371_v30, 1  ;;  %v1628_v58 = vrot.slane %v1626_v54, 1 }
  0x73   : >> { %1590 = vmatpush.bf16.msrb.mxu3 %v2858_v3 }
  0x74   : >> { %1336 = vmatpush.bf16.msrb.mxu0 %v2833_v5  ;;  %v1374_v42 = vor.u32 %v1373_v36, %v1369_v35  ;;  %v1629_v62 = vor.u32 %v1628_v58, %v1624_v57 }
  0x75   : >> { %1425 = vmatpush.bf16.msrb.mxu1 %v2841_v7 }
  0x76   : >> { %1509 = vmatpush.bf16.msrb.mxu2 %v2849_v8 }
  0x77   : >> { %1591 = vmatpush.bf16.msrb.mxu3 %v2857_v9  ;;  %v1711_v61 = vld.sshfl [vmem:[#allocation1] sm:$0xff pattern:$0x73625140] }
  0x78   : >> { %1337 = vmatpush.bf16.msrb.mxu0 %v2832_v10  ;;  %v1713_v63 = vrot.slane %v1711_v61, 1 }
  0x79   : >> { %1426 = vmatpush.bf16.msrb.mxu1 %v2840_v11 }
  0x7a   : >> { %1510 = vmatpush.bf16.msrb.mxu2 %v2848_v12 }
  0x7b   : >> { %1592 = vmatpush.bf16.msrb.mxu3 %v2856_v13 }
  0x7c   : >> { %1338 = vmatpush.bf16.msrb.mxu0 %v2831_v16 }
  0x7d   : >> { %1427 = vmatpush.bf16.msrb.mxu1 %v2839_v17 }
  0x7e   : >> { %1511 = vmatpush.bf16.msrb.mxu2 %v2847_v18 }
  0x7f   : >> { %1593 = vmatpush.bf16.msrb.mxu3 %v2855_v19 }
  0x80   : >> { %1339 = vmatpush.bf16.msrb.mxu0 %v2830_v20 }
  0x81   : >> { %1428 = vmatpush.bf16.msrb.mxu1 %v2838_v21 }
  0x82   : >> { %1512 = vmatpush.bf16.msrb.mxu2 %v2846_v22 }
  0x83   : >> { %1594 = vmatpush.bf16.msrb.mxu3 %v2854_v23 }
  0x84   : >> { %1340 = vmatpush.bf16.msrb.mxu0 %v2829_v24 }
  0x85   : >> { %1429 = vmatpush.bf16.msrb.mxu1 %v2837_v25 }
  0x86   : >> { %1513 = vmatpush.bf16.msrb.mxu2 %v2845_v26 }
  0x87   : >> { %1595 = vmatpush.bf16.msrb.mxu3 %v2853_v27 }
  0x88   : >> { %1341 = vmatpush.bf16.msrb.mxu0 %v2828_v29 }
  0x89   : >> { %1430 = vmatpush.bf16.msrb.mxu1 %v2836_v31 }
  0x8a   : >> { %1514 = vmatpush.bf16.msrb.mxu2 %v2844_v32 }
  0x8b   : >> { %1596 = vmatpush.bf16.msrb.mxu3 %v2852_v33 }
  0x8c   : >> { %1342 = vmatpush.bf16.msrb.mxu0 %v2827_v34 }
  0x8d   : >> { %1431 = vmatpush.bf16.msrb.mxu1 %v2835_v37 }
  0x8e   : >> { %1515 = vmatpush.bf16.msrb.mxu2 %v2843_v39 }
  0x8f   : >> { %1597 = vmatpush.bf16.msrb.mxu3 %v2851_v41  ;;  %1343 = vmatmul.bf16.vlgmr.msrb.gmra.mxu0 %v3252_v49  ;;  %v2871_v49 = vld [vmem:[%s3455_s3 + $0x220] sm:$0xff] }
  0x90   : >> { %1679 = vmatpush.bf16.msra.mxu0 %v2866_v38  ;;  %1432 = vmatmul.bf16.vlgmr.msrb.gmra.mxu1 %v1374_v42 }
  0x91   : >> { %1763 = vmatpush.bf16.msra.mxu1 %v2874_v40  ;;  %1516 = vmatmul.bf16.vlgmr.msrb.gmra.mxu2 %v1458_v43 }
  0x92   : >> { %1598 = vmatmul.bf16.vlgmr.msrb.gmra.mxu3 %v3321_v15 }
  0x94   : >> { %1680 = vmatpush.bf16.msra.mxu0 %v2865_v44 }
  0x95   : >> { %1764 = vmatpush.bf16.msra.mxu1 %v2873_v45 }
  0x98   : >> { %1681 = vmatpush.bf16.msra.mxu0 %v2864_v46 }
  0x99   : >> { %1765 = vmatpush.bf16.msra.mxu1 %v2872_v47 }
  0x9c   : >> { %1682 = vmatpush.bf16.msra.mxu0 %v2863_v48 }
  0x9d   : >> { %1766 = vmatpush.bf16.msra.mxu1 %v2871_v49 }
  0xa0   : >> { %1683 = vmatpush.bf16.msra.mxu0 %v2862_v50  ;;  %v2891_v50 = vld [vmem:[%s3456_s4] ss:$0 sm:$0xff] }
  0xa1   : >> { %1767 = vmatpush.bf16.msra.mxu1 %v2870_v51 }
  0xa4   : >> { %1684 = vmatpush.bf16.msra.mxu0 %v2861_v52 }
  0xa5   : >> { %1768 = vmatpush.bf16.msra.mxu1 %v2869_v53 }
  0xa8   : >> { %1685 = vmatpush.bf16.msra.mxu0 %v2860_v55 }
  0xa9   : >> { %1769 = vmatpush.bf16.msra.mxu1 %v2868_v56 }
  0xac   : >> { %1686 = vmatpush.bf16.msra.mxu0 %v2859_v59  ;;  %v352_v0 = vpop.f32.mrf.mxu0 }
  0xad   : >> { %1770 = vmatpush.bf16.msra.mxu1 %v2867_v60  ;;  %v413_v1 = vpop.f32.mrf.mxu1 }
  0xae   : >> { %v414_v2 = vadd.f32 %v413_v1, %v352_v0 }
  0xaf   : >> { %1687 = vmatmul.bf16.vlgmr.msra.gmra.mxu0 %v1629_v62 }
  0xb0   : >> { %1771 = vmatmul.bf16.vlgmr.msra.gmra.mxu1 %v1713_v63 }
  0xb4   : >> { %v354_v3 = vpop.f32.mrf.mxu0  ;;  %v496_v5 = vpop.f32.mrf.mxu2 }
  0xb5   : >> { %v415_v4 = vpop.f32.mrf.mxu1  ;;  %v579_v6 = vpop.f32.mrf.mxu3  ;;  %v500_v7 = vadd.f32 %v496_v5, %v414_v2 }
  0xb7   : >> { %v583_v8 = vadd.f32 %v579_v6, %v500_v7 }
  0xbc   : >> { %v498_v9 = vpop.f32.mrf.mxu2 }
  0xbd   : >> { %v581_v10 = vpop.f32.mrf.mxu3 }
  0xcc   : >> { %v668_v11 = vpop.f32.mrf.mxu0 }
  0xcd   : >> { %v752_v12 = vpop.f32.mrf.mxu1  ;;  %v672_v27 = vadd.f32 %v668_v11, %v583_v8 }
  0xcf   : >> { %v756_v28 = vadd.f32 %v752_v12, %v672_v27 }
  0xd4   : >> { %v835_v13 = vpop.f32.mrf.mxu2  ;;  %v670_v15 = vpop.f32.mrf.mxu0 }
  0xd5   : >> { %v924_v14 = vpop.f32.mrf.mxu3  ;;  %v754_v16 = vpop.f32.mrf.mxu1  ;;  %v839_v29 = vadd.f32 %v835_v13, %v756_v28 }
  0xd7   : >> { %v928_v32 = vadd.f32 %v924_v14, %v839_v29 }
  0xdc   : >> { %v837_v17 = vpop.f32.mrf.mxu2 }
  0xdd   : >> { %v926_v18 = vpop.f32.mrf.mxu3 }
  0xec   : >> { %v1008_v19 = vpop.f32.mrf.mxu0 }
  0xed   : >> { %v1089_v20 = vpop.f32.mrf.mxu1  ;;  %v1012_v33 = vadd.f32 %v1008_v19, %v928_v32 }
  0xef   : >> { %v1093_v38 = vadd.f32 %v1089_v20, %v1012_v33 }
  0xf4   : >> { %v1178_v21 = vpop.f32.mrf.mxu2  ;;  %v1010_v22 = vpop.f32.mrf.mxu0 }
  0xf5   : >> { %v1262_v23 = vpop.f32.mrf.mxu3  ;;  %v1091_v24 = vpop.f32.mrf.mxu1  ;;  %v1182_v39 = vadd.f32 %v1178_v21, %v1093_v38 }
  0xf7   : >> { %v1266_v40 = vadd.f32 %v1262_v23, %v1182_v39 }
  0xfc   : >> { %v1180_v25 = vpop.f32.mrf.mxu2 }
  0xfd   : >> { %v1264_v26 = vpop.f32.mrf.mxu3 }
 0x10c   : >> { %v1344_v30 = vpop.f32.mrf.mxu0 }
 0x10d   : >> { %v1433_v31 = vpop.f32.mrf.mxu1  ;;  %v1348_v43 = vadd.f32 %v1344_v30, %v1266_v40 }
 0x10f   : >> { %v1437_v44 = vadd.f32 %v1433_v31, %v1348_v43 }
 0x114   : >> { %v1517_v34 = vpop.f32.mrf.mxu2  ;;  %v1346_v35 = vpop.f32.mrf.mxu0 }
 0x115   : >> { %v1599_v36 = vpop.f32.mrf.mxu3  ;;  %v1435_v37 = vpop.f32.mrf.mxu1  ;;  %v1521_v45 = vadd.f32 %v1517_v34, %v1437_v44 }
 0x117   : >> { %v1603_v46 = vadd.f32 %v1599_v36, %v1521_v45 }
 0x11c   : >> { %v1519_v41 = vpop.f32.mrf.mxu2 }
 0x11d   : >> { %v1601_v42 = vpop.f32.mrf.mxu3 }
 0x12c   : >> { %v1688_v47 = vpop.f32.mrf.mxu0 }
 0x12d   : >> { %v1692_v48 = vadd.f32 %v1688_v47, %v1603_v46  ;;  %v1772_v49 = vpop.f32.mrf.mxu1 }
 0x12f   : >> { %v1776_v51 = vadd.f32 %v1772_v49, %v1692_v48 }
 0x131   : >> { %v1781_v52 = vadd.f32 %v2891_v50, %v1776_v51 }
 0x133   : >> { %vm1782_vm0 = vcmp.ge.f32.partialorder %v1781_v52, 0.0  ;;  %v1783_v53 = vmul.f32 0.2, %v1781_v52 }
 0x134   : >> { %v1690_v54 = vpop.f32.mrf.mxu0  ;;  %247 = sbr.rel (!%p245_p4) target bundleno = 15 (0xf), region = 103 }
 0x135   : >> { %v1784_v55 = vsel %vm1782_vm0, %v1781_v52, %v1783_v53  ;;  %v1774_v56 = vpop.f32.mrf.mxu1 }
 0x136   : >> { %v1785_v57 = vpack.c.bf16 %v1784_v55, %v1784_v55 }
 0x138   : >> { %1787 = vst [vmem:[%s1786_s11] sm:$0x1] %v1785_v57 }
 0x139 PF: > { %s15_s18 = sadd.s32 1, %s2902_s18  }
 0x13a   : > { %p12_p5 = scmp.ge.s32.totalorder %s15_s18, 4  }
 0x13c   :  { %14 = sbr.rel (!%p12_p5) target bundleno = 1 (0x1), region = 114 }

// kernel: cnn_forward.17
= control target key start
LH: loop header
LB: loop body
LE: loop exit
PB: predicated region body
PF: predicated region fallthrough
CT: control target
= control target key end

     0   :  { %s2932_s18 = smov 0   ;;  %s3425_s0 = inlined_call_operand.vmem [shape: bf16[2,6,6,128], index: 0, kind: input, shape index: {}]   ;;  %s3426_s1 = inlined_call_operand.vmem [shape: bf16[2,6,6,128], index: 1, kind: input, shape index: {}]   ;;  %s3427_s2 = inlined_call_operand.vmem [shape: bf16[3,3,128,128], index: 2, kind: input, shape index: {}]   ;;  %s3428_s3 = inlined_call_operand.vmem [shape: bf16[3,3,128,128], index: 3, kind: input, shape index: {}]   ;;  %s3429_s4 = inlined_call_operand.vmem [shape: f32[1,128], index: 4, kind: input, shape index: {}]   ;;  %s3430_s5 = inlined_call_operand.vmem [shape: bf16[2,4,4,128], index: 5, kind: output, shape index: {}]  }
   0x1 LB: > { %s1869_s19 = sadd.s32 4294967295, %s2896_s18   ;;  %p1873_p0 = scmp.ge.s32.totalorder %s2896_s18, 1  ;;  %s2896_s18 = sphi %s2932_s18, %s15_s18  }
   0x2   : > { %p197_p1 = scmp.lt.s32.totalorder %s2896_s18, 3 }
   0x4   : > { %p198_p2 = pnand %p1873_p0, %p197_p1 }
   0x5   : > { %p230_p3 = scmp.lt.s32.totalorder (!%p198_p2), %s1869_s19, 1  ;;  %s2955_s6 = smov (!%p198_p2), 0  }
   0x6   : > { %201 = sbr.rel (%p198_p2) target bundleno = 313 (0x139), region = 40 }
   0xb   : > { %s3432_s19 = smov (!%p230_p3, %s1869_s19), 1 }
   0xc   : > { %s2868_s20 = smul.u32 24, %s3432_s19  ;;  %s2723_s21 = sshll.u32 %s3432_s19, 3 }
   0xd   : > { %s2943_s24 = scalar_lea.vmem %s3430_s5, %s2723_s21 }
   0xe   : > { %s2948_s27 = scalar_lea.vmem %s3425_s0, %s2868_s20  ;;  %s2953_s30 = scalar_lea.vmem %s3426_s1, %s2868_s20 }
   0xf LB: >> { %v2739_v0 = vld [vmem:[%s3427_s2 + $0x78] sm:$0xff]  ;;  %v2738_v4 = vld [vmem:[%s3427_s2 + $0x70] sm:$0xff]  ;;  %v2737_v8 = vld [vmem:[%s3427_s2 + $0x68] sm:$0xff]  ;;  %s1878_s20 = sshll.u32 %s2900_s6, 2  ;;  %s2900_s6 = sphi %s2955_s6, %s250_s6  }
  0x10   : >> { %v2731_v1 = vld [vmem:[%s3427_s2 + $0x38] sm:$0xff]  ;;  %346 = vmatpush.bf16.msra.mxu0 %v2739_v0  ;;  %v2730_v5 = vld [vmem:[%s3427_s2 + $0x30] sm:$0xff]  ;;  %v2729_v9 = vld [vmem:[%s3427_s2 + $0x28] sm:$0xff]  ;;  %s3018_s26 = scalar_lea.vmem %s2948_s27, %s1878_s20  ;;  %s3201_s8 = scalar_lea.vmem %s2953_s30, %s1878_s20 }
  0x11   : >> { %v2747_v2 = vld [vmem:[%s3427_s2 + $0xb8] sm:$0xff]  ;;  %407 = vmatpush.bf16.msra.mxu1 %v2731_v1  ;;  %v2746_v6 = vld [vmem:[%s3427_s2 + $0xb0] sm:$0xff]  ;;  %v2745_v10 = vld [vmem:[%s3427_s2 + $0xa8] sm:$0xff] }
  0x12   : >> { %v2755_v3 = vld [vmem:[%s3427_s2 + $0xf8] sm:$0xff]  ;;  %487 = vmatpush.bf16.msra.mxu2 %v2747_v2  ;;  %v2754_v7 = vld [vmem:[%s3427_s2 + $0xf0] sm:$0xff]  ;;  %v2753_v11 = vld [vmem:[%s3427_s2 + $0xe8] sm:$0xff] }
  0x13   : >> { %570 = vmatpush.bf16.msra.mxu3 %v2755_v3  ;;  %v2736_v12 = vld [vmem:[%s3427_s2 + $0x60] sm:$0xff]  ;;  %v2735_v16 = vld [vmem:[%s3427_s2 + $0x58] sm:$0xff]  ;;  %v2734_v21 = vld [vmem:[%s3427_s2 + $0x50] sm:$0xff] }
  0x14   : >> { %347 = vmatpush.bf16.msra.mxu0 %v2738_v4  ;;  %v2728_v13 = vld [vmem:[%s3427_s2 + $0x20] sm:$0xff]  ;;  %v2727_v17 = vld [vmem:[%s3427_s2 + $0x18] sm:$0xff]  ;;  %v2726_v22 = vld [vmem:[%s3427_s2 + $0x10] sm:$0xff] }
  0x15   : >> { %408 = vmatpush.bf16.msra.mxu1 %v2730_v5  ;;  %v2744_v14 = vld [vmem:[%s3427_s2 + $0xa0] sm:$0xff]  ;;  %v2743_v18 = vld [vmem:[%s3427_s2 + $0x98] sm:$0xff]  ;;  %v2742_v24 = vld [vmem:[%s3427_s2 + $0x90] sm:$0xff] }
  0x16   : >> { %488 = vmatpush.bf16.msra.mxu2 %v2746_v6  ;;  %v2752_v15 = vld [vmem:[%s3427_s2 + $0xe0] sm:$0xff]  ;;  %v2751_v19 = vld [vmem:[%s3427_s2 + $0xd8] sm:$0xff]  ;;  %v2750_v25 = vld [vmem:[%s3427_s2 + $0xd0] sm:$0xff] }
  0x17   : >> { %571 = vmatpush.bf16.msra.mxu3 %v2754_v7  ;;  %v253_v20 = vld [vmem:[%s3018_s26] sm:$0x7]  ;;  %v2733_v27 = vld [vmem:[%s3427_s2 + $0x48] sm:$0xff]  ;;  %v2763_v37 = vld [vmem:[%s3427_s2 + $0x138] sm:$0xff] }
  0x18   : >> { %348 = vmatpush.bf16.msra.mxu0 %v2737_v8  ;;  %v288_v23 = vunpack.c.l.b16 %v253_v20  ;;  %v2725_v28 = vld [vmem:[%s3427_s2 + $0x8] sm:$0xff]  ;;  %v2732_v34 = vld [vmem:[%s3427_s2 + $0x40] sm:$0xff]  ;;  %v2771_v38 = vld [vmem:[%s3427_s2 + $0x178] sm:$0xff] }
  0x19   : >> { %409 = vmatpush.bf16.msra.mxu1 %v2729_v9  ;;  %v2741_v30 = vld [vmem:[%s3427_s2 + $0x88] sm:$0xff]  ;;  %v2724_v35 = vld [vmem:[%s3427_s2] sm:$0xff]  ;;  %v2779_v39 = vld [vmem:[%s3427_s2 + $0x1b8] sm:$0xff] }
  0x1a   : >> { %489 = vmatpush.bf16.msra.mxu2 %v2745_v10  ;;  %v289_v26 = vpack.c.b16 %v288_v23, %v288_v23  ;;  %v2749_v31 = vld [vmem:[%s3427_s2 + $0xc8] sm:$0xff]  ;;  %v2740_v36 = vld [vmem:[%s3427_s2 + $0x80] sm:$0xff]  ;;  %v2787_v42 = vld [vmem:[%s3427_s2 + $0x1f8] sm:$0xff] }
  0x1b   : >> { %572 = vmatpush.bf16.msra.mxu3 %v2753_v11  ;;  %v2748_v40 = vld [vmem:[%s3427_s2 + $0xc0] sm:$0xff]  ;;  %v2762_v44 = vld [vmem:[%s3427_s2 + $0x130] sm:$0xff]  ;;  %v2761_v49 = vld [vmem:[%s3427_s2 + $0x128] sm:$0xff] }
  0x1c   : >> { %349 = vmatpush.bf16.msra.mxu0 %v2736_v12  ;;  %v293_v29 = vshll.u32 %v289_v26, 16  ;;  %v291_v32 = vshrl.u32 %v289_v26, 16  ;;  %v437_v43 = vrot.slane %v289_v26, 1  ;;  %v2770_v45 = vld [vmem:[%s3427_s2 + $0x170] sm:$0xff]  ;;  %v2008_v48 = vld [vmem:[%s3018_s26 + $0x4] sm:$0x7] }
  0x1d   : >> { %410 = vmatpush.bf16.msra.mxu1 %v2728_v13  ;;  %v2778_v46 = vld [vmem:[%s3427_s2 + $0x1b0] sm:$0xff]  ;;  %v2769_v50 = vld [vmem:[%s3427_s2 + $0x168] sm:$0xff]  ;;  %v2760_v53 = vld [vmem:[%s3427_s2 + $0x120] sm:$0xff]  ;;  %v602_v61 = vunpack.c.l.b16 %v2008_v48 }
  0x1e   : >> { %490 = vmatpush.bf16.msra.mxu2 %v2744_v14  ;;  %v295_v33 = vrot.slane %v293_v29, 1  ;;  %v2786_v47 = vld [vmem:[%s3427_s2 + $0x1f0] sm:$0xff]  ;;  %v2777_v51 = vld [vmem:[%s3427_s2 + $0x1a8] sm:$0xff]  ;;  %v2768_v54 = vld [vmem:[%s3427_s2 + $0x160] sm:$0xff] }
  0x1f   : >> { %573 = vmatpush.bf16.msra.mxu3 %v2752_v15  ;;  %v2785_v52 = vld [vmem:[%s3427_s2 + $0x1e8] sm:$0xff]  ;;  %v2776_v55 = vld [vmem:[%s3427_s2 + $0x1a0] sm:$0xff]  ;;  %v2759_v57 = vld [vmem:[%s3427_s2 + $0x118] sm:$0xff]  ;;  %v603_v1 = vpack.c.b16 %v602_v61, %v602_v61 }
  0x20   : >> { %350 = vmatpush.bf16.msra.mxu0 %v2735_v16  ;;  %v296_v41 = vor.u32 %v295_v33, %v291_v32  ;;  %v2784_v56 = vld [vmem:[%s3427_s2 + $0x1e0] sm:$0xff]  ;;  %v2154_v58 = vld [vmem:[%s3018_s26 + $0x8] sm:$0x7]  ;;  %v2767_v59 = vld [vmem:[%s3427_s2 + $0x158] sm:$0xff] }
  0x21   : >> { %411 = vmatpush.bf16.msra.mxu1 %v2727_v17  ;;  %v2775_v60 = vld [vmem:[%s3427_s2 + $0x198] sm:$0xff]  ;;  %v856_v63 = vunpack.c.l.b16 %v2154_v58  ;;  %v2758_v0 = vld [vmem:[%s3427_s2 + $0x110] sm:$0xff]  ;;  %v2757_v6 = vld [vmem:[%s3427_s2 + $0x108] sm:$0xff]  ;;  %v607_v9 = vshll.u32 %v603_v1, 16  ;;  %v605_v15 = vshrl.u32 %v603_v1, 16 }
  0x22   : >> { %491 = vmatpush.bf16.msra.mxu2 %v2743_v18  ;;  %v2783_v62 = vld [vmem:[%s3427_s2 + $0x1d8] sm:$0xff]  ;;  %v2766_v2 = vld [vmem:[%s3427_s2 + $0x150] sm:$0xff]  ;;  %v2765_v7 = vld [vmem:[%s3427_s2 + $0x148] sm:$0xff] }
  0x23   : >> { %574 = vmatpush.bf16.msra.mxu3 %v2751_v19  ;;  %v2774_v3 = vld [vmem:[%s3427_s2 + $0x190] sm:$0xff]  ;;  %v3137_v5 = vpack.c.b16 %v856_v63, %v856_v63  ;;  %v2773_v8 = vld [vmem:[%s3427_s2 + $0x188] sm:$0xff]  ;;  %v2756_v12 = vld [vmem:[%s3427_s2 + $0x100] sm:$0xff]  ;;  %v609_v16 = vrot.slane %v607_v9, 1 }
  0x24   : >> { %351 = vmatpush.bf16.msra.mxu0 %v2734_v21  ;;  %v2782_v4 = vld [vmem:[%s3427_s2 + $0x1d0] sm:$0xff]  ;;  %v2781_v10 = vld [vmem:[%s3427_s2 + $0x1c8] sm:$0xff]  ;;  %v2764_v13 = vld [vmem:[%s3427_s2 + $0x140] sm:$0xff] }
  0x25   : >> { %412 = vmatpush.bf16.msra.mxu1 %v2726_v22  ;;  %v861_v11 = vshll.u32 %v3137_v5, 16  ;;  %v2772_v14 = vld [vmem:[%s3427_s2 + $0x180] sm:$0xff]  ;;  %v2795_v17 = vld [vmem:[%s3427_s2 + $0x238] sm:$0xff]  ;;  %v859_v21 = vshrl.u32 %v3137_v5, 16  ;;  %v2794_v26 = vld [vmem:[%s3427_s2 + $0x230] sm:$0xff] }
  0x26   : >> { %492 = vmatpush.bf16.msra.mxu2 %v2742_v24  ;;  %v2803_v18 = vld [vmem:[%s3428_s3 + $0x38] sm:$0xff]  ;;  %v610_v24 = vor.u32 %v609_v16, %v605_v15  ;;  %v2801_v32 = vld [vmem:[%s3428_s3 + $0x28] sm:$0xff]  ;;  %v2812_v63 = vld [vmem:[%s3428_s3 + $0x80] sm:$0xff] }
  0x27   : >> { %575 = vmatpush.bf16.msra.mxu3 %v2750_v25  ;;  %v2811_v19 = vld [vmem:[%s3428_s3 + $0x78] sm:$0xff]  ;;  %v863_v22 = vrot.slane %v861_v11, 1  ;;  %v691_v25 = vrot.slane %v603_v1, 1  ;;  %v2809_v33 = vld [vmem:[%s3428_s3 + $0x68] sm:$0xff]  ;;  %v2840_v15 = vld [vmem:[%s3428_s3 + $0x160] sm:$0xff] }
  0x28   : >> { %352 = vmatpush.bf16.msra.mxu0 %v2733_v27  ;;  %v2819_v23 = vld [vmem:[%s3428_s3 + $0xb8] sm:$0xff]  ;;  %v2802_v27 = vld [vmem:[%s3428_s3 + $0x30] sm:$0xff]  ;;  %v2833_v9 = vld [vmem:[%s3428_s3 + $0x128] sm:$0xff] }
  0x29   : >> { %413 = vmatpush.bf16.msra.mxu1 %v2725_v28  ;;  %v2810_v28 = vld [vmem:[%s3428_s3 + $0x70] sm:$0xff]  ;;  %v864_v29 = vor.u32 %v863_v22, %v859_v21  ;;  %v2835_v61 = vld [vmem:[%s3428_s3 + $0x138] sm:$0xff]  ;;  %v2849_v11 = vld [vmem:[%s3428_s3 + $0x1a8] sm:$0xff] }
  0x2a   : >> { %493 = vmatpush.bf16.msra.mxu2 %v2741_v30  ;;  %v2818_v30 = vld [vmem:[%s3428_s3 + $0xb0] sm:$0xff]  ;;  %v2848_v16 = vld [vmem:[%s3428_s3 + $0x1a0] sm:$0xff]  ;;  %v2847_v21 = vld [vmem:[%s3428_s3 + $0x198] sm:$0xff] }
  0x2b   : >> { %576 = vmatpush.bf16.msra.mxu3 %v2749_v31  ;;  %v2793_v31 = vld [vmem:[%s3427_s2 + $0x228] sm:$0xff]  ;;  %v2822_v22 = vld [vmem:[%s3428_s3 + $0xd0] sm:$0xff] }
  0x2c   : >> { %353 = vmatpush.bf16.msra.mxu0 %v2732_v34  ;;  %v2817_v34 = vld [vmem:[%s3428_s3 + $0xa8] sm:$0xff] }
  0x2d   : >> { %414 = vmatpush.bf16.msra.mxu1 %v2724_v35  ;;  %v2792_v35 = vld [vmem:[%s3427_s2 + $0x220] sm:$0xff] }
  0x2e   : >> { %494 = vmatpush.bf16.msra.mxu2 %v2740_v36  ;;  %v2800_v36 = vld [vmem:[%s3428_s3 + $0x20] sm:$0xff] }
  0x2f   : >> { %577 = vmatpush.bf16.msra.mxu3 %v2748_v40  ;;  %354 = vmatmul.bf16.vlgmr.msra.gmra.mxu0 %v296_v41  ;;  %v2791_v40 = vld [vmem:[%s3427_s2 + $0x218] sm:$0xff] }
  0x30   : >> { %660 = vmatpush.bf16.msrb.mxu0 %v2763_v37  ;;  %415 = vmatmul.bf16.vlgmr.msra.gmra.mxu1 %v253_v20  ;;  %v2780_v20 = vld [vmem:[%s3427_s2 + $0x1c0] sm:$0xff]  ;;  %v2799_v41 = vld [vmem:[%s3428_s3 + $0x18] sm:$0xff] }
  0x31   : >> { %741 = vmatpush.bf16.msrb.mxu1 %v2771_v38  ;;  %495 = vmatmul.bf16.vlgmr.msra.gmra.mxu2 %v437_v43  ;;  %v1011_v37 = vld [vmem:[%s3201_s8] sm:$0x7]  ;;  %v2807_v43 = vld [vmem:[%s3428_s3 + $0x58] sm:$0xff] }
  0x32   : >> { %824 = vmatpush.bf16.msrb.mxu2 %v2779_v39  ;;  %578 = vmatmul.bf16.vlgmr.msra.gmra.mxu3 %v2008_v48  ;;  %v2808_v38 = vld [vmem:[%s3428_s3 + $0x60] sm:$0xff]  ;;  %v2806_v48 = vld [vmem:[%s3428_s3 + $0x50] sm:$0xff] }
  0x33   : >> { %914 = vmatpush.bf16.msrb.mxu3 %v2787_v42  ;;  %v2816_v39 = vld [vmem:[%s3428_s3 + $0xa0] sm:$0xff]  ;;  %v1108_v42 = vunpack.c.l.b16 %v1011_v37 }
  0x34   : >> { %661 = vmatpush.bf16.msrb.mxu0 %v2762_v44  ;;  %v2815_v44 = vld [vmem:[%s3428_s3 + $0x98] sm:$0xff] }
  0x35   : >> { %742 = vmatpush.bf16.msrb.mxu1 %v2770_v45  ;;  %v2790_v45 = vld [vmem:[%s3427_s2 + $0x210] sm:$0xff] }
  0x36   : >> { %825 = vmatpush.bf16.msrb.mxu2 %v2778_v46  ;;  %v2798_v46 = vld [vmem:[%s3428_s3 + $0x10] sm:$0xff] }
  0x37   : >> { %915 = vmatpush.bf16.msrb.mxu3 %v2786_v47  ;;  %v1109_v47 = vpack.c.b16 %v1108_v42, %v1108_v42  ;;  %v2858_v42 = vld [vmem:[%s3428_s3 + $0x1f0] sm:$0xff] }
  0x38   : >> { %662 = vmatpush.bf16.msrb.mxu0 %v2761_v49  ;;  %v2814_v49 = vld [vmem:[%s3428_s3 + $0x90] sm:$0xff] }
  0x39   : >> { %743 = vmatpush.bf16.msrb.mxu1 %v2769_v50  ;;  %v2789_v50 = vld [vmem:[%s3427_s2 + $0x208] sm:$0xff] }
  0x3a   : >> { %826 = vmatpush.bf16.msrb.mxu2 %v2777_v51  ;;  %v2797_v51 = vld [vmem:[%s3428_s3 + $0x8] sm:$0xff] }
  0x3b   : >> { %916 = vmatpush.bf16.msrb.mxu3 %v2785_v52  ;;  %v1113_v52 = vshll.u32 %v1109_v47, 16 }
  0x3c   : >> { %663 = vmatpush.bf16.msrb.mxu0 %v2760_v53  ;;  %v2805_v53 = vld [vmem:[%s3428_s3 + $0x48] sm:$0xff] }
  0x3d   : >> { %744 = vmatpush.bf16.msrb.mxu1 %v2768_v54  ;;  %v2813_v54 = vld [vmem:[%s3428_s3 + $0x88] sm:$0xff] }
  0x3e   : >> { %827 = vmatpush.bf16.msrb.mxu2 %v2776_v55  ;;  %v2788_v55 = vld [vmem:[%s3427_s2 + $0x200] sm:$0xff] }
  0x3f   : >> { %917 = vmatpush.bf16.msrb.mxu3 %v2784_v56  ;;  %v2796_v56 = vld [vmem:[%s3428_s3] sm:$0xff] }
  0x40   : >> { %664 = vmatpush.bf16.msrb.mxu0 %v2759_v57  ;;  %v1111_v57 = vshrl.u32 %v1109_v47, 16 }
  0x41   : >> { %745 = vmatpush.bf16.msrb.mxu1 %v2767_v59  ;;  %v2804_v59 = vld [vmem:[%s3428_s3 + $0x40] sm:$0xff] }
  0x42   : >> { %828 = vmatpush.bf16.msrb.mxu2 %v2775_v60  ;;  %v2827_v60 = vld [vmem:[%s3428_s3 + $0xf8] sm:$0xff] }
  0x43   : >> { %918 = vmatpush.bf16.msrb.mxu3 %v2783_v62  ;;  %v2843_v62 = vld [vmem:[%s3428_s3 + $0x178] sm:$0xff] }
  0x44   : >> { %665 = vmatpush.bf16.msrb.mxu0 %v2758_v0  ;;  %v945_v0 = vrot.slane %v3137_v5, 1  ;;  %v2834_v5 = vld [vmem:[%s3428_s3 + $0x130] sm:$0xff] }
  0x45   : >> { %746 = vmatpush.bf16.msrb.mxu1 %v2766_v2  ;;  %v2851_v2 = vld [vmem:[%s3428_s3 + $0x1b8] sm:$0xff] }
  0x46   : >> { %829 = vmatpush.bf16.msrb.mxu2 %v2774_v3  ;;  %v2826_v3 = vld [vmem:[%s3428_s3 + $0xf0] sm:$0xff] }
  0x47   : >> { %919 = vmatpush.bf16.msrb.mxu3 %v2782_v4  ;;  %v1197_v4 = vrot.slane %v1109_v47, 1  ;;  %v2856_v47 = vld [vmem:[%s3428_s3 + $0x1e0] sm:$0xff] }
  0x48   : >> { %666 = vmatpush.bf16.msrb.mxu0 %v2757_v6  ;;  %v2842_v6 = vld [vmem:[%s3428_s3 + $0x170] sm:$0xff] }
  0x49   : >> { %747 = vmatpush.bf16.msrb.mxu1 %v2765_v7  ;;  %v2850_v7 = vld [vmem:[%s3428_s3 + $0x1b0] sm:$0xff] }
  0x4a   : >> { %830 = vmatpush.bf16.msrb.mxu2 %v2773_v8  ;;  %v2825_v8 = vld [vmem:[%s3428_s3 + $0xe8] sm:$0xff] }
  0x4b   : >> { %920 = vmatpush.bf16.msrb.mxu3 %v2781_v10  ;;  %v2841_v10 = vld [vmem:[%s3428_s3 + $0x168] sm:$0xff] }
  0x4c   : >> { %667 = vmatpush.bf16.msrb.mxu0 %v2756_v12  ;;  %v2824_v12 = vld [vmem:[%s3428_s3 + $0xe0] sm:$0xff] }
  0x4d   : >> { %748 = vmatpush.bf16.msrb.mxu1 %v2764_v13  ;;  %v2832_v13 = vld [vmem:[%s3428_s3 + $0x120] sm:$0xff] }
  0x4e   : >> { %831 = vmatpush.bf16.msrb.mxu2 %v2772_v14  ;;  %v2429_v14 = vld [vmem:[%s3201_s8 + $0x4] sm:$0x7] }
  0x4f   : >> { %921 = vmatpush.bf16.msrb.mxu3 %v2780_v20  ;;  %668 = vmatmul.bf16.vlgmr.msrb.gmra.mxu0 %v610_v24  ;;  %v2839_v20 = vld [vmem:[%s3428_s3 + $0x158] sm:$0xff]  ;;  %v2830_v24 = vld [vmem:[%s3428_s3 + $0x110] sm:$0xff] }
  0x50   : >> { %995 = vmatpush.bf16.msra.mxu0 %v2795_v17  ;;  %749 = vmatmul.bf16.vlgmr.msrb.gmra.mxu1 %v691_v25  ;;  %v2823_v17 = vld [vmem:[%s3428_s3 + $0xd8] sm:$0xff]  ;;  %v2838_v25 = vld [vmem:[%s3428_s3 + $0x150] sm:$0xff] }
  0x51   : >> { %1076 = vmatpush.bf16.msra.mxu1 %v2803_v18  ;;  %832 = vmatmul.bf16.vlgmr.msrb.gmra.mxu2 %v2154_v58  ;;  %v1115_v58 = vrot.slane %v1113_v52, 1  ;;  %v1361_v18 = vunpack.c.l.b16 %v2429_v14 }
  0x52   : >> { %1166 = vmatpush.bf16.msra.mxu2 %v2811_v19  ;;  %922 = vmatmul.bf16.vlgmr.msrb.gmra.mxu3 %v864_v29  ;;  %v2831_v19 = vld [vmem:[%s3428_s3 + $0x118] sm:$0xff]  ;;  %v2829_v29 = vld [vmem:[%s3428_s3 + $0x108] sm:$0xff] }
  0x53   : >> { %1247 = vmatpush.bf16.msra.mxu3 %v2819_v23  ;;  %v1116_v1 = vor.u32 %v1115_v58, %v1111_v57  ;;  %v1362_v23 = vpack.c.b16 %v1361_v18, %v1361_v18  ;;  %v2861_v57 = vld [vmem:[%s3428_s3 + $0x208] sm:$0xff] }
  0x54   : >> { %996 = vmatpush.bf16.msra.mxu0 %v2794_v26  ;;  %v2846_v26 = vld [vmem:[%s3428_s3 + $0x190] sm:$0xff] }
  0x55   : >> { %1077 = vmatpush.bf16.msra.mxu1 %v2802_v27  ;;  %v2821_v27 = vld [vmem:[%s3428_s3 + $0xc8] sm:$0xff] }
  0x56   : >> { %1167 = vmatpush.bf16.msra.mxu2 %v2810_v28  ;;  %v1366_v28 = vshll.u32 %v1362_v23, 16 }
  0x57   : >> { %1248 = vmatpush.bf16.msra.mxu3 %v2818_v30  ;;  %v2837_v30 = vld [vmem:[%s3428_s3 + $0x148] sm:$0xff] }
  0x58   : >> { %997 = vmatpush.bf16.msra.mxu0 %v2793_v31  ;;  %v2845_v31 = vld [vmem:[%s3428_s3 + $0x188] sm:$0xff] }
  0x59   : >> { %1078 = vmatpush.bf16.msra.mxu1 %v2801_v32  ;;  %v2820_v32 = vld [vmem:[%s3428_s3 + $0xc0] sm:$0xff] }
  0x5a   : >> { %1168 = vmatpush.bf16.msra.mxu2 %v2809_v33  ;;  %v1364_v33 = vshrl.u32 %v1362_v23, 16 }
  0x5b   : >> { %1249 = vmatpush.bf16.msra.mxu3 %v2817_v34  ;;  %v1368_v34 = vrot.slane %v1366_v28, 1 }
  0x5c   : >> { %998 = vmatpush.bf16.msra.mxu0 %v2792_v35  ;;  %v2828_v35 = vld [vmem:[%s3428_s3 + $0x100] sm:$0xff] }
  0x5d   : >> { %1079 = vmatpush.bf16.msra.mxu1 %v2800_v36  ;;  %v2859_v36 = vld [vmem:[%s3428_s3 + $0x1f8] sm:$0xff] }
  0x5e   : >> { %1169 = vmatpush.bf16.msra.mxu2 %v2808_v38  ;;  %v2867_v38 = vld [vmem:[%s3428_s3 + $0x238] sm:$0xff] }
  0x5f   : >> { %1250 = vmatpush.bf16.msra.mxu3 %v2816_v39  ;;  %v2844_v39 = vld [vmem:[%s3428_s3 + $0x180] sm:$0xff] }
  0x60   : >> { %999 = vmatpush.bf16.msra.mxu0 %v2791_v40  ;;  %v1369_v40 = vor.u32 %v1368_v34, %v1364_v33 }
  0x61   : >> { %1080 = vmatpush.bf16.msra.mxu1 %v2799_v41  ;;  %v1450_v41 = vrot.slane %v1362_v23, 1 }
  0x62   : >> { %1170 = vmatpush.bf16.msra.mxu2 %v2807_v43  ;;  %v2866_v43 = vld [vmem:[%s3428_s3 + $0x230] sm:$0xff] }
  0x63   : >> { %1251 = vmatpush.bf16.msra.mxu3 %v2815_v44  ;;  %v2575_v44 = vld [vmem:[%s3201_s8 + $0x8] sm:$0x7]  ;;  %s2720_s8 = sshll.u32 %s2900_s6, 1  ;;  %s250_s6 = sadd.s32 1, %s2900_s6  }
  0x64   : >> { %1000 = vmatpush.bf16.msra.mxu0 %v2790_v45  ;;  %v2857_v45 = vld [vmem:[%s3428_s3 + $0x1e8] sm:$0xff]  ;;  %s1777_s20 = scalar_lea.vmem %s2943_s24, %s2720_s8  ;;  %p247_p4 = scmp.ge.s32.totalorder %s250_s6, 4  }
  0x65   : >> { %1081 = vmatpush.bf16.msra.mxu1 %v2798_v46  ;;  %v2865_v46 = vld [vmem:[%s3428_s3 + $0x228] sm:$0xff] }
  0x66   : >> { %1171 = vmatpush.bf16.msra.mxu2 %v2806_v48  ;;  %v2864_v48 = vld [vmem:[%s3428_s3 + $0x220] sm:$0xff] }
  0x67   : >> { %1252 = vmatpush.bf16.msra.mxu3 %v2814_v49  ;;  %v1614_v49 = vunpack.c.l.b16 %v2575_v44 }
  0x68   : >> { %1001 = vmatpush.bf16.msra.mxu0 %v2789_v50  ;;  %v2855_v50 = vld [vmem:[%s3428_s3 + $0x1d8] sm:$0xff] }
  0x69   : >> { %1082 = vmatpush.bf16.msra.mxu1 %v2797_v51  ;;  %v2863_v51 = vld [vmem:[%s3428_s3 + $0x218] sm:$0xff]  ;;  %v1615_v52 = vpack.c.b16 %v1614_v49, %v1614_v49 }
  0x6a   : >> { %1172 = vmatpush.bf16.msra.mxu2 %v2805_v53  ;;  %v2854_v53 = vld [vmem:[%s3428_s3 + $0x1d0] sm:$0xff] }
  0x6b   : >> { %1253 = vmatpush.bf16.msra.mxu3 %v2813_v54  ;;  %v2862_v54 = vld [vmem:[%s3428_s3 + $0x210] sm:$0xff]  ;;  %v1617_v58 = vshrl.u32 %v1615_v52, 16 }
  0x6c   : >> { %1002 = vmatpush.bf16.msra.mxu0 %v2788_v55  ;;  %v1619_v55 = vshll.u32 %v1615_v52, 16 }
  0x6d   : >> { %1083 = vmatpush.bf16.msra.mxu1 %v2796_v56  ;;  %v2853_v56 = vld [vmem:[%s3428_s3 + $0x1c8] sm:$0xff] }
  0x6e   : >> { %1173 = vmatpush.bf16.msra.mxu2 %v2804_v59  ;;  %v1621_v59 = vrot.slane %v1619_v55, 1 }
  0x6f   : >> { %1254 = vmatpush.bf16.msra.mxu3 %v2812_v63  ;;  %1003 = vmatmul.bf16.vlgmr.msra.gmra.mxu0 %v945_v0  ;;  %v1703_v63 = vrot.slane %v1615_v52, 1 }
  0x70   : >> { %1329 = vmatpush.bf16.msrb.mxu0 %v2827_v60  ;;  %1084 = vmatmul.bf16.vlgmr.msra.gmra.mxu1 %v1011_v37  ;;  %v2836_v37 = vld [vmem:[%s3428_s3 + $0x140] sm:$0xff] }
  0x71   : >> { %1419 = vmatpush.bf16.msrb.mxu1 %v2835_v61  ;;  %1174 = vmatmul.bf16.vlgmr.msra.gmra.mxu2 %v1116_v1  ;;  %v2852_v60 = vld [vmem:[%s3428_s3 + $0x1c0] sm:$0xff] }
  0x72   : >> { %1500 = vmatpush.bf16.msrb.mxu2 %v2843_v62  ;;  %1255 = vmatmul.bf16.vlgmr.msra.gmra.mxu3 %v1197_v4  ;;  %v2860_v61 = vld [vmem:[%s3428_s3 + $0x200] sm:$0xff]  ;;  %v1622_v62 = vor.u32 %v1621_v59, %v1617_v58 }
  0x73   : >> { %1582 = vmatpush.bf16.msrb.mxu3 %v2851_v2 }
  0x74   : >> { %1330 = vmatpush.bf16.msrb.mxu0 %v2826_v3 }
  0x75   : >> { %1420 = vmatpush.bf16.msrb.mxu1 %v2834_v5 }
  0x76   : >> { %1501 = vmatpush.bf16.msrb.mxu2 %v2842_v6 }
  0x77   : >> { %1583 = vmatpush.bf16.msrb.mxu3 %v2850_v7 }
  0x78   : >> { %1331 = vmatpush.bf16.msrb.mxu0 %v2825_v8 }
  0x79   : >> { %1421 = vmatpush.bf16.msrb.mxu1 %v2833_v9 }
  0x7a   : >> { %1502 = vmatpush.bf16.msrb.mxu2 %v2841_v10 }
  0x7b   : >> { %1584 = vmatpush.bf16.msrb.mxu3 %v2849_v11 }
  0x7c   : >> { %1332 = vmatpush.bf16.msrb.mxu0 %v2824_v12 }
  0x7d   : >> { %1422 = vmatpush.bf16.msrb.mxu1 %v2832_v13 }
  0x7e   : >> { %1503 = vmatpush.bf16.msrb.mxu2 %v2840_v15 }
  0x7f   : >> { %1585 = vmatpush.bf16.msrb.mxu3 %v2848_v16 }
  0x80   : >> { %1333 = vmatpush.bf16.msrb.mxu0 %v2823_v17 }
  0x81   : >> { %1423 = vmatpush.bf16.msrb.mxu1 %v2831_v19 }
  0x82   : >> { %1504 = vmatpush.bf16.msrb.mxu2 %v2839_v20 }
  0x83   : >> { %1586 = vmatpush.bf16.msrb.mxu3 %v2847_v21 }
  0x84   : >> { %1334 = vmatpush.bf16.msrb.mxu0 %v2822_v22 }
  0x85   : >> { %1424 = vmatpush.bf16.msrb.mxu1 %v2830_v24 }
  0x86   : >> { %1505 = vmatpush.bf16.msrb.mxu2 %v2838_v25 }
  0x87   : >> { %1587 = vmatpush.bf16.msrb.mxu3 %v2846_v26 }
  0x88   : >> { %1335 = vmatpush.bf16.msrb.mxu0 %v2821_v27 }
  0x89   : >> { %1425 = vmatpush.bf16.msrb.mxu1 %v2829_v29 }
  0x8a   : >> { %1506 = vmatpush.bf16.msrb.mxu2 %v2837_v30 }
  0x8b   : >> { %1588 = vmatpush.bf16.msrb.mxu3 %v2845_v31 }
  0x8c   : >> { %1336 = vmatpush.bf16.msrb.mxu0 %v2820_v32 }
  0x8d   : >> { %1426 = vmatpush.bf16.msrb.mxu1 %v2828_v35 }
  0x8e   : >> { %1507 = vmatpush.bf16.msrb.mxu2 %v2836_v37 }
  0x8f   : >> { %1589 = vmatpush.bf16.msrb.mxu3 %v2844_v39  ;;  %1337 = vmatmul.bf16.vlgmr.msrb.gmra.mxu0 %v2429_v14 }
  0x90   : >> { %1672 = vmatpush.bf16.msra.mxu0 %v2859_v36  ;;  %1427 = vmatmul.bf16.vlgmr.msrb.gmra.mxu1 %v1369_v40 }
  0x91   : >> { %1753 = vmatpush.bf16.msra.mxu1 %v2867_v38  ;;  %1508 = vmatmul.bf16.vlgmr.msrb.gmra.mxu2 %v1450_v41 }
  0x92   : >> { %1590 = vmatmul.bf16.vlgmr.msrb.gmra.mxu3 %v2575_v44 }
  0x94   : >> { %1673 = vmatpush.bf16.msra.mxu0 %v2858_v42 }
  0x95   : >> { %1754 = vmatpush.bf16.msra.mxu1 %v2866_v43 }
  0x98   : >> { %1674 = vmatpush.bf16.msra.mxu0 %v2857_v45 }
  0x99   : >> { %1755 = vmatpush.bf16.msra.mxu1 %v2865_v46 }
  0x9c   : >> { %1675 = vmatpush.bf16.msra.mxu0 %v2856_v47 }
  0x9d   : >> { %1756 = vmatpush.bf16.msra.mxu1 %v2864_v48 }
  0xa0   : >> { %1676 = vmatpush.bf16.msra.mxu0 %v2855_v50  ;;  %v2885_v50 = vld [vmem:[%s3429_s4] ss:$0 sm:$0xff] }
  0xa1   : >> { %1757 = vmatpush.bf16.msra.mxu1 %v2863_v51 }
  0xa4   : >> { %1677 = vmatpush.bf16.msra.mxu0 %v2854_v53 }
  0xa5   : >> { %1758 = vmatpush.bf16.msra.mxu1 %v2862_v54 }
  0xa8   : >> { %1678 = vmatpush.bf16.msra.mxu0 %v2853_v56 }
  0xa9   : >> { %1759 = vmatpush.bf16.msra.mxu1 %v2861_v57 }
  0xac   : >> { %1679 = vmatpush.bf16.msra.mxu0 %v2852_v60  ;;  %v355_v0 = vpop.f32.mrf.mxu0 }
  0xad   : >> { %1760 = vmatpush.bf16.msra.mxu1 %v2860_v61  ;;  %v416_v1 = vpop.f32.mrf.mxu1 }
  0xae   : >> { %v417_v2 = vadd.f32 %v416_v1, %v355_v0 }
  0xaf   : >> { %1680 = vmatmul.bf16.vlgmr.msra.gmra.mxu0 %v1622_v62 }
  0xb0   : >> { %1761 = vmatmul.bf16.vlgmr.msra.gmra.mxu1 %v1703_v63 }
  0xb4   : >> { %v496_v3 = vpop.f32.mrf.mxu2  ;;  %v357_v5 = vpop.f32.mrf.mxu0 }
  0xb5   : >> { %v500_v4 = vadd.f32 %v496_v3, %v417_v2  ;;  %v579_v6 = vpop.f32.mrf.mxu3  ;;  %v418_v7 = vpop.f32.mrf.mxu1 }
  0xb7   : >> { %v583_v8 = vadd.f32 %v579_v6, %v500_v4 }
  0xbc   : >> { %v498_v9 = vpop.f32.mrf.mxu2 }
  0xbd   : >> { %v581_v10 = vpop.f32.mrf.mxu3 }
  0xcc   : >> { %v669_v11 = vpop.f32.mrf.mxu0 }
  0xcd   : >> { %v750_v12 = vpop.f32.mrf.mxu1  ;;  %v673_v27 = vadd.f32 %v669_v11, %v583_v8 }
  0xcf   : >> { %v754_v28 = vadd.f32 %v750_v12, %v673_v27 }
  0xd4   : >> { %v833_v13 = vpop.f32.mrf.mxu2  ;;  %v671_v15 = vpop.f32.mrf.mxu0 }
  0xd5   : >> { %v923_v14 = vpop.f32.mrf.mxu3  ;;  %v752_v16 = vpop.f32.mrf.mxu1  ;;  %v837_v29 = vadd.f32 %v833_v13, %v754_v28 }
  0xd7   : >> { %v927_v32 = vadd.f32 %v923_v14, %v837_v29 }
  0xdc   : >> { %v835_v17 = vpop.f32.mrf.mxu2 }
  0xdd   : >> { %v925_v18 = vpop.f32.mrf.mxu3 }
  0xec   : >> { %v1004_v19 = vpop.f32.mrf.mxu0 }
  0xed   : >> { %v1085_v20 = vpop.f32.mrf.mxu1  ;;  %v1008_v33 = vadd.f32 %v1004_v19, %v927_v32 }
  0xef   : >> { %v1089_v38 = vadd.f32 %v1085_v20, %v1008_v33 }
  0xf4   : >> { %v1175_v21 = vpop.f32.mrf.mxu2  ;;  %v1006_v22 = vpop.f32.mrf.mxu0 }
  0xf5   : >> { %v1256_v23 = vpop.f32.mrf.mxu3  ;;  %v1087_v24 = vpop.f32.mrf.mxu1  ;;  %v1179_v39 = vadd.f32 %v1175_v21, %v1089_v38 }
  0xf7   : >> { %v1260_v40 = vadd.f32 %v1256_v23, %v1179_v39 }
  0xfc   : >> { %v1177_v25 = vpop.f32.mrf.mxu2 }
  0xfd   : >> { %v1258_v26 = vpop.f32.mrf.mxu3 }
 0x10c   : >> { %v1338_v30 = vpop.f32.mrf.mxu0 }
 0x10d   : >> { %v1428_v31 = vpop.f32.mrf.mxu1  ;;  %v1342_v43 = vadd.f32 %v1338_v30, %v1260_v40 }
 0x10f   : >> { %v1432_v44 = vadd.f32 %v1428_v31, %v1342_v43 }
 0x114   : >> { %v1509_v34 = vpop.f32.mrf.mxu2  ;;  %v1340_v35 = vpop.f32.mrf.mxu0 }
 0x115   : >> { %v1591_v36 = vpop.f32.mrf.mxu3  ;;  %v1430_v37 = vpop.f32.mrf.mxu1  ;;  %v1513_v45 = vadd.f32 %v1509_v34, %v1432_v44 }
 0x117   : >> { %v1595_v46 = vadd.f32 %v1591_v36, %v1513_v45 }
 0x11c   : >> { %v1511_v41 = vpop.f32.mrf.mxu2 }
 0x11d   : >> { %v1593_v42 = vpop.f32.mrf.mxu3 }
 0x12c   : >> { %v1681_v47 = vpop.f32.mrf.mxu0 }
 0x12d   : >> { %v1685_v48 = vadd.f32 %v1681_v47, %v1595_v46  ;;  %v1762_v49 = vpop.f32.mrf.mxu1 }
 0x12f   : >> { %v1766_v51 = vadd.f32 %v1762_v49, %v1685_v48 }
 0x131   : >> { %v1771_v52 = vadd.f32 %v2885_v50, %v1766_v51 }
 0x133   : >> { %vm1772_vm0 = vcmp.ge.f32.partialorder %v1771_v52, 0.0  ;;  %v1773_v53 = vmul.f32 0.2, %v1771_v52 }
 0x134   : >> { %v1683_v54 = vpop.f32.mrf.mxu0  ;;  %249 = sbr.rel (!%p247_p4) target bundleno = 15 (0xf), region = 103 }
 0x135   : >> { %v1774_v55 = vsel %vm1772_vm0, %v1771_v52, %v1773_v53  ;;  %v1764_v56 = vpop.f32.mrf.mxu1 }
 0x136   : >> { %v1775_v57 = vpack.c.bf16 %v1774_v55, %v1774_v55 }
 0x138   : >> { %1778 = vst [vmem:[%s1777_s20] sm:$0x3] %v1775_v57 }
 0x139 PF: > { %s15_s18 = sadd.s32 1, %s2896_s18  }
 0x13a   : > { %p12_p5 = scmp.ge.s32.totalorder %s15_s18, 4  }
 0x13c   :  { %14 = sbr.rel (!%p12_p5) target bundleno = 1 (0x1), region = 114 }

// kernel: cnn_forward.18
= control target key start
LH: loop header
LB: loop body
LE: loop exit
PB: predicated region body
PF: predicated region fallthrough
CT: control target
= control target key end

     0   :  { %s2990_s18 = smov 0   ;;  %s3495_s0 = inlined_call_operand.vmem [shape: bf16[2,10,10,128], index: 0, kind: input, shape index: {}]   ;;  %s3496_s1 = inlined_call_operand.vmem [shape: bf16[2,10,10,128], index: 1, kind: input, shape index: {}]   ;;  %s3497_s2 = inlined_call_operand.vmem [shape: bf16[3,3,128,128], index: 2, kind: input, shape index: {}]   ;;  %s3498_s3 = inlined_call_operand.vmem [shape: bf16[3,3,128,128], index: 3, kind: input, shape index: {}]   ;;  %s3499_s4 = inlined_call_operand.vmem [shape: f32[1,128], index: 4, kind: input, shape index: {}]   ;;  %s3500_s5 = inlined_call_operand.vmem [shape: bf16[2,8,8,128], index: 5, kind: output, shape index: {}]  }
   0x1 LB: > { %s1890_s19 = sadd.s32 4294967295, %s2954_s18   ;;  %p1894_p0 = scmp.ge.s32.totalorder %s2954_s18, 1  ;;  %s2954_s18 = sphi %s2990_s18, %s15_s18  }
   0x2   : > { %p197_p1 = scmp.lt.s32.totalorder %s2954_s18, 3 }
   0x4   : > { %p198_p2 = pnand %p1894_p0, %p197_p1 }
   0x5   : > { %p230_p3 = scmp.lt.s32.totalorder (!%p198_p2), %s1890_s19, 1  ;;  %s3013_s6 = smov (!%p198_p2), 0  }
   0x6   : > { %201 = sbr.rel (%p198_p2) target bundleno = 313 (0x139), region = 40 }
   0xb   : > { %s3502_s19 = smov (!%p230_p3, %s1890_s19), 1 }
   0xc   : > { %s2926_s20 = smul.u32 80, %s3502_s19  ;;  %s2773_s21 = sshll.u32 %s3502_s19, 5 }
   0xd   : > { %s3001_s24 = scalar_lea.vmem %s3500_s5, %s2773_s21 }
   0xe   : > { %s3006_s27 = scalar_lea.vmem %s3495_s0, %s2926_s20  ;;  %s3011_s30 = scalar_lea.vmem %s3496_s1, %s2926_s20 }
   0xf LB: >> { %v2791_v0 = vld [vmem:[%s3497_s2 + $0x78] sm:$0xff]  ;;  %v2790_v4 = vld [vmem:[%s3497_s2 + $0x70] sm:$0xff]  ;;  %v2789_v8 = vld [vmem:[%s3497_s2 + $0x68] sm:$0xff]  ;;  %s2774_s20 = sshll.u32 %s2958_s6, 3  ;;  %s2770_s16 = sshll.u32 %s2958_s6, 2  ;;  %s2958_s6 = sphi %s3013_s6, %s250_s6  }
  0x10   : >> { %v2783_v1 = vld [vmem:[%s3497_s2 + $0x38] sm:$0xff]  ;;  %350 = vmatpush.bf16.msra.mxu0 %v2791_v0  ;;  %v2782_v5 = vld [vmem:[%s3497_s2 + $0x30] sm:$0xff]  ;;  %v2781_v9 = vld [vmem:[%s3497_s2 + $0x28] sm:$0xff]  ;;  %s3076_s26 = scalar_lea.vmem %s3006_s27, %s2774_s20  ;;  %s3277_s19 = scalar_lea.vmem %s3011_s30, %s2774_s20 }
  0x11   : >> { %v2799_v2 = vld [vmem:[%s3497_s2 + $0xb8] sm:$0xff]  ;;  %411 = vmatpush.bf16.msra.mxu1 %v2783_v1  ;;  %v2798_v6 = vld [vmem:[%s3497_s2 + $0xb0] sm:$0xff]  ;;  %v2797_v10 = vld [vmem:[%s3497_s2 + $0xa8] sm:$0xff]  ;;  %s1798_s17 = scalar_lea.vmem %s3001_s24, %s2770_s16  ;;  %s250_s6 = sadd.s32 1, %s2958_s6  }
  0x12   : >> { %v2808_v3 = vld [vmem:[%s3497_s2 + $0xf8] sm:$0xff]  ;;  %491 = vmatpush.bf16.msra.mxu2 %v2799_v2  ;;  %v2807_v7 = vld [vmem:[%s3497_s2 + $0xf0] sm:$0xff]  ;;  %v2806_v11 = vld [vmem:[%s3497_s2 + $0xe8] sm:$0xff]  ;;  %p247_p4 = scmp.ge.s32.totalorder %s250_s6, 8  }
  0x13   : >> { %576 = vmatpush.bf16.msra.mxu3 %v2808_v3  ;;  %v2788_v12 = vld [vmem:[%s3497_s2 + $0x60] sm:$0xff]  ;;  %v2787_v16 = vld [vmem:[%s3497_s2 + $0x58] sm:$0xff]  ;;  %v2786_v22 = vld [vmem:[%s3497_s2 + $0x50] sm:$0xff] }
  0x14   : >> { %351 = vmatpush.bf16.msra.mxu0 %v2790_v4  ;;  %v2780_v13 = vld [vmem:[%s3497_s2 + $0x20] sm:$0xff]  ;;  %v2779_v17 = vld [vmem:[%s3497_s2 + $0x18] sm:$0xff]  ;;  %v2778_v23 = vld [vmem:[%s3497_s2 + $0x10] sm:$0xff] }
  0x15   : >> { %412 = vmatpush.bf16.msra.mxu1 %v2782_v5  ;;  %v2796_v14 = vld [vmem:[%s3497_s2 + $0xa0] sm:$0xff]  ;;  %v2795_v18 = vld [vmem:[%s3497_s2 + $0x98] sm:$0xff]  ;;  %v2794_v25 = vld [vmem:[%s3497_s2 + $0x90] sm:$0xff] }
  0x16   : >> { %492 = vmatpush.bf16.msra.mxu2 %v2798_v6  ;;  %v2805_v15 = vld [vmem:[%s3497_s2 + $0xe0] sm:$0xff]  ;;  %v2804_v19 = vld [vmem:[%s3497_s2 + $0xd8] sm:$0xff]  ;;  %v2803_v26 = vld [vmem:[%s3497_s2 + $0xd0] sm:$0xff] }
  0x17   : >> { %577 = vmatpush.bf16.msra.mxu3 %v2807_v7  ;;  %v1919_v20 = vld [vmem:[%s3076_s26] sm:$0xf]  ;;  %v2775_v21 = vld [vmem:[%s3076_s26] sm:$0x10]  ;;  %v2785_v28 = vld [vmem:[%s3497_s2 + $0x48] sm:$0xff] }
  0x18   : >> { %352 = vmatpush.bf16.msra.mxu0 %v2789_v8  ;;  %v1920_v24 = vor.u32 %v2775_v21, %v1919_v20  ;;  %v2777_v29 = vld [vmem:[%s3497_s2 + $0x8] sm:$0xff]  ;;  %v2784_v34 = vld [vmem:[%s3497_s2 + $0x40] sm:$0xff]  ;;  %v2816_v37 = vld [vmem:[%s3497_s2 + $0x138] sm:$0xff] }
  0x19   : >> { %413 = vmatpush.bf16.msra.mxu1 %v2781_v9  ;;  %v2793_v30 = vld [vmem:[%s3497_s2 + $0x88] sm:$0xff]  ;;  %v2776_v35 = vld [vmem:[%s3497_s2] sm:$0xff]  ;;  %v2824_v38 = vld [vmem:[%s3497_s2 + $0x178] sm:$0xff] }
  0x1a   : >> { %493 = vmatpush.bf16.msra.mxu2 %v2797_v10  ;;  %v297_v27 = vshll.u32 %v1920_v24, 16  ;;  %v2802_v31 = vld [vmem:[%s3497_s2 + $0xc8] sm:$0xff]  ;;  %v295_v32 = vshrl.u32 %v1920_v24, 16  ;;  %v2792_v36 = vld [vmem:[%s3497_s2 + $0x80] sm:$0xff]  ;;  %v2833_v39 = vld [vmem:[%s3497_s2 + $0x1b8] sm:$0xff]  ;;  %v441_v43 = vrot.slane %v1920_v24, 1 }
  0x1b   : >> { %578 = vmatpush.bf16.msra.mxu3 %v2806_v11  ;;  %v2801_v40 = vld [vmem:[%s3497_s2 + $0xc0] sm:$0xff]  ;;  %v2841_v42 = vld [vmem:[%s3497_s2 + $0x1f8] sm:$0xff]  ;;  %v2815_v44 = vld [vmem:[%s3497_s2 + $0x130] sm:$0xff] }
  0x1c   : >> { %353 = vmatpush.bf16.msra.mxu0 %v2788_v12  ;;  %v299_v33 = vrot.slane %v297_v27, 1  ;;  %v2823_v45 = vld [vmem:[%s3497_s2 + $0x170] sm:$0xff]  ;;  %v254_v47 = vld [vmem:[%s3076_s26] sm:$0xf]  ;;  %v2034_v49 = vld [vmem:[%s3076_s26 + $0x8] sm:$0xf] }
  0x1d   : >> { %414 = vmatpush.bf16.msra.mxu1 %v2780_v13  ;;  %v2832_v46 = vld [vmem:[%s3497_s2 + $0x1b0] sm:$0xff]  ;;  %v2814_v50 = vld [vmem:[%s3497_s2 + $0x128] sm:$0xff]  ;;  %v2813_v54 = vld [vmem:[%s3497_s2 + $0x120] sm:$0xff] }
  0x1e   : >> { %494 = vmatpush.bf16.msra.mxu2 %v2796_v14  ;;  %v300_v41 = vor.u32 %v299_v33, %v295_v32  ;;  %v2840_v48 = vld [vmem:[%s3497_s2 + $0x1f0] sm:$0xff]  ;;  %v2822_v51 = vld [vmem:[%s3497_s2 + $0x168] sm:$0xff]  ;;  %v2821_v55 = vld [vmem:[%s3497_s2 + $0x160] sm:$0xff] }
  0x1f   : >> { %579 = vmatpush.bf16.msra.mxu3 %v2805_v15  ;;  %v2831_v52 = vld [vmem:[%s3497_s2 + $0x1a8] sm:$0xff]  ;;  %v2830_v56 = vld [vmem:[%s3497_s2 + $0x1a0] sm:$0xff]  ;;  %v2812_v58 = vld [vmem:[%s3497_s2 + $0x118] sm:$0xff] }
  0x20   : >> { %354 = vmatpush.bf16.msra.mxu0 %v2787_v16  ;;  %v2839_v53 = vld [vmem:[%s3497_s2 + $0x1e8] sm:$0xff]  ;;  %v2838_v57 = vld [vmem:[%s3497_s2 + $0x1e0] sm:$0xff]  ;;  %v2820_v59 = vld [vmem:[%s3497_s2 + $0x158] sm:$0xff] }
  0x21   : >> { %415 = vmatpush.bf16.msra.mxu1 %v2779_v17  ;;  %v2829_v60 = vld [vmem:[%s3497_s2 + $0x198] sm:$0xff]  ;;  %v2102_v61 = vld [vmem:[%s3076_s26 + $0x8] sm:$0xf]  ;;  %v2800_v62 = vld [vmem:[%s3076_s26 + $0x8] sm:$0x10] }
  0x22   : >> { %495 = vmatpush.bf16.msra.mxu2 %v2795_v18  ;;  %v2837_v63 = vld [vmem:[%s3497_s2 + $0x1d8] sm:$0xff]  ;;  %v2811_v0 = vld [vmem:[%s3497_s2 + $0x110] sm:$0xff]  ;;  %v2103_v5 = vor.u32 %v2800_v62, %v2102_v61  ;;  %v2810_v8 = vld [vmem:[%s3497_s2 + $0x108] sm:$0xff] }
  0x23   : >> { %580 = vmatpush.bf16.msra.mxu3 %v2804_v19  ;;  %v2253_v1 = vld [vmem:[%s3076_s26 + $0x10] sm:$0xf]  ;;  %v2825_v2 = vld [vmem:[%s3076_s26 + $0x10] sm:$0x10]  ;;  %v2818_v9 = vld [vmem:[%s3497_s2 + $0x148] sm:$0xff] }
  0x24   : >> { %355 = vmatpush.bf16.msra.mxu0 %v2786_v22  ;;  %v2819_v3 = vld [vmem:[%s3497_s2 + $0x150] sm:$0xff]  ;;  %v3200_v7 = vor.u32 %v2825_v2, %v2253_v1  ;;  %v2827_v10 = vld [vmem:[%s3497_s2 + $0x188] sm:$0xff]  ;;  %v615_v11 = vshll.u32 %v2103_v5, 16  ;;  %v2809_v14 = vld [vmem:[%s3497_s2 + $0x100] sm:$0xff]  ;;  %v613_v17 = vshrl.u32 %v2103_v5, 16 }
  0x25   : >> { %416 = vmatpush.bf16.msra.mxu1 %v2778_v23  ;;  %v2828_v4 = vld [vmem:[%s3497_s2 + $0x190] sm:$0xff]  ;;  %v2835_v12 = vld [vmem:[%s3497_s2 + $0x1c8] sm:$0xff]  ;;  %v2817_v15 = vld [vmem:[%s3497_s2 + $0x140] sm:$0xff] }
  0x26   : >> { %496 = vmatpush.bf16.msra.mxu2 %v2794_v25  ;;  %v2836_v6 = vld [vmem:[%s3497_s2 + $0x1d0] sm:$0xff]  ;;  %v873_v13 = vshll.u32 %v3200_v7, 16  ;;  %v2826_v16 = vld [vmem:[%s3497_s2 + $0x180] sm:$0xff]  ;;  %v617_v18 = vrot.slane %v615_v11, 1  ;;  %v2849_v19 = vld [vmem:[%s3497_s2 + $0x238] sm:$0xff]  ;;  %v871_v23 = vshrl.u32 %v3200_v7, 16 }
  0x27   : >> { %581 = vmatpush.bf16.msra.mxu3 %v2803_v26  ;;  %v2859_v20 = vld [vmem:[%s3498_s3 + $0x38] sm:$0xff]  ;;  %v2834_v22 = vld [vmem:[%s3497_s2 + $0x1c0] sm:$0xff]  ;;  %v2185_v26 = vld [vmem:[%s3076_s26 + $0x10] sm:$0xf] }
  0x28   : >> { %356 = vmatpush.bf16.msra.mxu0 %v2785_v28  ;;  %v2867_v21 = vld [vmem:[%s3498_s3 + $0x78] sm:$0xff]  ;;  %v875_v24 = vrot.slane %v873_v13, 1  ;;  %v618_v27 = vor.u32 %v617_v18, %v613_v17  ;;  %v699_v28 = vrot.slane %v2103_v5, 1  ;;  %v2874_v33 = vld [vmem:[%s3498_s3 + $0xb0] sm:$0xff]  ;;  %v2860_v62 = vld [vmem:[%s3498_s3 + $0x40] sm:$0xff] }
  0x29   : >> { %417 = vmatpush.bf16.msra.mxu1 %v2777_v29  ;;  %v2875_v25 = vld [vmem:[%s3498_s3 + $0xb8] sm:$0xff]  ;;  %v2848_v29 = vld [vmem:[%s3497_s2 + $0x230] sm:$0xff]  ;;  %v2868_v2 = vld [vmem:[%s3498_s3 + $0x80] sm:$0xff] }
  0x2a   : >> { %497 = vmatpush.bf16.msra.mxu2 %v2793_v30  ;;  %v2858_v30 = vld [vmem:[%s3498_s3 + $0x30] sm:$0xff]  ;;  %v876_v32 = vor.u32 %v875_v24, %v871_v23  ;;  %v2900_v1 = vld [vmem:[%s3498_s3 + $0x178] sm:$0xff]  ;;  %v2890_v13 = vld [vmem:[%s3498_s3 + $0x128] sm:$0xff] }
  0x2b   : >> { %582 = vmatpush.bf16.msra.mxu3 %v2802_v31  ;;  %v2866_v31 = vld [vmem:[%s3498_s3 + $0x70] sm:$0xff]  ;;  %v2909_v5 = vld [vmem:[%s3498_s3 + $0x1b8] sm:$0xff]  ;;  %v2889_v17 = vld [vmem:[%s3498_s3 + $0x120] sm:$0xff] }
  0x2c   : >> { %357 = vmatpush.bf16.msra.mxu0 %v2784_v34  ;;  %v2847_v34 = vld [vmem:[%s3497_s2 + $0x228] sm:$0xff]  ;;  %v2908_v11 = vld [vmem:[%s3498_s3 + $0x1b0] sm:$0xff]  ;;  %v2897_v18 = vld [vmem:[%s3498_s3 + $0x160] sm:$0xff] }
  0x2d   : >> { %418 = vmatpush.bf16.msra.mxu1 %v2776_v35  ;;  %v2857_v35 = vld [vmem:[%s3498_s3 + $0x28] sm:$0xff]  ;;  %v2896_v24 = vld [vmem:[%s3498_s3 + $0x158] sm:$0xff] }
  0x2e   : >> { %498 = vmatpush.bf16.msra.mxu2 %v2792_v36  ;;  %v2865_v36 = vld [vmem:[%s3498_s3 + $0x68] sm:$0xff] }
  0x2f   : >> { %583 = vmatpush.bf16.msra.mxu3 %v2801_v40  ;;  %358 = vmatmul.bf16.vlgmr.msra.gmra.mxu0 %v300_v41  ;;  %v2864_v40 = vld [vmem:[%s3498_s3 + $0x60] sm:$0xff]  ;;  %v2876_v23 = vld [vmem:[%s3277_s19 + $0x8] sm:$0x10] }
  0x30   : >> { %668 = vmatpush.bf16.msrb.mxu0 %v2816_v37  ;;  %419 = vmatmul.bf16.vlgmr.msra.gmra.mxu1 %v254_v47  ;;  %v2873_v37 = vld [vmem:[%s3498_s3 + $0xa8] sm:$0xff]  ;;  %v2872_v41 = vld [vmem:[%s3498_s3 + $0xa0] sm:$0xff]  ;;  %v2871_v47 = vld [vmem:[%s3498_s3 + $0x98] sm:$0xff] }
  0x31   : >> { %749 = vmatpush.bf16.msrb.mxu1 %v2824_v38  ;;  %499 = vmatmul.bf16.vlgmr.msra.gmra.mxu2 %v441_v43  ;;  %v2846_v38 = vld [vmem:[%s3497_s2 + $0x220] sm:$0xff]  ;;  %v2855_v43 = vld [vmem:[%s3498_s3 + $0x18] sm:$0xff] }
  0x32   : >> { %834 = vmatpush.bf16.msrb.mxu2 %v2833_v39  ;;  %584 = vmatmul.bf16.vlgmr.msra.gmra.mxu3 %v2034_v49  ;;  %v2856_v39 = vld [vmem:[%s3498_s3 + $0x20] sm:$0xff]  ;;  %v2854_v49 = vld [vmem:[%s3498_s3 + $0x10] sm:$0xff] }
  0x33   : >> { %926 = vmatpush.bf16.msrb.mxu3 %v2841_v42  ;;  %v2845_v42 = vld [vmem:[%s3497_s2 + $0x218] sm:$0xff] }
  0x34   : >> { %669 = vmatpush.bf16.msrb.mxu0 %v2815_v44  ;;  %v2863_v44 = vld [vmem:[%s3498_s3 + $0x58] sm:$0xff] }
  0x35   : >> { %750 = vmatpush.bf16.msrb.mxu1 %v2823_v45  ;;  %v2386_v45 = vld [vmem:[%s3277_s19] sm:$0xf] }
  0x36   : >> { %835 = vmatpush.bf16.msrb.mxu2 %v2832_v46  ;;  %v2851_v46 = vld [vmem:[%s3277_s19] sm:$0x10] }
  0x37   : >> { %927 = vmatpush.bf16.msrb.mxu3 %v2840_v48  ;;  %v2844_v48 = vld [vmem:[%s3497_s2 + $0x210] sm:$0xff] }
  0x38   : >> { %670 = vmatpush.bf16.msrb.mxu0 %v2814_v50  ;;  %v2387_v50 = vor.u32 %v2851_v46, %v2386_v45 }
  0x39   : >> { %751 = vmatpush.bf16.msrb.mxu1 %v2822_v51  ;;  %v2862_v51 = vld [vmem:[%s3498_s3 + $0x50] sm:$0xff] }
  0x3a   : >> { %836 = vmatpush.bf16.msrb.mxu2 %v2831_v52  ;;  %v2870_v52 = vld [vmem:[%s3498_s3 + $0x90] sm:$0xff] }
  0x3b   : >> { %928 = vmatpush.bf16.msrb.mxu3 %v2839_v53  ;;  %v2843_v53 = vld [vmem:[%s3497_s2 + $0x208] sm:$0xff] }
  0x3c   : >> { %671 = vmatpush.bf16.msrb.mxu0 %v2813_v54  ;;  %v2853_v54 = vld [vmem:[%s3498_s3 + $0x8] sm:$0xff] }
  0x3d   : >> { %752 = vmatpush.bf16.msrb.mxu1 %v2821_v55  ;;  %v1128_v55 = vshll.u32 %v2387_v50, 16 }
  0x3e   : >> { %837 = vmatpush.bf16.msrb.mxu2 %v2830_v56  ;;  %v2861_v56 = vld [vmem:[%s3498_s3 + $0x48] sm:$0xff] }
  0x3f   : >> { %929 = vmatpush.bf16.msrb.mxu3 %v2838_v57  ;;  %v2869_v57 = vld [vmem:[%s3498_s3 + $0x88] sm:$0xff]  ;;  %v1130_v61 = vrot.slane %v1128_v55, 1  ;;  %v2688_v55 = vld [vmem:[%s3277_s19 + $0x10] sm:$0xf] }
  0x40   : >> { %672 = vmatpush.bf16.msrb.mxu0 %v2812_v58  ;;  %v2842_v58 = vld [vmem:[%s3497_s2 + $0x200] sm:$0xff] }
  0x41   : >> { %753 = vmatpush.bf16.msrb.mxu1 %v2820_v59  ;;  %v2852_v59 = vld [vmem:[%s3498_s3] sm:$0xff] }
  0x42   : >> { %838 = vmatpush.bf16.msrb.mxu2 %v2829_v60  ;;  %v1126_v60 = vshrl.u32 %v2387_v50, 16 }
  0x43   : >> { %930 = vmatpush.bf16.msrb.mxu3 %v2837_v63  ;;  %v2884_v63 = vld [vmem:[%s3498_s3 + $0xf8] sm:$0xff] }
  0x44   : >> { %673 = vmatpush.bf16.msrb.mxu0 %v2811_v0  ;;  %v2892_v0 = vld [vmem:[%s3498_s3 + $0x138] sm:$0xff] }
  0x45   : >> { %754 = vmatpush.bf16.msrb.mxu1 %v2819_v3  ;;  %v957_v3 = vrot.slane %v3200_v7, 1  ;;  %v2891_v7 = vld [vmem:[%s3498_s3 + $0x130] sm:$0xff] }
  0x46   : >> { %839 = vmatpush.bf16.msrb.mxu2 %v2828_v4  ;;  %v1131_v4 = vor.u32 %v1130_v61, %v1126_v60  ;;  %v2920_v60 = vld [vmem:[%s3498_s3 + $0x210] sm:$0xff] }
  0x47   : >> { %931 = vmatpush.bf16.msrb.mxu3 %v2836_v6  ;;  %v2883_v6 = vld [vmem:[%s3498_s3 + $0xf0] sm:$0xff] }
  0x48   : >> { %674 = vmatpush.bf16.msrb.mxu0 %v2810_v8  ;;  %v1023_v8 = vld [vmem:[%s3277_s19] sm:$0xf] }
  0x49   : >> { %755 = vmatpush.bf16.msrb.mxu1 %v2818_v9  ;;  %v1212_v9 = vrot.slane %v2387_v50, 1  ;;  %v2915_v50 = vld [vmem:[%s3498_s3 + $0x1e8] sm:$0xff] }
  0x4a   : >> { %840 = vmatpush.bf16.msrb.mxu2 %v2827_v10  ;;  %v2899_v10 = vld [vmem:[%s3498_s3 + $0x170] sm:$0xff] }
  0x4b   : >> { %932 = vmatpush.bf16.msrb.mxu3 %v2835_v12  ;;  %v2882_v12 = vld [vmem:[%s3498_s3 + $0xe8] sm:$0xff] }
  0x4c   : >> { %675 = vmatpush.bf16.msrb.mxu0 %v2809_v14  ;;  %v2898_v14 = vld [vmem:[%s3498_s3 + $0x168] sm:$0xff] }
  0x4d   : >> { %756 = vmatpush.bf16.msrb.mxu1 %v2817_v15  ;;  %v2907_v15 = vld [vmem:[%s3498_s3 + $0x1a8] sm:$0xff] }
  0x4e   : >> { %841 = vmatpush.bf16.msrb.mxu2 %v2826_v16  ;;  %v2881_v16 = vld [vmem:[%s3498_s3 + $0xe0] sm:$0xff] }
  0x4f   : >> { %933 = vmatpush.bf16.msrb.mxu3 %v2834_v22  ;;  %676 = vmatmul.bf16.vlgmr.msrb.gmra.mxu0 %v618_v27  ;;  %v2537_v22 = vld [vmem:[%s3277_s19 + $0x8] sm:$0xf] }
  0x50   : >> { %1007 = vmatpush.bf16.msra.mxu0 %v2849_v19  ;;  %757 = vmatmul.bf16.vlgmr.msrb.gmra.mxu1 %v699_v28  ;;  %v2906_v19 = vld [vmem:[%s3498_s3 + $0x1a0] sm:$0xff]  ;;  %v2538_v27 = vor.u32 %v2876_v23, %v2537_v22  ;;  %v2887_v28 = vld [vmem:[%s3498_s3 + $0x110] sm:$0xff] }
  0x51   : >> { %1089 = vmatpush.bf16.msra.mxu1 %v2859_v20  ;;  %842 = vmatmul.bf16.vlgmr.msrb.gmra.mxu2 %v2185_v26  ;;  %v2880_v20 = vld [vmem:[%s3498_s3 + $0xd8] sm:$0xff]  ;;  %v2879_v26 = vld [vmem:[%s3498_s3 + $0xd0] sm:$0xff] }
  0x52   : >> { %1181 = vmatpush.bf16.msra.mxu2 %v2867_v21  ;;  %934 = vmatmul.bf16.vlgmr.msrb.gmra.mxu3 %v876_v32  ;;  %v2888_v21 = vld [vmem:[%s3498_s3 + $0x118] sm:$0xff]  ;;  %v1384_v32 = vshll.u32 %v2538_v27, 16  ;;  %v1468_v46 = vrot.slane %v2538_v27, 1 }
  0x53   : >> { %1262 = vmatpush.bf16.msra.mxu3 %v2875_v25  ;;  %v2905_v25 = vld [vmem:[%s3498_s3 + $0x198] sm:$0xff] }
  0x54   : >> { %1008 = vmatpush.bf16.msra.mxu0 %v2848_v29  ;;  %v2895_v29 = vld [vmem:[%s3498_s3 + $0x150] sm:$0xff] }
  0x55   : >> { %1090 = vmatpush.bf16.msra.mxu1 %v2858_v30  ;;  %v2904_v30 = vld [vmem:[%s3498_s3 + $0x190] sm:$0xff] }
  0x56   : >> { %1182 = vmatpush.bf16.msra.mxu2 %v2866_v31  ;;  %v2878_v31 = vld [vmem:[%s3498_s3 + $0xc8] sm:$0xff] }
  0x57   : >> { %1263 = vmatpush.bf16.msra.mxu3 %v2874_v33  ;;  %v2886_v33 = vld [vmem:[%s3498_s3 + $0x108] sm:$0xff] }
  0x58   : >> { %1009 = vmatpush.bf16.msra.mxu0 %v2847_v34  ;;  %v2894_v34 = vld [vmem:[%s3498_s3 + $0x148] sm:$0xff] }
  0x59   : >> { %1091 = vmatpush.bf16.msra.mxu1 %v2857_v35  ;;  %v2903_v35 = vld [vmem:[%s3498_s3 + $0x188] sm:$0xff] }
  0x5a   : >> { %1183 = vmatpush.bf16.msra.mxu2 %v2865_v36  ;;  %v2877_v36 = vld [vmem:[%s3498_s3 + $0xc0] sm:$0xff] }
  0x5b   : >> { %1264 = vmatpush.bf16.msra.mxu3 %v2873_v37  ;;  %v1382_v37 = vshrl.u32 %v2538_v27, 16 }
  0x5c   : >> { %1010 = vmatpush.bf16.msra.mxu0 %v2846_v38  ;;  %v1386_v38 = vrot.slane %v1384_v32, 1 }
  0x5d   : >> { %1092 = vmatpush.bf16.msra.mxu1 %v2856_v39  ;;  %v2885_v39 = vld [vmem:[%s3498_s3 + $0x100] sm:$0xff] }
  0x5e   : >> { %1184 = vmatpush.bf16.msra.mxu2 %v2864_v40  ;;  %v2917_v40 = vld [vmem:[%s3498_s3 + $0x1f8] sm:$0xff]  ;;  %v1387_v45 = vor.u32 %v1386_v38, %v1382_v37 }
  0x5f   : >> { %1265 = vmatpush.bf16.msra.mxu3 %v2872_v41  ;;  %v2893_v41 = vld [vmem:[%s3498_s3 + $0x140] sm:$0xff] }
  0x60   : >> { %1011 = vmatpush.bf16.msra.mxu0 %v2845_v42  ;;  %v2925_v42 = vld [vmem:[%s3498_s3 + $0x238] sm:$0xff] }
  0x61   : >> { %1093 = vmatpush.bf16.msra.mxu1 %v2855_v43  ;;  %v2902_v43 = vld [vmem:[%s3498_s3 + $0x180] sm:$0xff] }
  0x62   : >> { %1185 = vmatpush.bf16.msra.mxu2 %v2863_v44  ;;  %v2469_v44 = vld [vmem:[%s3277_s19 + $0x8] sm:$0xf] }
  0x63   : >> { %1266 = vmatpush.bf16.msra.mxu3 %v2871_v47  ;;  %v2916_v47 = vld [vmem:[%s3498_s3 + $0x1f0] sm:$0xff] }
  0x64   : >> { %1012 = vmatpush.bf16.msra.mxu0 %v2844_v48  ;;  %v2924_v48 = vld [vmem:[%s3498_s3 + $0x230] sm:$0xff] }
  0x65   : >> { %1094 = vmatpush.bf16.msra.mxu1 %v2854_v49  ;;  %v2620_v49 = vld [vmem:[%s3277_s19 + $0x10] sm:$0xf] }
  0x66   : >> { %1186 = vmatpush.bf16.msra.mxu2 %v2862_v51  ;;  %v2923_v51 = vld [vmem:[%s3498_s3 + $0x228] sm:$0xff] }
  0x67   : >> { %1267 = vmatpush.bf16.msra.mxu3 %v2870_v52  ;;  %v2914_v52 = vld [vmem:[%s3498_s3 + $0x1e0] sm:$0xff] }
  0x68   : >> { %1013 = vmatpush.bf16.msra.mxu0 %v2843_v53  ;;  %v2922_v53 = vld [vmem:[%s3498_s3 + $0x220] sm:$0xff] }
  0x69   : >> { %1095 = vmatpush.bf16.msra.mxu1 %v2853_v54  ;;  %v2913_v54 = vld [vmem:[%s3498_s3 + $0x1d8] sm:$0xff] }
  0x6a   : >> { %1187 = vmatpush.bf16.msra.mxu2 %v2861_v56  ;;  %v2901_v56 = vld [vmem:[%s3277_s19 + $0x10] sm:$0x10] }
  0x6b   : >> { %1268 = vmatpush.bf16.msra.mxu3 %v2869_v57  ;;  %v2921_v57 = vld [vmem:[%s3498_s3 + $0x218] sm:$0xff] }
  0x6c   : >> { %1014 = vmatpush.bf16.msra.mxu0 %v2842_v58  ;;  %v2689_v58 = vor.u32 %v2901_v56, %v2688_v55  ;;  %v2943_v56 = vld [vmem:[%s3499_s4] ss:$0 sm:$0xff] }
  0x6d   : >> { %1096 = vmatpush.bf16.msra.mxu1 %v2852_v59  ;;  %v2912_v59 = vld [vmem:[%s3498_s3 + $0x1d0] sm:$0xff] }
  0x6e   : >> { %1188 = vmatpush.bf16.msra.mxu2 %v2860_v62  ;;  %v1640_v61 = vshll.u32 %v2689_v58, 16  ;;  %v2911_v62 = vld [vmem:[%s3498_s3 + $0x1c8] sm:$0xff] }
  0x6f   : >> { %1269 = vmatpush.bf16.msra.mxu3 %v2868_v2  ;;  %1015 = vmatmul.bf16.vlgmr.msra.gmra.mxu0 %v957_v3  ;;  %v2910_v2 = vld [vmem:[%s3498_s3 + $0x1c0] sm:$0xff] }
  0x70   : >> { %1345 = vmatpush.bf16.msrb.mxu0 %v2884_v63  ;;  %1097 = vmatmul.bf16.vlgmr.msra.gmra.mxu1 %v1023_v8  ;;  %v2919_v63 = vld [vmem:[%s3498_s3 + $0x208] sm:$0xff]  ;;  %v2918_v3 = vld [vmem:[%s3498_s3 + $0x200] sm:$0xff] }
  0x71   : >> { %1437 = vmatpush.bf16.msrb.mxu1 %v2892_v0  ;;  %1189 = vmatmul.bf16.vlgmr.msra.gmra.mxu2 %v1131_v4  ;;  %v1638_v0 = vshrl.u32 %v2689_v58, 16 }
  0x72   : >> { %1518 = vmatpush.bf16.msrb.mxu2 %v2900_v1  ;;  %1270 = vmatmul.bf16.vlgmr.msra.gmra.mxu3 %v1212_v9  ;;  %v1642_v1 = vrot.slane %v1640_v61, 1 }
  0x73   : >> { %1601 = vmatpush.bf16.msrb.mxu3 %v2909_v5  ;;  %v1724_v5 = vrot.slane %v2689_v58, 1 }
  0x74   : >> { %1346 = vmatpush.bf16.msrb.mxu0 %v2883_v6  ;;  %v1643_v4 = vor.u32 %v1642_v1, %v1638_v0 }
  0x75   : >> { %1438 = vmatpush.bf16.msrb.mxu1 %v2891_v7 }
  0x76   : >> { %1519 = vmatpush.bf16.msrb.mxu2 %v2899_v10 }
  0x77   : >> { %1602 = vmatpush.bf16.msrb.mxu3 %v2908_v11 }
  0x78   : >> { %1347 = vmatpush.bf16.msrb.mxu0 %v2882_v12 }
  0x79   : >> { %1439 = vmatpush.bf16.msrb.mxu1 %v2890_v13 }
  0x7a   : >> { %1520 = vmatpush.bf16.msrb.mxu2 %v2898_v14 }
  0x7b   : >> { %1603 = vmatpush.bf16.msrb.mxu3 %v2907_v15 }
  0x7c   : >> { %1348 = vmatpush.bf16.msrb.mxu0 %v2881_v16 }
  0x7d   : >> { %1440 = vmatpush.bf16.msrb.mxu1 %v2889_v17 }
  0x7e   : >> { %1521 = vmatpush.bf16.msrb.mxu2 %v2897_v18 }
  0x7f   : >> { %1604 = vmatpush.bf16.msrb.mxu3 %v2906_v19 }
  0x80   : >> { %1349 = vmatpush.bf16.msrb.mxu0 %v2880_v20 }
  0x81   : >> { %1441 = vmatpush.bf16.msrb.mxu1 %v2888_v21 }
  0x82   : >> { %1522 = vmatpush.bf16.msrb.mxu2 %v2896_v24 }
  0x83   : >> { %1605 = vmatpush.bf16.msrb.mxu3 %v2905_v25 }
  0x84   : >> { %1350 = vmatpush.bf16.msrb.mxu0 %v2879_v26 }
  0x85   : >> { %1442 = vmatpush.bf16.msrb.mxu1 %v2887_v28 }
  0x86   : >> { %1523 = vmatpush.bf16.msrb.mxu2 %v2895_v29 }
  0x87   : >> { %1606 = vmatpush.bf16.msrb.mxu3 %v2904_v30 }
  0x88   : >> { %1351 = vmatpush.bf16.msrb.mxu0 %v2878_v31 }
  0x89   : >> { %1443 = vmatpush.bf16.msrb.mxu1 %v2886_v33 }
  0x8a   : >> { %1524 = vmatpush.bf16.msrb.mxu2 %v2894_v34 }
  0x8b   : >> { %1607 = vmatpush.bf16.msrb.mxu3 %v2903_v35 }
  0x8c   : >> { %1352 = vmatpush.bf16.msrb.mxu0 %v2877_v36 }
  0x8d   : >> { %1444 = vmatpush.bf16.msrb.mxu1 %v2885_v39 }
  0x8e   : >> { %1525 = vmatpush.bf16.msrb.mxu2 %v2893_v41 }
  0x8f   : >> { %1608 = vmatpush.bf16.msrb.mxu3 %v2902_v43  ;;  %1353 = vmatmul.bf16.vlgmr.msrb.gmra.mxu0 %v2469_v44 }
  0x90   : >> { %1693 = vmatpush.bf16.msra.mxu0 %v2917_v40  ;;  %1445 = vmatmul.bf16.vlgmr.msrb.gmra.mxu1 %v1387_v45 }
  0x91   : >> { %1774 = vmatpush.bf16.msra.mxu1 %v2925_v42  ;;  %1526 = vmatmul.bf16.vlgmr.msrb.gmra.mxu2 %v1468_v46 }
  0x92   : >> { %1609 = vmatmul.bf16.vlgmr.msrb.gmra.mxu3 %v2620_v49 }
  0x94   : >> { %1694 = vmatpush.bf16.msra.mxu0 %v2916_v47 }
  0x95   : >> { %1775 = vmatpush.bf16.msra.mxu1 %v2924_v48 }
  0x98   : >> { %1695 = vmatpush.bf16.msra.mxu0 %v2915_v50 }
  0x99   : >> { %1776 = vmatpush.bf16.msra.mxu1 %v2923_v51 }
  0x9c   : >> { %1696 = vmatpush.bf16.msra.mxu0 %v2914_v52 }
  0x9d   : >> { %1777 = vmatpush.bf16.msra.mxu1 %v2922_v53 }
  0xa0   : >> { %1697 = vmatpush.bf16.msra.mxu0 %v2913_v54 }
  0xa1   : >> { %1778 = vmatpush.bf16.msra.mxu1 %v2921_v57 }
  0xa4   : >> { %1698 = vmatpush.bf16.msra.mxu0 %v2912_v59 }
  0xa5   : >> { %1779 = vmatpush.bf16.msra.mxu1 %v2920_v60 }
  0xa8   : >> { %1699 = vmatpush.bf16.msra.mxu0 %v2911_v62 }
  0xa9   : >> { %1780 = vmatpush.bf16.msra.mxu1 %v2919_v63 }
  0xac   : >> { %1700 = vmatpush.bf16.msra.mxu0 %v2910_v2  ;;  %v359_v6 = vpop.f32.mrf.mxu0 }
  0xad   : >> { %1781 = vmatpush.bf16.msra.mxu1 %v2918_v3  ;;  %v420_v8 = vpop.f32.mrf.mxu1 }
  0xae   : >> { %v421_v9 = vadd.f32 %v420_v8, %v359_v6 }
  0xaf   : >> { %1701 = vmatmul.bf16.vlgmr.msra.gmra.mxu0 %v1643_v4 }
  0xb0   : >> { %1782 = vmatmul.bf16.vlgmr.msra.gmra.mxu1 %v1724_v5 }
  0xb4   : >> { %v500_v7 = vpop.f32.mrf.mxu2  ;;  %v361_v11 = vpop.f32.mrf.mxu0 }
  0xb5   : >> { %v504_v10 = vadd.f32 %v500_v7, %v421_v9  ;;  %v585_v12 = vpop.f32.mrf.mxu3  ;;  %v422_v13 = vpop.f32.mrf.mxu1 }
  0xb7   : >> { %v589_v14 = vadd.f32 %v585_v12, %v504_v10 }
  0xbc   : >> { %v502_v15 = vpop.f32.mrf.mxu2 }
  0xbd   : >> { %v587_v16 = vpop.f32.mrf.mxu3 }
  0xcc   : >> { %v677_v17 = vpop.f32.mrf.mxu0 }
  0xcd   : >> { %v758_v18 = vpop.f32.mrf.mxu1  ;;  %v681_v33 = vadd.f32 %v677_v17, %v589_v14 }
  0xcf   : >> { %v762_v34 = vadd.f32 %v758_v18, %v681_v33 }
  0xd4   : >> { %v843_v19 = vpop.f32.mrf.mxu2  ;;  %v679_v21 = vpop.f32.mrf.mxu0 }
  0xd5   : >> { %v935_v20 = vpop.f32.mrf.mxu3  ;;  %v760_v22 = vpop.f32.mrf.mxu1  ;;  %v847_v35 = vadd.f32 %v843_v19, %v762_v34 }
  0xd7   : >> { %v939_v38 = vadd.f32 %v935_v20, %v847_v35 }
  0xdc   : >> { %v845_v23 = vpop.f32.mrf.mxu2 }
  0xdd   : >> { %v937_v24 = vpop.f32.mrf.mxu3 }
  0xec   : >> { %v1016_v25 = vpop.f32.mrf.mxu0 }
  0xed   : >> { %v1098_v26 = vpop.f32.mrf.mxu1  ;;  %v1020_v39 = vadd.f32 %v1016_v25, %v939_v38 }
  0xef   : >> { %v1102_v44 = vadd.f32 %v1098_v26, %v1020_v39 }
  0xf4   : >> { %v1190_v27 = vpop.f32.mrf.mxu2  ;;  %v1018_v28 = vpop.f32.mrf.mxu0 }
  0xf5   : >> { %v1271_v29 = vpop.f32.mrf.mxu3  ;;  %v1100_v30 = vpop.f32.mrf.mxu1  ;;  %v1194_v45 = vadd.f32 %v1190_v27, %v1102_v44 }
  0xf7   : >> { %v1275_v46 = vadd.f32 %v1271_v29, %v1194_v45 }
  0xfc   : >> { %v1192_v31 = vpop.f32.mrf.mxu2 }
  0xfd   : >> { %v1273_v32 = vpop.f32.mrf.mxu3 }
 0x10c   : >> { %v1354_v36 = vpop.f32.mrf.mxu0 }
 0x10d   : >> { %v1446_v37 = vpop.f32.mrf.mxu1  ;;  %v1358_v49 = vadd.f32 %v1354_v36, %v1275_v46 }
 0x10f   : >> { %v1450_v50 = vadd.f32 %v1446_v37, %v1358_v49 }
 0x114   : >> { %v1527_v40 = vpop.f32.mrf.mxu2  ;;  %v1356_v41 = vpop.f32.mrf.mxu0 }
 0x115   : >> { %v1610_v42 = vpop.f32.mrf.mxu3  ;;  %v1448_v43 = vpop.f32.mrf.mxu1  ;;  %v1531_v51 = vadd.f32 %v1527_v40, %v1450_v50 }
 0x117   : >> { %v1614_v52 = vadd.f32 %v1610_v42, %v1531_v51 }
 0x11c   : >> { %v1529_v47 = vpop.f32.mrf.mxu2 }
 0x11d   : >> { %v1612_v48 = vpop.f32.mrf.mxu3 }
 0x12c   : >> { %v1702_v53 = vpop.f32.mrf.mxu0 }
 0x12d   : >> { %v1706_v54 = vadd.f32 %v1702_v53, %v1614_v52  ;;  %v1783_v55 = vpop.f32.mrf.mxu1 }
 0x12f   : >> { %v1787_v57 = vadd.f32 %v1783_v55, %v1706_v54 }
 0x131   : >> { %v1792_v58 = vadd.f32 %v2943_v56, %v1787_v57 }
 0x133   : >> { %vm1793_vm0 = vcmp.ge.f32.partialorder %v1792_v58, 0.0  ;;  %v1794_v59 = vmul.f32 0.2, %v1792_v58 }
 0x134   : >> { %v1704_v60 = vpop.f32.mrf.mxu0  ;;  %249 = sbr.rel (!%p247_p4) target bundleno = 15 (0xf), region = 103 }
 0x135   : >> { %v1795_v61 = vsel %vm1793_vm0, %v1792_v58, %v1794_v59  ;;  %v1785_v62 = vpop.f32.mrf.mxu1 }
 0x136   : >> { %v1796_v63 = vpack.c.bf16 %v1795_v61, %v1795_v61 }
 0x138   : >> { %1799 = vst [vmem:[%s1798_s17] sm:$0xf] %v1796_v63 }
 0x139 PF: > { %s15_s18 = sadd.s32 1, %s2954_s18  }
 0x13a   : > { %p12_p5 = scmp.ge.s32.totalorder %s15_s18, 4  }
 0x13c   :  { %14 = sbr.rel (!%p12_p5) target bundleno = 1 (0x1), region = 114 }

// kernel: cnn_forward.19
= control target key start
LH: loop header
LB: loop body
LE: loop exit
PB: predicated region body
PF: predicated region fallthrough
CT: control target
= control target key end

     0   :  { %s2108_s18 = smov 0   ;;  %s2465_s0 = inlined_call_operand.vmem [shape: bf16[2,18,18,128], index: 0, kind: input, shape index: {}]   ;;  %s2466_s1 = inlined_call_operand.vmem [shape: bf16[2,18,18,8], index: 1, kind: input, shape index: {}]   ;;  %s2467_s2 = inlined_call_operand.vmem [shape: bf16[3,3,128,128], index: 2, kind: input, shape index: {}]   ;;  %s2468_s3 = inlined_call_operand.vmem [shape: bf16[3,3,8,128], index: 3, kind: input, shape index: {}]   ;;  %s2469_s4 = inlined_call_operand.vmem [shape: f32[1,128], index: 4, kind: input, shape index: {}]   ;;  %s2470_s5 = inlined_call_operand.vmem [shape: f32[2,16,16,128], index: 5, kind: output, shape index: {}]  }
   0x1 LB: > { %s1480_s19 = sadd.s32 4294967295, %s2072_s18   ;;  %p1484_p0 = scmp.ge.s32.totalorder %s2072_s18, 1  ;;  %s2072_s18 = sphi %s2108_s18, %s15_s18  }
   0x2   : > { %p197_p1 = scmp.lt.s32.totalorder %s2072_s18, 3 }
   0x4   : > { %p198_p2 = pnand %p1484_p0, %p197_p1 }
   0x5   : > { %p230_p3 = scmp.lt.s32.totalorder (!%p198_p2), %s1480_s19, 1  ;;  %s2131_s6 = smov (!%p198_p2), 0  }
   0x6   : > { %201 = sbr.rel (%p198_p2) target bundleno = 277 (0x115), region = 40 }
   0xb   : > { %s2472_s19 = smov (!%p230_p3, %s1480_s19), 1 }
   0xc   : > { %s2044_s20 = smul.u32 216, %s2472_s19  ;;  %s1963_s21 = sshll.u32 %s2472_s19, 8 }
   0xd   : > { %s2119_s24 = scalar_lea.vmem %s2470_s5, %s1963_s21 }
   0xe   : > { %s2124_s27 = scalar_lea.vmem %s2465_s0, %s2044_s20  ;;  %s2129_s30 = scalar_lea.vmem %s2466_s1, %s2044_s20 }
   0xf LB: >> { %v1981_v0 = vld [vmem:[%s2467_s2 + $0x78] sm:$0xff]  ;;  %v1980_v4 = vld [vmem:[%s2467_s2 + $0x70] sm:$0xff]  ;;  %v1979_v8 = vld [vmem:[%s2467_s2 + $0x68] sm:$0xff]  ;;  %s1964_s7 = smul.u32 12, %s2076_s6  ;;  %vm299_vm0 = vsmask.f32 7424  ;;  %s2076_s6 = sphi %s2131_s6, %s251_s6  }
  0x10   : >> { %v1973_v1 = vld [vmem:[%s2467_s2 + $0x38] sm:$0xff]  ;;  %361 = vmatpush.bf16.msra.mxu0 %v1981_v0  ;;  %v1972_v5 = vld [vmem:[%s2467_s2 + $0x30] sm:$0xff]  ;;  %v1971_v9 = vld [vmem:[%s2467_s2 + $0x28] sm:$0xff]  ;;  %vm455_vm1 = vcmask 1046528   ;;  %vm1091_vm2 = vcmask 1043456   ;;  %vm1087_vm3 = vcmask 64512  }
  0x11   : >> { %v1989_v2 = vld [vmem:[%s2467_s2 + $0xb8] sm:$0xff]  ;;  %424 = vmatpush.bf16.msra.mxu1 %v1973_v1  ;;  %v1988_v6 = vld [vmem:[%s2467_s2 + $0xb0] sm:$0xff]  ;;  %v1987_v10 = vld [vmem:[%s2467_s2 + $0xa8] sm:$0xff]  ;;  %s2182_s16 = scalar_lea.vmem %s2124_s27, %s1964_s7  ;;  %s2346_s15 = scalar_lea.vmem %s2129_s30, %s1964_s7 }
  0x12   : >> { %v1998_v3 = vld [vmem:[%s2467_s2 + $0xf8] sm:$0xff]  ;;  %508 = vmatpush.bf16.msra.mxu2 %v1989_v2  ;;  %v1997_v7 = vld [vmem:[%s2467_s2 + $0xf0] sm:$0xff]  ;;  %v1996_v11 = vld [vmem:[%s2467_s2 + $0xe8] sm:$0xff]  ;;  %s1960_s25 = sshll.u32 %s2076_s6, 4  ;;  %s251_s6 = sadd.s32 1, %s2076_s6  }
  0x13   : >> { %602 = vmatpush.bf16.msra.mxu3 %v1998_v3  ;;  %v1978_v12 = vld [vmem:[%s2467_s2 + $0x60] sm:$0xff]  ;;  %v257_v16 = vld [vmem:[%s2182_s16 + $0x8] sm:$0x1]  ;;  %v1977_v17 = vld [vmem:[%s2467_s2 + $0x58] sm:$0xff]  ;;  %s1387_s26 = scalar_lea.vmem %s2119_s24, %s1960_s25  ;;  %p248_p4 = scmp.ge.s32.totalorder %s251_s6, 16  }
  0x14   : >> { %362 = vmatpush.bf16.msra.mxu0 %v1980_v4  ;;  %v1970_v13 = vld [vmem:[%s2467_s2 + $0x20] sm:$0xff]  ;;  %v1969_v18 = vld [vmem:[%s2467_s2 + $0x18] sm:$0xff]  ;;  %v296_v22 = vunpack.c.l.b16 %v257_v16  ;;  %v1976_v23 = vld [vmem:[%s2467_s2 + $0x50] sm:$0xff] }
  0x15   : >> { %425 = vmatpush.bf16.msra.mxu1 %v1972_v5  ;;  %v1986_v14 = vld [vmem:[%s2467_s2 + $0xa0] sm:$0xff]  ;;  %v1985_v20 = vld [vmem:[%s2467_s2 + $0x98] sm:$0xff]  ;;  %v1968_v24 = vld [vmem:[%s2467_s2 + $0x10] sm:$0xff] }
  0x16   : >> { %509 = vmatpush.bf16.msra.mxu2 %v1988_v6  ;;  %v1995_v15 = vld [vmem:[%s2467_s2 + $0xe0] sm:$0xff]  ;;  %v1994_v21 = vld [vmem:[%s2467_s2 + $0xd8] sm:$0xff]  ;;  %v1984_v26 = vld [vmem:[%s2467_s2 + $0x90] sm:$0xff]  ;;  %v298_v28 = vpack.c.b16 %v296_v22, %v296_v22 }
  0x17   : >> { %603 = vmatpush.bf16.msra.mxu3 %v1997_v7  ;;  %v2198_v19 = vld [vmem:[%s2182_s16] sm:$0xff]  ;;  %v1993_v27 = vld [vmem:[%s2467_s2 + $0xd0] sm:$0xff]  ;;  %v1975_v29 = vld [vmem:[%s2467_s2 + $0x48] sm:$0xff] }
  0x18   : >> { %363 = vmatpush.bf16.msra.mxu0 %v1979_v8  ;;  %v303_v25 = vshll.u32 %v2198_v19, 16  ;;  %v1967_v30 = vld [vmem:[%s2467_s2 + $0x8] sm:$0xff]  ;;  %v301_v31 = vshrl.u32 %v2198_v19, 16  ;;  %v308_v33 = vshll.u32 %v298_v28, 16  ;;  %v1974_v36 = vld [vmem:[%s2467_s2 + $0x40] sm:$0xff]  ;;  %v2006_v41 = vld [vmem:[%s2467_s2 + $0x138] sm:$0xff] }
  0x19   : >> { %426 = vmatpush.bf16.msra.mxu1 %v1971_v9  ;;  %v1983_v34 = vld [vmem:[%s2467_s2 + $0x88] sm:$0xff]  ;;  %v1966_v37 = vld [vmem:[%s2467_s2] sm:$0xff]  ;;  %v456_v42 = vrot.slane %v2198_v19, 1  ;;  %v457_v43 = vrot.slane %v298_v28, 1  ;;  %v2014_v44 = vld [vmem:[%s2467_s2 + $0x178] sm:$0xff] }
  0x1a   : >> { %510 = vmatpush.bf16.msra.mxu2 %v1987_v10  ;;  %v305_v32 = vrot.slane %v303_v25, 1  ;;  %v1992_v35 = vld [vmem:[%s2467_s2 + $0xc8] sm:$0xff]  ;;  %v310_v39 = vrot.slane %v308_v33, 1  ;;  %v1982_v40 = vld [vmem:[%s2467_s2 + $0x80] sm:$0xff]  ;;  %v2023_v45 = vld [vmem:[%s2467_s2 + $0x1b8] sm:$0xff] }
  0x1b   : >> { %604 = vmatpush.bf16.msra.mxu3 %v1996_v11  ;;  %v1991_v46 = vld [vmem:[%s2467_s2 + $0xc0] sm:$0xff]  ;;  %v2031_v47 = vld [vmem:[%s2467_s2 + $0x1f8] sm:$0xff]  ;;  %v2005_v49 = vld [vmem:[%s2467_s2 + $0x130] sm:$0xff]  ;;  %v458_v50 = vsel %vm455_vm1, %v456_v42, %v457_v43 }
  0x1c   : >> { %364 = vmatpush.bf16.msra.mxu0 %v1978_v12  ;;  %v306_v38 = vor.u32 %v305_v32, %v301_v31  ;;  %v2013_v51 = vld [vmem:[%s2467_s2 + $0x170] sm:$0xff]  ;;  %v2004_v55 = vld [vmem:[%s2467_s2 + $0x128] sm:$0xff]  ;;  %v2003_v59 = vld [vmem:[%s2467_s2 + $0x120] sm:$0xff] }
  0x1d   : >> { %427 = vmatpush.bf16.msra.mxu1 %v1970_v13  ;;  %v2022_v52 = vld [vmem:[%s2467_s2 + $0x1b0] sm:$0xff]  ;;  %v2012_v56 = vld [vmem:[%s2467_s2 + $0x168] sm:$0xff]  ;;  %v2011_v60 = vld [vmem:[%s2467_s2 + $0x160] sm:$0xff] }
  0x1e   : >> { %511 = vmatpush.bf16.msra.mxu2 %v1986_v14  ;;  %v311_v48 = vsel %vm299_vm0, %v306_v38, %v310_v39  ;;  %v2269_v53 = vld [vmem:[%s2182_s16 + $0xc] sm:$0xff]  ;;  %v2020_v61 = vld [vmem:[%s2467_s2 + $0x1a0] sm:$0xff]  ;;  %v1624_v62 = vld [vmem:[%s2182_s16 + $0x14] sm:$0x1] }
  0x1f   : >> { %605 = vmatpush.bf16.msra.mxu3 %v1995_v15  ;;  %v2030_v54 = vld [vmem:[%s2467_s2 + $0x1f0] sm:$0xff]  ;;  %v2021_v57 = vld [vmem:[%s2467_s2 + $0x1a8] sm:$0xff]  ;;  %v2028_v63 = vld [vmem:[%s2467_s2 + $0x1e0] sm:$0xff]  ;;  %v636_v1 = vunpack.c.l.b16 %v1624_v62  ;;  %v641_v10 = vshll.u32 %v2269_v53, 16  ;;  %v732_v32 = vrot.slane %v2269_v53, 1 }
  0x20   : >> { %365 = vmatpush.bf16.msra.mxu0 %v1977_v17  ;;  %v2029_v58 = vld [vmem:[%s2467_s2 + $0x1e8] sm:$0xff]  ;;  %v2002_v0 = vld [vmem:[%s2467_s2 + $0x118] sm:$0xff]  ;;  %v1775_v2 = vld [vmem:[%s2182_s16 + $0x20] sm:$0x1]  ;;  %v639_v17 = vshrl.u32 %v2269_v53, 16 }
  0x21   : >> { %428 = vmatpush.bf16.msra.mxu1 %v1969_v18  ;;  %v2010_v3 = vld [vmem:[%s2467_s2 + $0x158] sm:$0xff]  ;;  %v912_v7 = vunpack.c.l.b16 %v1775_v2  ;;  %v2001_v8 = vld [vmem:[%s2467_s2 + $0x110] sm:$0xff]  ;;  %v637_v9 = vpack.c.b16 %v636_v1, %v636_v1  ;;  %v2000_v16 = vld [vmem:[%s2467_s2 + $0x108] sm:$0xff]  ;;  %v643_v18 = vrot.slane %v641_v10, 1 }
  0x22   : >> { %512 = vmatpush.bf16.msra.mxu2 %v1985_v20  ;;  %v2019_v4 = vld [vmem:[%s2467_s2 + $0x198] sm:$0xff]  ;;  %v2009_v11 = vld [vmem:[%s2467_s2 + $0x150] sm:$0xff]  ;;  %v2008_v20 = vld [vmem:[%s2467_s2 + $0x148] sm:$0xff] }
  0x23   : >> { %606 = vmatpush.bf16.msra.mxu3 %v1994_v21  ;;  %v2027_v5 = vld [vmem:[%s2467_s2 + $0x1d8] sm:$0xff]  ;;  %v2018_v12 = vld [vmem:[%s2467_s2 + $0x190] sm:$0xff]  ;;  %v2330_v14 = vpack.c.b16 %v912_v7, %v912_v7  ;;  %v2017_v21 = vld [vmem:[%s2467_s2 + $0x188] sm:$0xff]  ;;  %v733_v33 = vrot.slane %v637_v9, 1 }
  0x24   : >> { %366 = vmatpush.bf16.msra.mxu0 %v1976_v23  ;;  %v2315_v6 = vld [vmem:[%s2182_s16 + $0x18] sm:$0xff]  ;;  %v2026_v13 = vld [vmem:[%s2467_s2 + $0x1d0] sm:$0xff]  ;;  %v2025_v22 = vld [vmem:[%s2467_s2 + $0x1c8] sm:$0xff] }
  0x25   : >> { %429 = vmatpush.bf16.msra.mxu1 %v1968_v24  ;;  %v917_v15 = vshll.u32 %v2315_v6, 16  ;;  %v915_v23 = vshrl.u32 %v2315_v6, 16  ;;  %v922_v25 = vshll.u32 %v2330_v14, 16  ;;  %v2016_v31 = vld [vmem:[%s2467_s2 + $0x180] sm:$0xff]  ;;  %v734_v43 = vsel %vm455_vm1, %v732_v32, %v733_v33  ;;  %v2035_v1 = vld [vmem:[%s2467_s2 + $0x218] sm:$0xff] }
  0x26   : >> { %513 = vmatpush.bf16.msra.mxu2 %v1984_v26  ;;  %v1999_v26 = vld [vmem:[%s2467_s2 + $0x100] sm:$0xff]  ;;  %v1936_v2 = vld [vmem:[%s2346_s15 + $0x14] sm:$0x1]  ;;  %v1956_v7 = vld [vmem:[%s2468_s3 + $0x1c] sm:$0xf] }
  0x27   : >> { %607 = vmatpush.bf16.msra.mxu3 %v1993_v27  ;;  %v919_v24 = vrot.slane %v917_v15, 1  ;;  %v644_v27 = vor.u32 %v643_v18, %v639_v17  ;;  %v924_v39 = vrot.slane %v922_v25, 1  ;;  %v2036_v62 = vld [vmem:[%s2467_s2 + $0x220] sm:$0xff]  ;;  %v1213_v10 = vunpack.c.l.b16 %v1936_v2  ;;  %v2033_v18 = vld [vmem:[%s2467_s2 + $0x208] sm:$0xff] }
  0x28   : >> { %367 = vmatpush.bf16.msra.mxu0 %v1975_v29  ;;  %v1930_v29 = vld [vmem:[%s2468_s3 + $0x4] sm:$0xf]  ;;  %v1009_v25 = vrot.slane %v2330_v14, 1 }
  0x29   : >> { %430 = vmatpush.bf16.msra.mxu1 %v1967_v30  ;;  %v2007_v30 = vld [vmem:[%s2467_s2 + $0x140] sm:$0xff]  ;;  %v920_v38 = vor.u32 %v919_v24, %v915_v23  ;;  %v1008_v24 = vrot.slane %v2315_v6, 1 }
  0x2a   : >> { %514 = vmatpush.bf16.msra.mxu2 %v1983_v34  ;;  %v2039_v34 = vld [vmem:[%s2467_s2 + $0x238] sm:$0xff]  ;;  %v2032_v23 = vld [vmem:[%s2467_s2 + $0x200] sm:$0xff] }
  0x2b   : >> { %608 = vmatpush.bf16.msra.mxu3 %v1992_v35  ;;  %v2024_v35 = vld [vmem:[%s2467_s2 + $0x1c0] sm:$0xff] }
  0x2c   : >> { %368 = vmatpush.bf16.msra.mxu0 %v1974_v36  ;;  %v1080_v36 = vld [vmem:[%s2346_s15 + $0x8] sm:$0x1] }
  0x2d   : >> { %431 = vmatpush.bf16.msra.mxu1 %v1966_v37  ;;  %v1131_v37 = vsel %vm1091_vm2, %v1930_v29, 0  ;;  %v1010_v29 = vsel %vm455_vm1, %v1008_v24, %v1009_v25 }
  0x2e   : >> { %515 = vmatpush.bf16.msra.mxu2 %v1982_v40  ;;  %v1081_v40 = vld [vmem:[%s2468_s3] sm:$0xf] }
  0x2f   : >> { %609 = vmatpush.bf16.msra.mxu3 %v1991_v46  ;;  %369 = vmatmul.bf16.vlgmr.msra.gmra.mxu0 %v311_v48  ;;  %v1943_v46 = vld [vmem:[%s2468_s3 + $0x10] sm:$0xf] }
  0x30   : >> { %699 = vmatpush.bf16.msrb.mxu0 %v2006_v41  ;;  %432 = vmatmul.bf16.vlgmr.msra.gmra.mxu1 %v2198_v19  ;;  %v646_v19 = vshll.u32 %v637_v9, 16  ;;  %v1932_v41 = vld [vmem:[%s2468_s3 + $0x8] sm:$0xf]  ;;  %v2038_v48 = vld [vmem:[%s2467_s2 + $0x230] sm:$0xff] }
  0x31   : >> { %784 = vmatpush.bf16.msrb.mxu1 %v2014_v44  ;;  %516 = vmatmul.bf16.vlgmr.msra.gmra.mxu2 %v458_v50  ;;  %v2041_v44 = vld [vmem:[%s2346_s15] sm:$0xff]  ;;  %v1158_v50 = vsel %vm1091_vm2, %v1932_v41, 0  ;;  %v2042_v9 = vld [vmem:[%s2346_s15 + $0xc] sm:$0xff] }
  0x32   : >> { %878 = vmatpush.bf16.msrb.mxu2 %v2023_v45  ;;  %610 = vmatmul.bf16.vlgmr.msra.gmra.mxu3 %v2269_v53  ;;  %v648_v28 = vrot.slane %v646_v19, 1  ;;  %v1114_v45 = vunpack.c.l.b16 %v1080_v36  ;;  %v1230_v53 = vsel %vm1091_vm2, %v1943_v46, 0  ;;  %v1217_v17 = vshll.u32 %v2042_v9, 16 }
  0x33   : >> { %975 = vmatpush.bf16.msrb.mxu3 %v2031_v47  ;;  %v1937_v47 = vld [vmem:[%s2468_s3 + $0xc] sm:$0xf]  ;;  %v1215_v19 = vshrl.u32 %v2042_v9, 16 }
  0x34   : >> { %700 = vmatpush.bf16.msrb.mxu0 %v2005_v49  ;;  %v649_v42 = vsel %vm299_vm0, %v644_v27, %v648_v28  ;;  %v1093_v49 = vsel %vm1091_vm2, %v1081_v40, 0 }
  0x35   : >> { %785 = vmatpush.bf16.msrb.mxu1 %v2013_v51  ;;  %v1945_v51 = vld [vmem:[%s2468_s3 + $0x14] sm:$0xf] }
  0x36   : >> { %879 = vmatpush.bf16.msrb.mxu2 %v2022_v52  ;;  %v925_v52 = vsel %vm299_vm0, %v920_v38, %v924_v39 }
  0x37   : >> { %976 = vmatpush.bf16.msrb.mxu3 %v2030_v54  ;;  %v1192_v54 = vsel %vm1091_vm2, %v1937_v47, 0 }
  0x38   : >> { %701 = vmatpush.bf16.msrb.mxu0 %v2004_v55  ;;  %v1115_v55 = vpack.c.b16 %v1114_v45, %v1114_v45 }
  0x39   : >> { %786 = vmatpush.bf16.msrb.mxu1 %v2012_v56  ;;  %v1118_v56 = vshll.u32 %v2041_v44, 16 }
  0x3a   : >> { %880 = vmatpush.bf16.msrb.mxu2 %v2021_v57  ;;  %v1257_v57 = vsel %vm1091_vm2, %v1945_v51, 0 }
  0x3b   : >> { %977 = vmatpush.bf16.msrb.mxu3 %v2029_v58  ;;  %v2037_v58 = vld [vmem:[%s2467_s2 + $0x228] sm:$0xff] }
  0x3c   : >> { %702 = vmatpush.bf16.msrb.mxu0 %v2003_v59  ;;  %v1116_v59 = vshrl.u32 %v2041_v44, 16 }
  0x3d   : >> { %787 = vmatpush.bf16.msrb.mxu1 %v2011_v60  ;;  %v1120_v60 = vrot.slane %v1118_v56, 1 }
  0x3e   : >> { %881 = vmatpush.bf16.msrb.mxu2 %v2020_v61  ;;  %v1123_v61 = vshll.u32 %v1115_v55, 16 }
  0x3f   : >> { %978 = vmatpush.bf16.msrb.mxu3 %v2028_v63  ;;  %v1121_v63 = vor.u32 %v1120_v60, %v1116_v59 }
  0x40   : >> { %703 = vmatpush.bf16.msrb.mxu0 %v2002_v0  ;;  %v1125_v0 = vrot.slane %v1123_v61, 1 }
  0x41   : >> { %788 = vmatpush.bf16.msrb.mxu1 %v2010_v3  ;;  %v1151_v3 = vrot.slane %v2041_v44, 1 }
  0x42   : >> { %882 = vmatpush.bf16.msrb.mxu2 %v2019_v4  ;;  %v1152_v4 = vrot.slane %v1115_v55, 1 }
  0x43   : >> { %979 = vmatpush.bf16.msrb.mxu3 %v2027_v5  ;;  %v1958_v5 = vld [vmem:[%s2468_s3 + $0x20] sm:$0xf] }
  0x44   : >> { %704 = vmatpush.bf16.msrb.mxu0 %v2001_v8  ;;  %v1126_v8 = vsel %vm299_vm0, %v1121_v63, %v1125_v0  ;;  %v1153_v15 = vsel %vm455_vm1, %v1151_v3, %v1152_v4 }
  0x45   : >> { %789 = vmatpush.bf16.msrb.mxu1 %v2009_v11  ;;  %v2034_v11 = vld [vmem:[%s2467_s2 + $0x210] sm:$0xff] }
  0x46   : >> { %883 = vmatpush.bf16.msrb.mxu2 %v2018_v12  ;;  %v1356_v12 = vsel %vm1091_vm2, %v1958_v5, 0 }
  0x47   : >> { %980 = vmatpush.bf16.msrb.mxu3 %v2026_v13  ;;  %v1329_v13 = vsel %vm1091_vm2, %v1956_v7, 0 }
  0x48   : >> { %705 = vmatpush.bf16.msrb.mxu0 %v2000_v16  ;;  %v1214_v16 = vpack.c.b16 %v1213_v10, %v1213_v10 }
  0x49   : >> { %790 = vmatpush.bf16.msrb.mxu1 %v2008_v20  ;;  %v1219_v20 = vrot.slane %v1217_v17, 1 }
  0x4a   : >> { %884 = vmatpush.bf16.msrb.mxu2 %v2017_v21  ;;  %v1222_v21 = vshll.u32 %v1214_v16, 16  ;;  %v1251_v32 = vrot.slane %v1214_v16, 1 }
  0x4b   : >> { %981 = vmatpush.bf16.msrb.mxu3 %v2025_v22  ;;  %v1950_v22 = vld [vmem:[%s2468_s3 + $0x18] sm:$0xf]  ;;  %v1220_v27 = vor.u32 %v1219_v20, %v1215_v19 }
  0x4c   : >> { %706 = vmatpush.bf16.msrb.mxu0 %v1999_v26  ;;  %v1291_v26 = vsel %vm1091_vm2, %v1950_v22, 0  ;;  %v1224_v28 = vrot.slane %v1222_v21, 1 }
  0x4d   : >> { %791 = vmatpush.bf16.msrb.mxu1 %v2007_v30  ;;  %v1949_v30 = vld [vmem:[%s2346_s15 + $0x20] sm:$0x1] }
  0x4e   : >> { %885 = vmatpush.bf16.msrb.mxu2 %v2016_v31  ;;  %v1250_v31 = vrot.slane %v2042_v9, 1  ;;  %v1225_v33 = vsel %vm299_vm0, %v1220_v27, %v1224_v28 }
  0x4f   : >> { %982 = vmatpush.bf16.msrb.mxu3 %v2024_v35  ;;  %707 = vmatmul.bf16.vlgmr.msrb.gmra.mxu0 %v649_v42  ;;  %v1312_v35 = vunpack.c.l.b16 %v1949_v30 }
  0x50   : >> { %1060 = vmatpush.bf16.msra.mxu0 %v2039_v34  ;;  %792 = vmatmul.bf16.vlgmr.msrb.gmra.mxu1 %v734_v43  ;;  %v2043_v34 = vld [vmem:[%s2346_s15 + $0x18] sm:$0xff] }
  0x51   : >> { %886 = vmatmul.bf16.vlgmr.msrb.gmra.mxu2 %v2315_v6  ;;  %1102 = vmatpush.bf16.msra.mxu1 %v1093_v49  ;;  %v1252_v6 = vsel %vm455_vm1, %v1250_v31, %v1251_v32  ;;  %v1313_v14 = vpack.c.b16 %v1312_v35, %v1312_v35  ;;  %v1316_v36 = vshll.u32 %v2043_v34, 16  ;;  %v1349_v42 = vrot.slane %v2043_v34, 1 }
  0x52   : >> { %1140 = vmatpush.bf16.msra.mxu2 %v1131_v37  ;;  %983 = vmatmul.bf16.vlgmr.msrb.gmra.mxu3 %v925_v52  ;;  %v1314_v37 = vshrl.u32 %v2043_v34, 16 }
  0x53   : >> { %1167 = vmatpush.bf16.msra.mxu3 %v1158_v50  ;;  %v1318_v38 = vrot.slane %v1316_v36, 1  ;;  %v1321_v39 = vshll.u32 %v1313_v14, 16  ;;  %v1350_v43 = vrot.slane %v1313_v14, 1 }
  0x54   : >> { %1061 = vmatpush.bf16.msra.mxu0 %v2038_v48 }
  0x55   : >> { %1201 = vmatpush.bf16.msrb.mxu1 %v1192_v54  ;;  %v1319_v40 = vor.u32 %v1318_v38, %v1314_v37  ;;  %v1323_v41 = vrot.slane %v1321_v39, 1  ;;  %v1351_v45 = vsel %vm455_vm1, %v1349_v42, %v1350_v43  ;;  %v2061_v43 = vld [vmem:[%s2469_s4] ss:$0 sm:$0xff] }
  0x56   : >> { %1239 = vmatpush.bf16.msrb.mxu2 %v1230_v53 }
  0x57   : >> { %1266 = vmatpush.bf16.msrb.mxu3 %v1257_v57 }
  0x58   : >> { %1062 = vmatpush.bf16.msra.mxu0 %v2037_v58 }
  0x5c   : >> { %1063 = vmatpush.bf16.msra.mxu0 %v2036_v62 }
  0x60   : >> { %1064 = vmatpush.bf16.msra.mxu0 %v2035_v1  ;;  %1929 = vmatmul.msk.bf16.vlgmr.msra.gmra.mxu1 %vm1087_vm3, %v2041_v44  ;;  %v1324_v44 = vsel %vm299_vm0, %v1319_v40, %v1323_v41 }
  0x61   : >> { %1931 = vmatmul.msk.bf16.vlgmr.msra.gmra.mxu2 %vm1087_vm3, %v1126_v8  ;;  %1338 = vmatpush.bf16.msra.mxu1 %v1329_v13 }
  0x62   : >> { %1365 = vmatpush.bf16.msra.mxu2 %v1356_v12  ;;  %1933 = vmatmul.msk.bf16.vlgmr.msra.gmra.mxu3 %vm1087_vm3, %v1153_v15 }
  0x64   : >> { %1065 = vmatpush.bf16.msra.mxu0 %v2034_v11 }
  0x68   : >> { %1066 = vmatpush.bf16.msra.mxu0 %v2033_v18 }
  0x6c   : >> { %1067 = vmatpush.bf16.msra.mxu0 %v2032_v23 }
  0x6f   : >> { %1068 = vmatmul.bf16.vlgmr.msra.gmra.mxu0 %v1010_v29 }
  0x70   : >> { %1300 = vmatpush.bf16.msrb.mxu0 %v1291_v26  ;;  %1942 = vmatmul.msk.bf16.vlgmr.msrb.gmra.mxu1 %vm1087_vm3, %v2042_v9 }
  0x71   : >> { %1944 = vmatmul.msk.bf16.vlgmr.msrb.gmra.mxu2 %vm1087_vm3, %v1225_v33 }
  0x72   : >> { %1946 = vmatmul.msk.bf16.vlgmr.msrb.gmra.mxu3 %vm1087_vm3, %v1252_v6 }
  0x7f   : >> { %1955 = vmatmul.msk.bf16.vlgmr.msrb.gmra.mxu0 %vm1087_vm3, %v2043_v34 }
  0x80   : >> { %1957 = vmatmul.msk.bf16.vlgmr.msra.gmra.mxu1 %vm1087_vm3, %v1324_v44 }
  0x81   : >> { %1959 = vmatmul.msk.bf16.vlgmr.msra.gmra.mxu2 %vm1087_vm3, %v1351_v45 }
  0xac   : >> { %v370_v50 = vpop.f32.mrf.mxu0 }
  0xad   : >> { %v433_v46 = vpop.f32.mrf.mxu1 }
  0xae   : >> { %v434_v56 = vadd.f32 %v433_v46, %v370_v50 }
  0xb4   : >> { %v517_v47 = vpop.f32.mrf.mxu2  ;;  %v372_v54 = vpop.f32.mrf.mxu0 }
  0xb5   : >> { %v611_v48 = vpop.f32.mrf.mxu3  ;;  %v435_v49 = vpop.f32.mrf.mxu1  ;;  %v522_v60 = vadd.f32 %v517_v47, %v434_v56 }
  0xb6   : >> { %v436_v63 = vadd.f32 %v435_v49, %v372_v54 }
  0xb7   : >> { %v616_v62 = vadd.f32 %v611_v48, %v522_v60 }
  0xbc   : >> { %v519_v51 = vpop.f32.mrf.mxu2 }
  0xbd   : >> { %v613_v52 = vpop.f32.mrf.mxu3  ;;  %v523_v3 = vadd.f32 %v519_v51, %v436_v63 }
  0xbf   : >> { %v617_v8 = vadd.f32 %v613_v52, %v523_v3 }
  0xcc   : >> { %v708_v59 = vpop.f32.mrf.mxu0 }
  0xcd   : >> { %v793_v53 = vpop.f32.mrf.mxu1  ;;  %v713_v2 = vadd.f32 %v708_v59, %v616_v62 }
  0xcf   : >> { %v798_v5 = vadd.f32 %v793_v53, %v713_v2 }
  0xd4   : >> { %v887_v55 = vpop.f32.mrf.mxu2  ;;  %v710_v4 = vpop.f32.mrf.mxu0 }
  0xd5   : >> { %v795_v57 = vpop.f32.mrf.mxu1  ;;  %v984_v58 = vpop.f32.mrf.mxu3  ;;  %v892_v9 = vadd.f32 %v887_v55, %v798_v5  ;;  %v714_v12 = vadd.f32 %v710_v4, %v617_v8 }
  0xd7   : >> { %v989_v13 = vadd.f32 %v984_v58, %v892_v9  ;;  %v799_v16 = vadd.f32 %v795_v57, %v714_v12 }
  0xdc   : >> { %v889_v61 = vpop.f32.mrf.mxu2 }
  0xdd   : >> { %v986_v0 = vpop.f32.mrf.mxu3  ;;  %v1104_v1 = vpop.f32.mrf.mxu1  ;;  %v893_v19 = vadd.f32 %v889_v61, %v799_v16 }
  0xdf   : >> { %v990_v24 = vadd.f32 %v986_v0, %v893_v19 }
  0xe4   : >> { %v1142_v7 = vpop.f32.mrf.mxu2 }
  0xe5   : >> { %v1106_v10 = vpop.f32.mrf.mxu1  ;;  %v1169_v11 = vpop.f32.mrf.mxu3 }
  0xec   : >> { %v1069_v15 = vpop.f32.mrf.mxu0  ;;  %v1144_v18 = vpop.f32.mrf.mxu2 }
  0xed   : >> { %v1074_v17 = vadd.f32 %v1069_v15, %v989_v13  ;;  %v1171_v21 = vpop.f32.mrf.mxu3  ;;  %v1203_v22 = vpop.f32.mrf.mxu1 }
  0xef   : >> { %v1109_v20 = vadd.f32 %v1104_v1, %v1074_v17 }
  0xf1   : >> { %v1147_v23 = vadd.f32 %v1142_v7, %v1109_v20 }
  0xf3   : >> { %v1174_v25 = vadd.f32 %v1169_v11, %v1147_v23 }
  0xf4   : >> { %v1071_v26 = vpop.f32.mrf.mxu0  ;;  %v1241_v28 = vpop.f32.mrf.mxu2 }
  0xf5   : >> { %v1075_v27 = vadd.f32 %v1071_v26, %v990_v24  ;;  %v1208_v29 = vadd.f32 %v1203_v22, %v1174_v25  ;;  %v1205_v31 = vpop.f32.mrf.mxu1  ;;  %v1268_v33 = vpop.f32.mrf.mxu3 }
  0xf7   : >> { %v1110_v30 = vadd.f32 %v1106_v10, %v1075_v27  ;;  %v1246_v34 = vadd.f32 %v1241_v28, %v1208_v29 }
  0xf9   : >> { %v1148_v32 = vadd.f32 %v1144_v18, %v1110_v30  ;;  %v1273_v37 = vadd.f32 %v1268_v33, %v1246_v34 }
  0xfb   : >> { %v1175_v35 = vadd.f32 %v1171_v21, %v1148_v32 }
  0xfc   : >> { %v1302_v6 = vpop.f32.mrf.mxu0  ;;  %v1243_v14 = vpop.f32.mrf.mxu2 }
  0xfd   : >> { %v1209_v36 = vadd.f32 %v1205_v31, %v1175_v35  ;;  %v1340_v38 = vpop.f32.mrf.mxu1  ;;  %v1307_v39 = vadd.f32 %v1302_v6, %v1273_v37  ;;  %v1270_v41 = vpop.f32.mrf.mxu3 }
  0xff   : >> { %v1247_v40 = vadd.f32 %v1243_v14, %v1209_v36  ;;  %v1345_v42 = vadd.f32 %v1340_v38, %v1307_v39 }
 0x101   : >> { %v1274_v46 = vadd.f32 %v1270_v41, %v1247_v40 }
 0x104   : >> { %v1304_v44 = vpop.f32.mrf.mxu0  ;;  %v1367_v45 = vpop.f32.mrf.mxu2 }
 0x105   : >> { %v1372_v47 = vadd.f32 %v1367_v45, %v1345_v42  ;;  %v1308_v48 = vadd.f32 %v1304_v44, %v1274_v46  ;;  %v1342_v50 = vpop.f32.mrf.mxu1 }
 0x107   : >> { %v1378_v49 = vadd.f32 %v2061_v43, %v1372_v47  ;;  %v1346_v53 = vadd.f32 %v1342_v50, %v1308_v48 }
 0x109   : >> { %vm1380_vm4 = vcmp.ge.f32.partialorder %v1378_v49, 0.0  ;;  %v1382_v51 = vmul.f32 0.2, %v1378_v49 }
 0x10b   : >> { %v1384_v52 = vsel %vm1380_vm4, %v1378_v49, %v1382_v51 }
 0x10c   : >> { %1388 = vst [vmem:[%s1387_s26] sm:$0xff] %v1384_v52  ;;  %v1369_v54 = vpop.f32.mrf.mxu2 }
 0x10d   : >> { %v1373_v55 = vadd.f32 %v1369_v54, %v1346_v53 }
 0x10f   : >> { %v1379_v56 = vadd.f32 %v2061_v43, %v1373_v55 }
 0x110   : > { %250 = sbr.rel (!%p248_p4) target bundleno = 15 (0xf), region = 103 }
 0x111   : >> { %vm1381_vm5 = vcmp.ge.f32.partialorder %v1379_v56, 0.0  ;;  %v1383_v57 = vmul.f32 0.2, %v1379_v56 }
 0x113   : >> { %v1385_v58 = vsel %vm1381_vm5, %v1379_v56, %v1383_v57 }
 0x114   : >> { %1389 = vst [vmem:[%s1387_s26 + $0x8] sm:$0xff] %v1385_v58 }
 0x115 PF: > { %s15_s18 = sadd.s32 1, %s2072_s18  }
 0x116   : > { %p12_p5 = scmp.ge.s32.totalorder %s15_s18, 4  }
 0x118   :  { %14 = sbr.rel (!%p12_p5) target bundleno = 1 (0x1), region = 114 }

</bundles_post_ra>
